<compile_context>
chip_gen: v7x
topology: tpu7x:2x2x1
jax: 0.10.0
libtpu: 0.0.40
codegen_flags: <defaults>
</compile_context>

<pallas_src>
import functools

import jax
import jax.numpy as jnp
from jax.experimental import pallas as pl
from jax.experimental.pallas import tpu as pltpu

DIM = 768
NUM_HEADS = 12
HEAD_DIM = DIM // NUM_HEADS
SCALE = HEAD_DIM ** (-0.5)

# 48 MiB: > scoped defaults on v5e/v6e (16/32 MiB), < v7x 64 MiB physical/TC.
VMEM_LIMIT_BYTES = 48 * 1024 * 1024
# bf16 W_qkv (768x2304) + W_o (768x768), double-buffered by the pipeline.
_WEIGHT_VMEM_BYTES = 2 * (DIM * 3 * DIM + DIM * DIM) * 2
# x/out blocks (f32, double-buffered) + qkv/q/k/v/attn temporaries, per row.
_BYTES_PER_ROW = 36 * 1024


def _pick_batch_block(B, N):
    """Pick Bt (batch elements per grid step); B % Bt == 0 by construction."""
    budget = VMEM_LIMIT_BYTES - _WEIGHT_VMEM_BYTES - 8 * 1024 * 1024
    max_rows = max(N, min(512, budget // _BYTES_PER_ROW))
    divs = [d for d in range(1, B + 1) if B % d == 0 and d * N <= max_rows]
    if not divs:
        # TODO(synk): very long N -> tile the sequence (flash-style) instead.
        return 1
    best = max(divs)
    # Prefer an even number of grid steps (v7x: 2 TensorCores share the grid
    # via dimension_semantics=("parallel",)) as long as the per-step M-dim
    # still fills the MXU.
    even = [d for d in divs if (B // d) % 2 == 0]
    if even and max(even) * N >= 128:
        return max(even)
    return best


# ----------------------------------------------------------------------------
# Single fused kernel: QKV projection + per-head attention + output projection
# ----------------------------------------------------------------------------
def fused_attention_kernel(x_ref, wqkv_ref, bqkv_ref, wo_ref, bo_ref, o_ref,
                           *, bt, num_heads, head_dim):
    """Whole forward for one block of `bt` batch elements.

    x_ref    : (bt, N, C) f32
    wqkv_ref : (C, 3C)    bf16   columns = [scale*Wq | Wk | Wv]
    bqkv_ref : (1, 3C)    f32    = [scale*bq | bk | bv]
    wo_ref   : (C, C)     bf16
    bo_ref   : (1, C)     f32
    o_ref    : (bt, N, C) f32
    """
    C = num_heads * head_dim
    n = x_ref.shape[1]
    rows = bt * n

    # ---- Fused Q/K/V projection on the flattened (bt*N, C) slab (MXU) ------
    x = x_ref[...].reshape(rows, C).astype(jnp.bfloat16)
    qkv = jnp.dot(x, wqkv_ref[...], preferred_element_type=jnp.float32)
    qkv = qkv + bqkv_ref[...]                                  # (rows, 3C) f32

    # Softmax scale is already folded into W_q / b_q on the host.
    q = qkv[:, 0 * C:1 * C].astype(jnp.bfloat16)               # (rows, C)
    k = qkv[:, 1 * C:2 * C].astype(jnp.bfloat16)
    v = qkv[:, 2 * C:3 * C].astype(jnp.bfloat16)

    # ---- Per-head attention, batched over the bt batch elements ------------
    # One batched dot_general per head (covers all bt elements at once) —
    # far fewer tiny MXU push/pop sequences than bt*heads 2-D matmuls.
    head_outs = []
    for h in range(num_heads):
        cl = slice(h * head_dim, (h + 1) * head_dim)
        qh = q[:, cl].reshape(bt, n, head_dim)                 # (bt, n, d)
        kh = k[:, cl].reshape(bt, n, head_dim)
        vh = v[:, cl].reshape(bt, n, head_dim)
        s = jnp.einsum("bnd,bmd->bnm", qh, kh,
                       preferred_element_type=jnp.float32)     # (bt, n, n) f32
        smax = jnp.max(s, axis=-1, keepdims=True)
        p = jnp.exp(s - smax)
        denom = jnp.sum(p, axis=-1, keepdims=True)
        p = p * pl.reciprocal(denom, approx=True)              # EUP, not VALU
        head_outs.append(
            jnp.einsum("bnm,bmd->bnd", p.astype(jnp.bfloat16), vh,
                       preferred_element_type=jnp.float32))    # (bt, n, d) f32

    # Lane-dense (rows, C=768) slab: full 128-lane stores, no HBM transpose.
    attn = jnp.concatenate(head_outs, axis=-1)                 # (bt, n, C)
    attn = attn.reshape(rows, C).astype(jnp.bfloat16)

    # ---- Output projection (MXU) --------------------------------------------
    out = jnp.dot(attn, wo_ref[...], preferred_element_type=jnp.float32)
    out = out + bo_ref[...]                                    # (rows, C) f32
    o_ref[...] = out.reshape(bt, n, C).astype(o_ref.dtype)


def attention_forward(x, params):
    """x: (B, N, C) f32 -> (B, N, C) f32 (same semantics as the torch module)."""
    B, N, C = x.shape
    assert C == DIM

    # Host-side weight prep (one-off):
    #  * fold the softmax scale into W_q / b_q (no in-kernel scale multiply)
    #  * fuse Q/K/V weights into one (C, 3C) matrix (single projection matmul)
    #  * cast weights to bf16 for the MXU; biases stay f32 (added post-accum)
    wqkv = jnp.concatenate(
        [params["wq"] * SCALE, params["wk"], params["wv"]],
        axis=1).astype(jnp.bfloat16)
    bqkv = jnp.concatenate(
        [params["bq"] * SCALE, params["bk"], params["bv"]], axis=1)
    wo = params["wo"].astype(jnp.bfloat16)
    bo = params["bo"]

    bt = _pick_batch_block(B, N)
    grid = (B // bt,)

    kernel = functools.partial(
        fused_attention_kernel, bt=bt, num_heads=NUM_HEADS, head_dim=HEAD_DIM)

    return pl.pallas_call(
        kernel,
        out_shape=jax.ShapeDtypeStruct((B, N, C), jnp.float32),
        grid=grid,
        in_specs=[
            pl.BlockSpec((bt, N, C), lambda b: (b, 0, 0)),     # x, one batch block
            pl.BlockSpec((C, 3 * C), lambda b: (0, 0)),        # fused W_qkv (resident)
            pl.BlockSpec((1, 3 * C), lambda b: (0, 0)),        # fused b_qkv
            pl.BlockSpec((C, C), lambda b: (0, 0)),            # W_o (resident)
            pl.BlockSpec((1, C), lambda b: (0, 0)),            # b_o
        ],
        out_specs=pl.BlockSpec((bt, N, C), lambda b: (b, 0, 0)),
        compiler_params=pltpu.CompilerParams(
            dimension_semantics=("parallel",),
            vmem_limit_bytes=VMEM_LIMIT_BYTES,
        ),
    )(x, wqkv, bqkv, wo, bo)


# ----------------------------------------------------------------------------
# Pure-JAX reference (f32 everywhere) for correctness checking.
# ----------------------------------------------------------------------------
def attention_reference(x, params):
    B, N, C = x.shape
    H, D = NUM_HEADS, HEAD_DIM
    q = x @ params["wq"] + params["bq"]
    k = x @ params["wk"] + params["bk"]
    v = x @ params["wv"] + params["bv"]

    def to_heads(t):
        return t.reshape(B, N, H, D).transpose(0, 2, 1, 3)     # (B, H, N, D)

    qh, kh, vh = to_heads(q), to_heads(k), to_heads(v)
    s = jnp.einsum("bhnd,bhmd->bhnm", qh, kh) * SCALE
    p = jax.nn.softmax(s, axis=-1)
    o = jnp.einsum("bhnm,bhmd->bhnd", p, vh)
    o = o.transpose(0, 2, 1, 3).reshape(B, N, C)
    return o @ params["wo"] + params["bo"]


def init_params(key):
    ks = jax.random.split(key, 8)

    def w(k):
        return jax.random.normal(k, (DIM, DIM), jnp.float32) * 0.02

    def b(k):
        return jax.random.normal(k, (1, DIM), jnp.float32) * 0.02

    return {
        "wq": w(ks[0]), "bq": b(ks[1]),
        "wk": w(ks[2]), "bk": b(ks[3]),
        "wv": w(ks[4]), "bv": b(ks[5]),
        "wo": w(ks[6]), "bo": b(ks[7]),
    }


def _check(B, N, key):
    k_x, k_p = jax.random.split(key)
    x = jax.random.normal(k_x, (B, N, DIM), jnp.float32)
    params = init_params(k_p)

    out = jax.block_until_ready(attention_forward(x, params))
    ref = attention_reference(x, params)
    assert out.shape == (B, N, DIM)
    # bf16 matmul inputs with f32 accumulation -> slightly loose tolerance.
    assert jnp.allclose(out, ref, atol=2e-2, rtol=2e-2), \
        f"mismatch vs reference at B={B}, N={N}"


if __name__ == "__main__":
    key = jax.random.PRNGKey(0)
    k1, k2 = jax.random.split(key)

    # Small case matching the module spec (channel dim fixed at 768).
    _check(B=2, N=8, key=k1)       # Bt=2, grid=(1,)
    # Slightly larger case that exercises batch blocking with >1 grid step.
    _check(B=4, N=128, key=k2)     # Bt=2, grid=(2,)

    print("KERNEL_OK")
</pallas_src>

<mosaic_0001>
module attributes {stable_mosaic.version = 11 : i64} {
  func.func @fused_attention_kernel(%arg0: i32, %arg1: memref<2x8x768xf32, #tpu.memory_space<vmem>>, %arg2: memref<768x2304xbf16, #tpu.memory_space<vmem>>, %arg3: memref<1x2304xf32, #tpu.memory_space<vmem>>, %arg4: memref<768x768xbf16, #tpu.memory_space<vmem>>, %arg5: memref<1x768xf32, #tpu.memory_space<vmem>>, %arg6: memref<2x8x768xf32, #tpu.memory_space<vmem>>) attributes {dimension_semantics = [#tpu.dimension_semantics<parallel>], iteration_bounds = array<i64: 1>, scalar_prefetch = 0 : i64, scratch_operands = 0 : i64, tpu.core_type = #tpu.core_type<tc>, window_params = [{transform_indices = @transform_0, window_bounds = array<i64: 2, 8, 768>}, {pipeline_mode = #tpu.pipeline_mode<synchronous>, transform_indices = @transform_1, window_bounds = array<i64: 768, 2304>}, {pipeline_mode = #tpu.pipeline_mode<synchronous>, transform_indices = @transform_2, window_bounds = array<i64: 1, 2304>}, {pipeline_mode = #tpu.pipeline_mode<synchronous>, transform_indices = @transform_3, window_bounds = array<i64: 768, 768>}, {pipeline_mode = #tpu.pipeline_mode<synchronous>, transform_indices = @transform_4, window_bounds = array<i64: 1, 768>}, {transform_indices = @transform_5, window_bounds = array<i64: 2, 8, 768>}]} {
    %c0 = arith.constant 0 : index
    %c0_0 = arith.constant 0 : index
    %c0_1 = arith.constant 0 : index
    %0 = vector.load %arg1[%c0, %c0_0, %c0_1] : memref<2x8x768xf32, #tpu.memory_space<vmem>>, vector<2x8x768xf32>
    %1 = vector.shape_cast %0 : vector<2x8x768xf32> to vector<16x768xf32>
    %2 = arith.truncf %1 : vector<16x768xf32> to vector<16x768xbf16>
    %c0_2 = arith.constant 0 : index
    %c0_3 = arith.constant 0 : index
    %3 = vector.load %arg2[%c0_2, %c0_3] : memref<768x2304xbf16, #tpu.memory_space<vmem>>, vector<768x2304xbf16>
    %cst = arith.constant dense<0.000000e+00> : vector<16x2304xf32>
    %4 = tpu.matmul %2, %3, %cst {dimension_numbers = #tpu.dot_dimension_numbers<[1], [0], [0], [1], [0, 0, 1, 1], [], []>} : vector<16x768xbf16>, vector<768x2304xbf16>, vector<16x2304xf32> -> vector<16x2304xf32>
    %c0_4 = arith.constant 0 : index
    %c0_5 = arith.constant 0 : index
    %5 = vector.load %arg3[%c0_4, %c0_5] : memref<1x2304xf32, #tpu.memory_space<vmem>>, vector<1x2304xf32>
    %6 = vector.broadcast %5 : vector<1x2304xf32> to vector<16x2304xf32>
    %7 = arith.addf %4, %6 : vector<16x2304xf32>
    %8 = vector.extract_strided_slice %7 {offsets = [0, 0], sizes = [16, 768], strides = [1, 1]} : vector<16x2304xf32> to vector<16x768xf32>
    %9 = arith.truncf %8 : vector<16x768xf32> to vector<16x768xbf16>
    %10 = vector.extract_strided_slice %7 {offsets = [0, 768], sizes = [16, 768], strides = [1, 1]} : vector<16x2304xf32> to vector<16x768xf32>
    %11 = arith.truncf %10 : vector<16x768xf32> to vector<16x768xbf16>
    %12 = vector.extract_strided_slice %7 {offsets = [0, 1536], sizes = [16, 768], strides = [1, 1]} : vector<16x2304xf32> to vector<16x768xf32>
    %13 = arith.truncf %12 : vector<16x768xf32> to vector<16x768xbf16>
    %14 = vector.extract_strided_slice %9 {offsets = [0, 0], sizes = [16, 64], strides = [1, 1]} : vector<16x768xbf16> to vector<16x64xbf16>
    %15 = vector.shape_cast %14 : vector<16x64xbf16> to vector<2x8x64xbf16>
    %16 = vector.extract_strided_slice %11 {offsets = [0, 0], sizes = [16, 64], strides = [1, 1]} : vector<16x768xbf16> to vector<16x64xbf16>
    %17 = vector.shape_cast %16 : vector<16x64xbf16> to vector<2x8x64xbf16>
    %18 = vector.extract_strided_slice %13 {offsets = [0, 0], sizes = [16, 64], strides = [1, 1]} : vector<16x768xbf16> to vector<16x64xbf16>
    %19 = vector.shape_cast %18 : vector<16x64xbf16> to vector<2x8x64xbf16>
    "tpu.trace_start"() <{level = 10 : i32, message = "bnd,bmd->bnm"}> : () -> ()
    %cst_6 = arith.constant dense<0.000000e+00> : vector<2x8x8xf32>
    %20 = tpu.matmul %15, %17, %cst_6 {dimension_numbers = #tpu.dot_dimension_numbers<[2], [2], [1], [1], [0, 0, 0, 1, 1, 1], [0], [0]>} : vector<2x8x64xbf16>, vector<2x8x64xbf16>, vector<2x8x8xf32> -> vector<2x8x8xf32>
    "tpu.trace_stop"() : () -> ()
    %cst_7 = arith.constant dense<0xFF800000> : vector<2x8xf32>
    %21 = vector.multi_reduction <maximumf>, %20, %cst_7 [2] : vector<2x8x8xf32> to vector<2x8xf32>
    %22 = vector.shape_cast %21 : vector<2x8xf32> to vector<2x8x1xf32>
    %23 = vector.broadcast %22 : vector<2x8x1xf32> to vector<2x8x8xf32>
    %24 = arith.subf %20, %23 : vector<2x8x8xf32>
    %25 = math.exp %24 : vector<2x8x8xf32>
    %cst_8 = arith.constant dense<0.000000e+00> : vector<2x8xf32>
    %26 = vector.multi_reduction <add>, %25, %cst_8 [2] : vector<2x8x8xf32> to vector<2x8xf32>
    %27 = vector.shape_cast %26 : vector<2x8xf32> to vector<2x8x1xf32>
    %28 = tpu.reciprocal %27 {approx = true} : vector<2x8x1xf32> -> vector<2x8x1xf32>
    %29 = vector.broadcast %28 : vector<2x8x1xf32> to vector<2x8x8xf32>
    %30 = arith.mulf %25, %29 : vector<2x8x8xf32>
    %31 = arith.truncf %30 : vector<2x8x8xf32> to vector<2x8x8xbf16>
    "tpu.trace_start"() <{level = 10 : i32, message = "bnm,bmd->bnd"}> : () -> ()
    %cst_9 = arith.constant dense<0.000000e+00> : vector<2x8x64xf32>
    %32 = tpu.matmul %31, %19, %cst_9 {dimension_numbers = #tpu.dot_dimension_numbers<[2], [1], [1], [2], [0, 0, 0, 1, 1, 2], [0], [0]>} : vector<2x8x8xbf16>, vector<2x8x64xbf16>, vector<2x8x64xf32> -> vector<2x8x64xf32>
    "tpu.trace_stop"() : () -> ()
    %33 = vector.extract_strided_slice %9 {offsets = [0, 64], sizes = [16, 64], strides = [1, 1]} : vector<16x768xbf16> to vector<16x64xbf16>
    %34 = vector.shape_cast %33 : vector<16x64xbf16> to vector<2x8x64xbf16>
    %35 = vector.extract_strided_slice %11 {offsets = [0, 64], sizes = [16, 64], strides = [1, 1]} : vector<16x768xbf16> to vector<16x64xbf16>
    %36 = vector.shape_cast %35 : vector<16x64xbf16> to vector<2x8x64xbf16>
    %37 = vector.extract_strided_slice %13 {offsets = [0, 64], sizes = [16, 64], strides = [1, 1]} : vector<16x768xbf16> to vector<16x64xbf16>
    %38 = vector.shape_cast %37 : vector<16x64xbf16> to vector<2x8x64xbf16>
    "tpu.trace_start"() <{level = 10 : i32, message = "bnd,bmd->bnm"}> : () -> ()
    %cst_10 = arith.constant dense<0.000000e+00> : vector<2x8x8xf32>
    %39 = tpu.matmul %34, %36, %cst_10 {dimension_numbers = #tpu.dot_dimension_numbers<[2], [2], [1], [1], [0, 0, 0, 1, 1, 1], [0], [0]>} : vector<2x8x64xbf16>, vector<2x8x64xbf16>, vector<2x8x8xf32> -> vector<2x8x8xf32>
    "tpu.trace_stop"() : () -> ()
    %cst_11 = arith.constant dense<0xFF800000> : vector<2x8xf32>
    %40 = vector.multi_reduction <maximumf>, %39, %cst_11 [2] : vector<2x8x8xf32> to vector<2x8xf32>
    %41 = vector.shape_cast %40 : vector<2x8xf32> to vector<2x8x1xf32>
    %42 = vector.broadcast %41 : vector<2x8x1xf32> to vector<2x8x8xf32>
    %43 = arith.subf %39, %42 : vector<2x8x8xf32>
    %44 = math.exp %43 : vector<2x8x8xf32>
    %cst_12 = arith.constant dense<0.000000e+00> : vector<2x8xf32>
    %45 = vector.multi_reduction <add>, %44, %cst_12 [2] : vector<2x8x8xf32> to vector<2x8xf32>
    %46 = vector.shape_cast %45 : vector<2x8xf32> to vector<2x8x1xf32>
    %47 = tpu.reciprocal %46 {approx = true} : vector<2x8x1xf32> -> vector<2x8x1xf32>
    %48 = vector.broadcast %47 : vector<2x8x1xf32> to vector<2x8x8xf32>
    %49 = arith.mulf %44, %48 : vector<2x8x8xf32>
    %50 = arith.truncf %49 : vector<2x8x8xf32> to vector<2x8x8xbf16>
    "tpu.trace_start"() <{level = 10 : i32, message = "bnm,bmd->bnd"}> : () -> ()
    %cst_13 = arith.constant dense<0.000000e+00> : vector<2x8x64xf32>
    %51 = tpu.matmul %50, %38, %cst_13 {dimension_numbers = #tpu.dot_dimension_numbers<[2], [1], [1], [2], [0, 0, 0, 1, 1, 2], [0], [0]>} : vector<2x8x8xbf16>, vector<2x8x64xbf16>, vector<2x8x64xf32> -> vector<2x8x64xf32>
    "tpu.trace_stop"() : () -> ()
    %52 = vector.extract_strided_slice %9 {offsets = [0, 128], sizes = [16, 64], strides = [1, 1]} : vector<16x768xbf16> to vector<16x64xbf16>
    %53 = vector.shape_cast %52 : vector<16x64xbf16> to vector<2x8x64xbf16>
    %54 = vector.extract_strided_slice %11 {offsets = [0, 128], sizes = [16, 64], strides = [1, 1]} : vector<16x768xbf16> to vector<16x64xbf16>
    %55 = vector.shape_cast %54 : vector<16x64xbf16> to vector<2x8x64xbf16>
    %56 = vector.extract_strided_slice %13 {offsets = [0, 128], sizes = [16, 64], strides = [1, 1]} : vector<16x768xbf16> to vector<16x64xbf16>
    %57 = vector.shape_cast %56 : vector<16x64xbf16> to vector<2x8x64xbf16>
    "tpu.trace_start"() <{level = 10 : i32, message = "bnd,bmd->bnm"}> : () -> ()
    %cst_14 = arith.constant dense<0.000000e+00> : vector<2x8x8xf32>
    %58 = tpu.matmul %53, %55, %cst_14 {dimension_numbers = #tpu.dot_dimension_numbers<[2], [2], [1], [1], [0, 0, 0, 1, 1, 1], [0], [0]>} : vector<2x8x64xbf16>, vector<2x8x64xbf16>, vector<2x8x8xf32> -> vector<2x8x8xf32>
    "tpu.trace_stop"() : () -> ()
    %cst_15 = arith.constant dense<0xFF800000> : vector<2x8xf32>
    %59 = vector.multi_reduction <maximumf>, %58, %cst_15 [2] : vector<2x8x8xf32> to vector<2x8xf32>
    %60 = vector.shape_cast %59 : vector<2x8xf32> to vector<2x8x1xf32>
    %61 = vector.broadcast %60 : vector<2x8x1xf32> to vector<2x8x8xf32>
    %62 = arith.subf %58, %61 : vector<2x8x8xf32>
    %63 = math.exp %62 : vector<2x8x8xf32>
    %cst_16 = arith.constant dense<0.000000e+00> : vector<2x8xf32>
    %64 = vector.multi_reduction <add>, %63, %cst_16 [2] : vector<2x8x8xf32> to vector<2x8xf32>
    %65 = vector.shape_cast %64 : vector<2x8xf32> to vector<2x8x1xf32>
    %66 = tpu.reciprocal %65 {approx = true} : vector<2x8x1xf32> -> vector<2x8x1xf32>
    %67 = vector.broadcast %66 : vector<2x8x1xf32> to vector<2x8x8xf32>
    %68 = arith.mulf %63, %67 : vector<2x8x8xf32>
    %69 = arith.truncf %68 : vector<2x8x8xf32> to vector<2x8x8xbf16>
    "tpu.trace_start"() <{level = 10 : i32, message = "bnm,bmd->bnd"}> : () -> ()
    %cst_17 = arith.constant dense<0.000000e+00> : vector<2x8x64xf32>
    %70 = tpu.matmul %69, %57, %cst_17 {dimension_numbers = #tpu.dot_dimension_numbers<[2], [1], [1], [2], [0, 0, 0, 1, 1, 2], [0], [0]>} : vector<2x8x8xbf16>, vector<2x8x64xbf16>, vector<2x8x64xf32> -> vector<2x8x64xf32>
    "tpu.trace_stop"() : () -> ()
    %71 = vector.extract_strided_slice %9 {offsets = [0, 192], sizes = [16, 64], strides = [1, 1]} : vector<16x768xbf16> to vector<16x64xbf16>
    %72 = vector.shape_cast %71 : vector<16x64xbf16> to vector<2x8x64xbf16>
    %73 = vector.extract_strided_slice %11 {offsets = [0, 192], sizes = [16, 64], strides = [1, 1]} : vector<16x768xbf16> to vector<16x64xbf16>
    %74 = vector.shape_cast %73 : vector<16x64xbf16> to vector<2x8x64xbf16>
    %75 = vector.extract_strided_slice %13 {offsets = [0, 192], sizes = [16, 64], strides = [1, 1]} : vector<16x768xbf16> to vector<16x64xbf16>
    %76 = vector.shape_cast %75 : vector<16x64xbf16> to vector<2x8x64xbf16>
    "tpu.trace_start"() <{level = 10 : i32, message = "bnd,bmd->bnm"}> : () -> ()
    %cst_18 = arith.constant dense<0.000000e+00> : vector<2x8x8xf32>
    %77 = tpu.matmul %72, %74, %cst_18 {dimension_numbers = #tpu.dot_dimension_numbers<[2], [2], [1], [1], [0, 0, 0, 1, 1, 1], [0], [0]>} : vector<2x8x64xbf16>, vector<2x8x64xbf16>, vector<2x8x8xf32> -> vector<2x8x8xf32>
    "tpu.trace_stop"() : () -> ()
    %cst_19 = arith.constant dense<0xFF800000> : vector<2x8xf32>
    %78 = vector.multi_reduction <maximumf>, %77, %cst_19 [2] : vector<2x8x8xf32> to vector<2x8xf32>
    %79 = vector.shape_cast %78 : vector<2x8xf32> to vector<2x8x1xf32>
    %80 = vector.broadcast %79 : vector<2x8x1xf32> to vector<2x8x8xf32>
    %81 = arith.subf %77, %80 : vector<2x8x8xf32>
    %82 = math.exp %81 : vector<2x8x8xf32>
    %cst_20 = arith.constant dense<0.000000e+00> : vector<2x8xf32>
    %83 = vector.multi_reduction <add>, %82, %cst_20 [2] : vector<2x8x8xf32> to vector<2x8xf32>
    %84 = vector.shape_cast %83 : vector<2x8xf32> to vector<2x8x1xf32>
    %85 = tpu.reciprocal %84 {approx = true} : vector<2x8x1xf32> -> vector<2x8x1xf32>
    %86 = vector.broadcast %85 : vector<2x8x1xf32> to vector<2x8x8xf32>
    %87 = arith.mulf %82, %86 : vector<2x8x8xf32>
    %88 = arith.truncf %87 : vector<2x8x8xf32> to vector<2x8x8xbf16>
    "tpu.trace_start"() <{level = 10 : i32, message = "bnm,bmd->bnd"}> : () -> ()
    %cst_21 = arith.constant dense<0.000000e+00> : vector<2x8x64xf32>
    %89 = tpu.matmul %88, %76, %cst_21 {dimension_numbers = #tpu.dot_dimension_numbers<[2], [1], [1], [2], [0, 0, 0, 1, 1, 2], [0], [0]>} : vector<2x8x8xbf16>, vector<2x8x64xbf16>, vector<2x8x64xf32> -> vector<2x8x64xf32>
    "tpu.trace_stop"() : () -> ()
    %90 = vector.extract_strided_slice %9 {offsets = [0, 256], sizes = [16, 64], strides = [1, 1]} : vector<16x768xbf16> to vector<16x64xbf16>
    %91 = vector.shape_cast %90 : vector<16x64xbf16> to vector<2x8x64xbf16>
    %92 = vector.extract_strided_slice %11 {offsets = [0, 256], sizes = [16, 64], strides = [1, 1]} : vector<16x768xbf16> to vector<16x64xbf16>
    %93 = vector.shape_cast %92 : vector<16x64xbf16> to vector<2x8x64xbf16>
    %94 = vector.extract_strided_slice %13 {offsets = [0, 256], sizes = [16, 64], strides = [1, 1]} : vector<16x768xbf16> to vector<16x64xbf16>
    %95 = vector.shape_cast %94 : vector<16x64xbf16> to vector<2x8x64xbf16>
    "tpu.trace_start"() <{level = 10 : i32, message = "bnd,bmd->bnm"}> : () -> ()
    %cst_22 = arith.constant dense<0.000000e+00> : vector<2x8x8xf32>
    %96 = tpu.matmul %91, %93, %cst_22 {dimension_numbers = #tpu.dot_dimension_numbers<[2], [2], [1], [1], [0, 0, 0, 1, 1, 1], [0], [0]>} : vector<2x8x64xbf16>, vector<2x8x64xbf16>, vector<2x8x8xf32> -> vector<2x8x8xf32>
    "tpu.trace_stop"() : () -> ()
    %cst_23 = arith.constant dense<0xFF800000> : vector<2x8xf32>
    %97 = vector.multi_reduction <maximumf>, %96, %cst_23 [2] : vector<2x8x8xf32> to vector<2x8xf32>
    %98 = vector.shape_cast %97 : vector<2x8xf32> to vector<2x8x1xf32>
    %99 = vector.broadcast %98 : vector<2x8x1xf32> to vector<2x8x8xf32>
    %100 = arith.subf %96, %99 : vector<2x8x8xf32>
    %101 = math.exp %100 : vector<2x8x8xf32>
    %cst_24 = arith.constant dense<0.000000e+00> : vector<2x8xf32>
    %102 = vector.multi_reduction <add>, %101, %cst_24 [2] : vector<2x8x8xf32> to vector<2x8xf32>
    %103 = vector.shape_cast %102 : vector<2x8xf32> to vector<2x8x1xf32>
    %104 = tpu.reciprocal %103 {approx = true} : vector<2x8x1xf32> -> vector<2x8x1xf32>
    %105 = vector.broadcast %104 : vector<2x8x1xf32> to vector<2x8x8xf32>
    %106 = arith.mulf %101, %105 : vector<2x8x8xf32>
    %107 = arith.truncf %106 : vector<2x8x8xf32> to vector<2x8x8xbf16>
    "tpu.trace_start"() <{level = 10 : i32, message = "bnm,bmd->bnd"}> : () -> ()
    %cst_25 = arith.constant dense<0.000000e+00> : vector<2x8x64xf32>
    %108 = tpu.matmul %107, %95, %cst_25 {dimension_numbers = #tpu.dot_dimension_numbers<[2], [1], [1], [2], [0, 0, 0, 1, 1, 2], [0], [0]>} : vector<2x8x8xbf16>, vector<2x8x64xbf16>, vector<2x8x64xf32> -> vector<2x8x64xf32>
    "tpu.trace_stop"() : () -> ()
    %109 = vector.extract_strided_slice %9 {offsets = [0, 320], sizes = [16, 64], strides = [1, 1]} : vector<16x768xbf16> to vector<16x64xbf16>
    %110 = vector.shape_cast %109 : vector<16x64xbf16> to vector<2x8x64xbf16>
    %111 = vector.extract_strided_slice %11 {offsets = [0, 320], sizes = [16, 64], strides = [1, 1]} : vector<16x768xbf16> to vector<16x64xbf16>
    %112 = vector.shape_cast %111 : vector<16x64xbf16> to vector<2x8x64xbf16>
    %113 = vector.extract_strided_slice %13 {offsets = [0, 320], sizes = [16, 64], strides = [1, 1]} : vector<16x768xbf16> to vector<16x64xbf16>
    %114 = vector.shape_cast %113 : vector<16x64xbf16> to vector<2x8x64xbf16>
    "tpu.trace_start"() <{level = 10 : i32, message = "bnd,bmd->bnm"}> : () -> ()
    %cst_26 = arith.constant dense<0.000000e+00> : vector<2x8x8xf32>
    %115 = tpu.matmul %110, %112, %cst_26 {dimension_numbers = #tpu.dot_dimension_numbers<[2], [2], [1], [1], [0, 0, 0, 1, 1, 1], [0], [0]>} : vector<2x8x64xbf16>, vector<2x8x64xbf16>, vector<2x8x8xf32> -> vector<2x8x8xf32>
    "tpu.trace_stop"() : () -> ()
    %cst_27 = arith.constant dense<0xFF800000> : vector<2x8xf32>
    %116 = vector.multi_reduction <maximumf>, %115, %cst_27 [2] : vector<2x8x8xf32> to vector<2x8xf32>
    %117 = vector.shape_cast %116 : vector<2x8xf32> to vector<2x8x1xf32>
    %118 = vector.broadcast %117 : vector<2x8x1xf32> to vector<2x8x8xf32>
    %119 = arith.subf %115, %118 : vector<2x8x8xf32>
    %120 = math.exp %119 : vector<2x8x8xf32>
    %cst_28 = arith.constant dense<0.000000e+00> : vector<2x8xf32>
    %121 = vector.multi_reduction <add>, %120, %cst_28 [2] : vector<2x8x8xf32> to vector<2x8xf32>
    %122 = vector.shape_cast %121 : vector<2x8xf32> to vector<2x8x1xf32>
    %123 = tpu.reciprocal %122 {approx = true} : vector<2x8x1xf32> -> vector<2x8x1xf32>
    %124 = vector.broadcast %123 : vector<2x8x1xf32> to vector<2x8x8xf32>
    %125 = arith.mulf %120, %124 : vector<2x8x8xf32>
    %126 = arith.truncf %125 : vector<2x8x8xf32> to vector<2x8x8xbf16>
    "tpu.trace_start"() <{level = 10 : i32, message = "bnm,bmd->bnd"}> : () -> ()
    %cst_29 = arith.constant dense<0.000000e+00> : vector<2x8x64xf32>
    %127 = tpu.matmul %126, %114, %cst_29 {dimension_numbers = #tpu.dot_dimension_numbers<[2], [1], [1], [2], [0, 0, 0, 1, 1, 2], [0], [0]>} : vector<2x8x8xbf16>, vector<2x8x64xbf16>, vector<2x8x64xf32> -> vector<2x8x64xf32>
    "tpu.trace_stop"() : () -> ()
    %128 = vector.extract_strided_slice %9 {offsets = [0, 384], sizes = [16, 64], strides = [1, 1]} : vector<16x768xbf16> to vector<16x64xbf16>
    %129 = vector.shape_cast %128 : vector<16x64xbf16> to vector<2x8x64xbf16>
    %130 = vector.extract_strided_slice %11 {offsets = [0, 384], sizes = [16, 64], strides = [1, 1]} : vector<16x768xbf16> to vector<16x64xbf16>
    %131 = vector.shape_cast %130 : vector<16x64xbf16> to vector<2x8x64xbf16>
    %132 = vector.extract_strided_slice %13 {offsets = [0, 384], sizes = [16, 64], strides = [1, 1]} : vector<16x768xbf16> to vector<16x64xbf16>
    %133 = vector.shape_cast %132 : vector<16x64xbf16> to vector<2x8x64xbf16>
    "tpu.trace_start"() <{level = 10 : i32, message = "bnd,bmd->bnm"}> : () -> ()
    %cst_30 = arith.constant dense<0.000000e+00> : vector<2x8x8xf32>
    %134 = tpu.matmul %129, %131, %cst_30 {dimension_numbers = #tpu.dot_dimension_numbers<[2], [2], [1], [1], [0, 0, 0, 1, 1, 1], [0], [0]>} : vector<2x8x64xbf16>, vector<2x8x64xbf16>, vector<2x8x8xf32> -> vector<2x8x8xf32>
    "tpu.trace_stop"() : () -> ()
    %cst_31 = arith.constant dense<0xFF800000> : vector<2x8xf32>
    %135 = vector.multi_reduction <maximumf>, %134, %cst_31 [2] : vector<2x8x8xf32> to vector<2x8xf32>
    %136 = vector.shape_cast %135 : vector<2x8xf32> to vector<2x8x1xf32>
    %137 = vector.broadcast %136 : vector<2x8x1xf32> to vector<2x8x8xf32>
    %138 = arith.subf %134, %137 : vector<2x8x8xf32>
    %139 = math.exp %138 : vector<2x8x8xf32>
    %cst_32 = arith.constant dense<0.000000e+00> : vector<2x8xf32>
    %140 = vector.multi_reduction <add>, %139, %cst_32 [2] : vector<2x8x8xf32> to vector<2x8xf32>
    %141 = vector.shape_cast %140 : vector<2x8xf32> to vector<2x8x1xf32>
    %142 = tpu.reciprocal %141 {approx = true} : vector<2x8x1xf32> -> vector<2x8x1xf32>
    %143 = vector.broadcast %142 : vector<2x8x1xf32> to vector<2x8x8xf32>
    %144 = arith.mulf %139, %143 : vector<2x8x8xf32>
    %145 = arith.truncf %144 : vector<2x8x8xf32> to vector<2x8x8xbf16>
    "tpu.trace_start"() <{level = 10 : i32, message = "bnm,bmd->bnd"}> : () -> ()
    %cst_33 = arith.constant dense<0.000000e+00> : vector<2x8x64xf32>
    %146 = tpu.matmul %145, %133, %cst_33 {dimension_numbers = #tpu.dot_dimension_numbers<[2], [1], [1], [2], [0, 0, 0, 1, 1, 2], [0], [0]>} : vector<2x8x8xbf16>, vector<2x8x64xbf16>, vector<2x8x64xf32> -> vector<2x8x64xf32>
    "tpu.trace_stop"() : () -> ()
    %147 = vector.extract_strided_slice %9 {offsets = [0, 448], sizes = [16, 64], strides = [1, 1]} : vector<16x768xbf16> to vector<16x64xbf16>
    %148 = vector.shape_cast %147 : vector<16x64xbf16> to vector<2x8x64xbf16>
    %149 = vector.extract_strided_slice %11 {offsets = [0, 448], sizes = [16, 64], strides = [1, 1]} : vector<16x768xbf16> to vector<16x64xbf16>
    %150 = vector.shape_cast %149 : vector<16x64xbf16> to vector<2x8x64xbf16>
    %151 = vector.extract_strided_slice %13 {offsets = [0, 448], sizes = [16, 64], strides = [1, 1]} : vector<16x768xbf16> to vector<16x64xbf16>
    %152 = vector.shape_cast %151 : vector<16x64xbf16> to vector<2x8x64xbf16>
    "tpu.trace_start"() <{level = 10 : i32, message = "bnd,bmd->bnm"}> : () -> ()
    %cst_34 = arith.constant dense<0.000000e+00> : vector<2x8x8xf32>
    %153 = tpu.matmul %148, %150, %cst_34 {dimension_numbers = #tpu.dot_dimension_numbers<[2], [2], [1], [1], [0, 0, 0, 1, 1, 1], [0], [0]>} : vector<2x8x64xbf16>, vector<2x8x64xbf16>, vector<2x8x8xf32> -> vector<2x8x8xf32>
    "tpu.trace_stop"() : () -> ()
    %cst_35 = arith.constant dense<0xFF800000> : vector<2x8xf32>
    %154 = vector.multi_reduction <maximumf>, %153, %cst_35 [2] : vector<2x8x8xf32> to vector<2x8xf32>
    %155 = vector.shape_cast %154 : vector<2x8xf32> to vector<2x8x1xf32>
    %156 = vector.broadcast %155 : vector<2x8x1xf32> to vector<2x8x8xf32>
    %157 = arith.subf %153, %156 : vector<2x8x8xf32>
    %158 = math.exp %157 : vector<2x8x8xf32>
    %cst_36 = arith.constant dense<0.000000e+00> : vector<2x8xf32>
    %159 = vector.multi_reduction <add>, %158, %cst_36 [2] : vector<2x8x8xf32> to vector<2x8xf32>
    %160 = vector.shape_cast %159 : vector<2x8xf32> to vector<2x8x1xf32>
    %161 = tpu.reciprocal %160 {approx = true} : vector<2x8x1xf32> -> vector<2x8x1xf32>
    %162 = vector.broadcast %161 : vector<2x8x1xf32> to vector<2x8x8xf32>
    %163 = arith.mulf %158, %162 : vector<2x8x8xf32>
    %164 = arith.truncf %163 : vector<2x8x8xf32> to vector<2x8x8xbf16>
    "tpu.trace_start"() <{level = 10 : i32, message = "bnm,bmd->bnd"}> : () -> ()
    %cst_37 = arith.constant dense<0.000000e+00> : vector<2x8x64xf32>
    %165 = tpu.matmul %164, %152, %cst_37 {dimension_numbers = #tpu.dot_dimension_numbers<[2], [1], [1], [2], [0, 0, 0, 1, 1, 2], [0], [0]>} : vector<2x8x8xbf16>, vector<2x8x64xbf16>, vector<2x8x64xf32> -> vector<2x8x64xf32>
    "tpu.trace_stop"() : () -> ()
    %166 = vector.extract_strided_slice %9 {offsets = [0, 512], sizes = [16, 64], strides = [1, 1]} : vector<16x768xbf16> to vector<16x64xbf16>
    %167 = vector.shape_cast %166 : vector<16x64xbf16> to vector<2x8x64xbf16>
    %168 = vector.extract_strided_slice %11 {offsets = [0, 512], sizes = [16, 64], strides = [1, 1]} : vector<16x768xbf16> to vector<16x64xbf16>
    %169 = vector.shape_cast %168 : vector<16x64xbf16> to vector<2x8x64xbf16>
    %170 = vector.extract_strided_slice %13 {offsets = [0, 512], sizes = [16, 64], strides = [1, 1]} : vector<16x768xbf16> to vector<16x64xbf16>
    %171 = vector.shape_cast %170 : vector<16x64xbf16> to vector<2x8x64xbf16>
    "tpu.trace_start"() <{level = 10 : i32, message = "bnd,bmd->bnm"}> : () -> ()
    %cst_38 = arith.constant dense<0.000000e+00> : vector<2x8x8xf32>
    %172 = tpu.matmul %167, %169, %cst_38 {dimension_numbers = #tpu.dot_dimension_numbers<[2], [2], [1], [1], [0, 0, 0, 1, 1, 1], [0], [0]>} : vector<2x8x64xbf16>, vector<2x8x64xbf16>, vector<2x8x8xf32> -> vector<2x8x8xf32>
    "tpu.trace_stop"() : () -> ()
    %cst_39 = arith.constant dense<0xFF800000> : vector<2x8xf32>
    %173 = vector.multi_reduction <maximumf>, %172, %cst_39 [2] : vector<2x8x8xf32> to vector<2x8xf32>
    %174 = vector.shape_cast %173 : vector<2x8xf32> to vector<2x8x1xf32>
    %175 = vector.broadcast %174 : vector<2x8x1xf32> to vector<2x8x8xf32>
    %176 = arith.subf %172, %175 : vector<2x8x8xf32>
    %177 = math.exp %176 : vector<2x8x8xf32>
    %cst_40 = arith.constant dense<0.000000e+00> : vector<2x8xf32>
    %178 = vector.multi_reduction <add>, %177, %cst_40 [2] : vector<2x8x8xf32> to vector<2x8xf32>
    %179 = vector.shape_cast %178 : vector<2x8xf32> to vector<2x8x1xf32>
    %180 = tpu.reciprocal %179 {approx = true} : vector<2x8x1xf32> -> vector<2x8x1xf32>
    %181 = vector.broadcast %180 : vector<2x8x1xf32> to vector<2x8x8xf32>
    %182 = arith.mulf %177, %181 : vector<2x8x8xf32>
    %183 = arith.truncf %182 : vector<2x8x8xf32> to vector<2x8x8xbf16>
    "tpu.trace_start"() <{level = 10 : i32, message = "bnm,bmd->bnd"}> : () -> ()
    %cst_41 = arith.constant dense<0.000000e+00> : vector<2x8x64xf32>
    %184 = tpu.matmul %183, %171, %cst_41 {dimension_numbers = #tpu.dot_dimension_numbers<[2], [1], [1], [2], [0, 0, 0, 1, 1, 2], [0], [0]>} : vector<2x8x8xbf16>, vector<2x8x64xbf16>, vector<2x8x64xf32> -> vector<2x8x64xf32>
    "tpu.trace_stop"() : () -> ()
    %185 = vector.extract_strided_slice %9 {offsets = [0, 576], sizes = [16, 64], strides = [1, 1]} : vector<16x768xbf16> to vector<16x64xbf16>
    %186 = vector.shape_cast %185 : vector<16x64xbf16> to vector<2x8x64xbf16>
    %187 = vector.extract_strided_slice %11 {offsets = [0, 576], sizes = [16, 64], strides = [1, 1]} : vector<16x768xbf16> to vector<16x64xbf16>
    %188 = vector.shape_cast %187 : vector<16x64xbf16> to vector<2x8x64xbf16>
    %189 = vector.extract_strided_slice %13 {offsets = [0, 576], sizes = [16, 64], strides = [1, 1]} : vector<16x768xbf16> to vector<16x64xbf16>
    %190 = vector.shape_cast %189 : vector<16x64xbf16> to vector<2x8x64xbf16>
    "tpu.trace_start"() <{level = 10 : i32, message = "bnd,bmd->bnm"}> : () -> ()
    %cst_42 = arith.constant dense<0.000000e+00> : vector<2x8x8xf32>
    %191 = tpu.matmul %186, %188, %cst_42 {dimension_numbers = #tpu.dot_dimension_numbers<[2], [2], [1], [1], [0, 0, 0, 1, 1, 1], [0], [0]>} : vector<2x8x64xbf16>, vector<2x8x64xbf16>, vector<2x8x8xf32> -> vector<2x8x8xf32>
    "tpu.trace_stop"() : () -> ()
    %cst_43 = arith.constant dense<0xFF800000> : vector<2x8xf32>
    %192 = vector.multi_reduction <maximumf>, %191, %cst_43 [2] : vector<2x8x8xf32> to vector<2x8xf32>
    %193 = vector.shape_cast %192 : vector<2x8xf32> to vector<2x8x1xf32>
    %194 = vector.broadcast %193 : vector<2x8x1xf32> to vector<2x8x8xf32>
    %195 = arith.subf %191, %194 : vector<2x8x8xf32>
    %196 = math.exp %195 : vector<2x8x8xf32>
    %cst_44 = arith.constant dense<0.000000e+00> : vector<2x8xf32>
    %197 = vector.multi_reduction <add>, %196, %cst_44 [2] : vector<2x8x8xf32> to vector<2x8xf32>
    %198 = vector.shape_cast %197 : vector<2x8xf32> to vector<2x8x1xf32>
    %199 = tpu.reciprocal %198 {approx = true} : vector<2x8x1xf32> -> vector<2x8x1xf32>
    %200 = vector.broadcast %199 : vector<2x8x1xf32> to vector<2x8x8xf32>
    %201 = arith.mulf %196, %200 : vector<2x8x8xf32>
    %202 = arith.truncf %201 : vector<2x8x8xf32> to vector<2x8x8xbf16>
    "tpu.trace_start"() <{level = 10 : i32, message = "bnm,bmd->bnd"}> : () -> ()
    %cst_45 = arith.constant dense<0.000000e+00> : vector<2x8x64xf32>
    %203 = tpu.matmul %202, %190, %cst_45 {dimension_numbers = #tpu.dot_dimension_numbers<[2], [1], [1], [2], [0, 0, 0, 1, 1, 2], [0], [0]>} : vector<2x8x8xbf16>, vector<2x8x64xbf16>, vector<2x8x64xf32> -> vector<2x8x64xf32>
    "tpu.trace_stop"() : () -> ()
    %204 = vector.extract_strided_slice %9 {offsets = [0, 640], sizes = [16, 64], strides = [1, 1]} : vector<16x768xbf16> to vector<16x64xbf16>
    %205 = vector.shape_cast %204 : vector<16x64xbf16> to vector<2x8x64xbf16>
    %206 = vector.extract_strided_slice %11 {offsets = [0, 640], sizes = [16, 64], strides = [1, 1]} : vector<16x768xbf16> to vector<16x64xbf16>
    %207 = vector.shape_cast %206 : vector<16x64xbf16> to vector<2x8x64xbf16>
    %208 = vector.extract_strided_slice %13 {offsets = [0, 640], sizes = [16, 64], strides = [1, 1]} : vector<16x768xbf16> to vector<16x64xbf16>
    %209 = vector.shape_cast %208 : vector<16x64xbf16> to vector<2x8x64xbf16>
    "tpu.trace_start"() <{level = 10 : i32, message = "bnd,bmd->bnm"}> : () -> ()
    %cst_46 = arith.constant dense<0.000000e+00> : vector<2x8x8xf32>
    %210 = tpu.matmul %205, %207, %cst_46 {dimension_numbers = #tpu.dot_dimension_numbers<[2], [2], [1], [1], [0, 0, 0, 1, 1, 1], [0], [0]>} : vector<2x8x64xbf16>, vector<2x8x64xbf16>, vector<2x8x8xf32> -> vector<2x8x8xf32>
    "tpu.trace_stop"() : () -> ()
    %cst_47 = arith.constant dense<0xFF800000> : vector<2x8xf32>
    %211 = vector.multi_reduction <maximumf>, %210, %cst_47 [2] : vector<2x8x8xf32> to vector<2x8xf32>
    %212 = vector.shape_cast %211 : vector<2x8xf32> to vector<2x8x1xf32>
    %213 = vector.broadcast %212 : vector<2x8x1xf32> to vector<2x8x8xf32>
    %214 = arith.subf %210, %213 : vector<2x8x8xf32>
    %215 = math.exp %214 : vector<2x8x8xf32>
    %cst_48 = arith.constant dense<0.000000e+00> : vector<2x8xf32>
    %216 = vector.multi_reduction <add>, %215, %cst_48 [2] : vector<2x8x8xf32> to vector<2x8xf32>
    %217 = vector.shape_cast %216 : vector<2x8xf32> to vector<2x8x1xf32>
    %218 = tpu.reciprocal %217 {approx = true} : vector<2x8x1xf32> -> vector<2x8x1xf32>
    %219 = vector.broadcast %218 : vector<2x8x1xf32> to vector<2x8x8xf32>
    %220 = arith.mulf %215, %219 : vector<2x8x8xf32>
    %221 = arith.truncf %220 : vector<2x8x8xf32> to vector<2x8x8xbf16>
    "tpu.trace_start"() <{level = 10 : i32, message = "bnm,bmd->bnd"}> : () -> ()
    %cst_49 = arith.constant dense<0.000000e+00> : vector<2x8x64xf32>
    %222 = tpu.matmul %221, %209, %cst_49 {dimension_numbers = #tpu.dot_dimension_numbers<[2], [1], [1], [2], [0, 0, 0, 1, 1, 2], [0], [0]>} : vector<2x8x8xbf16>, vector<2x8x64xbf16>, vector<2x8x64xf32> -> vector<2x8x64xf32>
    "tpu.trace_stop"() : () -> ()
    %223 = vector.extract_strided_slice %9 {offsets = [0, 704], sizes = [16, 64], strides = [1, 1]} : vector<16x768xbf16> to vector<16x64xbf16>
    %224 = vector.shape_cast %223 : vector<16x64xbf16> to vector<2x8x64xbf16>
    %225 = vector.extract_strided_slice %11 {offsets = [0, 704], sizes = [16, 64], strides = [1, 1]} : vector<16x768xbf16> to vector<16x64xbf16>
    %226 = vector.shape_cast %225 : vector<16x64xbf16> to vector<2x8x64xbf16>
    %227 = vector.extract_strided_slice %13 {offsets = [0, 704], sizes = [16, 64], strides = [1, 1]} : vector<16x768xbf16> to vector<16x64xbf16>
    %228 = vector.shape_cast %227 : vector<16x64xbf16> to vector<2x8x64xbf16>
    "tpu.trace_start"() <{level = 10 : i32, message = "bnd,bmd->bnm"}> : () -> ()
    %cst_50 = arith.constant dense<0.000000e+00> : vector<2x8x8xf32>
    %229 = tpu.matmul %224, %226, %cst_50 {dimension_numbers = #tpu.dot_dimension_numbers<[2], [2], [1], [1], [0, 0, 0, 1, 1, 1], [0], [0]>} : vector<2x8x64xbf16>, vector<2x8x64xbf16>, vector<2x8x8xf32> -> vector<2x8x8xf32>
    "tpu.trace_stop"() : () -> ()
    %cst_51 = arith.constant dense<0xFF800000> : vector<2x8xf32>
    %230 = vector.multi_reduction <maximumf>, %229, %cst_51 [2] : vector<2x8x8xf32> to vector<2x8xf32>
    %231 = vector.shape_cast %230 : vector<2x8xf32> to vector<2x8x1xf32>
    %232 = vector.broadcast %231 : vector<2x8x1xf32> to vector<2x8x8xf32>
    %233 = arith.subf %229, %232 : vector<2x8x8xf32>
    %234 = math.exp %233 : vector<2x8x8xf32>
    %cst_52 = arith.constant dense<0.000000e+00> : vector<2x8xf32>
    %235 = vector.multi_reduction <add>, %234, %cst_52 [2] : vector<2x8x8xf32> to vector<2x8xf32>
    %236 = vector.shape_cast %235 : vector<2x8xf32> to vector<2x8x1xf32>
    %237 = tpu.reciprocal %236 {approx = true} : vector<2x8x1xf32> -> vector<2x8x1xf32>
    %238 = vector.broadcast %237 : vector<2x8x1xf32> to vector<2x8x8xf32>
    %239 = arith.mulf %234, %238 : vector<2x8x8xf32>
    %240 = arith.truncf %239 : vector<2x8x8xf32> to vector<2x8x8xbf16>
    "tpu.trace_start"() <{level = 10 : i32, message = "bnm,bmd->bnd"}> : () -> ()
    %cst_53 = arith.constant dense<0.000000e+00> : vector<2x8x64xf32>
    %241 = tpu.matmul %240, %228, %cst_53 {dimension_numbers = #tpu.dot_dimension_numbers<[2], [1], [1], [2], [0, 0, 0, 1, 1, 2], [0], [0]>} : vector<2x8x8xbf16>, vector<2x8x64xbf16>, vector<2x8x64xf32> -> vector<2x8x64xf32>
    "tpu.trace_stop"() : () -> ()
    %242 = tpu.concatenate %32, %51, %70, %89, %108, %127, %146, %165, %184, %203, %222, %241 in 2 : vector<2x8x64xf32>, vector<2x8x64xf32>, vector<2x8x64xf32>, vector<2x8x64xf32>, vector<2x8x64xf32>, vector<2x8x64xf32>, vector<2x8x64xf32>, vector<2x8x64xf32>, vector<2x8x64xf32>, vector<2x8x64xf32>, vector<2x8x64xf32>, vector<2x8x64xf32> -> vector<2x8x768xf32>
    %243 = vector.shape_cast %242 : vector<2x8x768xf32> to vector<16x768xf32>
    %244 = arith.truncf %243 : vector<16x768xf32> to vector<16x768xbf16>
    %c0_54 = arith.constant 0 : index
    %c0_55 = arith.constant 0 : index
    %245 = vector.load %arg4[%c0_54, %c0_55] : memref<768x768xbf16, #tpu.memory_space<vmem>>, vector<768x768xbf16>
    %cst_56 = arith.constant dense<0.000000e+00> : vector<16x768xf32>
    %246 = tpu.matmul %244, %245, %cst_56 {dimension_numbers = #tpu.dot_dimension_numbers<[1], [0], [0], [1], [0, 0, 1, 1], [], []>} : vector<16x768xbf16>, vector<768x768xbf16>, vector<16x768xf32> -> vector<16x768xf32>
    %c0_57 = arith.constant 0 : index
    %c0_58 = arith.constant 0 : index
    %247 = vector.load %arg5[%c0_57, %c0_58] : memref<1x768xf32, #tpu.memory_space<vmem>>, vector<1x768xf32>
    %248 = vector.broadcast %247 : vector<1x768xf32> to vector<16x768xf32>
    %249 = arith.addf %246, %248 : vector<16x768xf32>
    %250 = vector.shape_cast %249 : vector<16x768xf32> to vector<2x8x768xf32>
    %c0_59 = arith.constant 0 : index
    %c0_60 = arith.constant 0 : index
    %c0_61 = arith.constant 0 : index
    %251 = vector.load %arg6[%c0_59, %c0_60, %c0_61] : memref<2x8x768xf32, #tpu.memory_space<vmem>>, vector<2x8x768xf32>
    tpu.vector_store %arg6[%c0_59, %c0_60, %c0_61], %250 {strides = array<i32>} : memref<2x8x768xf32, #tpu.memory_space<vmem>>, vector<2x8x768xf32>,
    return
  }
  func.func @transform_0(%arg0: i32) -> (i32, i32, i32) {
    %c0_i32 = arith.constant 0 : i32
    %c0_i32_0 = arith.constant 0 : i32
    %c0_i32_1 = arith.constant 0 : i32
    return %arg0, %c0_i32, %c0_i32_0 : i32, i32, i32
  }
  func.func @transform_1(%arg0: i32) -> (i32, i32) {
    %c0_i32 = arith.constant 0 : i32
    %c0_i32_0 = arith.constant 0 : i32
    %c0_i32_1 = arith.constant 0 : i32
    return %c0_i32, %c0_i32_0 : i32, i32
  }
  func.func @transform_2(%arg0: i32) -> (i32, i32) {
    %c0_i32 = arith.constant 0 : i32
    %c0_i32_0 = arith.constant 0 : i32
    %c0_i32_1 = arith.constant 0 : i32
    return %c0_i32, %c0_i32_0 : i32, i32
  }
  func.func @transform_3(%arg0: i32) -> (i32, i32) {
    %c0_i32 = arith.constant 0 : i32
    %c0_i32_0 = arith.constant 0 : i32
    %c0_i32_1 = arith.constant 0 : i32
    return %c0_i32, %c0_i32_0 : i32, i32
  }
  func.func @transform_4(%arg0: i32) -> (i32, i32) {
    %c0_i32 = arith.constant 0 : i32
    %c0_i32_0 = arith.constant 0 : i32
    %c0_i32_1 = arith.constant 0 : i32
    return %c0_i32, %c0_i32_0 : i32, i32
  }
  func.func @transform_5(%arg0: i32) -> (i32, i32, i32) {
    %c0_i32 = arith.constant 0 : i32
    %c0_i32_0 = arith.constant 0 : i32
    %c0_i32_1 = arith.constant 0 : i32
    return %arg0, %c0_i32, %c0_i32_0 : i32, i32, i32
  }
}

</mosaic_0001>

<bundles_post_ra>
// kernel: tpu_custom_call.1
= control target key start
LH: loop header
LB: loop body
LE: loop exit
PB: predicated region body
PF: predicated region fallthrough
CT: control target
= control target key end

     0   :  { %10 = vsyncpa [#allocation3], 0  ;;  %s16198_s0 = inlined_call_operand.hbm [shape: f32[2,8,768], index: 0, kind: input, shape index: {}]   ;;  %s16199_s1 = inlined_call_operand.hbm [shape: bf16[768,2304], index: 1, kind: input, shape index: {}]   ;;  %s16200_s2 = inlined_call_operand.hbm [shape: f32[1,2304], index: 2, kind: input, shape index: {}]   ;;  %s16201_s3 = inlined_call_operand.hbm [shape: bf16[768,768], index: 3, kind: input, shape index: {}]   ;;  %s16202_s4 = inlined_call_operand.hbm [shape: f32[1,768], index: 4, kind: input, shape index: {}]   ;;  %s16203_s5 = inlined_call_operand.hbm [shape: f32[2,8,768], index: 5, kind: output, shape index: {}]  }
   0x1   :  { %11 = vsyncpa [#allocation6], 0 }
   0x2   :  { %12 = vsyncpa [#allocation9], 0 }
   0x3   :  { %13 = vsyncpa [#allocation4], 0  ;;  %s15280_s18 = smov [#allocation5]   ;;  %s15140_s22 = scalar_lea.hbm %s16199_s1, 110592 }
   0x4   :  { %s31_s19 = sshll.u32 %s15280_s18, 4  ;;  %p15141_p0 = scmp.ne.s32.totalorder %s16199_s1, %s15140_s22  ;;  %s32_s19 = int_to_ptr.vmem [resolvable:$true] %s31_s19 }
   0x5   :  { %p15144_p1 = scmp.lt.u32.totalorder %s15140_s22, %s16199_s1 }
   0x7   :  { %p15146_p2 = pnand %p15144_p1, %p15141_p0 }
   0x9   :  { %15149 = shalt.err (!%p15146_p2)
}
   0xa   :  { %s15150_s27 = scalar_lea.vmem %s32_s19, 110592  ;;  %p15155_p4 = scmp.lt.s32.totalorder %s32_s19, %s32_s19 }
   0xb   :  { %p15151_p3 = scmp.ne.s32.totalorder %s32_s19, %s15150_s27  ;;  %p15156_p5 = scmp.lt.s32.totalorder %s15150_s27, %s15150_s27 }
   0xd   :  { %p15157_p6 = por %p15156_p5, %p15155_p4 }
   0xf   :  { %p15158_p7 = pnand %p15157_p6, %p15151_p3 }
  0x11   :  { %15161 = shalt.err (!%p15158_p7)
}
  0x12   :  { %s15281_s28 = smov 1152   ;;  %s15282_s29 = smov 72  }
  0x13   :  { %37 = dma.hbm_to_vmem [thread:$0]  %s16199_s1, 110592, %s32_s19, [#allocation6], %s15281_s28, %s15281_s28, %s15282_s29  }
  0x14   :  { %s15283_s7 = smov [#allocation8]   ;;  %s15162_s11 = scalar_lea.hbm %s16201_s3, 36864 }
  0x15   :  { %s53_s8 = sshll.u32 %s15283_s7, 4  ;;  %p15163_p8 = scmp.ne.s32.totalorder %s16201_s3, %s15162_s11  ;;  %s54_s8 = int_to_ptr.vmem [resolvable:$true] %s53_s8 }
  0x16   :  { %p15166_p9 = scmp.lt.u32.totalorder %s15162_s11, %s16201_s3 }
  0x18   :  { %p15168_p10 = pnand %p15166_p9, %p15163_p8 }
  0x1a   :  { %15171 = shalt.err (!%p15168_p10)
}
  0x1b   :  { %s15172_s16 = scalar_lea.vmem %s54_s8, 36864  ;;  %p15177_p12 = scmp.lt.s32.totalorder %s54_s8, %s54_s8 }
  0x1c   :  { %p15173_p11 = scmp.ne.s32.totalorder %s54_s8, %s15172_s16  ;;  %p15178_p13 = scmp.lt.s32.totalorder %s15172_s16, %s15172_s16 }
  0x1e   :  { %p15179_p0 = por %p15178_p13, %p15177_p12 }
  0x20   :  { %p15180_p1 = pnand %p15179_p0, %p15173_p11 }
  0x22   :  { %15183 = shalt.err (!%p15180_p1)
}
  0x23   :  { %s15284_s1 = smov 384   ;;  %s15285_s17 = smov 24  }
  0x24   :  { %59 = dma.hbm_to_vmem [thread:$0]  %s16201_s3, 36864, %s54_s8, [#allocation9], %s15284_s1, %s15284_s1, %s15285_s17  }
  0x25   :  { %s15286_s20 = smov [#allocation2]   ;;  %s15184_s24 = scalar_lea.hbm %s16198_s0, 1536 }
  0x26   :  { %s19_s21 = sshll.u32 %s15286_s20, 4  ;;  %p15185_p2 = scmp.ne.s32.totalorder %s16198_s0, %s15184_s24  ;;  %s20_s21 = int_to_ptr.vmem [resolvable:$true] %s19_s21 }
  0x27   :  { %p15188_p3 = scmp.lt.u32.totalorder %s15184_s24, %s16198_s0 }
  0x29   :  { %p15190_p4 = pnand %p15188_p3, %p15185_p2 }
  0x2b   :  { %15193 = shalt.err (!%p15190_p4)
}
  0x2c   :  { %s15194_s29 = scalar_lea.vmem %s20_s21, 1536  ;;  %p15199_p6 = scmp.lt.s32.totalorder %s20_s21, %s20_s21 }
  0x2d   :  { %p15195_p5 = scmp.ne.s32.totalorder %s20_s21, %s15194_s29  ;;  %p15200_p7 = scmp.lt.s32.totalorder %s15194_s29, %s15194_s29 }
  0x2f   :  { %p15201_p8 = por %p15200_p7, %p15199_p6 }
  0x31   :  { %p15202_p9 = pnand %p15201_p8, %p15195_p5 }
  0x33   :  { %15205 = shalt.err (!%p15202_p9)
}
  0x34   :  { %s15287_s3 = smov 768   ;;  %s15288_s30 = smov 48  }
  0x35   :  { %25 = dma.hbm_to_vmem [thread:$0]  %s16198_s0, 1536, %s20_s21, [#allocation3], %s15287_s3, %s15287_s3, %s15288_s30  }
  0x36   :  { %s15289_s8 = smov [#allocation7]   ;;  %s15290_s10 = smov [#allocation10]  }
  0x37   :  { %s44_s9 = sshll.u32 %s15289_s8, 4  ;;  %s66_s11 = sshll.u32 %s15290_s10, 4  ;;  %s45_s9 = int_to_ptr.vmem [resolvable:$true] %s44_s9  ;;  %s67_s11 = int_to_ptr.vmem [resolvable:$true] %s66_s11 }
  0x38   :  { %s15206_s14 = scalar_lea.hbm %s16200_s2, 288 }
  0x39   :  { %p15207_p10 = scmp.ne.s32.totalorder %s16200_s2, %s15206_s14  ;;  %p15210_p11 = scmp.lt.u32.totalorder %s15206_s14, %s16200_s2 }
  0x3b   :  { %p15212_p12 = pnand %p15210_p11, %p15207_p10 }
  0x3d   :  { %15215 = shalt.err (!%p15212_p12)
}
  0x3e   :  { %s15216_s0 = scalar_lea.vmem %s45_s9, 288  ;;  %p15221_p0 = scmp.lt.s32.totalorder %s45_s9, %s45_s9 }
  0x3f   :  { %p15217_p13 = scmp.ne.s32.totalorder %s45_s9, %s15216_s0  ;;  %p15222_p1 = scmp.lt.s32.totalorder %s15216_s0, %s15216_s0 }
  0x41   :  { %p15223_p2 = por %p15222_p1, %p15221_p0 }
  0x43   :  { %p15224_p3 = pnand %p15223_p2, %p15217_p13 }
  0x45   :  { %15227 = shalt.err (!%p15224_p3)
}
  0x46   :  { %47 = dma.hbm_to_vmem [thread:$0]  %s16200_s2, 288, %s45_s9, [#allocation6]  }
  0x47   :  { %s15228_s22 = scalar_lea.hbm %s16202_s4, 96 }
  0x48   :  { %p15229_p4 = scmp.ne.s32.totalorder %s16202_s4, %s15228_s22  ;;  %p15232_p5 = scmp.lt.u32.totalorder %s15228_s22, %s16202_s4 }
  0x4a   :  { %p15234_p6 = pnand %p15232_p5, %p15229_p4 }
  0x4c   :  { %15237 = shalt.err (!%p15234_p6)
}
  0x4d   :  { %s15238_s27 = scalar_lea.vmem %s67_s11, 96  ;;  %p15243_p8 = scmp.lt.s32.totalorder %s67_s11, %s67_s11 }
  0x4e   :  { %p15239_p7 = scmp.ne.s32.totalorder %s67_s11, %s15238_s27  ;;  %p15244_p9 = scmp.lt.s32.totalorder %s15238_s27, %s15238_s27 }
  0x50   :  { %p15245_p10 = por %p15244_p9, %p15243_p8 }
  0x52   :  { %p15246_p11 = pnand %p15245_p10, %p15239_p7 }
  0x54   :  { %15249 = shalt.err (!%p15246_p11)
}
  0x55   :  { %69 = dma.hbm_to_vmem [thread:$0]  %s16202_s4, 96, %s67_s11, [#allocation9]  }
  0x56   :  { %15272 = dma.done.wait [#allocation3], 1536  }
  0x57   :  { %15273 = vsyncadd [#allocation3], 4294965760 }
  0x58   :  { %15274 = dma.done.wait [#allocation6], 110880  }
  0x59   :  { %15275 = vsyncadd [#allocation6], 4294856416 }
  0x5a   :  { %15276 = dma.done.wait [#allocation9], 36960  }
  0x5b   :  { %15277 = vsyncadd [#allocation9], 4294930336  ;;  %v13313_v0 = vld [vmem:[#allocation5 + $0x4] ss:$72 sps:$4 sm:$0xff]   ;;  %v13317_v2 = vld [vmem:[#allocation5] ss:$72 sps:$4 sm:$0xff]  }
  0x5c   :  { %v13315_v1 = vld [vmem:[#allocation5 + $0x904] ss:$72 sps:$4 sm:$0xff]   ;;  %5384 = vmatprep.subr.bf16.mxu1 %v13313_v0  ;;  %v13318_v3 = vld [vmem:[#allocation5 + $0x900] ss:$72 sps:$4 sm:$0xff]   ;;  %v13319_v4 = vld [vmem:[#allocation5 + $0x94] ss:$72 sps:$4 sm:$0xff]  }
  0x5d   :  { %5427 = vmatprep.subr.bf16.mxu0 %v13315_v1  ;;  %5385 = vmatpush1.bf16.msra.mxu1 %v13317_v2  ;;  %v13321_v5 = vld [vmem:[#allocation5 + $0x994] ss:$72 sps:$4 sm:$0xff]   ;;  %v13323_v6 = vld [vmem:[#allocation5 + $0x90] ss:$72 sps:$4 sm:$0xff]   ;;  %v13325_v8 = vld [vmem:[#allocation5 + $0x124] ss:$72 sps:$4 sm:$0xff]  }
  0x5e   :  { %5428 = vmatpush1.bf16.msra.mxu0 %v13318_v3  ;;  %5386 = vmatprep.subr.bf16.mxu1 %v13319_v4  ;;  %v13324_v7 = vld [vmem:[#allocation5 + $0x990] ss:$72 sps:$4 sm:$0xff]   ;;  %v13327_v9 = vld [vmem:[#allocation5 + $0xa24] ss:$72 sps:$4 sm:$0xff]   ;;  %v13329_v10 = vld [vmem:[#allocation5 + $0x120] ss:$72 sps:$4 sm:$0xff]  }
  0x5f   :  { %5429 = vmatprep.subr.bf16.mxu0 %v13321_v5  ;;  %v13330_v11 = vld [vmem:[#allocation5 + $0xa20] ss:$72 sps:$4 sm:$0xff]   ;;  %v13331_v12 = vld [vmem:[#allocation5 + $0x1b4] ss:$72 sps:$4 sm:$0xff]   ;;  %v13335_v14 = vld [vmem:[#allocation5 + $0x1b0] ss:$72 sps:$4 sm:$0xff]  }
  0x60   :  { %v13333_v13 = vld [vmem:[#allocation5 + $0xab4] ss:$72 sps:$4 sm:$0xff]   ;;  %v13336_v15 = vld [vmem:[#allocation5 + $0xab0] ss:$72 sps:$4 sm:$0xff]   ;;  %v13337_v16 = vld [vmem:[#allocation5 + $0x244] ss:$72 sps:$4 sm:$0xff]  }
  0x61   :  { %5387 = vmatpush1.bf16.msra.mxu1 %v13323_v6  ;;  %v13339_v17 = vld [vmem:[#allocation5 + $0xb44] ss:$72 sps:$4 sm:$0xff]   ;;  %v13341_v18 = vld [vmem:[#allocation5 + $0x240] ss:$72 sps:$4 sm:$0xff]   ;;  %v13343_v20 = vld [vmem:[#allocation5 + $0x2d4] ss:$72 sps:$4 sm:$0xff]  }
  0x62   :  { %5430 = vmatpush1.bf16.msra.mxu0 %v13324_v7  ;;  %5388 = vmatprep.subr.bf16.mxu1 %v13325_v8  ;;  %v13342_v19 = vld [vmem:[#allocation5 + $0xb40] ss:$72 sps:$4 sm:$0xff]   ;;  %v13345_v21 = vld [vmem:[#allocation5 + $0xbd4] ss:$72 sps:$4 sm:$0xff]   ;;  %v13347_v22 = vld [vmem:[#allocation5 + $0x2d0] ss:$72 sps:$4 sm:$0xff]  }
  0x63   :  { %5431 = vmatprep.subr.bf16.mxu0 %v13327_v9  ;;  %v13348_v23 = vld [vmem:[#allocation5 + $0xbd0] ss:$72 sps:$4 sm:$0xff]   ;;  %v13349_v24 = vld [vmem:[#allocation5 + $0x364] ss:$72 sps:$4 sm:$0xff]   ;;  %v13353_v26 = vld [vmem:[#allocation5 + $0x360] ss:$72 sps:$4 sm:$0xff]  }
  0x64   :  { %v13351_v25 = vld [vmem:[#allocation5 + $0xc64] ss:$72 sps:$4 sm:$0xff]   ;;  %v13354_v27 = vld [vmem:[#allocation5 + $0xc60] ss:$72 sps:$4 sm:$0xff]   ;;  %v13355_v28 = vld [vmem:[#allocation5 + $0x3f4] ss:$72 sps:$4 sm:$0xff]  }
  0x65   :  { %5389 = vmatpush1.bf16.msra.mxu1 %v13329_v10  ;;  %v13357_v29 = vld [vmem:[#allocation5 + $0xcf4] ss:$72 sps:$4 sm:$0xff]   ;;  %v13359_v30 = vld [vmem:[#allocation5 + $0x3f0] ss:$72 sps:$4 sm:$0xff]   ;;  %v13361_v32 = vld [vmem:[#allocation5 + $0x484] ss:$72 sps:$4 sm:$0xff]  }
  0x66   :  { %5432 = vmatpush1.bf16.msra.mxu0 %v13330_v11  ;;  %5390 = vmatprep.subr.bf16.mxu1 %v13331_v12  ;;  %v13360_v31 = vld [vmem:[#allocation5 + $0xcf0] ss:$72 sps:$4 sm:$0xff]   ;;  %v13363_v33 = vld [vmem:[#allocation5 + $0xd84] ss:$72 sps:$4 sm:$0xff]   ;;  %v13365_v34 = vld [vmem:[#allocation5 + $0x480] ss:$72 sps:$4 sm:$0xff]  }
  0x67   :  { %5433 = vmatprep.subr.bf16.mxu0 %v13333_v13  ;;  %v13366_v35 = vld [vmem:[#allocation5 + $0xd80] ss:$72 sps:$4 sm:$0xff]   ;;  %v13367_v36 = vld [vmem:[#allocation5 + $0x514] ss:$72 sps:$4 sm:$0xff]   ;;  %v13371_v38 = vld [vmem:[#allocation5 + $0x510] ss:$72 sps:$4 sm:$0xff]  }
  0x68   :  { %v13369_v37 = vld [vmem:[#allocation5 + $0xe14] ss:$72 sps:$4 sm:$0xff]   ;;  %v13372_v39 = vld [vmem:[#allocation5 + $0xe10] ss:$72 sps:$4 sm:$0xff]   ;;  %v13373_v40 = vld [vmem:[#allocation5 + $0x5a4] ss:$72 sps:$4 sm:$0xff]  }
  0x69   :  { %5391 = vmatpush1.bf16.msra.mxu1 %v13335_v14  ;;  %v13375_v41 = vld [vmem:[#allocation5 + $0xea4] ss:$72 sps:$4 sm:$0xff]   ;;  %v13377_v42 = vld [vmem:[#allocation5 + $0x5a0] ss:$72 sps:$4 sm:$0xff]   ;;  %v13379_v44 = vld [vmem:[#allocation5 + $0x634] ss:$72 sps:$4 sm:$0xff]  }
  0x6a   :  { %5434 = vmatpush1.bf16.msra.mxu0 %v13336_v15  ;;  %5392 = vmatprep.subr.bf16.mxu1 %v13337_v16  ;;  %v13378_v43 = vld [vmem:[#allocation5 + $0xea0] ss:$72 sps:$4 sm:$0xff]   ;;  %v13381_v45 = vld [vmem:[#allocation5 + $0xf34] ss:$72 sps:$4 sm:$0xff]   ;;  %v13383_v47 = vld [vmem:[#allocation5 + $0x630] ss:$72 sps:$4 sm:$0xff]  }
  0x6b   :  { %5435 = vmatprep.subr.bf16.mxu0 %v13339_v17  ;;  %v87_v46 = vld [vmem:[#allocation2 + $0x8] sm:$0xff]  ;;  %v13384_v48 = vld [vmem:[#allocation5 + $0xf30] ss:$72 sps:$4 sm:$0xff]   ;;  %v13391_v58 = vld [vmem:[#allocation5 + $0x754] ss:$72 sps:$4 sm:$0xff]   ;;  %vm15292_vm0 = vmmov 0  }
  0x6c   :  { %v93_v49 = vld [vmem:[#allocation2 + $0x38] sm:$0xff]  ;;  %v95_v52 = vld [vmem:[#allocation2 + $0x48] sm:$0xff]  ;;  %v86_v6 = vld [vmem:[#allocation2] sm:$0xff]  ;;  %vm6578_vm1 = vcmask 523264   ;;  %vm6699_vm2 = vcmask 1043456   ;;  %vm6671_vm3 = vcmask 64512  }
  0x6d   :  { %5393 = vmatpush1.bf16.msra.mxu1 %v13341_v18  ;;  %v15388_v50 = vpack.c.bf16 %v93_v49, %v87_v46  ;;  %v89_v51 = vld [vmem:[#allocation2 + $0x18] sm:$0xff]  ;;  %v13385_v53 = vld [vmem:[#allocation5 + $0x6c4] ss:$72 sps:$4 sm:$0xff]   ;;  %v13389_v56 = vld [vmem:[#allocation5 + $0x6c0] ss:$72 sps:$4 sm:$0xff]   ;;  %s15293_s4 = smov 64  }
  0x6e   :  { %5436 = vmatpush1.bf16.msra.mxu0 %v13342_v19  ;;  %5394 = vmatprep.subr.bf16.mxu1 %v13343_v20  ;;  %v13387_v54 = vld [vmem:[#allocation5 + $0xfc4] ss:$72 sps:$4 sm:$0xff]   ;;  %v15390_v55 = vpack.c.bf16 %v95_v52, %v89_v51  ;;  %v13390_v57 = vld [vmem:[#allocation5 + $0xfc0] ss:$72 sps:$4 sm:$0xff]   ;;  %v13393_v59 = vld [vmem:[#allocation5 + $0x1054] ss:$72 sps:$4 sm:$0xff]  }
  0x6f   :  { %5437 = vmatprep.subr.bf16.mxu0 %v13345_v21  ;;  %5416 = vmatprep.mubr.bf16.mxu1 %v15388_v50  ;;  %v13395_v60 = vld [vmem:[#allocation5 + $0x750] ss:$72 sps:$4 sm:$0xff]   ;;  %v13397_v62 = vld [vmem:[#allocation5 + $0x7e4] ss:$72 sps:$4 sm:$0xff]   ;;  %v13401_v0 = vld [vmem:[#allocation5 + $0x7e0] ss:$72 sps:$4 sm:$0xff]  }
  0x70   :  { %5459 = vmatprep.mubr.bf16.mxu0 %v15390_v55  ;;  %v13396_v61 = vld [vmem:[#allocation5 + $0x1050] ss:$72 sps:$4 sm:$0xff]   ;;  %v13399_v63 = vld [vmem:[#allocation5 + $0x10e4] ss:$72 sps:$4 sm:$0xff]   ;;  %v13402_v1 = vld [vmem:[#allocation5 + $0x10e0] ss:$72 sps:$4 sm:$0xff]  }
  0x71   :  { %5395 = vmatpush1.bf16.msra.mxu1 %v13347_v22  ;;  %v13403_v2 = vld [vmem:[#allocation5 + $0x874] ss:$72 sps:$4 sm:$0xff]   ;;  %v13407_v4 = vld [vmem:[#allocation5 + $0x870] ss:$72 sps:$4 sm:$0xff]   ;;  %v13411_v8 = vld [vmem:[#allocation5 + $0x1204] ss:$72 sps:$4 sm:$0xff]  }
  0x72   :  { %5438 = vmatpush1.bf16.msra.mxu0 %v13348_v23  ;;  %5396 = vmatprep.subr.bf16.mxu1 %v13349_v24  ;;  %v13405_v3 = vld [vmem:[#allocation5 + $0x1174] ss:$72 sps:$4 sm:$0xff]   ;;  %v13408_v5 = vld [vmem:[#allocation5 + $0x1170] ss:$72 sps:$4 sm:$0xff]   ;;  %v94_v10 = vld [vmem:[#allocation2 + $0x40] sm:$0xff]  ;;  %s15294_s29 = smov [#allocation11]  }
  0x73   :  { %5439 = vmatprep.subr.bf16.mxu0 %v13351_v25  ;;  %v92_v7 = vld [vmem:[#allocation2 + $0x30] sm:$0xff]  ;;  %v13409_v13 = vld [vmem:[#allocation5 + $0x1200] ss:$72 sps:$4 sm:$0xff]   ;;  %v13420_v17 = vld [vmem:[#allocation5 + $0x9c] ss:$72 sps:$4 sm:$0xff]   ;;  %s11454_s6 = sshll.u32 %s15294_s29, 4  ;;  %s11455_s6 = int_to_ptr.vmem [resolvable:$true] %s11454_s6 }
  0x74   :  { %v88_v9 = vld [vmem:[#allocation2 + $0x10] sm:$0xff]  ;;  %v15394_v12 = vpack.c.bf16 %v92_v7, %v86_v6  ;;  %v13418_v19 = vld [vmem:[#allocation5 + $0x98] ss:$72 sps:$4 sm:$0xff]   ;;  %v13423_v20 = vld [vmem:[#allocation5 + $0x1324] ss:$72 sps:$4 sm:$0xff]   ;;  %s15250_s7 = scalar_lea.vmem %s11455_s6, 1536  ;;  %p15255_p13 = scmp.lt.s32.totalorder %s11455_s6, %s11455_s6 }
  0x75   :  { %5397 = vmatpush1.bf16.msra.mxu1 %v13353_v26  ;;  %v13414_v11 = vld [vmem:[#allocation5 + $0xc] ss:$72 sps:$4 sm:$0xff]   ;;  %v13412_v14 = vld [vmem:[#allocation5 + $0x8] ss:$72 sps:$4 sm:$0xff]   ;;  %v15396_v15 = vpack.c.bf16 %v94_v10, %v88_v9  ;;  %v13432_v25 = vld [vmem:[#allocation5 + $0x1bc] ss:$72 sps:$4 sm:$0xff]   ;;  %p15251_p12 = scmp.ne.s32.totalorder %s11455_s6, %s15250_s7  ;;  %p15256_p0 = scmp.lt.s32.totalorder %s15250_s7, %s15250_s7 }
  0x76   :  { %5440 = vmatpush1.bf16.msra.mxu0 %v13354_v27  ;;  %5398 = vmatprep.subr.bf16.mxu1 %v13355_v28  ;;  %v13417_v16 = vld [vmem:[#allocation5 + $0x1294] ss:$72 sps:$4 sm:$0xff]   ;;  %v13415_v18 = vld [vmem:[#allocation5 + $0x1290] ss:$72 sps:$4 sm:$0xff]   ;;  %v13421_v22 = vld [vmem:[#allocation5 + $0x1320] ss:$72 sps:$4 sm:$0xff]  }
  0x77   :  { %5441 = vmatprep.subr.bf16.mxu0 %v13357_v29  ;;  %v13426_v21 = vld [vmem:[#allocation5 + $0x12c] ss:$72 sps:$4 sm:$0xff]   ;;  %v13424_v23 = vld [vmem:[#allocation5 + $0x128] ss:$72 sps:$4 sm:$0xff]   ;;  %v13430_v27 = vld [vmem:[#allocation5 + $0x1b8] ss:$72 sps:$4 sm:$0xff]   ;;  %p15257_p1 = por %p15256_p0, %p15255_p13 }
  0x78   :  { %v13429_v24 = vld [vmem:[#allocation5 + $0x13b4] ss:$72 sps:$4 sm:$0xff]   ;;  %v13427_v26 = vld [vmem:[#allocation5 + $0x13b0] ss:$72 sps:$4 sm:$0xff]   ;;  %v13435_v28 = vld [vmem:[#allocation5 + $0x1444] ss:$72 sps:$4 sm:$0xff]  }
  0x79   :  { %5399 = vmatpush1.bf16.msra.mxu1 %v13359_v30  ;;  %v13438_v29 = vld [vmem:[#allocation5 + $0x24c] ss:$72 sps:$4 sm:$0xff]   ;;  %v13433_v30 = vld [vmem:[#allocation5 + $0x1440] ss:$72 sps:$4 sm:$0xff]   ;;  %v13492_v6 = vld [vmem:[#allocation5 + $0x75c] ss:$72 sps:$4 sm:$0xff]   ;;  %p15258_p2 = pnand %p15257_p1, %p15251_p12 }
  0x7a   :  { %5442 = vmatpush1.bf16.msra.mxu0 %v13360_v31  ;;  %5400 = vmatprep.subr.bf16.mxu1 %v13361_v32  ;;  %v13436_v31 = vld [vmem:[#allocation5 + $0x248] ss:$72 sps:$4 sm:$0xff]   ;;  %v13441_v32 = vld [vmem:[#allocation5 + $0x14d4] ss:$72 sps:$4 sm:$0xff]   ;;  %v13454_v46 = vld [vmem:[#allocation5 + $0x3f8] ss:$72 sps:$4 sm:$0xff]  }
  0x7b   :  { %5443 = vmatprep.subr.bf16.mxu0 %v13363_v33  ;;  %v13444_v33 = vld [vmem:[#allocation5 + $0x2dc] ss:$72 sps:$4 sm:$0xff]   ;;  %v13457_v49 = vld [vmem:[#allocation5 + $0x1680] ss:$72 sps:$4 sm:$0xff]   ;;  %v13487_v7 = vld [vmem:[#allocation5 + $0x1950] ss:$72 sps:$4 sm:$0xff]  }
  0x7c   :  { %v13460_v51 = vld [vmem:[#allocation5 + $0x488] ss:$72 sps:$4 sm:$0xff]   ;;  %v13465_v52 = vld [vmem:[#allocation5 + $0x1714] ss:$72 sps:$4 sm:$0xff]   ;;  %v13495_v9 = vld [vmem:[#allocation5 + $0x19e4] ss:$72 sps:$4 sm:$0xff]  }
  0x7d   :  { %5401 = vmatpush1.bf16.msra.mxu1 %v13365_v34  ;;  %v13439_v34 = vld [vmem:[#allocation5 + $0x14d0] ss:$72 sps:$4 sm:$0xff]   ;;  %v13498_v10 = vld [vmem:[#allocation5 + $0x7ec] ss:$72 sps:$4 sm:$0xff]  }
  0x7e   :  { %5444 = vmatpush1.bf16.msra.mxu0 %v13366_v35  ;;  %5402 = vmatprep.subr.bf16.mxu1 %v13367_v36  ;;  %v13442_v35 = vld [vmem:[#allocation5 + $0x2d8] ss:$72 sps:$4 sm:$0xff]   ;;  %v13447_v36 = vld [vmem:[#allocation5 + $0x1564] ss:$72 sps:$4 sm:$0xff]  }
  0x7f   :  { %5445 = vmatprep.subr.bf16.mxu0 %v13369_v37  ;;  %v13450_v37 = vld [vmem:[#allocation5 + $0x36c] ss:$72 sps:$4 sm:$0xff]  }
  0x81   :  { %5403 = vmatpush1.bf16.msra.mxu1 %v13371_v38  ;;  %v13445_v38 = vld [vmem:[#allocation5 + $0x1560] ss:$72 sps:$4 sm:$0xff]  }
  0x82   :  { %5446 = vmatpush1.bf16.msra.mxu0 %v13372_v39  ;;  %5404 = vmatprep.subr.bf16.mxu1 %v13373_v40  ;;  %v13448_v39 = vld [vmem:[#allocation5 + $0x368] ss:$72 sps:$4 sm:$0xff]   ;;  %v13453_v40 = vld [vmem:[#allocation5 + $0x15f4] ss:$72 sps:$4 sm:$0xff]  }
  0x83   :  { %5447 = vmatprep.subr.bf16.mxu0 %v13375_v41  ;;  %v91_v41 = vld [vmem:[#allocation2 + $0x28] sm:$0xff] }
  0x85   :  { %5405 = vmatpush1.bf16.msra.mxu1 %v13377_v42  ;;  %v97_v42 = vld [vmem:[#allocation2 + $0x58] sm:$0xff] }
  0x86   :  { %5448 = vmatpush1.bf16.msra.mxu0 %v13378_v43  ;;  %5406 = vmatprep.subr.bf16.mxu1 %v13379_v44  ;;  %v13456_v43 = vld [vmem:[#allocation5 + $0x3fc] ss:$72 sps:$4 sm:$0xff]   ;;  %v15401_v44 = vpack.c.bf16 %v97_v42, %v91_v41  ;;  %v13532_v41 = vld [vmem:[#allocation5 + $0x250] ss:$72 sps:$4 sm:$0xff]  }
  0x87   :  { %5449 = vmatprep.subr.bf16.mxu0 %v13381_v45  ;;  %v13451_v45 = vld [vmem:[#allocation5 + $0x15f0] ss:$72 sps:$4 sm:$0xff]   ;;  %v13537_v42 = vld [vmem:[#allocation5 + $0xbdc] ss:$72 sps:$4 sm:$0xff]  }
  0x89   :  { %5407 = vmatpush1.bf16.msra.mxu1 %v13383_v47  ;;  %v13459_v47 = vld [vmem:[#allocation5 + $0x1684] ss:$72 sps:$4 sm:$0xff]  }
  0x8a   :  { %5450 = vmatpush1.bf16.msra.mxu0 %v13384_v48  ;;  %5408 = vmatprep.subr.bf16.mxu1 %v13385_v53  ;;  %v13462_v48 = vld [vmem:[#allocation5 + $0x48c] ss:$72 sps:$4 sm:$0xff]   ;;  %v13468_v53 = vld [vmem:[#allocation5 + $0x51c] ss:$72 sps:$4 sm:$0xff]  }
  0x8b   :  { %5451 = vmatprep.subr.bf16.mxu0 %v13387_v54  ;;  %v13463_v54 = vld [vmem:[#allocation5 + $0x1710] ss:$72 sps:$4 sm:$0xff]  }
  0x8d   :  { %5409 = vmatpush1.bf16.msra.mxu1 %v13389_v56  ;;  %v13466_v56 = vld [vmem:[#allocation5 + $0x518] ss:$72 sps:$4 sm:$0xff]  }
  0x8e   :  { %5452 = vmatpush1.bf16.msra.mxu0 %v13390_v57  ;;  %5410 = vmatprep.subr.bf16.mxu1 %v13391_v58  ;;  %v13471_v57 = vld [vmem:[#allocation5 + $0x17a4] ss:$72 sps:$4 sm:$0xff]  }
  0x8f   :  { %5453 = vmatprep.subr.bf16.mxu0 %v13393_v59  ;;  %v13474_v58 = vld [vmem:[#allocation5 + $0x5ac] ss:$72 sps:$4 sm:$0xff]   ;;  %v13469_v59 = vld [vmem:[#allocation5 + $0x17a0] ss:$72 sps:$4 sm:$0xff]  }
  0x91   :  { %5411 = vmatpush1.bf16.msra.mxu1 %v13395_v60  ;;  %v13472_v60 = vld [vmem:[#allocation5 + $0x5a8] ss:$72 sps:$4 sm:$0xff]  }
  0x92   :  { %5454 = vmatpush1.bf16.msra.mxu0 %v13396_v61  ;;  %5412 = vmatprep.subr.bf16.mxu1 %v13397_v62  ;;  %v13477_v61 = vld [vmem:[#allocation5 + $0x1834] ss:$72 sps:$4 sm:$0xff]  }
  0x93   :  { %5455 = vmatprep.subr.bf16.mxu0 %v13399_v63  ;;  %v13480_v62 = vld [vmem:[#allocation5 + $0x63c] ss:$72 sps:$4 sm:$0xff]   ;;  %v13475_v63 = vld [vmem:[#allocation5 + $0x1830] ss:$72 sps:$4 sm:$0xff]  }
  0x95   :  { %5413 = vmatpush1.bf16.msra.mxu1 %v13401_v0  ;;  %v13478_v0 = vld [vmem:[#allocation5 + $0x638] ss:$72 sps:$4 sm:$0xff]  }
  0x96   :  { %5456 = vmatpush1.bf16.msra.mxu0 %v13402_v1  ;;  %5414 = vmatprep.subr.bf16.mxu1 %v13403_v2  ;;  %v13483_v1 = vld [vmem:[#allocation5 + $0x18c4] ss:$72 sps:$4 sm:$0xff]  }
  0x97   :  { %5457 = vmatprep.subr.bf16.mxu0 %v13405_v3  ;;  %v13486_v2 = vld [vmem:[#allocation5 + $0x6cc] ss:$72 sps:$4 sm:$0xff]   ;;  %v13481_v3 = vld [vmem:[#allocation5 + $0x18c0] ss:$72 sps:$4 sm:$0xff]  }
  0x99   :  { %5415 = vmatpush1.bf16.msra.mxu1 %v13407_v4  ;;  %v13484_v4 = vld [vmem:[#allocation5 + $0x6c8] ss:$72 sps:$4 sm:$0xff]  }
  0x9a   :  { %5458 = vmatpush1.bf16.msra.mxu0 %v13408_v5  ;;  %5513 = vmatprep.subr.bf16.mxu1 %v13414_v11  ;;  %v13489_v5 = vld [vmem:[#allocation5 + $0x1954] ss:$72 sps:$4 sm:$0xff]   ;;  %v13493_v11 = vld [vmem:[#allocation5 + $0x19e0] ss:$72 sps:$4 sm:$0xff]  }
  0x9b   :  { %5470 = vmatprep.subr.bf16.mxu0 %v13411_v8  ;;  %v13490_v8 = vld [vmem:[#allocation5 + $0x758] ss:$72 sps:$4 sm:$0xff]  }
  0x9c   :  { %5417 = vmatmul.mubr.bf16.vlgmr.msra.gmra.mrb[0].mxu1 %v15394_v12 }
  0x9d   :  { %5460 = vmatmul.mubr.bf16.vlgmr.msra.gmra.mrb[0].mxu0 %v15396_v15  ;;  %5514 = vmatpush1.bf16.msra.mxu1 %v13412_v14  ;;  %v13501_v14 = vld [vmem:[#allocation5 + $0x1a74] ss:$72 sps:$4 sm:$0xff]  }
  0x9e   :  { %5471 = vmatpush1.bf16.msra.mxu0 %v13409_v13  ;;  %5515 = vmatprep.subr.bf16.mxu1 %v13420_v17  ;;  %v13496_v13 = vld [vmem:[#allocation5 + $0x7e8] ss:$72 sps:$4 sm:$0xff]  }
  0x9f   :  { %5472 = vmatprep.subr.bf16.mxu0 %v13417_v16  ;;  %5545 = vmatprep.mubr.bf16.mxu1 %v15388_v50  ;;  %v13504_v16 = vld [vmem:[#allocation5 + $0x87c] ss:$72 sps:$4 sm:$0xff]   ;;  %v13499_v17 = vld [vmem:[#allocation5 + $0x1a70] ss:$72 sps:$4 sm:$0xff]  }
  0xa0   :  { %5502 = vmatprep.mubr.bf16.mxu0 %v15401_v44 }
  0xa1   :  { %5516 = vmatpush1.bf16.msra.mxu1 %v13418_v19  ;;  %v90_v19 = vld [vmem:[#allocation2 + $0x20] sm:$0xff] }
  0xa2   :  { %5473 = vmatpush1.bf16.msra.mxu0 %v13415_v18  ;;  %5517 = vmatprep.subr.bf16.mxu1 %v13426_v21  ;;  %v13502_v18 = vld [vmem:[#allocation5 + $0x878] ss:$72 sps:$4 sm:$0xff]   ;;  %v13507_v21 = vld [vmem:[#allocation5 + $0x90c] ss:$72 sps:$4 sm:$0xff]  }
  0xa3   :  { %5474 = vmatprep.subr.bf16.mxu0 %v13423_v20  ;;  %v96_v20 = vld [vmem:[#allocation2 + $0x50] sm:$0xff] }
  0xa5   :  { %5518 = vmatpush1.bf16.msra.mxu1 %v13424_v23  ;;  %v15404_v23 = vpack.c.bf16 %v96_v20, %v90_v19  ;;  %v13591_v19 = vld [vmem:[#allocation5 + $0x10ec] ss:$72 sps:$4 sm:$0xff]  }
  0xa6   :  { %5475 = vmatpush1.bf16.msra.mxu0 %v13421_v22  ;;  %5519 = vmatprep.subr.bf16.mxu1 %v13432_v25  ;;  %v13510_v22 = vld [vmem:[#allocation5 + $0x14] ss:$72 sps:$4 sm:$0xff]   ;;  %v13508_v25 = vld [vmem:[#allocation5 + $0x10] ss:$72 sps:$4 sm:$0xff]  }
  0xa7   :  { %5476 = vmatprep.subr.bf16.mxu0 %v13429_v24  ;;  %v13505_v24 = vld [vmem:[#allocation5 + $0x908] ss:$72 sps:$4 sm:$0xff]   ;;  %v13594_v20 = vld [vmem:[#allocation5 + $0x7f4] ss:$72 sps:$4 sm:$0xff]  }
  0xa9   :  { %5520 = vmatpush1.bf16.msra.mxu1 %v13430_v27  ;;  %v13516_v27 = vld [vmem:[#allocation5 + $0xa4] ss:$72 sps:$4 sm:$0xff]  }
  0xaa   :  { %5477 = vmatpush1.bf16.msra.mxu0 %v13427_v26  ;;  %5521 = vmatprep.subr.bf16.mxu1 %v13438_v29  ;;  %v13513_v26 = vld [vmem:[#allocation5 + $0x99c] ss:$72 sps:$4 sm:$0xff]   ;;  %v13514_v29 = vld [vmem:[#allocation5 + $0xa0] ss:$72 sps:$4 sm:$0xff]  }
  0xab   :  { %5478 = vmatprep.subr.bf16.mxu0 %v13435_v28  ;;  %v13511_v28 = vld [vmem:[#allocation5 + $0x998] ss:$72 sps:$4 sm:$0xff]  }
  0xad   :  { %5522 = vmatpush1.bf16.msra.mxu1 %v13436_v31  ;;  %v13522_v31 = vld [vmem:[#allocation5 + $0x134] ss:$72 sps:$4 sm:$0xff]  }
  0xae   :  { %5479 = vmatpush1.bf16.msra.mxu0 %v13433_v30  ;;  %5523 = vmatprep.subr.bf16.mxu1 %v13444_v33  ;;  %v13519_v30 = vld [vmem:[#allocation5 + $0xa2c] ss:$72 sps:$4 sm:$0xff]   ;;  %v13520_v33 = vld [vmem:[#allocation5 + $0x130] ss:$72 sps:$4 sm:$0xff]  }
  0xaf   :  { %5480 = vmatprep.subr.bf16.mxu0 %v13441_v32  ;;  %v13517_v32 = vld [vmem:[#allocation5 + $0xa28] ss:$72 sps:$4 sm:$0xff]  }
  0xb1   :  { %5524 = vmatpush1.bf16.msra.mxu1 %v13442_v35  ;;  %v13528_v35 = vld [vmem:[#allocation5 + $0x1c4] ss:$72 sps:$4 sm:$0xff]  }
  0xb2   :  { %5481 = vmatpush1.bf16.msra.mxu0 %v13439_v34  ;;  %5525 = vmatprep.subr.bf16.mxu1 %v13450_v37  ;;  %v13525_v34 = vld [vmem:[#allocation5 + $0xabc] ss:$72 sps:$4 sm:$0xff]   ;;  %v13526_v37 = vld [vmem:[#allocation5 + $0x1c0] ss:$72 sps:$4 sm:$0xff]  }
  0xb3   :  { %5482 = vmatprep.subr.bf16.mxu0 %v13447_v36  ;;  %v13523_v36 = vld [vmem:[#allocation5 + $0xab8] ss:$72 sps:$4 sm:$0xff]  }
  0xb5   :  { %5526 = vmatpush1.bf16.msra.mxu1 %v13448_v39  ;;  %v13534_v39 = vld [vmem:[#allocation5 + $0x254] ss:$72 sps:$4 sm:$0xff]  }
  0xb6   :  { %5483 = vmatpush1.bf16.msra.mxu0 %v13445_v38  ;;  %5527 = vmatprep.subr.bf16.mxu1 %v13456_v43  ;;  %v13531_v38 = vld [vmem:[#allocation5 + $0xb4c] ss:$72 sps:$4 sm:$0xff]  }
  0xb7   :  { %5484 = vmatprep.subr.bf16.mxu0 %v13453_v40  ;;  %v13529_v40 = vld [vmem:[#allocation5 + $0xb48] ss:$72 sps:$4 sm:$0xff]   ;;  %v13540_v43 = vld [vmem:[#allocation5 + $0x2e4] ss:$72 sps:$4 sm:$0xff]  }
  0xb9   :  { %5528 = vmatpush1.bf16.msra.mxu1 %v13454_v46  ;;  %v13538_v46 = vld [vmem:[#allocation5 + $0x2e0] ss:$72 sps:$4 sm:$0xff]  }
  0xba   :  { %5485 = vmatpush1.bf16.msra.mxu0 %v13451_v45  ;;  %5529 = vmatprep.subr.bf16.mxu1 %v13462_v48  ;;  %v13535_v45 = vld [vmem:[#allocation5 + $0xbd8] ss:$72 sps:$4 sm:$0xff]   ;;  %v13546_v48 = vld [vmem:[#allocation5 + $0x374] ss:$72 sps:$4 sm:$0xff]  }
  0xbb   :  { %5486 = vmatprep.subr.bf16.mxu0 %v13459_v47  ;;  %v13543_v47 = vld [vmem:[#allocation5 + $0xc6c] ss:$72 sps:$4 sm:$0xff]  }
  0xbd   :  { %5530 = vmatpush1.bf16.msra.mxu1 %v13460_v51  ;;  %v13544_v51 = vld [vmem:[#allocation5 + $0x370] ss:$72 sps:$4 sm:$0xff]  }
  0xbe   :  { %5487 = vmatpush1.bf16.msra.mxu0 %v13457_v49  ;;  %5531 = vmatprep.subr.bf16.mxu1 %v13468_v53  ;;  %v13541_v49 = vld [vmem:[#allocation5 + $0xc68] ss:$72 sps:$4 sm:$0xff]   ;;  %v13552_v53 = vld [vmem:[#allocation5 + $0x404] ss:$72 sps:$4 sm:$0xff]  }
  0xbf   :  { %5488 = vmatprep.subr.bf16.mxu0 %v13465_v52  ;;  %v13549_v52 = vld [vmem:[#allocation5 + $0xcfc] ss:$72 sps:$4 sm:$0xff]  }
  0xc1   :  { %5532 = vmatpush1.bf16.msra.mxu1 %v13466_v56  ;;  %v13550_v56 = vld [vmem:[#allocation5 + $0x400] ss:$72 sps:$4 sm:$0xff]  }
  0xc2   :  { %5489 = vmatpush1.bf16.msra.mxu0 %v13463_v54  ;;  %5533 = vmatprep.subr.bf16.mxu1 %v13474_v58  ;;  %v13547_v54 = vld [vmem:[#allocation5 + $0xcf8] ss:$72 sps:$4 sm:$0xff]   ;;  %v13558_v58 = vld [vmem:[#allocation5 + $0x494] ss:$72 sps:$4 sm:$0xff]  }
  0xc3   :  { %5490 = vmatprep.subr.bf16.mxu0 %v13471_v57  ;;  %v13555_v57 = vld [vmem:[#allocation5 + $0xd8c] ss:$72 sps:$4 sm:$0xff]  }
  0xc5   :  { %5534 = vmatpush1.bf16.msra.mxu1 %v13472_v60  ;;  %v13556_v60 = vld [vmem:[#allocation5 + $0x490] ss:$72 sps:$4 sm:$0xff]  }
  0xc6   :  { %5491 = vmatpush1.bf16.msra.mxu0 %v13469_v59  ;;  %5535 = vmatprep.subr.bf16.mxu1 %v13480_v62  ;;  %v13553_v59 = vld [vmem:[#allocation5 + $0xd88] ss:$72 sps:$4 sm:$0xff]   ;;  %v13564_v62 = vld [vmem:[#allocation5 + $0x524] ss:$72 sps:$4 sm:$0xff]  }
  0xc7   :  { %5492 = vmatprep.subr.bf16.mxu0 %v13477_v61  ;;  %v13561_v61 = vld [vmem:[#allocation5 + $0xe1c] ss:$72 sps:$4 sm:$0xff]  }
  0xc9   :  { %5536 = vmatpush1.bf16.msra.mxu1 %v13478_v0  ;;  %v13562_v0 = vld [vmem:[#allocation5 + $0x520] ss:$72 sps:$4 sm:$0xff]  }
  0xca   :  { %5493 = vmatpush1.bf16.msra.mxu0 %v13475_v63  ;;  %5537 = vmatprep.subr.bf16.mxu1 %v13486_v2  ;;  %v13559_v63 = vld [vmem:[#allocation5 + $0xe18] ss:$72 sps:$4 sm:$0xff]   ;;  %v13570_v2 = vld [vmem:[#allocation5 + $0x5b4] ss:$72 sps:$4 sm:$0xff]  }
  0xcb   :  { %5494 = vmatprep.subr.bf16.mxu0 %v13483_v1  ;;  %v13567_v1 = vld [vmem:[#allocation5 + $0xeac] ss:$72 sps:$4 sm:$0xff]  }
  0xcd   :  { %5538 = vmatpush1.bf16.msra.mxu1 %v13484_v4  ;;  %v13568_v4 = vld [vmem:[#allocation5 + $0x5b0] ss:$72 sps:$4 sm:$0xff]  }
  0xce   :  { %5495 = vmatpush1.bf16.msra.mxu0 %v13481_v3  ;;  %5539 = vmatprep.subr.bf16.mxu1 %v13492_v6  ;;  %v13565_v3 = vld [vmem:[#allocation5 + $0xea8] ss:$72 sps:$4 sm:$0xff]   ;;  %v13576_v6 = vld [vmem:[#allocation5 + $0x644] ss:$72 sps:$4 sm:$0xff]  }
  0xcf   :  { %5496 = vmatprep.subr.bf16.mxu0 %v13489_v5  ;;  %v13573_v5 = vld [vmem:[#allocation5 + $0xf3c] ss:$72 sps:$4 sm:$0xff]  }
  0xd1   :  { %5540 = vmatpush1.bf16.msra.mxu1 %v13490_v8  ;;  %v13574_v8 = vld [vmem:[#allocation5 + $0x640] ss:$72 sps:$4 sm:$0xff]  }
  0xd2   :  { %5497 = vmatpush1.bf16.msra.mxu0 %v13487_v7  ;;  %5541 = vmatprep.subr.bf16.mxu1 %v13498_v10  ;;  %v13571_v7 = vld [vmem:[#allocation5 + $0xf38] ss:$72 sps:$4 sm:$0xff]   ;;  %v13582_v10 = vld [vmem:[#allocation5 + $0x6d4] ss:$72 sps:$4 sm:$0xff]  }
  0xd3   :  { %5498 = vmatprep.subr.bf16.mxu0 %v13495_v9  ;;  %v13579_v9 = vld [vmem:[#allocation5 + $0xfcc] ss:$72 sps:$4 sm:$0xff]  }
  0xd5   :  { %5542 = vmatpush1.bf16.msra.mxu1 %v13496_v13  ;;  %v13580_v13 = vld [vmem:[#allocation5 + $0x6d0] ss:$72 sps:$4 sm:$0xff]  }
  0xd6   :  { %5499 = vmatpush1.bf16.msra.mxu0 %v13493_v11  ;;  %5543 = vmatprep.subr.bf16.mxu1 %v13504_v16  ;;  %v13577_v11 = vld [vmem:[#allocation5 + $0xfc8] ss:$72 sps:$4 sm:$0xff]   ;;  %v13588_v16 = vld [vmem:[#allocation5 + $0x764] ss:$72 sps:$4 sm:$0xff]  }
  0xd7   :  { %5500 = vmatprep.subr.bf16.mxu0 %v13501_v14  ;;  %v13585_v14 = vld [vmem:[#allocation5 + $0x105c] ss:$72 sps:$4 sm:$0xff]  }
  0xd9   :  { %5544 = vmatpush1.bf16.msra.mxu1 %v13502_v18  ;;  %v13586_v18 = vld [vmem:[#allocation5 + $0x760] ss:$72 sps:$4 sm:$0xff]  }
  0xda   :  { %5501 = vmatpush1.bf16.msra.mxu0 %v13499_v17  ;;  %5556 = vmatprep.subr.bf16.mxu1 %v13507_v21  ;;  %v13583_v17 = vld [vmem:[#allocation5 + $0x1058] ss:$72 sps:$4 sm:$0xff]   ;;  %v13589_v21 = vld [vmem:[#allocation5 + $0x10e8] ss:$72 sps:$4 sm:$0xff]  }
  0xdb   :  { %5642 = vmatprep.subr.bf16.mxu0 %v13510_v22  ;;  %v13592_v22 = vld [vmem:[#allocation5 + $0x7f0] ss:$72 sps:$4 sm:$0xff]  }
  0xdc   :  { %5546 = vmatmul.mubr.bf16.vlgmr.msra.gmra.mrb[4].mxu1 %v15394_v12 }
  0xdd   :  { %5503 = vmatmul.mubr.bf16.vlgmr.msra.gmra.mrb[0].mxu0 %v15404_v23  ;;  %5557 = vmatpush1.bf16.msra.mxu1 %v13505_v24  ;;  %v13597_v24 = vld [vmem:[#allocation5 + $0x117c] ss:$72 sps:$4 sm:$0xff]  }
  0xde   :  { %5643 = vmatpush1.bf16.msra.mxu0 %v13508_v25  ;;  %5558 = vmatprep.subr.bf16.mxu1 %v13513_v26  ;;  %v13600_v25 = vld [vmem:[#allocation5 + $0x884] ss:$72 sps:$4 sm:$0xff]   ;;  %v13595_v26 = vld [vmem:[#allocation5 + $0x1178] ss:$72 sps:$4 sm:$0xff]  }
  0xdf   :  { %5644 = vmatprep.subr.bf16.mxu0 %v13516_v27  ;;  %5588 = vmatprep.mubr.bf16.mxu1 %v15390_v55  ;;  %v13598_v27 = vld [vmem:[#allocation5 + $0x880] ss:$72 sps:$4 sm:$0xff]  }
  0xe0   :  { %5674 = vmatprep.mubr.bf16.mxu0 %v15388_v50 }
  0xe1   :  { %5559 = vmatpush1.bf16.msra.mxu1 %v13511_v28  ;;  %v13603_v28 = vld [vmem:[#allocation5 + $0x120c] ss:$72 sps:$4 sm:$0xff]  }
  0xe2   :  { %5645 = vmatpush1.bf16.msra.mxu0 %v13514_v29  ;;  %5560 = vmatprep.subr.bf16.mxu1 %v13519_v30  ;;  %v13606_v29 = vld [vmem:[#allocation5 + $0x914] ss:$72 sps:$4 sm:$0xff]   ;;  %v13601_v30 = vld [vmem:[#allocation5 + $0x1208] ss:$72 sps:$4 sm:$0xff]  }
  0xe3   :  { %5646 = vmatprep.subr.bf16.mxu0 %v13522_v31  ;;  %v13604_v31 = vld [vmem:[#allocation5 + $0x910] ss:$72 sps:$4 sm:$0xff]  }
  0xe5   :  { %5561 = vmatpush1.bf16.msra.mxu1 %v13517_v32  ;;  %v13609_v32 = vld [vmem:[#allocation5 + $0x129c] ss:$72 sps:$4 sm:$0xff]  }
  0xe6   :  { %5647 = vmatpush1.bf16.msra.mxu0 %v13520_v33  ;;  %5562 = vmatprep.subr.bf16.mxu1 %v13525_v34  ;;  %v13612_v33 = vld [vmem:[#allocation5 + $0x9a4] ss:$72 sps:$4 sm:$0xff]   ;;  %v13607_v34 = vld [vmem:[#allocation5 + $0x1298] ss:$72 sps:$4 sm:$0xff]  }
  0xe7   :  { %5648 = vmatprep.subr.bf16.mxu0 %v13528_v35  ;;  %v13610_v35 = vld [vmem:[#allocation5 + $0x9a0] ss:$72 sps:$4 sm:$0xff]  }
  0xe9   :  { %5563 = vmatpush1.bf16.msra.mxu1 %v13523_v36  ;;  %v13615_v36 = vld [vmem:[#allocation5 + $0x132c] ss:$72 sps:$4 sm:$0xff]  }
  0xea   :  { %5649 = vmatpush1.bf16.msra.mxu0 %v13526_v37  ;;  %5564 = vmatprep.subr.bf16.mxu1 %v13531_v38  ;;  %v13618_v37 = vld [vmem:[#allocation5 + $0xa34] ss:$72 sps:$4 sm:$0xff]   ;;  %v13613_v38 = vld [vmem:[#allocation5 + $0x1328] ss:$72 sps:$4 sm:$0xff]  }
  0xeb   :  { %5650 = vmatprep.subr.bf16.mxu0 %v13534_v39  ;;  %v13616_v39 = vld [vmem:[#allocation5 + $0xa30] ss:$72 sps:$4 sm:$0xff]  }
  0xed   :  { %5565 = vmatpush1.bf16.msra.mxu1 %v13529_v40  ;;  %v13621_v40 = vld [vmem:[#allocation5 + $0x13bc] ss:$72 sps:$4 sm:$0xff]  }
  0xee   :  { %5651 = vmatpush1.bf16.msra.mxu0 %v13532_v41  ;;  %5566 = vmatprep.subr.bf16.mxu1 %v13537_v42  ;;  %v13624_v41 = vld [vmem:[#allocation5 + $0xac4] ss:$72 sps:$4 sm:$0xff]   ;;  %v13619_v42 = vld [vmem:[#allocation5 + $0x13b8] ss:$72 sps:$4 sm:$0xff]  }
  0xef   :  { %5652 = vmatprep.subr.bf16.mxu0 %v13540_v43  ;;  %v13622_v43 = vld [vmem:[#allocation5 + $0xac0] ss:$72 sps:$4 sm:$0xff]  }
  0xf1   :  { %5567 = vmatpush1.bf16.msra.mxu1 %v13535_v45  ;;  %v13627_v45 = vld [vmem:[#allocation5 + $0x144c] ss:$72 sps:$4 sm:$0xff]  }
  0xf2   :  { %5653 = vmatpush1.bf16.msra.mxu0 %v13538_v46  ;;  %5568 = vmatprep.subr.bf16.mxu1 %v13543_v47  ;;  %v13630_v46 = vld [vmem:[#allocation5 + $0xb54] ss:$72 sps:$4 sm:$0xff]   ;;  %v13625_v47 = vld [vmem:[#allocation5 + $0x1448] ss:$72 sps:$4 sm:$0xff]  }
  0xf3   :  { %5654 = vmatprep.subr.bf16.mxu0 %v13546_v48  ;;  %v13628_v48 = vld [vmem:[#allocation5 + $0xb50] ss:$72 sps:$4 sm:$0xff]  }
  0xf5   :  { %5569 = vmatpush1.bf16.msra.mxu1 %v13541_v49  ;;  %v13633_v49 = vld [vmem:[#allocation5 + $0x14dc] ss:$72 sps:$4 sm:$0xff]  }
  0xf6   :  { %5655 = vmatpush1.bf16.msra.mxu0 %v13544_v51  ;;  %5570 = vmatprep.subr.bf16.mxu1 %v13549_v52  ;;  %v13636_v51 = vld [vmem:[#allocation5 + $0xbe4] ss:$72 sps:$4 sm:$0xff]   ;;  %v13631_v52 = vld [vmem:[#allocation5 + $0x14d8] ss:$72 sps:$4 sm:$0xff]  }
  0xf7   :  { %5656 = vmatprep.subr.bf16.mxu0 %v13552_v53  ;;  %v13634_v53 = vld [vmem:[#allocation5 + $0xbe0] ss:$72 sps:$4 sm:$0xff]  }
  0xf9   :  { %5571 = vmatpush1.bf16.msra.mxu1 %v13547_v54  ;;  %v13639_v54 = vld [vmem:[#allocation5 + $0x156c] ss:$72 sps:$4 sm:$0xff]  }
  0xfa   :  { %5657 = vmatpush1.bf16.msra.mxu0 %v13550_v56  ;;  %5572 = vmatprep.subr.bf16.mxu1 %v13555_v57  ;;  %v13642_v56 = vld [vmem:[#allocation5 + $0xc74] ss:$72 sps:$4 sm:$0xff]   ;;  %v13637_v57 = vld [vmem:[#allocation5 + $0x1568] ss:$72 sps:$4 sm:$0xff]  }
  0xfb   :  { %5658 = vmatprep.subr.bf16.mxu0 %v13558_v58  ;;  %v13640_v58 = vld [vmem:[#allocation5 + $0xc70] ss:$72 sps:$4 sm:$0xff]  }
  0xfd   :  { %5573 = vmatpush1.bf16.msra.mxu1 %v13553_v59  ;;  %v13645_v59 = vld [vmem:[#allocation5 + $0x15fc] ss:$72 sps:$4 sm:$0xff]  }
  0xfe   :  { %5659 = vmatpush1.bf16.msra.mxu0 %v13556_v60  ;;  %5574 = vmatprep.subr.bf16.mxu1 %v13561_v61  ;;  %v13648_v60 = vld [vmem:[#allocation5 + $0xd04] ss:$72 sps:$4 sm:$0xff]   ;;  %v13643_v61 = vld [vmem:[#allocation5 + $0x15f8] ss:$72 sps:$4 sm:$0xff]  }
  0xff   :  { %5660 = vmatprep.subr.bf16.mxu0 %v13564_v62  ;;  %v13646_v62 = vld [vmem:[#allocation5 + $0xd00] ss:$72 sps:$4 sm:$0xff]  }
 0x101   :  { %5575 = vmatpush1.bf16.msra.mxu1 %v13559_v63  ;;  %v13651_v63 = vld [vmem:[#allocation5 + $0x168c] ss:$72 sps:$4 sm:$0xff]  }
 0x102   :  { %5661 = vmatpush1.bf16.msra.mxu0 %v13562_v0  ;;  %5576 = vmatprep.subr.bf16.mxu1 %v13567_v1  ;;  %v13654_v0 = vld [vmem:[#allocation5 + $0xd94] ss:$72 sps:$4 sm:$0xff]   ;;  %v13649_v1 = vld [vmem:[#allocation5 + $0x1688] ss:$72 sps:$4 sm:$0xff]  }
 0x103   :  { %5662 = vmatprep.subr.bf16.mxu0 %v13570_v2  ;;  %v13652_v2 = vld [vmem:[#allocation5 + $0xd90] ss:$72 sps:$4 sm:$0xff]  }
 0x105   :  { %5577 = vmatpush1.bf16.msra.mxu1 %v13565_v3  ;;  %v13657_v3 = vld [vmem:[#allocation5 + $0x171c] ss:$72 sps:$4 sm:$0xff]  }
 0x106   :  { %5663 = vmatpush1.bf16.msra.mxu0 %v13568_v4  ;;  %5578 = vmatprep.subr.bf16.mxu1 %v13573_v5  ;;  %v13660_v4 = vld [vmem:[#allocation5 + $0xe24] ss:$72 sps:$4 sm:$0xff]   ;;  %v13655_v5 = vld [vmem:[#allocation5 + $0x1718] ss:$72 sps:$4 sm:$0xff]  }
 0x107   :  { %5664 = vmatprep.subr.bf16.mxu0 %v13576_v6  ;;  %v13658_v6 = vld [vmem:[#allocation5 + $0xe20] ss:$72 sps:$4 sm:$0xff]  }
 0x109   :  { %5579 = vmatpush1.bf16.msra.mxu1 %v13571_v7  ;;  %v13663_v7 = vld [vmem:[#allocation5 + $0x17ac] ss:$72 sps:$4 sm:$0xff]  }
 0x10a   :  { %5665 = vmatpush1.bf16.msra.mxu0 %v13574_v8  ;;  %5580 = vmatprep.subr.bf16.mxu1 %v13579_v9  ;;  %v13666_v8 = vld [vmem:[#allocation5 + $0xeb4] ss:$72 sps:$4 sm:$0xff]   ;;  %v13661_v9 = vld [vmem:[#allocation5 + $0x17a8] ss:$72 sps:$4 sm:$0xff]  }
 0x10b   :  { %5666 = vmatprep.subr.bf16.mxu0 %v13582_v10  ;;  %v13664_v10 = vld [vmem:[#allocation5 + $0xeb0] ss:$72 sps:$4 sm:$0xff]  }
 0x10d   :  { %5581 = vmatpush1.bf16.msra.mxu1 %v13577_v11  ;;  %v13669_v11 = vld [vmem:[#allocation5 + $0x183c] ss:$72 sps:$4 sm:$0xff]  }
 0x10e   :  { %5667 = vmatpush1.bf16.msra.mxu0 %v13580_v13  ;;  %5582 = vmatprep.subr.bf16.mxu1 %v13585_v14  ;;  %v13672_v13 = vld [vmem:[#allocation5 + $0xf44] ss:$72 sps:$4 sm:$0xff]   ;;  %v13667_v14 = vld [vmem:[#allocation5 + $0x1838] ss:$72 sps:$4 sm:$0xff]  }
 0x10f   :  { %5668 = vmatprep.subr.bf16.mxu0 %v13588_v16  ;;  %v13670_v16 = vld [vmem:[#allocation5 + $0xf40] ss:$72 sps:$4 sm:$0xff]  }
 0x111   :  { %5583 = vmatpush1.bf16.msra.mxu1 %v13583_v17  ;;  %v13675_v17 = vld [vmem:[#allocation5 + $0x18cc] ss:$72 sps:$4 sm:$0xff]  }
 0x112   :  { %5669 = vmatpush1.bf16.msra.mxu0 %v13586_v18  ;;  %5584 = vmatprep.subr.bf16.mxu1 %v13591_v19  ;;  %v13678_v18 = vld [vmem:[#allocation5 + $0xfd4] ss:$72 sps:$4 sm:$0xff]   ;;  %v13673_v19 = vld [vmem:[#allocation5 + $0x18c8] ss:$72 sps:$4 sm:$0xff]  }
 0x113   :  { %5670 = vmatprep.subr.bf16.mxu0 %v13594_v20  ;;  %v13676_v20 = vld [vmem:[#allocation5 + $0xfd0] ss:$72 sps:$4 sm:$0xff]  }
 0x115   :  { %5585 = vmatpush1.bf16.msra.mxu1 %v13589_v21  ;;  %v13681_v21 = vld [vmem:[#allocation5 + $0x195c] ss:$72 sps:$4 sm:$0xff]  }
 0x116   :  { %5671 = vmatpush1.bf16.msra.mxu0 %v13592_v22  ;;  %5586 = vmatprep.subr.bf16.mxu1 %v13597_v24  ;;  %v13684_v22 = vld [vmem:[#allocation5 + $0x1064] ss:$72 sps:$4 sm:$0xff]   ;;  %v13679_v24 = vld [vmem:[#allocation5 + $0x1958] ss:$72 sps:$4 sm:$0xff]  }
 0x117   :  { %5672 = vmatprep.subr.bf16.mxu0 %v13600_v25  ;;  %v13682_v25 = vld [vmem:[#allocation5 + $0x1060] ss:$72 sps:$4 sm:$0xff]  }
 0x119   :  { %5587 = vmatpush1.bf16.msra.mxu1 %v13595_v26  ;;  %v13687_v26 = vld [vmem:[#allocation5 + $0x19ec] ss:$72 sps:$4 sm:$0xff]  }
 0x11a   :  { %5673 = vmatpush1.bf16.msra.mxu0 %v13598_v27  ;;  %5599 = vmatprep.subr.bf16.mxu1 %v13603_v28  ;;  %v13690_v27 = vld [vmem:[#allocation5 + $0x10f4] ss:$72 sps:$4 sm:$0xff]   ;;  %v13685_v28 = vld [vmem:[#allocation5 + $0x19e8] ss:$72 sps:$4 sm:$0xff]  }
 0x11b   :  { %5685 = vmatprep.subr.bf16.mxu0 %v13606_v29  ;;  %v13688_v29 = vld [vmem:[#allocation5 + $0x10f0] ss:$72 sps:$4 sm:$0xff]  }
 0x11c   :  { %5589 = vmatmul.mubr.bf16.vlgmr.msra.gmra.mrb[4].mxu1 %v15396_v15 }
 0x11d   :  { %5675 = vmatmul.mubr.bf16.vlgmr.msra.gmra.mrb[4].mxu0 %v15394_v12  ;;  %5600 = vmatpush1.bf16.msra.mxu1 %v13601_v30  ;;  %v13693_v30 = vld [vmem:[#allocation5 + $0x1a7c] ss:$72 sps:$4 sm:$0xff]  }
 0x11e   :  { %5686 = vmatpush1.bf16.msra.mxu0 %v13604_v31  ;;  %5601 = vmatprep.subr.bf16.mxu1 %v13609_v32  ;;  %v13696_v31 = vld [vmem:[#allocation5 + $0x1184] ss:$72 sps:$4 sm:$0xff]   ;;  %v13691_v32 = vld [vmem:[#allocation5 + $0x1a78] ss:$72 sps:$4 sm:$0xff]  }
 0x11f   :  { %5687 = vmatprep.subr.bf16.mxu0 %v13612_v33  ;;  %5631 = vmatprep.mubr.bf16.mxu1 %v15401_v44  ;;  %v13694_v33 = vld [vmem:[#allocation5 + $0x1180] ss:$72 sps:$4 sm:$0xff]  }
 0x120   :  { %5717 = vmatprep.mubr.bf16.mxu0 %v15390_v55 }
 0x121   :  { %5602 = vmatpush1.bf16.msra.mxu1 %v13607_v34  ;;  %v13699_v34 = vld [vmem:[#allocation5 + $0x1214] ss:$72 sps:$4 sm:$0xff]  }
 0x122   :  { %5688 = vmatpush1.bf16.msra.mxu0 %v13610_v35  ;;  %5603 = vmatprep.subr.bf16.mxu1 %v13615_v36  ;;  %v13702_v35 = vld [vmem:[#allocation5 + $0x1c] ss:$72 sps:$4 sm:$0xff]   ;;  %v13697_v36 = vld [vmem:[#allocation5 + $0x1210] ss:$72 sps:$4 sm:$0xff]  }
 0x123   :  { %5689 = vmatprep.subr.bf16.mxu0 %v13618_v37  ;;  %v13700_v37 = vld [vmem:[#allocation5 + $0x18] ss:$72 sps:$4 sm:$0xff]  }
 0x125   :  { %5604 = vmatpush1.bf16.msra.mxu1 %v13613_v38  ;;  %v13705_v38 = vld [vmem:[#allocation5 + $0x12a4] ss:$72 sps:$4 sm:$0xff]  }
 0x126   :  { %5690 = vmatpush1.bf16.msra.mxu0 %v13616_v39  ;;  %5605 = vmatprep.subr.bf16.mxu1 %v13621_v40  ;;  %v13708_v39 = vld [vmem:[#allocation5 + $0xac] ss:$72 sps:$4 sm:$0xff]   ;;  %v13703_v40 = vld [vmem:[#allocation5 + $0x12a0] ss:$72 sps:$4 sm:$0xff]  }
 0x127   :  { %5691 = vmatprep.subr.bf16.mxu0 %v13624_v41  ;;  %v13706_v41 = vld [vmem:[#allocation5 + $0xa8] ss:$72 sps:$4 sm:$0xff]  }
 0x129   :  { %5606 = vmatpush1.bf16.msra.mxu1 %v13619_v42  ;;  %v13711_v42 = vld [vmem:[#allocation5 + $0x1334] ss:$72 sps:$4 sm:$0xff]  }
 0x12a   :  { %5692 = vmatpush1.bf16.msra.mxu0 %v13622_v43  ;;  %5607 = vmatprep.subr.bf16.mxu1 %v13627_v45  ;;  %v13714_v43 = vld [vmem:[#allocation5 + $0x13c] ss:$72 sps:$4 sm:$0xff]   ;;  %v13709_v45 = vld [vmem:[#allocation5 + $0x1330] ss:$72 sps:$4 sm:$0xff]  }
 0x12b   :  { %5693 = vmatprep.subr.bf16.mxu0 %v13630_v46  ;;  %v13712_v46 = vld [vmem:[#allocation5 + $0x138] ss:$72 sps:$4 sm:$0xff]  }
 0x12d   :  { %5608 = vmatpush1.bf16.msra.mxu1 %v13625_v47  ;;  %v13717_v47 = vld [vmem:[#allocation5 + $0x13c4] ss:$72 sps:$4 sm:$0xff]  }
 0x12e   :  { %5694 = vmatpush1.bf16.msra.mxu0 %v13628_v48  ;;  %5609 = vmatprep.subr.bf16.mxu1 %v13633_v49  ;;  %v13720_v48 = vld [vmem:[#allocation5 + $0x1cc] ss:$72 sps:$4 sm:$0xff]   ;;  %v13715_v49 = vld [vmem:[#allocation5 + $0x13c0] ss:$72 sps:$4 sm:$0xff]  }
 0x12f   :  { %5695 = vmatprep.subr.bf16.mxu0 %v13636_v51  ;;  %v13718_v51 = vld [vmem:[#allocation5 + $0x1c8] ss:$72 sps:$4 sm:$0xff]  }
 0x131   :  { %5610 = vmatpush1.bf16.msra.mxu1 %v13631_v52  ;;  %v13723_v52 = vld [vmem:[#allocation5 + $0x1454] ss:$72 sps:$4 sm:$0xff]  }
 0x132   :  { %5696 = vmatpush1.bf16.msra.mxu0 %v13634_v53  ;;  %5611 = vmatprep.subr.bf16.mxu1 %v13639_v54  ;;  %v13726_v53 = vld [vmem:[#allocation5 + $0x25c] ss:$72 sps:$4 sm:$0xff]   ;;  %v13721_v54 = vld [vmem:[#allocation5 + $0x1450] ss:$72 sps:$4 sm:$0xff]  }
 0x133   :  { %5697 = vmatprep.subr.bf16.mxu0 %v13642_v56  ;;  %v13724_v56 = vld [vmem:[#allocation5 + $0x258] ss:$72 sps:$4 sm:$0xff]  }
 0x135   :  { %5612 = vmatpush1.bf16.msra.mxu1 %v13637_v57  ;;  %v13729_v57 = vld [vmem:[#allocation5 + $0x14e4] ss:$72 sps:$4 sm:$0xff]  }
 0x136   :  { %5698 = vmatpush1.bf16.msra.mxu0 %v13640_v58  ;;  %5613 = vmatprep.subr.bf16.mxu1 %v13645_v59  ;;  %v13732_v58 = vld [vmem:[#allocation5 + $0x2ec] ss:$72 sps:$4 sm:$0xff]   ;;  %v13727_v59 = vld [vmem:[#allocation5 + $0x14e0] ss:$72 sps:$4 sm:$0xff]  }
 0x137   :  { %5699 = vmatprep.subr.bf16.mxu0 %v13648_v60  ;;  %v13730_v60 = vld [vmem:[#allocation5 + $0x2e8] ss:$72 sps:$4 sm:$0xff]  }
 0x139   :  { %5614 = vmatpush1.bf16.msra.mxu1 %v13643_v61  ;;  %v13735_v61 = vld [vmem:[#allocation5 + $0x1574] ss:$72 sps:$4 sm:$0xff]  }
 0x13a   :  { %5700 = vmatpush1.bf16.msra.mxu0 %v13646_v62  ;;  %5615 = vmatprep.subr.bf16.mxu1 %v13651_v63  ;;  %v13738_v62 = vld [vmem:[#allocation5 + $0x37c] ss:$72 sps:$4 sm:$0xff]  }
 0x13b   :  { %5701 = vmatprep.subr.bf16.mxu0 %v13654_v0 }
 0x13d   :  { %5616 = vmatpush1.bf16.msra.mxu1 %v13649_v1 }
 0x13e   :  { %5702 = vmatpush1.bf16.msra.mxu0 %v13652_v2  ;;  %5617 = vmatprep.subr.bf16.mxu1 %v13657_v3  ;;  %v13733_v2 = vld [vmem:[#allocation5 + $0x1570] ss:$72 sps:$4 sm:$0xff]  }
 0x13f   :  { %5703 = vmatprep.subr.bf16.mxu0 %v13660_v4  ;;  %v13736_v3 = vld [vmem:[#allocation5 + $0x378] ss:$72 sps:$4 sm:$0xff]  }
 0x141   :  { %5618 = vmatpush1.bf16.msra.mxu1 %v13655_v5  ;;  %v13741_v5 = vld [vmem:[#allocation5 + $0x1604] ss:$72 sps:$4 sm:$0xff]  }
 0x142   :  { %5704 = vmatpush1.bf16.msra.mxu0 %v13658_v6  ;;  %5619 = vmatprep.subr.bf16.mxu1 %v13663_v7  ;;  %v13744_v6 = vld [vmem:[#allocation5 + $0x40c] ss:$72 sps:$4 sm:$0xff]   ;;  %v13739_v7 = vld [vmem:[#allocation5 + $0x1600] ss:$72 sps:$4 sm:$0xff]  }
 0x143   :  { %5705 = vmatprep.subr.bf16.mxu0 %v13666_v8  ;;  %v13742_v8 = vld [vmem:[#allocation5 + $0x408] ss:$72 sps:$4 sm:$0xff]  }
 0x145   :  { %5620 = vmatpush1.bf16.msra.mxu1 %v13661_v9  ;;  %v13747_v9 = vld [vmem:[#allocation5 + $0x1694] ss:$72 sps:$4 sm:$0xff]  }
 0x146   :  { %5706 = vmatpush1.bf16.msra.mxu0 %v13664_v10  ;;  %5621 = vmatprep.subr.bf16.mxu1 %v13669_v11  ;;  %v13750_v10 = vld [vmem:[#allocation5 + $0x49c] ss:$72 sps:$4 sm:$0xff]   ;;  %v13745_v11 = vld [vmem:[#allocation5 + $0x1690] ss:$72 sps:$4 sm:$0xff]  }
 0x147   :  { %5707 = vmatprep.subr.bf16.mxu0 %v13672_v13  ;;  %v13748_v13 = vld [vmem:[#allocation5 + $0x498] ss:$72 sps:$4 sm:$0xff]  }
 0x149   :  { %5622 = vmatpush1.bf16.msra.mxu1 %v13667_v14  ;;  %v13753_v14 = vld [vmem:[#allocation5 + $0x1724] ss:$72 sps:$4 sm:$0xff]  }
 0x14a   :  { %5708 = vmatpush1.bf16.msra.mxu0 %v13670_v16  ;;  %5623 = vmatprep.subr.bf16.mxu1 %v13675_v17  ;;  %v13756_v16 = vld [vmem:[#allocation5 + $0x52c] ss:$72 sps:$4 sm:$0xff]   ;;  %v13751_v17 = vld [vmem:[#allocation5 + $0x1720] ss:$72 sps:$4 sm:$0xff]  }
 0x14b   :  { %5709 = vmatprep.subr.bf16.mxu0 %v13678_v18  ;;  %v13754_v18 = vld [vmem:[#allocation5 + $0x528] ss:$72 sps:$4 sm:$0xff]  }
 0x14d   :  { %5624 = vmatpush1.bf16.msra.mxu1 %v13673_v19  ;;  %v13759_v19 = vld [vmem:[#allocation5 + $0x17b4] ss:$72 sps:$4 sm:$0xff]  }
 0x14e   :  { %5710 = vmatpush1.bf16.msra.mxu0 %v13676_v20  ;;  %5625 = vmatprep.subr.bf16.mxu1 %v13681_v21  ;;  %v13762_v20 = vld [vmem:[#allocation5 + $0x5bc] ss:$72 sps:$4 sm:$0xff]   ;;  %v13757_v21 = vld [vmem:[#allocation5 + $0x17b0] ss:$72 sps:$4 sm:$0xff]  }
 0x14f   :  { %5711 = vmatprep.subr.bf16.mxu0 %v13684_v22  ;;  %v13760_v22 = vld [vmem:[#allocation5 + $0x5b8] ss:$72 sps:$4 sm:$0xff]  }
 0x151   :  { %5626 = vmatpush1.bf16.msra.mxu1 %v13679_v24  ;;  %v13765_v24 = vld [vmem:[#allocation5 + $0x1844] ss:$72 sps:$4 sm:$0xff]  }
 0x152   :  { %5712 = vmatpush1.bf16.msra.mxu0 %v13682_v25  ;;  %5627 = vmatprep.subr.bf16.mxu1 %v13687_v26  ;;  %v13768_v25 = vld [vmem:[#allocation5 + $0x64c] ss:$72 sps:$4 sm:$0xff]   ;;  %v13763_v26 = vld [vmem:[#allocation5 + $0x1840] ss:$72 sps:$4 sm:$0xff]  }
 0x153   :  { %5713 = vmatprep.subr.bf16.mxu0 %v13690_v27  ;;  %v13766_v27 = vld [vmem:[#allocation5 + $0x648] ss:$72 sps:$4 sm:$0xff]  }
 0x155   :  { %5628 = vmatpush1.bf16.msra.mxu1 %v13685_v28  ;;  %v13771_v28 = vld [vmem:[#allocation5 + $0x18d4] ss:$72 sps:$4 sm:$0xff]  }
 0x156   :  { %5714 = vmatpush1.bf16.msra.mxu0 %v13688_v29  ;;  %5629 = vmatprep.subr.bf16.mxu1 %v13693_v30  ;;  %v13774_v29 = vld [vmem:[#allocation5 + $0x6dc] ss:$72 sps:$4 sm:$0xff]   ;;  %v13769_v30 = vld [vmem:[#allocation5 + $0x18d0] ss:$72 sps:$4 sm:$0xff]  }
 0x157   :  { %5715 = vmatprep.subr.bf16.mxu0 %v13696_v31  ;;  %v13772_v31 = vld [vmem:[#allocation5 + $0x6d8] ss:$72 sps:$4 sm:$0xff]  }
 0x159   :  { %5630 = vmatpush1.bf16.msra.mxu1 %v13691_v32  ;;  %v13777_v32 = vld [vmem:[#allocation5 + $0x1964] ss:$72 sps:$4 sm:$0xff]  }
 0x15a   :  { %5716 = vmatpush1.bf16.msra.mxu0 %v13694_v33  ;;  %5771 = vmatprep.subr.bf16.mxu1 %v13702_v35  ;;  %v13780_v33 = vld [vmem:[#allocation5 + $0x76c] ss:$72 sps:$4 sm:$0xff]   ;;  %v13778_v35 = vld [vmem:[#allocation5 + $0x768] ss:$72 sps:$4 sm:$0xff]  }
 0x15b   :  { %5728 = vmatprep.subr.bf16.mxu0 %v13699_v34  ;;  %v13775_v34 = vld [vmem:[#allocation5 + $0x1960] ss:$72 sps:$4 sm:$0xff]  }
 0x15c   :  { %5632 = vmatmul.mubr.bf16.vlgmr.msra.gmra.mrb[4].mxu1 %v15404_v23 }
 0x15d   :  { %5718 = vmatmul.mubr.bf16.vlgmr.msra.gmra.mrb[4].mxu0 %v15396_v15  ;;  %5772 = vmatpush1.bf16.msra.mxu1 %v13700_v37  ;;  %v13786_v37 = vld [vmem:[#allocation5 + $0x7fc] ss:$72 sps:$4 sm:$0xff]  }
 0x15e   :  { %5729 = vmatpush1.bf16.msra.mxu0 %v13697_v36  ;;  %5773 = vmatprep.subr.bf16.mxu1 %v13708_v39  ;;  %v13783_v36 = vld [vmem:[#allocation5 + $0x19f4] ss:$72 sps:$4 sm:$0xff]   ;;  %v13784_v39 = vld [vmem:[#allocation5 + $0x7f8] ss:$72 sps:$4 sm:$0xff]  }
 0x15f   :  { %5730 = vmatprep.subr.bf16.mxu0 %v13705_v38  ;;  %5760 = vmatprep.mubr.bf16.mxu0 %v15401_v44  ;;  %v13781_v38 = vld [vmem:[#allocation5 + $0x19f0] ss:$72 sps:$4 sm:$0xff]  }
 0x160   :  { %5803 = vmatprep.mubr.bf16.mxu1 %v15388_v50 }
 0x161   :  { %5774 = vmatpush1.bf16.msra.mxu1 %v13706_v41  ;;  %v13792_v41 = vld [vmem:[#allocation5 + $0x88c] ss:$72 sps:$4 sm:$0xff]  }
 0x162   :  { %5731 = vmatpush1.bf16.msra.mxu0 %v13703_v40  ;;  %5775 = vmatprep.subr.bf16.mxu1 %v13714_v43  ;;  %v13789_v40 = vld [vmem:[#allocation5 + $0x1a84] ss:$72 sps:$4 sm:$0xff]   ;;  %v13790_v43 = vld [vmem:[#allocation5 + $0x888] ss:$72 sps:$4 sm:$0xff]  }
 0x163   :  { %5732 = vmatprep.subr.bf16.mxu0 %v13711_v42  ;;  %v13787_v42 = vld [vmem:[#allocation5 + $0x1a80] ss:$72 sps:$4 sm:$0xff]  }
 0x165   :  { %5776 = vmatpush1.bf16.msra.mxu1 %v13712_v46  ;;  %v13798_v46 = vld [vmem:[#allocation5 + $0x24] ss:$72 sps:$4 sm:$0xff]  }
 0x166   :  { %5733 = vmatpush1.bf16.msra.mxu0 %v13709_v45  ;;  %5777 = vmatprep.subr.bf16.mxu1 %v13720_v48  ;;  %v13795_v45 = vld [vmem:[#allocation5 + $0x91c] ss:$72 sps:$4 sm:$0xff]   ;;  %v13796_v48 = vld [vmem:[#allocation5 + $0x20] ss:$72 sps:$4 sm:$0xff]  }
 0x167   :  { %5734 = vmatprep.subr.bf16.mxu0 %v13717_v47  ;;  %v13793_v47 = vld [vmem:[#allocation5 + $0x918] ss:$72 sps:$4 sm:$0xff]  }
 0x169   :  { %5778 = vmatpush1.bf16.msra.mxu1 %v13718_v51  ;;  %v13804_v51 = vld [vmem:[#allocation5 + $0xb4] ss:$72 sps:$4 sm:$0xff]  }
 0x16a   :  { %5735 = vmatpush1.bf16.msra.mxu0 %v13715_v49  ;;  %5779 = vmatprep.subr.bf16.mxu1 %v13726_v53  ;;  %v13801_v49 = vld [vmem:[#allocation5 + $0x9ac] ss:$72 sps:$4 sm:$0xff]   ;;  %v13802_v53 = vld [vmem:[#allocation5 + $0xb0] ss:$72 sps:$4 sm:$0xff]  }
 0x16b   :  { %5736 = vmatprep.subr.bf16.mxu0 %v13723_v52  ;;  %v13799_v52 = vld [vmem:[#allocation5 + $0x9a8] ss:$72 sps:$4 sm:$0xff]  }
 0x16d   :  { %5780 = vmatpush1.bf16.msra.mxu1 %v13724_v56  ;;  %v13807_v56 = vld [vmem:[#allocation5 + $0xa3c] ss:$72 sps:$4 sm:$0xff]  }
 0x16e   :  { %5737 = vmatpush1.bf16.msra.mxu0 %v13721_v54  ;;  %5781 = vmatprep.subr.bf16.mxu1 %v13732_v58  ;;  %v974_v54 = vlaneseq  ;;  %v13805_v58 = vld [vmem:[#allocation5 + $0xa38] ss:$72 sps:$4 sm:$0xff]  }
 0x16f   :  { %5738 = vmatprep.subr.bf16.mxu0 %v13729_v57  ;;  %v15418_v63 = vpop.f32.mrb[0].mxu1  ;;  %v13810_v57 = vld [vmem:[#allocation5 + $0x144] ss:$72 sps:$4 sm:$0xff]  }
 0x170   :  { %v15420_v0 = vpop.f32.mrb[1].mxu1 }
 0x171   :  { %v15422_v1 = vpop.f32.mrb[2].mxu1  ;;  %5782 = vmatpush1.bf16.msra.mxu1 %v13730_v60  ;;  %v15430_v60 = vshrl.u32 %v974_v54, 7  ;;  %v13862_v54 = vld [vmem:[#allocation5 + $0x650] ss:$72 sps:$4 sm:$0xff]  }
 0x172   :  { %5739 = vmatpush1.bf16.msra.mxu0 %v13727_v59  ;;  %v15424_v4 = vpop.f32.mrb[3].mxu1  ;;  %5783 = vmatprep.subr.bf16.mxu1 %v13738_v62  ;;  %v13808_v59 = vld [vmem:[#allocation5 + $0x140] ss:$72 sps:$4 sm:$0xff]   ;;  %v13816_v62 = vld [vmem:[#allocation5 + $0x1d4] ss:$72 sps:$4 sm:$0xff]  }
 0x173   :  { %5740 = vmatprep.subr.bf16.mxu0 %v13735_v61  ;;  %v13813_v61 = vld [vmem:[#allocation5 + $0xacc] ss:$72 sps:$4 sm:$0xff]  }
 0x175   :  { %5784 = vmatpush1.bf16.msra.mxu1 %v13736_v3  ;;  %v13811_v3 = vld [vmem:[#allocation5 + $0xac8] ss:$72 sps:$4 sm:$0xff]  }
 0x176   :  { %5741 = vmatpush1.bf16.msra.mxu0 %v13733_v2  ;;  %5785 = vmatprep.subr.bf16.mxu1 %v13744_v6  ;;  %v968_v2 = vld [vmem:[#allocation7] sm:$0xff]  ;;  %v15433_v6 = vsub.s32 0, %v15430_v60 }
 0x177   :  { %5742 = vmatprep.subr.bf16.mxu0 %v13741_v5  ;;  %v13814_v5 = vld [vmem:[#allocation5 + $0x1d0] ss:$72 sps:$4 sm:$0xff]  }
 0x179   :  { %5786 = vmatpush1.bf16.msra.mxu1 %v13742_v8  ;;  %v13822_v8 = vld [vmem:[#allocation5 + $0x264] ss:$72 sps:$4 sm:$0xff]  }
 0x17a   :  { %5743 = vmatpush1.bf16.msra.mxu0 %v13739_v7  ;;  %5787 = vmatprep.subr.bf16.mxu1 %v13750_v10  ;;  %v13819_v7 = vld [vmem:[#allocation5 + $0xb5c] ss:$72 sps:$4 sm:$0xff]   ;;  %v13817_v10 = vld [vmem:[#allocation5 + $0xb58] ss:$72 sps:$4 sm:$0xff]  }
 0x17b   :  { %5744 = vmatprep.subr.bf16.mxu0 %v13747_v9  ;;  %v15436_v9 = vsub.s32 1, %v15430_v60 }
 0x17d   :  { %5788 = vmatpush1.bf16.msra.mxu1 %v13748_v13  ;;  %v977_v13 = vrot.slane %v968_v2, %v15433_v6 }
 0x17e   :  { %5745 = vmatpush1.bf16.msra.mxu0 %v13745_v11  ;;  %5789 = vmatprep.subr.bf16.mxu1 %v13756_v16  ;;  %v13820_v11 = vld [vmem:[#allocation5 + $0x260] ss:$72 sps:$4 sm:$0xff]   ;;  %v13828_v16 = vld [vmem:[#allocation5 + $0x2f4] ss:$72 sps:$4 sm:$0xff]  }
 0x17f   :  { %5746 = vmatprep.subr.bf16.mxu0 %v13753_v14  ;;  %v13825_v14 = vld [vmem:[#allocation5 + $0xbec] ss:$72 sps:$4 sm:$0xff]  }
 0x181   :  { %5790 = vmatpush1.bf16.msra.mxu1 %v13754_v18  ;;  %v13823_v18 = vld [vmem:[#allocation5 + $0xbe8] ss:$72 sps:$4 sm:$0xff]  }
 0x182   :  { %5747 = vmatpush1.bf16.msra.mxu0 %v13751_v17  ;;  %5791 = vmatprep.subr.bf16.mxu1 %v13762_v20  ;;  %v981_v17 = vrot.slane %v968_v2, %v15436_v9  ;;  %v5419_v20 = vadd.f32 %v15418_v63, %v977_v13  ;;  %v13871_v2 = vld [vmem:[#allocation5 + $0x1068] ss:$72 sps:$4 sm:$0xff]  }
 0x183   :  { %5748 = vmatprep.subr.bf16.mxu0 %v13759_v19  ;;  %v13826_v19 = vld [vmem:[#allocation5 + $0x2f0] ss:$72 sps:$4 sm:$0xff]  }
 0x185   :  { %5792 = vmatpush1.bf16.msra.mxu1 %v13760_v22  ;;  %v13834_v22 = vld [vmem:[#allocation5 + $0x384] ss:$72 sps:$4 sm:$0xff]  }
 0x186   :  { %5749 = vmatpush1.bf16.msra.mxu0 %v13757_v21  ;;  %5793 = vmatprep.subr.bf16.mxu1 %v13768_v25  ;;  %v13831_v21 = vld [vmem:[#allocation5 + $0xc7c] ss:$72 sps:$4 sm:$0xff]  }
 0x187   :  { %5750 = vmatprep.subr.bf16.mxu0 %v13765_v24  ;;  %v5421_v24 = vadd.f32 %v15420_v0, %v981_v17  ;;  %v13837_v0 = vld [vmem:[#allocation5 + $0xd0c] ss:$72 sps:$4 sm:$0xff]  }
 0x189   :  { %5794 = vmatpush1.bf16.msra.mxu1 %v13766_v27  ;;  %v13832_v27 = vld [vmem:[#allocation5 + $0x380] ss:$72 sps:$4 sm:$0xff]  }
 0x18a   :  { %5751 = vmatpush1.bf16.msra.mxu0 %v13763_v26  ;;  %5795 = vmatprep.subr.bf16.mxu1 %v13774_v29  ;;  %v13829_v26 = vld [vmem:[#allocation5 + $0xc78] ss:$72 sps:$4 sm:$0xff]  }
 0x18b   :  { %5752 = vmatprep.subr.bf16.mxu0 %v13771_v28  ;;  %v5423_v28 = vadd.f32 %v15422_v1, %v977_v13  ;;  %v13835_v1 = vld [vmem:[#allocation5 + $0xd08] ss:$72 sps:$4 sm:$0xff]   ;;  %v13888_v13 = vld [vmem:[#allocation5 + $0x894] ss:$72 sps:$4 sm:$0xff]  }
 0x18d   :  { %5796 = vmatpush1.bf16.msra.mxu1 %v13772_v31  ;;  %v5425_v31 = vadd.f32 %v15424_v4, %v981_v17  ;;  %v13843_v4 = vld [vmem:[#allocation5 + $0xd9c] ss:$72 sps:$4 sm:$0xff]  }
 0x18e   :  { %5753 = vmatpush1.bf16.msra.mxu0 %v13769_v30  ;;  %5797 = vmatprep.subr.bf16.mxu1 %v13780_v33  ;;  %v13891_v17 = vld [vmem:[#allocation5 + $0x121c] ss:$72 sps:$4 sm:$0xff]  }
 0x18f   :  { %5754 = vmatprep.subr.bf16.mxu0 %v13777_v32 }
 0x191   :  { %5798 = vmatpush1.bf16.msra.mxu1 %v13778_v35  ;;  %v13840_v35 = vld [vmem:[#allocation5 + $0x414] ss:$72 sps:$4 sm:$0xff]  }
 0x192   :  { %5755 = vmatpush1.bf16.msra.mxu0 %v13775_v34  ;;  %5799 = vmatprep.subr.bf16.mxu1 %v13786_v37  ;;  %v13838_v37 = vld [vmem:[#allocation5 + $0x410] ss:$72 sps:$4 sm:$0xff]  }
 0x193   :  { %5756 = vmatprep.subr.bf16.mxu0 %v13783_v36 }
 0x195   :  { %5800 = vmatpush1.bf16.msra.mxu1 %v13784_v39  ;;  %v13841_v39 = vld [vmem:[#allocation5 + $0xd98] ss:$72 sps:$4 sm:$0xff]  }
 0x196   :  { %5757 = vmatpush1.bf16.msra.mxu0 %v13781_v38  ;;  %5801 = vmatprep.subr.bf16.mxu1 %v13792_v41  ;;  %v13846_v38 = vld [vmem:[#allocation5 + $0x4a4] ss:$72 sps:$4 sm:$0xff]  }
 0x197   :  { %5758 = vmatprep.subr.bf16.mxu0 %v13789_v40  ;;  %v13844_v40 = vld [vmem:[#allocation5 + $0x4a0] ss:$72 sps:$4 sm:$0xff]   ;;  %v13849_v41 = vld [vmem:[#allocation5 + $0xe2c] ss:$72 sps:$4 sm:$0xff]  }
 0x199   :  { %5802 = vmatpush1.bf16.msra.mxu1 %v13790_v43  ;;  %v13847_v43 = vld [vmem:[#allocation5 + $0xe28] ss:$72 sps:$4 sm:$0xff]  }
 0x19a   :  { %5759 = vmatpush1.bf16.msra.mxu0 %v13787_v42  ;;  %5814 = vmatprep.subr.bf16.mxu1 %v13795_v45  ;;  %v13852_v42 = vld [vmem:[#allocation5 + $0x534] ss:$72 sps:$4 sm:$0xff]   ;;  %v13850_v45 = vld [vmem:[#allocation5 + $0x530] ss:$72 sps:$4 sm:$0xff]  }
 0x19b   :  { %5900 = vmatprep.subr.bf16.mxu0 %v13798_v46  ;;  %v13855_v46 = vld [vmem:[#allocation5 + $0xebc] ss:$72 sps:$4 sm:$0xff]  }
 0x19c   :  { %5804 = vmatmul.mubr.bf16.vlgmr.msra.gmra.mrb[8].mxu1 %v15394_v12 }
 0x19d   :  { %5761 = vmatmul.mubr.bf16.vlgmr.msra.gmra.mrb[4].mxu0 %v15404_v23  ;;  %5815 = vmatpush1.bf16.msra.mxu1 %v13793_v47  ;;  %v13858_v47 = vld [vmem:[#allocation5 + $0x5c4] ss:$72 sps:$4 sm:$0xff]  }
 0x19e   :  { %5901 = vmatpush1.bf16.msra.mxu0 %v13796_v48  ;;  %5816 = vmatprep.subr.bf16.mxu1 %v13801_v49  ;;  %v13853_v48 = vld [vmem:[#allocation5 + $0xeb8] ss:$72 sps:$4 sm:$0xff]  }
 0x19f   :  { %5902 = vmatprep.subr.bf16.mxu0 %v13804_v51  ;;  %5846 = vmatprep.mubr.bf16.mxu1 %v15390_v55  ;;  %v13856_v49 = vld [vmem:[#allocation5 + $0x5c0] ss:$72 sps:$4 sm:$0xff]   ;;  %v13861_v51 = vld [vmem:[#allocation5 + $0xf4c] ss:$72 sps:$4 sm:$0xff]  }
 0x1a0   :  { %5932 = vmatprep.mubr.bf16.mxu0 %v15388_v50 }
 0x1a1   :  { %5817 = vmatpush1.bf16.msra.mxu1 %v13799_v52  ;;  %v13864_v52 = vld [vmem:[#allocation5 + $0x654] ss:$72 sps:$4 sm:$0xff]  }
 0x1a2   :  { %5903 = vmatpush1.bf16.msra.mxu0 %v13802_v53  ;;  %5818 = vmatprep.subr.bf16.mxu1 %v13807_v56  ;;  %v13859_v53 = vld [vmem:[#allocation5 + $0xf48] ss:$72 sps:$4 sm:$0xff]   ;;  %v13867_v56 = vld [vmem:[#allocation5 + $0xfdc] ss:$72 sps:$4 sm:$0xff]  }
 0x1a3   :  { %5904 = vmatprep.subr.bf16.mxu0 %v13810_v57  ;;  %v13870_v57 = vld [vmem:[#allocation5 + $0x6e4] ss:$72 sps:$4 sm:$0xff]  }
 0x1a5   :  { %5819 = vmatpush1.bf16.msra.mxu1 %v13805_v58  ;;  %v13865_v58 = vld [vmem:[#allocation5 + $0xfd8] ss:$72 sps:$4 sm:$0xff]  }
 0x1a6   :  { %5905 = vmatpush1.bf16.msra.mxu0 %v13808_v59  ;;  %5820 = vmatprep.subr.bf16.mxu1 %v13813_v61  ;;  %v13868_v59 = vld [vmem:[#allocation5 + $0x6e0] ss:$72 sps:$4 sm:$0xff]   ;;  %v13873_v61 = vld [vmem:[#allocation5 + $0x106c] ss:$72 sps:$4 sm:$0xff]  }
 0x1a7   :  { %5906 = vmatprep.subr.bf16.mxu0 %v13816_v62  ;;  %v13876_v62 = vld [vmem:[#allocation5 + $0x774] ss:$72 sps:$4 sm:$0xff]  }
 0x1a9   :  { %5821 = vmatpush1.bf16.msra.mxu1 %v13811_v3  ;;  %v13874_v3 = vld [vmem:[#allocation5 + $0x770] ss:$72 sps:$4 sm:$0xff]  }
 0x1aa   :  { %5907 = vmatpush1.bf16.msra.mxu0 %v13814_v5  ;;  %5822 = vmatprep.subr.bf16.mxu1 %v13819_v7  ;;  %v13879_v5 = vld [vmem:[#allocation5 + $0x10fc] ss:$72 sps:$4 sm:$0xff]  }
 0x1ab   :  { %5908 = vmatprep.subr.bf16.mxu0 %v13822_v8  ;;  %v13882_v7 = vld [vmem:[#allocation5 + $0x804] ss:$72 sps:$4 sm:$0xff]   ;;  %v13877_v8 = vld [vmem:[#allocation5 + $0x10f8] ss:$72 sps:$4 sm:$0xff]  }
 0x1ad   :  { %5823 = vmatpush1.bf16.msra.mxu1 %v13817_v10  ;;  %v13880_v10 = vld [vmem:[#allocation5 + $0x800] ss:$72 sps:$4 sm:$0xff]  }
 0x1ae   :  { %5909 = vmatpush1.bf16.msra.mxu0 %v13820_v11  ;;  %5824 = vmatprep.subr.bf16.mxu1 %v13825_v14  ;;  %v13885_v11 = vld [vmem:[#allocation5 + $0x118c] ss:$72 sps:$4 sm:$0xff]   ;;  %v13883_v14 = vld [vmem:[#allocation5 + $0x1188] ss:$72 sps:$4 sm:$0xff]  }
 0x1af   :  { %5910 = vmatprep.subr.bf16.mxu0 %v13828_v16  ;;  %v13886_v16 = vld [vmem:[#allocation5 + $0x890] ss:$72 sps:$4 sm:$0xff]  }
 0x1b0   :  { %v5504_v25 = vpop.f32.mrb[0].mxu0 }
 0x1b1   :  { %v15443_v29 = vadd.f32 %v5504_v25, %v5419_v20  ;;  %v5506_v30 = vpop.f32.mrb[1].mxu0  ;;  %5825 = vmatpush1.bf16.msra.mxu1 %v13823_v18  ;;  %v13894_v18 = vld [vmem:[#allocation5 + $0x924] ss:$72 sps:$4 sm:$0xff]   ;;  %v13892_v20 = vld [vmem:[#allocation5 + $0x920] ss:$72 sps:$4 sm:$0xff]  }
 0x1b2   :  { %v15446_v32 = vadd.f32 %v5506_v30, %v5421_v24  ;;  %v5508_v33 = vpop.f32.mrb[2].mxu0  ;;  %5911 = vmatpush1.bf16.msra.mxu0 %v13826_v19  ;;  %5826 = vmatprep.subr.bf16.mxu1 %v13831_v21  ;;  %v13889_v19 = vld [vmem:[#allocation5 + $0x1218] ss:$72 sps:$4 sm:$0xff]   ;;  %v13897_v21 = vld [vmem:[#allocation5 + $0x12ac] ss:$72 sps:$4 sm:$0xff]  }
 0x1b3   :  { %v15448_v63 = vadd.f32 %v5508_v33, %v5423_v28  ;;  %v5510_v34 = vpop.f32.mrb[3].mxu0  ;;  %5912 = vmatprep.subr.bf16.mxu0 %v13834_v22  ;;  %v13900_v22 = vld [vmem:[#allocation5 + $0x9b4] ss:$72 sps:$4 sm:$0xff]   ;;  %v13895_v24 = vld [vmem:[#allocation5 + $0x12a8] ss:$72 sps:$4 sm:$0xff]  }
 0x1b4   :  { %v15450_v36 = vadd.f32 %v5510_v34, %v5425_v31  ;;  %v13898_v25 = vld [vmem:[#allocation5 + $0x9b0] ss:$72 sps:$4 sm:$0xff]   ;;  %v13904_v30 = vld [vmem:[#allocation5 + $0xa40] ss:$72 sps:$4 sm:$0xff]   ;;  %v13909_v31 = vld [vmem:[#allocation5 + $0x13cc] ss:$72 sps:$4 sm:$0xff]  }
 0x1b5   :  { %5827 = vmatpush1.bf16.msra.mxu1 %v13829_v26  ;;  %v13903_v26 = vld [vmem:[#allocation5 + $0x133c] ss:$72 sps:$4 sm:$0xff]   ;;  %v13901_v28 = vld [vmem:[#allocation5 + $0x1338] ss:$72 sps:$4 sm:$0xff]   ;;  %v13907_v34 = vld [vmem:[#allocation5 + $0x13c8] ss:$72 sps:$4 sm:$0xff]  }
 0x1b6   :  { %5913 = vmatpush1.bf16.msra.mxu0 %v13832_v27  ;;  %5828 = vmatprep.subr.bf16.mxu1 %v13837_v0  ;;  %v13906_v27 = vld [vmem:[#allocation5 + $0xa44] ss:$72 sps:$4 sm:$0xff]   ;;  %v13912_v33 = vld [vmem:[#allocation5 + $0xad4] ss:$72 sps:$4 sm:$0xff]   ;;  %v13910_v0 = vld [vmem:[#allocation5 + $0xad0] ss:$72 sps:$4 sm:$0xff]  }
 0x1b7   :  { %5914 = vmatprep.subr.bf16.mxu0 %v13840_v35  ;;  %v13915_v35 = vld [vmem:[#allocation5 + $0x145c] ss:$72 sps:$4 sm:$0xff]  }
 0x1b9   :  { %5829 = vmatpush1.bf16.msra.mxu1 %v13835_v1  ;;  %v13918_v1 = vld [vmem:[#allocation5 + $0xb64] ss:$72 sps:$4 sm:$0xff]  }
 0x1ba   :  { %5915 = vmatpush1.bf16.msra.mxu0 %v13838_v37  ;;  %5830 = vmatprep.subr.bf16.mxu1 %v13843_v4  ;;  %v13913_v37 = vld [vmem:[#allocation5 + $0x1458] ss:$72 sps:$4 sm:$0xff]  }
 0x1bb   :  { %5916 = vmatprep.subr.bf16.mxu0 %v13846_v38  ;;  %v13916_v4 = vld [vmem:[#allocation5 + $0xb60] ss:$72 sps:$4 sm:$0xff]   ;;  %v13921_v38 = vld [vmem:[#allocation5 + $0x14ec] ss:$72 sps:$4 sm:$0xff]  }
 0x1bd   :  { %5831 = vmatpush1.bf16.msra.mxu1 %v13841_v39  ;;  %v13924_v39 = vld [vmem:[#allocation5 + $0xbf4] ss:$72 sps:$4 sm:$0xff]  }
 0x1be   :  { %5917 = vmatpush1.bf16.msra.mxu0 %v13844_v40  ;;  %5832 = vmatprep.subr.bf16.mxu1 %v13849_v41  ;;  %v13919_v40 = vld [vmem:[#allocation5 + $0x14e8] ss:$72 sps:$4 sm:$0xff]  }
 0x1bf   :  { %5918 = vmatprep.subr.bf16.mxu0 %v13852_v42  ;;  %v13922_v41 = vld [vmem:[#allocation5 + $0xbf0] ss:$72 sps:$4 sm:$0xff]   ;;  %v13927_v42 = vld [vmem:[#allocation5 + $0x157c] ss:$72 sps:$4 sm:$0xff]  }
 0x1c1   :  { %5833 = vmatpush1.bf16.msra.mxu1 %v13847_v43  ;;  %v13930_v43 = vld [vmem:[#allocation5 + $0xc84] ss:$72 sps:$4 sm:$0xff]  }
 0x1c2   :  { %5919 = vmatpush1.bf16.msra.mxu0 %v13850_v45  ;;  %5834 = vmatprep.subr.bf16.mxu1 %v13855_v46  ;;  %v13925_v45 = vld [vmem:[#allocation5 + $0x1578] ss:$72 sps:$4 sm:$0xff]  }
 0x1c3   :  { %5920 = vmatprep.subr.bf16.mxu0 %v13858_v47  ;;  %v13928_v46 = vld [vmem:[#allocation5 + $0xc80] ss:$72 sps:$4 sm:$0xff]   ;;  %v13933_v47 = vld [vmem:[#allocation5 + $0x160c] ss:$72 sps:$4 sm:$0xff]  }
 0x1c5   :  { %5835 = vmatpush1.bf16.msra.mxu1 %v13853_v48  ;;  %v13936_v48 = vld [vmem:[#allocation5 + $0xd14] ss:$72 sps:$4 sm:$0xff]  }
 0x1c6   :  { %5921 = vmatpush1.bf16.msra.mxu0 %v13856_v49  ;;  %5836 = vmatprep.subr.bf16.mxu1 %v13861_v51  ;;  %v13931_v49 = vld [vmem:[#allocation5 + $0x1608] ss:$72 sps:$4 sm:$0xff]  }
 0x1c7   :  { %5922 = vmatprep.subr.bf16.mxu0 %v13864_v52  ;;  %v13934_v51 = vld [vmem:[#allocation5 + $0xd10] ss:$72 sps:$4 sm:$0xff]   ;;  %v13939_v52 = vld [vmem:[#allocation5 + $0x169c] ss:$72 sps:$4 sm:$0xff]  }
 0x1c9   :  { %5837 = vmatpush1.bf16.msra.mxu1 %v13859_v53  ;;  %v13942_v53 = vld [vmem:[#allocation5 + $0xda4] ss:$72 sps:$4 sm:$0xff]  }
 0x1ca   :  { %5923 = vmatpush1.bf16.msra.mxu0 %v13862_v54  ;;  %5838 = vmatprep.subr.bf16.mxu1 %v13867_v56  ;;  %v13937_v54 = vld [vmem:[#allocation5 + $0x1698] ss:$72 sps:$4 sm:$0xff]  }
 0x1cb   :  { %5924 = vmatprep.subr.bf16.mxu0 %v13870_v57  ;;  %v13940_v56 = vld [vmem:[#allocation5 + $0xda0] ss:$72 sps:$4 sm:$0xff]   ;;  %v13945_v57 = vld [vmem:[#allocation5 + $0x172c] ss:$72 sps:$4 sm:$0xff]  }
 0x1cd   :  { %5839 = vmatpush1.bf16.msra.mxu1 %v13865_v58  ;;  %v13948_v58 = vld [vmem:[#allocation5 + $0xe34] ss:$72 sps:$4 sm:$0xff]  }
 0x1ce   :  { %5925 = vmatpush1.bf16.msra.mxu0 %v13868_v59  ;;  %5840 = vmatprep.subr.bf16.mxu1 %v13873_v61  ;;  %v13943_v59 = vld [vmem:[#allocation5 + $0x1728] ss:$72 sps:$4 sm:$0xff]  }
 0x1cf   :  { %5926 = vmatprep.subr.bf16.mxu0 %v13876_v62  ;;  %v13946_v61 = vld [vmem:[#allocation5 + $0xe30] ss:$72 sps:$4 sm:$0xff]   ;;  %v13951_v62 = vld [vmem:[#allocation5 + $0x17bc] ss:$72 sps:$4 sm:$0xff]  }
 0x1d1   :  { %5841 = vmatpush1.bf16.msra.mxu1 %v13871_v2  ;;  %v13954_v2 = vld [vmem:[#allocation5 + $0xec4] ss:$72 sps:$4 sm:$0xff]  }
 0x1d2   :  { %5927 = vmatpush1.bf16.msra.mxu0 %v13874_v3  ;;  %5842 = vmatprep.subr.bf16.mxu1 %v13879_v5  ;;  %v13949_v3 = vld [vmem:[#allocation5 + $0x17b8] ss:$72 sps:$4 sm:$0xff]  }
 0x1d3   :  { %5928 = vmatprep.subr.bf16.mxu0 %v13882_v7  ;;  %v13952_v5 = vld [vmem:[#allocation5 + $0xec0] ss:$72 sps:$4 sm:$0xff]   ;;  %v13957_v7 = vld [vmem:[#allocation5 + $0x184c] ss:$72 sps:$4 sm:$0xff]  }
 0x1d5   :  { %5843 = vmatpush1.bf16.msra.mxu1 %v13877_v8  ;;  %v13960_v8 = vld [vmem:[#allocation5 + $0xf54] ss:$72 sps:$4 sm:$0xff]  }
 0x1d6   :  { %5929 = vmatpush1.bf16.msra.mxu0 %v13880_v10  ;;  %5844 = vmatprep.subr.bf16.mxu1 %v13885_v11  ;;  %v13955_v10 = vld [vmem:[#allocation5 + $0x1848] ss:$72 sps:$4 sm:$0xff]  }
 0x1d7   :  { %5930 = vmatprep.subr.bf16.mxu0 %v13888_v13  ;;  %v13958_v11 = vld [vmem:[#allocation5 + $0xf50] ss:$72 sps:$4 sm:$0xff]   ;;  %v13963_v13 = vld [vmem:[#allocation5 + $0x18dc] ss:$72 sps:$4 sm:$0xff]  }
 0x1d9   :  { %5845 = vmatpush1.bf16.msra.mxu1 %v13883_v14  ;;  %v13966_v14 = vld [vmem:[#allocation5 + $0xfe4] ss:$72 sps:$4 sm:$0xff]  }
 0x1da   :  { %5931 = vmatpush1.bf16.msra.mxu0 %v13886_v16  ;;  %5857 = vmatprep.subr.bf16.mxu1 %v13891_v17  ;;  %v13961_v16 = vld [vmem:[#allocation5 + $0x18d8] ss:$72 sps:$4 sm:$0xff]  }
 0x1db   :  { %5943 = vmatprep.subr.bf16.mxu0 %v13894_v18  ;;  %v13964_v17 = vld [vmem:[#allocation5 + $0xfe0] ss:$72 sps:$4 sm:$0xff]   ;;  %v13969_v18 = vld [vmem:[#allocation5 + $0x196c] ss:$72 sps:$4 sm:$0xff]  }
 0x1dc   :  { %5847 = vmatmul.mubr.bf16.vlgmr.msra.gmra.mrb[8].mxu1 %v15396_v15 }
 0x1dd   :  { %5933 = vmatmul.mubr.bf16.vlgmr.msra.gmra.mrb[8].mxu0 %v15394_v12  ;;  %5858 = vmatpush1.bf16.msra.mxu1 %v13889_v19  ;;  %v13972_v19 = vld [vmem:[#allocation5 + $0x1074] ss:$72 sps:$4 sm:$0xff]  }
 0x1de   :  { %5944 = vmatpush1.bf16.msra.mxu0 %v13892_v20  ;;  %5859 = vmatprep.subr.bf16.mxu1 %v13897_v21  ;;  %v13967_v20 = vld [vmem:[#allocation5 + $0x1968] ss:$72 sps:$4 sm:$0xff]  }
 0x1df   :  { %5945 = vmatprep.subr.bf16.mxu0 %v13900_v22  ;;  %5889 = vmatprep.mubr.bf16.mxu1 %v15401_v44  ;;  %v13970_v21 = vld [vmem:[#allocation5 + $0x1070] ss:$72 sps:$4 sm:$0xff]   ;;  %v13975_v22 = vld [vmem:[#allocation5 + $0x19fc] ss:$72 sps:$4 sm:$0xff]  }
 0x1e0   :  { %5975 = vmatprep.mubr.bf16.mxu0 %v15390_v55 }
 0x1e1   :  { %5860 = vmatpush1.bf16.msra.mxu1 %v13895_v24  ;;  %v13978_v24 = vld [vmem:[#allocation5 + $0x1104] ss:$72 sps:$4 sm:$0xff]  }
 0x1e2   :  { %5946 = vmatpush1.bf16.msra.mxu0 %v13898_v25  ;;  %5861 = vmatprep.subr.bf16.mxu1 %v13903_v26  ;;  %v13973_v25 = vld [vmem:[#allocation5 + $0x19f8] ss:$72 sps:$4 sm:$0xff]  }
 0x1e3   :  { %5947 = vmatprep.subr.bf16.mxu0 %v13906_v27  ;;  %v13976_v26 = vld [vmem:[#allocation5 + $0x1100] ss:$72 sps:$4 sm:$0xff]   ;;  %v13981_v27 = vld [vmem:[#allocation5 + $0x1a8c] ss:$72 sps:$4 sm:$0xff]  }
 0x1e5   :  { %5862 = vmatpush1.bf16.msra.mxu1 %v13901_v28  ;;  %v13984_v28 = vld [vmem:[#allocation5 + $0x1194] ss:$72 sps:$4 sm:$0xff]  }
 0x1e6   :  { %5948 = vmatpush1.bf16.msra.mxu0 %v13904_v30  ;;  %5863 = vmatprep.subr.bf16.mxu1 %v13909_v31  ;;  %v13979_v30 = vld [vmem:[#allocation5 + $0x1a88] ss:$72 sps:$4 sm:$0xff]  }
 0x1e7   :  { %5949 = vmatprep.subr.bf16.mxu0 %v13912_v33  ;;  %v13982_v31 = vld [vmem:[#allocation5 + $0x1190] ss:$72 sps:$4 sm:$0xff]   ;;  %v13987_v33 = vld [vmem:[#allocation5 + $0x1224] ss:$72 sps:$4 sm:$0xff]  }
 0x1e9   :  { %5864 = vmatpush1.bf16.msra.mxu1 %v13907_v34  ;;  %v13990_v34 = vld [vmem:[#allocation5 + $0x2c] ss:$72 sps:$4 sm:$0xff]  }
 0x1ea   :  { %5950 = vmatpush1.bf16.msra.mxu0 %v13910_v0  ;;  %5865 = vmatprep.subr.bf16.mxu1 %v13915_v35  ;;  %v13985_v0 = vld [vmem:[#allocation5 + $0x1220] ss:$72 sps:$4 sm:$0xff]  }
 0x1eb   :  { %5951 = vmatprep.subr.bf16.mxu0 %v13918_v1  ;;  %v13988_v35 = vld [vmem:[#allocation5 + $0x28] ss:$72 sps:$4 sm:$0xff]   ;;  %v13993_v1 = vld [vmem:[#allocation5 + $0x12b4] ss:$72 sps:$4 sm:$0xff]  }
 0x1ed   :  { %5866 = vmatpush1.bf16.msra.mxu1 %v13913_v37  ;;  %v13996_v37 = vld [vmem:[#allocation5 + $0xbc] ss:$72 sps:$4 sm:$0xff]  }
 0x1ee   :  { %5952 = vmatpush1.bf16.msra.mxu0 %v13916_v4  ;;  %5867 = vmatprep.subr.bf16.mxu1 %v13921_v38  ;;  %v13991_v4 = vld [vmem:[#allocation5 + $0x12b0] ss:$72 sps:$4 sm:$0xff]  }
 0x1ef   :  { %5953 = vmatprep.subr.bf16.mxu0 %v13924_v39  ;;  %v13994_v38 = vld [vmem:[#allocation5 + $0xb8] ss:$72 sps:$4 sm:$0xff]   ;;  %v13999_v39 = vld [vmem:[#allocation5 + $0x1344] ss:$72 sps:$4 sm:$0xff]  }
 0x1f1   :  { %5868 = vmatpush1.bf16.msra.mxu1 %v13919_v40  ;;  %v14002_v40 = vld [vmem:[#allocation5 + $0x14c] ss:$72 sps:$4 sm:$0xff]  }
 0x1f2   :  { %5954 = vmatpush1.bf16.msra.mxu0 %v13922_v41  ;;  %5869 = vmatprep.subr.bf16.mxu1 %v13927_v42  ;;  %v13997_v41 = vld [vmem:[#allocation5 + $0x1340] ss:$72 sps:$4 sm:$0xff]  }
 0x1f3   :  { %5955 = vmatprep.subr.bf16.mxu0 %v13930_v43  ;;  %v14000_v42 = vld [vmem:[#allocation5 + $0x148] ss:$72 sps:$4 sm:$0xff]   ;;  %v14005_v43 = vld [vmem:[#allocation5 + $0x13d4] ss:$72 sps:$4 sm:$0xff]  }
 0x1f5   :  { %5870 = vmatpush1.bf16.msra.mxu1 %v13925_v45  ;;  %v14008_v45 = vld [vmem:[#allocation5 + $0x1dc] ss:$72 sps:$4 sm:$0xff]  }
 0x1f6   :  { %5956 = vmatpush1.bf16.msra.mxu0 %v13928_v46  ;;  %5871 = vmatprep.subr.bf16.mxu1 %v13933_v47  ;;  %v14003_v46 = vld [vmem:[#allocation5 + $0x13d0] ss:$72 sps:$4 sm:$0xff]  }
 0x1f7   :  { %5957 = vmatprep.subr.bf16.mxu0 %v13936_v48  ;;  %v14006_v47 = vld [vmem:[#allocation5 + $0x1d8] ss:$72 sps:$4 sm:$0xff]   ;;  %v14011_v48 = vld [vmem:[#allocation5 + $0x1464] ss:$72 sps:$4 sm:$0xff]  }
 0x1f9   :  { %5872 = vmatpush1.bf16.msra.mxu1 %v13931_v49  ;;  %v14014_v49 = vld [vmem:[#allocation5 + $0x26c] ss:$72 sps:$4 sm:$0xff]  }
 0x1fa   :  { %5958 = vmatpush1.bf16.msra.mxu0 %v13934_v51  ;;  %5873 = vmatprep.subr.bf16.mxu1 %v13939_v52  ;;  %v14009_v51 = vld [vmem:[#allocation5 + $0x1460] ss:$72 sps:$4 sm:$0xff]  }
 0x1fb   :  { %5959 = vmatprep.subr.bf16.mxu0 %v13942_v53  ;;  %v14012_v52 = vld [vmem:[#allocation5 + $0x268] ss:$72 sps:$4 sm:$0xff]   ;;  %v14017_v53 = vld [vmem:[#allocation5 + $0x14f4] ss:$72 sps:$4 sm:$0xff]  }
 0x1fd   :  { %5874 = vmatpush1.bf16.msra.mxu1 %v13937_v54  ;;  %v14020_v54 = vld [vmem:[#allocation5 + $0x2fc] ss:$72 sps:$4 sm:$0xff]  }
 0x1fe   :  { %5960 = vmatpush1.bf16.msra.mxu0 %v13940_v56  ;;  %5875 = vmatprep.subr.bf16.mxu1 %v13945_v57  ;;  %v14015_v56 = vld [vmem:[#allocation5 + $0x14f0] ss:$72 sps:$4 sm:$0xff]  }
 0x1ff   :  { %5961 = vmatprep.subr.bf16.mxu0 %v13948_v58  ;;  %v14018_v57 = vld [vmem:[#allocation5 + $0x2f8] ss:$72 sps:$4 sm:$0xff]   ;;  %v14023_v58 = vld [vmem:[#allocation5 + $0x1584] ss:$72 sps:$4 sm:$0xff]  }
 0x201   :  { %5876 = vmatpush1.bf16.msra.mxu1 %v13943_v59  ;;  %v14026_v59 = vld [vmem:[#allocation5 + $0x38c] ss:$72 sps:$4 sm:$0xff]  }
 0x202   :  { %5962 = vmatpush1.bf16.msra.mxu0 %v13946_v61  ;;  %5877 = vmatprep.subr.bf16.mxu1 %v13951_v62 }
 0x203   :  { %5963 = vmatprep.subr.bf16.mxu0 %v13954_v2 }
 0x205   :  { %5878 = vmatpush1.bf16.msra.mxu1 %v13949_v3  ;;  %v14021_v3 = vld [vmem:[#allocation5 + $0x1580] ss:$72 sps:$4 sm:$0xff]  }
 0x206   :  { %5964 = vmatpush1.bf16.msra.mxu0 %v13952_v5  ;;  %5879 = vmatprep.subr.bf16.mxu1 %v13957_v7  ;;  %v14024_v5 = vld [vmem:[#allocation5 + $0x388] ss:$72 sps:$4 sm:$0xff]  }
 0x207   :  { %5965 = vmatprep.subr.bf16.mxu0 %v13960_v8  ;;  %v14029_v8 = vld [vmem:[#allocation5 + $0x1614] ss:$72 sps:$4 sm:$0xff]  }
 0x209   :  { %5880 = vmatpush1.bf16.msra.mxu1 %v13955_v10  ;;  %v14032_v10 = vld [vmem:[#allocation5 + $0x41c] ss:$72 sps:$4 sm:$0xff]  }
 0x20a   :  { %5966 = vmatpush1.bf16.msra.mxu0 %v13958_v11  ;;  %5881 = vmatprep.subr.bf16.mxu1 %v13963_v13  ;;  %v14027_v11 = vld [vmem:[#allocation5 + $0x1610] ss:$72 sps:$4 sm:$0xff]  }
 0x20b   :  { %5967 = vmatprep.subr.bf16.mxu0 %v13966_v14  ;;  %v14030_v13 = vld [vmem:[#allocation5 + $0x418] ss:$72 sps:$4 sm:$0xff]   ;;  %v14035_v14 = vld [vmem:[#allocation5 + $0x16a4] ss:$72 sps:$4 sm:$0xff]  }
 0x20d   :  { %5882 = vmatpush1.bf16.msra.mxu1 %v13961_v16  ;;  %v14038_v16 = vld [vmem:[#allocation5 + $0x4ac] ss:$72 sps:$4 sm:$0xff]  }
 0x20e   :  { %5968 = vmatpush1.bf16.msra.mxu0 %v13964_v17  ;;  %5883 = vmatprep.subr.bf16.mxu1 %v13969_v18  ;;  %v14033_v17 = vld [vmem:[#allocation5 + $0x16a0] ss:$72 sps:$4 sm:$0xff]  }
 0x20f   :  { %5969 = vmatprep.subr.bf16.mxu0 %v13972_v19  ;;  %v14036_v18 = vld [vmem:[#allocation5 + $0x4a8] ss:$72 sps:$4 sm:$0xff]   ;;  %v14041_v19 = vld [vmem:[#allocation5 + $0x1734] ss:$72 sps:$4 sm:$0xff]  }
 0x211   :  { %5884 = vmatpush1.bf16.msra.mxu1 %v13967_v20  ;;  %v14044_v20 = vld [vmem:[#allocation5 + $0x53c] ss:$72 sps:$4 sm:$0xff]  }
 0x212   :  { %5970 = vmatpush1.bf16.msra.mxu0 %v13970_v21  ;;  %5885 = vmatprep.subr.bf16.mxu1 %v13975_v22  ;;  %v14039_v21 = vld [vmem:[#allocation5 + $0x1730] ss:$72 sps:$4 sm:$0xff]  }
 0x213   :  { %5971 = vmatprep.subr.bf16.mxu0 %v13978_v24  ;;  %v14042_v22 = vld [vmem:[#allocation5 + $0x538] ss:$72 sps:$4 sm:$0xff]   ;;  %v14047_v24 = vld [vmem:[#allocation5 + $0x17c4] ss:$72 sps:$4 sm:$0xff]  }
 0x215   :  { %5886 = vmatpush1.bf16.msra.mxu1 %v13973_v25  ;;  %v14050_v25 = vld [vmem:[#allocation5 + $0x5cc] ss:$72 sps:$4 sm:$0xff]  }
 0x216   :  { %5972 = vmatpush1.bf16.msra.mxu0 %v13976_v26  ;;  %5887 = vmatprep.subr.bf16.mxu1 %v13981_v27  ;;  %v14045_v26 = vld [vmem:[#allocation5 + $0x17c0] ss:$72 sps:$4 sm:$0xff]  }
 0x217   :  { %5973 = vmatprep.subr.bf16.mxu0 %v13984_v28  ;;  %v14048_v27 = vld [vmem:[#allocation5 + $0x5c8] ss:$72 sps:$4 sm:$0xff]   ;;  %v14053_v28 = vld [vmem:[#allocation5 + $0x1854] ss:$72 sps:$4 sm:$0xff]  }
 0x219   :  { %5888 = vmatpush1.bf16.msra.mxu1 %v13979_v30  ;;  %v14056_v30 = vld [vmem:[#allocation5 + $0x65c] ss:$72 sps:$4 sm:$0xff]  }
 0x21a   :  { %5974 = vmatpush1.bf16.msra.mxu0 %v13982_v31  ;;  %6029 = vmatprep.subr.bf16.mxu1 %v13990_v34  ;;  %v14051_v31 = vld [vmem:[#allocation5 + $0x1850] ss:$72 sps:$4 sm:$0xff]   ;;  %v14059_v34 = vld [vmem:[#allocation5 + $0x18e4] ss:$72 sps:$4 sm:$0xff]  }
 0x21b   :  { %5986 = vmatprep.subr.bf16.mxu0 %v13987_v33  ;;  %v14054_v33 = vld [vmem:[#allocation5 + $0x658] ss:$72 sps:$4 sm:$0xff]  }
 0x21c   :  { %5890 = vmatmul.mubr.bf16.vlgmr.msra.gmra.mrb[8].mxu1 %v15404_v23 }
 0x21d   :  { %5976 = vmatmul.mubr.bf16.vlgmr.msra.gmra.mrb[8].mxu0 %v15396_v15  ;;  %6030 = vmatpush1.bf16.msra.mxu1 %v13988_v35  ;;  %v14057_v35 = vld [vmem:[#allocation5 + $0x18e0] ss:$72 sps:$4 sm:$0xff]  }
 0x21e   :  { %5987 = vmatpush1.bf16.msra.mxu0 %v13985_v0  ;;  %6031 = vmatprep.subr.bf16.mxu1 %v13996_v37  ;;  %v14062_v0 = vld [vmem:[#allocation5 + $0x6ec] ss:$72 sps:$4 sm:$0xff]  }
 0x21f   :  { %5988 = vmatprep.subr.bf16.mxu0 %v13993_v1  ;;  %6018 = vmatprep.mubr.bf16.mxu0 %v15401_v44  ;;  %v14060_v1 = vld [vmem:[#allocation5 + $0x6e8] ss:$72 sps:$4 sm:$0xff]   ;;  %v14065_v37 = vld [vmem:[#allocation5 + $0x1974] ss:$72 sps:$4 sm:$0xff]  }
 0x220   :  { %6061 = vmatprep.mubr.bf16.mxu1 %v15388_v50 }
 0x221   :  { %6032 = vmatpush1.bf16.msra.mxu1 %v13994_v38  ;;  %v14063_v38 = vld [vmem:[#allocation5 + $0x1970] ss:$72 sps:$4 sm:$0xff]  }
 0x222   :  { %5989 = vmatpush1.bf16.msra.mxu0 %v13991_v4  ;;  %6033 = vmatprep.subr.bf16.mxu1 %v14002_v40  ;;  %v14068_v4 = vld [vmem:[#allocation5 + $0x77c] ss:$72 sps:$4 sm:$0xff]  }
 0x223   :  { %5990 = vmatprep.subr.bf16.mxu0 %v13999_v39  ;;  %v14066_v39 = vld [vmem:[#allocation5 + $0x778] ss:$72 sps:$4 sm:$0xff]   ;;  %v14071_v40 = vld [vmem:[#allocation5 + $0x1a04] ss:$72 sps:$4 sm:$0xff]  }
 0x225   :  { %6034 = vmatpush1.bf16.msra.mxu1 %v14000_v42  ;;  %v14069_v42 = vld [vmem:[#allocation5 + $0x1a00] ss:$72 sps:$4 sm:$0xff]  }
 0x226   :  { %5991 = vmatpush1.bf16.msra.mxu0 %v13997_v41  ;;  %6035 = vmatprep.subr.bf16.mxu1 %v14008_v45  ;;  %v14074_v41 = vld [vmem:[#allocation5 + $0x80c] ss:$72 sps:$4 sm:$0xff]  }
 0x227   :  { %5992 = vmatprep.subr.bf16.mxu0 %v14005_v43  ;;  %v14072_v43 = vld [vmem:[#allocation5 + $0x808] ss:$72 sps:$4 sm:$0xff]   ;;  %v14077_v45 = vld [vmem:[#allocation5 + $0x1a94] ss:$72 sps:$4 sm:$0xff]  }
 0x229   :  { %6036 = vmatpush1.bf16.msra.mxu1 %v14006_v47  ;;  %v14075_v47 = vld [vmem:[#allocation5 + $0x1a90] ss:$72 sps:$4 sm:$0xff]  }
 0x22a   :  { %5993 = vmatpush1.bf16.msra.mxu0 %v14003_v46  ;;  %6037 = vmatprep.subr.bf16.mxu1 %v14014_v49  ;;  %v14080_v46 = vld [vmem:[#allocation5 + $0x89c] ss:$72 sps:$4 sm:$0xff]   ;;  %v14083_v49 = vld [vmem:[#allocation5 + $0x92c] ss:$72 sps:$4 sm:$0xff]  }
 0x22b   :  { %5994 = vmatprep.subr.bf16.mxu0 %v14011_v48  ;;  %v14078_v48 = vld [vmem:[#allocation5 + $0x898] ss:$72 sps:$4 sm:$0xff]  }
 0x22d   :  { %6038 = vmatpush1.bf16.msra.mxu1 %v14012_v52  ;;  %v14081_v52 = vld [vmem:[#allocation5 + $0x928] ss:$72 sps:$4 sm:$0xff]  }
 0x22e   :  { %5995 = vmatpush1.bf16.msra.mxu0 %v14009_v51  ;;  %6039 = vmatprep.subr.bf16.mxu1 %v14020_v54  ;;  %v14086_v51 = vld [vmem:[#allocation5 + $0x34] ss:$72 sps:$4 sm:$0xff]  }
 0x22f   :  { %5996 = vmatprep.subr.bf16.mxu0 %v14017_v53  ;;  %v15460_v61 = vpop.f32.mrb[4].mxu1  ;;  %v14084_v53 = vld [vmem:[#allocation5 + $0x30] ss:$72 sps:$4 sm:$0xff]   ;;  %v14089_v54 = vld [vmem:[#allocation5 + $0x9bc] ss:$72 sps:$4 sm:$0xff]  }
 0x230   :  { %v15462_v62 = vpop.f32.mrb[5].mxu1 }
 0x231   :  { %v15464_v2 = vpop.f32.mrb[6].mxu1  ;;  %6040 = vmatpush1.bf16.msra.mxu1 %v14018_v57  ;;  %v14087_v57 = vld [vmem:[#allocation5 + $0x9b8] ss:$72 sps:$4 sm:$0xff]  }
 0x232   :  { %5997 = vmatpush1.bf16.msra.mxu0 %v14015_v56  ;;  %v15466_v7 = vpop.f32.mrb[7].mxu1  ;;  %6041 = vmatprep.subr.bf16.mxu1 %v14026_v59  ;;  %v14092_v56 = vld [vmem:[#allocation5 + $0xc4] ss:$72 sps:$4 sm:$0xff]  }
 0x233   :  { %5998 = vmatprep.subr.bf16.mxu0 %v14023_v58  ;;  %v14090_v58 = vld [vmem:[#allocation5 + $0xc0] ss:$72 sps:$4 sm:$0xff]   ;;  %v14095_v59 = vld [vmem:[#allocation5 + $0xa4c] ss:$72 sps:$4 sm:$0xff]  }
 0x235   :  { %6042 = vmatpush1.bf16.msra.mxu1 %v14024_v5  ;;  %v14093_v5 = vld [vmem:[#allocation5 + $0xa48] ss:$72 sps:$4 sm:$0xff]  }
 0x236   :  { %5999 = vmatpush1.bf16.msra.mxu0 %v14021_v3  ;;  %6043 = vmatprep.subr.bf16.mxu1 %v14032_v10  ;;  %v14098_v3 = vld [vmem:[#allocation5 + $0x154] ss:$72 sps:$4 sm:$0xff]  }
 0x237   :  { %6000 = vmatprep.subr.bf16.mxu0 %v14029_v8  ;;  %v14096_v8 = vld [vmem:[#allocation5 + $0x150] ss:$72 sps:$4 sm:$0xff]   ;;  %v14101_v10 = vld [vmem:[#allocation5 + $0xadc] ss:$72 sps:$4 sm:$0xff]  }
 0x239   :  { %6044 = vmatpush1.bf16.msra.mxu1 %v14030_v13  ;;  %v14099_v13 = vld [vmem:[#allocation5 + $0xad8] ss:$72 sps:$4 sm:$0xff]  }
 0x23a   :  { %6001 = vmatpush1.bf16.msra.mxu0 %v14027_v11  ;;  %6045 = vmatprep.subr.bf16.mxu1 %v14038_v16  ;;  %v14104_v11 = vld [vmem:[#allocation5 + $0x1e4] ss:$72 sps:$4 sm:$0xff]  }
 0x23b   :  { %6002 = vmatprep.subr.bf16.mxu0 %v14035_v14  ;;  %v14102_v14 = vld [vmem:[#allocation5 + $0x1e0] ss:$72 sps:$4 sm:$0xff]   ;;  %v14107_v16 = vld [vmem:[#allocation5 + $0xb6c] ss:$72 sps:$4 sm:$0xff]  }
 0x23d   :  { %6046 = vmatpush1.bf16.msra.mxu1 %v14036_v18  ;;  %v14105_v18 = vld [vmem:[#allocation5 + $0xb68] ss:$72 sps:$4 sm:$0xff]  }
 0x23e   :  { %6003 = vmatpush1.bf16.msra.mxu0 %v14033_v17  ;;  %6047 = vmatprep.subr.bf16.mxu1 %v14044_v20  ;;  %v14110_v17 = vld [vmem:[#allocation5 + $0x274] ss:$72 sps:$4 sm:$0xff]  }
 0x23f   :  { %6004 = vmatprep.subr.bf16.mxu0 %v14041_v19  ;;  %v14108_v19 = vld [vmem:[#allocation5 + $0x270] ss:$72 sps:$4 sm:$0xff]   ;;  %v14113_v20 = vld [vmem:[#allocation5 + $0xbfc] ss:$72 sps:$4 sm:$0xff]  }
 0x241   :  { %6048 = vmatpush1.bf16.msra.mxu1 %v14042_v22  ;;  %v14111_v22 = vld [vmem:[#allocation5 + $0xbf8] ss:$72 sps:$4 sm:$0xff]  }
 0x242   :  { %6005 = vmatpush1.bf16.msra.mxu0 %v14039_v21  ;;  %6049 = vmatprep.subr.bf16.mxu1 %v14050_v25  ;;  %v14116_v21 = vld [vmem:[#allocation5 + $0x304] ss:$72 sps:$4 sm:$0xff]  }
 0x243   :  { %6006 = vmatprep.subr.bf16.mxu0 %v14047_v24  ;;  %v14114_v24 = vld [vmem:[#allocation5 + $0x300] ss:$72 sps:$4 sm:$0xff]   ;;  %v14119_v25 = vld [vmem:[#allocation5 + $0xc8c] ss:$72 sps:$4 sm:$0xff]  }
 0x245   :  { %6050 = vmatpush1.bf16.msra.mxu1 %v14048_v27  ;;  %v14117_v27 = vld [vmem:[#allocation5 + $0xc88] ss:$72 sps:$4 sm:$0xff]  }
 0x246   :  { %6007 = vmatpush1.bf16.msra.mxu0 %v14045_v26  ;;  %6051 = vmatprep.subr.bf16.mxu1 %v14056_v30  ;;  %v14122_v26 = vld [vmem:[#allocation5 + $0x394] ss:$72 sps:$4 sm:$0xff]  }
 0x247   :  { %6008 = vmatprep.subr.bf16.mxu0 %v14053_v28  ;;  %v14120_v28 = vld [vmem:[#allocation5 + $0x390] ss:$72 sps:$4 sm:$0xff]   ;;  %v14125_v30 = vld [vmem:[#allocation5 + $0xd1c] ss:$72 sps:$4 sm:$0xff]  }
 0x249   :  { %6052 = vmatpush1.bf16.msra.mxu1 %v14054_v33  ;;  %v14123_v33 = vld [vmem:[#allocation5 + $0xd18] ss:$72 sps:$4 sm:$0xff]  }
 0x24a   :  { %6009 = vmatpush1.bf16.msra.mxu0 %v14051_v31  ;;  %6053 = vmatprep.subr.bf16.mxu1 %v14062_v0  ;;  %v14128_v31 = vld [vmem:[#allocation5 + $0x424] ss:$72 sps:$4 sm:$0xff]  }
 0x24b   :  { %6010 = vmatprep.subr.bf16.mxu0 %v14059_v34  ;;  %v14126_v34 = vld [vmem:[#allocation5 + $0x420] ss:$72 sps:$4 sm:$0xff]   ;;  %v14131_v0 = vld [vmem:[#allocation5 + $0xdac] ss:$72 sps:$4 sm:$0xff]  }
 0x24d   :  { %6054 = vmatpush1.bf16.msra.mxu1 %v14060_v1  ;;  %v14129_v1 = vld [vmem:[#allocation5 + $0xda8] ss:$72 sps:$4 sm:$0xff]  }
 0x24e   :  { %6011 = vmatpush1.bf16.msra.mxu0 %v14057_v35  ;;  %6055 = vmatprep.subr.bf16.mxu1 %v14068_v4  ;;  %v14134_v35 = vld [vmem:[#allocation5 + $0x4b4] ss:$72 sps:$4 sm:$0xff]  }
 0x24f   :  { %6012 = vmatprep.subr.bf16.mxu0 %v14065_v37  ;;  %v14132_v37 = vld [vmem:[#allocation5 + $0x4b0] ss:$72 sps:$4 sm:$0xff]   ;;  %v14137_v4 = vld [vmem:[#allocation5 + $0xe3c] ss:$72 sps:$4 sm:$0xff]  }
 0x251   :  { %6056 = vmatpush1.bf16.msra.mxu1 %v14066_v39  ;;  %v14135_v39 = vld [vmem:[#allocation5 + $0xe38] ss:$72 sps:$4 sm:$0xff]  }
 0x252   :  { %6013 = vmatpush1.bf16.msra.mxu0 %v14063_v38  ;;  %6057 = vmatprep.subr.bf16.mxu1 %v14074_v41  ;;  %v14140_v38 = vld [vmem:[#allocation5 + $0x544] ss:$72 sps:$4 sm:$0xff]  }
 0x253   :  { %6014 = vmatprep.subr.bf16.mxu0 %v14071_v40  ;;  %v14138_v40 = vld [vmem:[#allocation5 + $0x540] ss:$72 sps:$4 sm:$0xff]   ;;  %v14143_v41 = vld [vmem:[#allocation5 + $0xecc] ss:$72 sps:$4 sm:$0xff]  }
 0x255   :  { %6058 = vmatpush1.bf16.msra.mxu1 %v14072_v43  ;;  %v14141_v43 = vld [vmem:[#allocation5 + $0xec8] ss:$72 sps:$4 sm:$0xff]  }
 0x256   :  { %6015 = vmatpush1.bf16.msra.mxu0 %v14069_v42  ;;  %6059 = vmatprep.subr.bf16.mxu1 %v14080_v46  ;;  %v14146_v42 = vld [vmem:[#allocation5 + $0x5d4] ss:$72 sps:$4 sm:$0xff]  }
 0x257   :  { %6016 = vmatprep.subr.bf16.mxu0 %v14077_v45  ;;  %v14144_v45 = vld [vmem:[#allocation5 + $0x5d0] ss:$72 sps:$4 sm:$0xff]   ;;  %v14149_v46 = vld [vmem:[#allocation5 + $0xf5c] ss:$72 sps:$4 sm:$0xff]  }
 0x259   :  { %6060 = vmatpush1.bf16.msra.mxu1 %v14078_v48  ;;  %v14147_v48 = vld [vmem:[#allocation5 + $0xf58] ss:$72 sps:$4 sm:$0xff]  }
 0x25a   :  { %6017 = vmatpush1.bf16.msra.mxu0 %v14075_v47  ;;  %6072 = vmatprep.subr.bf16.mxu1 %v14083_v49  ;;  %v14152_v47 = vld [vmem:[#allocation5 + $0x664] ss:$72 sps:$4 sm:$0xff]   ;;  %v14150_v49 = vld [vmem:[#allocation5 + $0x660] ss:$72 sps:$4 sm:$0xff]  }
 0x25b   :  { %6158 = vmatprep.subr.bf16.mxu0 %v14086_v51  ;;  %v14155_v51 = vld [vmem:[#allocation5 + $0xfec] ss:$72 sps:$4 sm:$0xff]  }
 0x25c   :  { %6062 = vmatmul.mubr.bf16.vlgmr.msra.gmra.mrb[12].mxu1 %v15394_v12 }
 0x25d   :  { %6019 = vmatmul.mubr.bf16.vlgmr.msra.gmra.mrb[8].mxu0 %v15404_v23  ;;  %6073 = vmatpush1.bf16.msra.mxu1 %v14081_v52  ;;  %v14158_v52 = vld [vmem:[#allocation5 + $0x6f4] ss:$72 sps:$4 sm:$0xff]  }
 0x25e   :  { %6159 = vmatpush1.bf16.msra.mxu0 %v14084_v53  ;;  %6074 = vmatprep.subr.bf16.mxu1 %v14089_v54  ;;  %v14153_v53 = vld [vmem:[#allocation5 + $0xfe8] ss:$72 sps:$4 sm:$0xff]  }
 0x25f   :  { %6160 = vmatprep.subr.bf16.mxu0 %v14092_v56  ;;  %6104 = vmatprep.mubr.bf16.mxu1 %v15390_v55  ;;  %v14156_v54 = vld [vmem:[#allocation5 + $0x6f0] ss:$72 sps:$4 sm:$0xff]   ;;  %v14161_v56 = vld [vmem:[#allocation5 + $0x107c] ss:$72 sps:$4 sm:$0xff]  }
 0x260   :  { %6190 = vmatprep.mubr.bf16.mxu0 %v15388_v50 }
 0x261   :  { %6075 = vmatpush1.bf16.msra.mxu1 %v14087_v57  ;;  %v14164_v57 = vld [vmem:[#allocation5 + $0x784] ss:$72 sps:$4 sm:$0xff]  }
 0x262   :  { %6161 = vmatpush1.bf16.msra.mxu0 %v14090_v58  ;;  %6076 = vmatprep.subr.bf16.mxu1 %v14095_v59  ;;  %v14159_v58 = vld [vmem:[#allocation5 + $0x1078] ss:$72 sps:$4 sm:$0xff]  }
 0x263   :  { %6162 = vmatprep.subr.bf16.mxu0 %v14098_v3  ;;  %v14162_v59 = vld [vmem:[#allocation5 + $0x780] ss:$72 sps:$4 sm:$0xff]   ;;  %v14167_v3 = vld [vmem:[#allocation5 + $0x110c] ss:$72 sps:$4 sm:$0xff]  }
 0x265   :  { %6077 = vmatpush1.bf16.msra.mxu1 %v14093_v5  ;;  %v14170_v5 = vld [vmem:[#allocation5 + $0x814] ss:$72 sps:$4 sm:$0xff]  }
 0x266   :  { %6163 = vmatpush1.bf16.msra.mxu0 %v14096_v8  ;;  %6078 = vmatprep.subr.bf16.mxu1 %v14101_v10  ;;  %v14165_v8 = vld [vmem:[#allocation5 + $0x1108] ss:$72 sps:$4 sm:$0xff]  }
 0x267   :  { %6164 = vmatprep.subr.bf16.mxu0 %v14104_v11  ;;  %v14168_v10 = vld [vmem:[#allocation5 + $0x810] ss:$72 sps:$4 sm:$0xff]   ;;  %v14173_v11 = vld [vmem:[#allocation5 + $0x119c] ss:$72 sps:$4 sm:$0xff]  }
 0x269   :  { %6079 = vmatpush1.bf16.msra.mxu1 %v14099_v13  ;;  %v14176_v13 = vld [vmem:[#allocation5 + $0x8a4] ss:$72 sps:$4 sm:$0xff]  }
 0x26a   :  { %6165 = vmatpush1.bf16.msra.mxu0 %v14102_v14  ;;  %6080 = vmatprep.subr.bf16.mxu1 %v14107_v16  ;;  %v14171_v14 = vld [vmem:[#allocation5 + $0x1198] ss:$72 sps:$4 sm:$0xff]  }
 0x26b   :  { %6166 = vmatprep.subr.bf16.mxu0 %v14110_v17  ;;  %v14174_v16 = vld [vmem:[#allocation5 + $0x8a0] ss:$72 sps:$4 sm:$0xff]   ;;  %v14179_v17 = vld [vmem:[#allocation5 + $0x122c] ss:$72 sps:$4 sm:$0xff]  }
 0x26d   :  { %6081 = vmatpush1.bf16.msra.mxu1 %v14105_v18  ;;  %v14182_v18 = vld [vmem:[#allocation5 + $0x934] ss:$72 sps:$4 sm:$0xff]  }
 0x26e   :  { %6167 = vmatpush1.bf16.msra.mxu0 %v14108_v19  ;;  %6082 = vmatprep.subr.bf16.mxu1 %v14113_v20  ;;  %v14177_v19 = vld [vmem:[#allocation5 + $0x1228] ss:$72 sps:$4 sm:$0xff]  }
 0x26f   :  { %6168 = vmatprep.subr.bf16.mxu0 %v14116_v21  ;;  %v14180_v20 = vld [vmem:[#allocation5 + $0x930] ss:$72 sps:$4 sm:$0xff]   ;;  %v14185_v21 = vld [vmem:[#allocation5 + $0x12bc] ss:$72 sps:$4 sm:$0xff]  }
 0x271   :  { %6083 = vmatpush1.bf16.msra.mxu1 %v14111_v22  ;;  %v14188_v22 = vld [vmem:[#allocation5 + $0x9c4] ss:$72 sps:$4 sm:$0xff]  }
 0x272   :  { %6169 = vmatpush1.bf16.msra.mxu0 %v14114_v24  ;;  %6084 = vmatprep.subr.bf16.mxu1 %v14119_v25  ;;  %v14183_v24 = vld [vmem:[#allocation5 + $0x12b8] ss:$72 sps:$4 sm:$0xff]  }
 0x273   :  { %6170 = vmatprep.subr.bf16.mxu0 %v14122_v26  ;;  %v14186_v25 = vld [vmem:[#allocation5 + $0x9c0] ss:$72 sps:$4 sm:$0xff]   ;;  %v14191_v26 = vld [vmem:[#allocation5 + $0x134c] ss:$72 sps:$4 sm:$0xff]  }
 0x275   :  { %6085 = vmatpush1.bf16.msra.mxu1 %v14117_v27  ;;  %v14194_v27 = vld [vmem:[#allocation5 + $0xa54] ss:$72 sps:$4 sm:$0xff]  }
 0x276   :  { %6171 = vmatpush1.bf16.msra.mxu0 %v14120_v28  ;;  %6086 = vmatprep.subr.bf16.mxu1 %v14125_v30  ;;  %v14189_v28 = vld [vmem:[#allocation5 + $0x1348] ss:$72 sps:$4 sm:$0xff]  }
 0x277   :  { %6172 = vmatprep.subr.bf16.mxu0 %v14128_v31  ;;  %v14192_v30 = vld [vmem:[#allocation5 + $0xa50] ss:$72 sps:$4 sm:$0xff]   ;;  %v14197_v31 = vld [vmem:[#allocation5 + $0x13dc] ss:$72 sps:$4 sm:$0xff]  }
 0x279   :  { %6087 = vmatpush1.bf16.msra.mxu1 %v14123_v33  ;;  %v14200_v33 = vld [vmem:[#allocation5 + $0xae4] ss:$72 sps:$4 sm:$0xff]  }
 0x27a   :  { %6173 = vmatpush1.bf16.msra.mxu0 %v14126_v34  ;;  %6088 = vmatprep.subr.bf16.mxu1 %v14131_v0  ;;  %v14195_v34 = vld [vmem:[#allocation5 + $0x13d8] ss:$72 sps:$4 sm:$0xff]  }
 0x27b   :  { %6174 = vmatprep.subr.bf16.mxu0 %v14134_v35  ;;  %v14198_v0 = vld [vmem:[#allocation5 + $0xae0] ss:$72 sps:$4 sm:$0xff]   ;;  %v14203_v35 = vld [vmem:[#allocation5 + $0x146c] ss:$72 sps:$4 sm:$0xff]  }
 0x27d   :  { %6089 = vmatpush1.bf16.msra.mxu1 %v14129_v1  ;;  %v14206_v1 = vld [vmem:[#allocation5 + $0xb74] ss:$72 sps:$4 sm:$0xff]  }
 0x27e   :  { %6175 = vmatpush1.bf16.msra.mxu0 %v14132_v37  ;;  %6090 = vmatprep.subr.bf16.mxu1 %v14137_v4  ;;  %v14201_v37 = vld [vmem:[#allocation5 + $0x1468] ss:$72 sps:$4 sm:$0xff]  }
 0x27f   :  { %6176 = vmatprep.subr.bf16.mxu0 %v14140_v38  ;;  %v14204_v4 = vld [vmem:[#allocation5 + $0xb70] ss:$72 sps:$4 sm:$0xff]   ;;  %v14209_v38 = vld [vmem:[#allocation5 + $0x14fc] ss:$72 sps:$4 sm:$0xff]  }
 0x281   :  { %6091 = vmatpush1.bf16.msra.mxu1 %v14135_v39  ;;  %v14212_v39 = vld [vmem:[#allocation5 + $0xc04] ss:$72 sps:$4 sm:$0xff]  }
 0x282   :  { %6177 = vmatpush1.bf16.msra.mxu0 %v14138_v40  ;;  %6092 = vmatprep.subr.bf16.mxu1 %v14143_v41  ;;  %v14207_v40 = vld [vmem:[#allocation5 + $0x14f8] ss:$72 sps:$4 sm:$0xff]  }
 0x283   :  { %6178 = vmatprep.subr.bf16.mxu0 %v14146_v42  ;;  %v14210_v41 = vld [vmem:[#allocation5 + $0xc00] ss:$72 sps:$4 sm:$0xff]   ;;  %v14215_v42 = vld [vmem:[#allocation5 + $0x158c] ss:$72 sps:$4 sm:$0xff]  }
 0x285   :  { %6093 = vmatpush1.bf16.msra.mxu1 %v14141_v43  ;;  %v14218_v43 = vld [vmem:[#allocation5 + $0xc94] ss:$72 sps:$4 sm:$0xff]  }
 0x286   :  { %6179 = vmatpush1.bf16.msra.mxu0 %v14144_v45  ;;  %6094 = vmatprep.subr.bf16.mxu1 %v14149_v46  ;;  %v14213_v45 = vld [vmem:[#allocation5 + $0x1588] ss:$72 sps:$4 sm:$0xff]  }
 0x287   :  { %6180 = vmatprep.subr.bf16.mxu0 %v14152_v47  ;;  %v14216_v46 = vld [vmem:[#allocation5 + $0xc90] ss:$72 sps:$4 sm:$0xff]   ;;  %v14221_v47 = vld [vmem:[#allocation5 + $0x161c] ss:$72 sps:$4 sm:$0xff]  }
 0x289   :  { %6095 = vmatpush1.bf16.msra.mxu1 %v14147_v48  ;;  %v14224_v48 = vld [vmem:[#allocation5 + $0xd24] ss:$72 sps:$4 sm:$0xff]  }
 0x28a   :  { %6181 = vmatpush1.bf16.msra.mxu0 %v14150_v49  ;;  %6096 = vmatprep.subr.bf16.mxu1 %v14155_v51  ;;  %v14219_v49 = vld [vmem:[#allocation5 + $0x1618] ss:$72 sps:$4 sm:$0xff]  }
 0x28b   :  { %6182 = vmatprep.subr.bf16.mxu0 %v14158_v52  ;;  %v14222_v51 = vld [vmem:[#allocation5 + $0xd20] ss:$72 sps:$4 sm:$0xff]   ;;  %v14227_v52 = vld [vmem:[#allocation5 + $0x16ac] ss:$72 sps:$4 sm:$0xff]  }
 0x28d   :  { %6097 = vmatpush1.bf16.msra.mxu1 %v14153_v53  ;;  %v14230_v53 = vld [vmem:[#allocation5 + $0xdb4] ss:$72 sps:$4 sm:$0xff]  }
 0x28e   :  { %6183 = vmatpush1.bf16.msra.mxu0 %v14156_v54  ;;  %6098 = vmatprep.subr.bf16.mxu1 %v14161_v56  ;;  %v14225_v54 = vld [vmem:[#allocation5 + $0x16a8] ss:$72 sps:$4 sm:$0xff]  }
 0x28f   :  { %6184 = vmatprep.subr.bf16.mxu0 %v14164_v57  ;;  %v14228_v56 = vld [vmem:[#allocation5 + $0xdb0] ss:$72 sps:$4 sm:$0xff]   ;;  %v14233_v57 = vld [vmem:[#allocation5 + $0x173c] ss:$72 sps:$4 sm:$0xff]  }
 0x291   :  { %6099 = vmatpush1.bf16.msra.mxu1 %v14159_v58  ;;  %v14236_v58 = vld [vmem:[#allocation5 + $0xe44] ss:$72 sps:$4 sm:$0xff]  }
 0x292   :  { %6185 = vmatpush1.bf16.msra.mxu0 %v14162_v59  ;;  %6100 = vmatprep.subr.bf16.mxu1 %v14167_v3  ;;  %v14231_v59 = vld [vmem:[#allocation5 + $0x1738] ss:$72 sps:$4 sm:$0xff]  }
 0x293   :  { %6186 = vmatprep.subr.bf16.mxu0 %v14170_v5  ;;  %v14234_v3 = vld [vmem:[#allocation5 + $0xe40] ss:$72 sps:$4 sm:$0xff]   ;;  %v14239_v5 = vld [vmem:[#allocation5 + $0x17cc] ss:$72 sps:$4 sm:$0xff]  }
 0x295   :  { %6101 = vmatpush1.bf16.msra.mxu1 %v14165_v8  ;;  %v14242_v8 = vld [vmem:[#allocation5 + $0xed4] ss:$72 sps:$4 sm:$0xff]  }
 0x296   :  { %6187 = vmatpush1.bf16.msra.mxu0 %v14168_v10  ;;  %6102 = vmatprep.subr.bf16.mxu1 %v14173_v11  ;;  %v14237_v10 = vld [vmem:[#allocation5 + $0x17c8] ss:$72 sps:$4 sm:$0xff]  }
 0x297   :  { %6188 = vmatprep.subr.bf16.mxu0 %v14176_v13  ;;  %v14240_v11 = vld [vmem:[#allocation5 + $0xed0] ss:$72 sps:$4 sm:$0xff]   ;;  %v14245_v13 = vld [vmem:[#allocation5 + $0x185c] ss:$72 sps:$4 sm:$0xff]  }
 0x299   :  { %6103 = vmatpush1.bf16.msra.mxu1 %v14171_v14  ;;  %v14248_v14 = vld [vmem:[#allocation5 + $0xf64] ss:$72 sps:$4 sm:$0xff]  }
 0x29a   :  { %6189 = vmatpush1.bf16.msra.mxu0 %v14174_v16  ;;  %6115 = vmatprep.subr.bf16.mxu1 %v14179_v17  ;;  %v14243_v16 = vld [vmem:[#allocation5 + $0x1858] ss:$72 sps:$4 sm:$0xff]  }
 0x29b   :  { %6201 = vmatprep.subr.bf16.mxu0 %v14182_v18  ;;  %v14246_v17 = vld [vmem:[#allocation5 + $0xf60] ss:$72 sps:$4 sm:$0xff]   ;;  %v14251_v18 = vld [vmem:[#allocation5 + $0x18ec] ss:$72 sps:$4 sm:$0xff]  }
 0x29c   :  { %6105 = vmatmul.mubr.bf16.vlgmr.msra.gmra.mrb[12].mxu1 %v15396_v15 }
 0x29d   :  { %6191 = vmatmul.mubr.bf16.vlgmr.msra.gmra.mrb[12].mxu0 %v15394_v12  ;;  %6116 = vmatpush1.bf16.msra.mxu1 %v14177_v19  ;;  %v14254_v19 = vld [vmem:[#allocation5 + $0xff4] ss:$72 sps:$4 sm:$0xff]  }
 0x29e   :  { %6202 = vmatpush1.bf16.msra.mxu0 %v14180_v20  ;;  %6117 = vmatprep.subr.bf16.mxu1 %v14185_v21  ;;  %v14249_v20 = vld [vmem:[#allocation5 + $0x18e8] ss:$72 sps:$4 sm:$0xff]  }
 0x29f   :  { %6203 = vmatprep.subr.bf16.mxu0 %v14188_v22  ;;  %6147 = vmatprep.mubr.bf16.mxu1 %v15401_v44  ;;  %v14252_v21 = vld [vmem:[#allocation5 + $0xff0] ss:$72 sps:$4 sm:$0xff]   ;;  %v14257_v22 = vld [vmem:[#allocation5 + $0x197c] ss:$72 sps:$4 sm:$0xff]  }
 0x2a0   :  { %6233 = vmatprep.mubr.bf16.mxu0 %v15390_v55 }
 0x2a1   :  { %6118 = vmatpush1.bf16.msra.mxu1 %v14183_v24  ;;  %v14260_v24 = vld [vmem:[#allocation5 + $0x1084] ss:$72 sps:$4 sm:$0xff]  }
 0x2a2   :  { %6204 = vmatpush1.bf16.msra.mxu0 %v14186_v25  ;;  %6119 = vmatprep.subr.bf16.mxu1 %v14191_v26  ;;  %v14255_v25 = vld [vmem:[#allocation5 + $0x1978] ss:$72 sps:$4 sm:$0xff]  }
 0x2a3   :  { %6205 = vmatprep.subr.bf16.mxu0 %v14194_v27  ;;  %v14258_v26 = vld [vmem:[#allocation5 + $0x1080] ss:$72 sps:$4 sm:$0xff]   ;;  %v14263_v27 = vld [vmem:[#allocation5 + $0x1a0c] ss:$72 sps:$4 sm:$0xff]  }
 0x2a5   :  { %6120 = vmatpush1.bf16.msra.mxu1 %v14189_v28  ;;  %v14266_v28 = vld [vmem:[#allocation5 + $0x1114] ss:$72 sps:$4 sm:$0xff]  }
 0x2a6   :  { %6206 = vmatpush1.bf16.msra.mxu0 %v14192_v30  ;;  %6121 = vmatprep.subr.bf16.mxu1 %v14197_v31  ;;  %v14261_v30 = vld [vmem:[#allocation5 + $0x1a08] ss:$72 sps:$4 sm:$0xff]  }
 0x2a7   :  { %6207 = vmatprep.subr.bf16.mxu0 %v14200_v33  ;;  %v14264_v31 = vld [vmem:[#allocation5 + $0x1110] ss:$72 sps:$4 sm:$0xff]   ;;  %v14269_v33 = vld [vmem:[#allocation5 + $0x1a9c] ss:$72 sps:$4 sm:$0xff]  }
 0x2a9   :  { %6122 = vmatpush1.bf16.msra.mxu1 %v14195_v34  ;;  %v14272_v34 = vld [vmem:[#allocation5 + $0x11a4] ss:$72 sps:$4 sm:$0xff]  }
 0x2aa   :  { %6208 = vmatpush1.bf16.msra.mxu0 %v14198_v0  ;;  %6123 = vmatprep.subr.bf16.mxu1 %v14203_v35  ;;  %v14267_v0 = vld [vmem:[#allocation5 + $0x1a98] ss:$72 sps:$4 sm:$0xff]  }
 0x2ab   :  { %6209 = vmatprep.subr.bf16.mxu0 %v14206_v1  ;;  %v14270_v35 = vld [vmem:[#allocation5 + $0x11a0] ss:$72 sps:$4 sm:$0xff]   ;;  %v14275_v1 = vld [vmem:[#allocation5 + $0x1234] ss:$72 sps:$4 sm:$0xff]  }
 0x2ad   :  { %6124 = vmatpush1.bf16.msra.mxu1 %v14201_v37  ;;  %v14278_v37 = vld [vmem:[#allocation5 + $0x3c] ss:$72 sps:$4 sm:$0xff]  }
 0x2ae   :  { %6210 = vmatpush1.bf16.msra.mxu0 %v14204_v4  ;;  %6125 = vmatprep.subr.bf16.mxu1 %v14209_v38  ;;  %v14273_v4 = vld [vmem:[#allocation5 + $0x1230] ss:$72 sps:$4 sm:$0xff]  }
 0x2af   :  { %6211 = vmatprep.subr.bf16.mxu0 %v14212_v39  ;;  %v14276_v38 = vld [vmem:[#allocation5 + $0x38] ss:$72 sps:$4 sm:$0xff]   ;;  %v14281_v39 = vld [vmem:[#allocation5 + $0x12c4] ss:$72 sps:$4 sm:$0xff]  }
 0x2b1   :  { %6126 = vmatpush1.bf16.msra.mxu1 %v14207_v40  ;;  %v14284_v40 = vld [vmem:[#allocation5 + $0xcc] ss:$72 sps:$4 sm:$0xff]  }
 0x2b2   :  { %6212 = vmatpush1.bf16.msra.mxu0 %v14210_v41  ;;  %6127 = vmatprep.subr.bf16.mxu1 %v14215_v42  ;;  %v14279_v41 = vld [vmem:[#allocation5 + $0x12c0] ss:$72 sps:$4 sm:$0xff]  }
 0x2b3   :  { %6213 = vmatprep.subr.bf16.mxu0 %v14218_v43  ;;  %v14282_v42 = vld [vmem:[#allocation5 + $0xc8] ss:$72 sps:$4 sm:$0xff]   ;;  %v14287_v43 = vld [vmem:[#allocation5 + $0x1354] ss:$72 sps:$4 sm:$0xff]  }
 0x2b5   :  { %6128 = vmatpush1.bf16.msra.mxu1 %v14213_v45  ;;  %v14290_v45 = vld [vmem:[#allocation5 + $0x15c] ss:$72 sps:$4 sm:$0xff]  }
 0x2b6   :  { %6214 = vmatpush1.bf16.msra.mxu0 %v14216_v46  ;;  %6129 = vmatprep.subr.bf16.mxu1 %v14221_v47  ;;  %v14285_v46 = vld [vmem:[#allocation5 + $0x1350] ss:$72 sps:$4 sm:$0xff]  }
 0x2b7   :  { %6215 = vmatprep.subr.bf16.mxu0 %v14224_v48  ;;  %v14288_v47 = vld [vmem:[#allocation5 + $0x158] ss:$72 sps:$4 sm:$0xff]   ;;  %v14293_v48 = vld [vmem:[#allocation5 + $0x13e4] ss:$72 sps:$4 sm:$0xff]  }
 0x2b9   :  { %6130 = vmatpush1.bf16.msra.mxu1 %v14219_v49  ;;  %v14296_v49 = vld [vmem:[#allocation5 + $0x1ec] ss:$72 sps:$4 sm:$0xff]  }
 0x2ba   :  { %6216 = vmatpush1.bf16.msra.mxu0 %v14222_v51  ;;  %6131 = vmatprep.subr.bf16.mxu1 %v14227_v52  ;;  %v14291_v51 = vld [vmem:[#allocation5 + $0x13e0] ss:$72 sps:$4 sm:$0xff]  }
 0x2bb   :  { %6217 = vmatprep.subr.bf16.mxu0 %v14230_v53  ;;  %v14294_v52 = vld [vmem:[#allocation5 + $0x1e8] ss:$72 sps:$4 sm:$0xff]   ;;  %v14299_v53 = vld [vmem:[#allocation5 + $0x1474] ss:$72 sps:$4 sm:$0xff]  }
 0x2bd   :  { %6132 = vmatpush1.bf16.msra.mxu1 %v14225_v54  ;;  %v14302_v54 = vld [vmem:[#allocation5 + $0x27c] ss:$72 sps:$4 sm:$0xff]  }
 0x2be   :  { %6218 = vmatpush1.bf16.msra.mxu0 %v14228_v56  ;;  %6133 = vmatprep.subr.bf16.mxu1 %v14233_v57  ;;  %v14297_v56 = vld [vmem:[#allocation5 + $0x1470] ss:$72 sps:$4 sm:$0xff]  }
 0x2bf   :  { %6219 = vmatprep.subr.bf16.mxu0 %v14236_v58  ;;  %v14300_v57 = vld [vmem:[#allocation5 + $0x278] ss:$72 sps:$4 sm:$0xff]   ;;  %v14305_v58 = vld [vmem:[#allocation5 + $0x1504] ss:$72 sps:$4 sm:$0xff]  }
 0x2c1   :  { %6134 = vmatpush1.bf16.msra.mxu1 %v14231_v59  ;;  %v14308_v59 = vld [vmem:[#allocation5 + $0x30c] ss:$72 sps:$4 sm:$0xff]  }
 0x2c2   :  { %6220 = vmatpush1.bf16.msra.mxu0 %v14234_v3  ;;  %6135 = vmatprep.subr.bf16.mxu1 %v14239_v5  ;;  %v14303_v3 = vld [vmem:[#allocation5 + $0x1500] ss:$72 sps:$4 sm:$0xff]  }
 0x2c3   :  { %6221 = vmatprep.subr.bf16.mxu0 %v14242_v8  ;;  %v14306_v5 = vld [vmem:[#allocation5 + $0x308] ss:$72 sps:$4 sm:$0xff]   ;;  %v14311_v8 = vld [vmem:[#allocation5 + $0x1594] ss:$72 sps:$4 sm:$0xff]  }
 0x2c5   :  { %6136 = vmatpush1.bf16.msra.mxu1 %v14237_v10  ;;  %v14314_v10 = vld [vmem:[#allocation5 + $0x39c] ss:$72 sps:$4 sm:$0xff]  }
 0x2c6   :  { %6222 = vmatpush1.bf16.msra.mxu0 %v14240_v11  ;;  %6137 = vmatprep.subr.bf16.mxu1 %v14245_v13 }
 0x2c7   :  { %6223 = vmatprep.subr.bf16.mxu0 %v14248_v14 }
 0x2c9   :  { %6138 = vmatpush1.bf16.msra.mxu1 %v14243_v16  ;;  %v14309_v16 = vld [vmem:[#allocation5 + $0x1590] ss:$72 sps:$4 sm:$0xff]  }
 0x2ca   :  { %6224 = vmatpush1.bf16.msra.mxu0 %v14246_v17  ;;  %6139 = vmatprep.subr.bf16.mxu1 %v14251_v18  ;;  %v14312_v17 = vld [vmem:[#allocation5 + $0x398] ss:$72 sps:$4 sm:$0xff]  }
 0x2cb   :  { %6225 = vmatprep.subr.bf16.mxu0 %v14254_v19  ;;  %v14317_v19 = vld [vmem:[#allocation5 + $0x1624] ss:$72 sps:$4 sm:$0xff]  }
 0x2cd   :  { %6140 = vmatpush1.bf16.msra.mxu1 %v14249_v20  ;;  %v14320_v20 = vld [vmem:[#allocation5 + $0x42c] ss:$72 sps:$4 sm:$0xff]  }
 0x2ce   :  { %6226 = vmatpush1.bf16.msra.mxu0 %v14252_v21  ;;  %6141 = vmatprep.subr.bf16.mxu1 %v14257_v22  ;;  %v14315_v21 = vld [vmem:[#allocation5 + $0x1620] ss:$72 sps:$4 sm:$0xff]  }
 0x2cf   :  { %6227 = vmatprep.subr.bf16.mxu0 %v14260_v24  ;;  %v14318_v22 = vld [vmem:[#allocation5 + $0x428] ss:$72 sps:$4 sm:$0xff]   ;;  %v14323_v24 = vld [vmem:[#allocation5 + $0x16b4] ss:$72 sps:$4 sm:$0xff]  }
 0x2d1   :  { %6142 = vmatpush1.bf16.msra.mxu1 %v14255_v25  ;;  %v14326_v25 = vld [vmem:[#allocation5 + $0x4bc] ss:$72 sps:$4 sm:$0xff]  }
 0x2d2   :  { %6228 = vmatpush1.bf16.msra.mxu0 %v14258_v26  ;;  %6143 = vmatprep.subr.bf16.mxu1 %v14263_v27  ;;  %v14321_v26 = vld [vmem:[#allocation5 + $0x16b0] ss:$72 sps:$4 sm:$0xff]  }
 0x2d3   :  { %6229 = vmatprep.subr.bf16.mxu0 %v14266_v28  ;;  %v14324_v27 = vld [vmem:[#allocation5 + $0x4b8] ss:$72 sps:$4 sm:$0xff]   ;;  %v14329_v28 = vld [vmem:[#allocation5 + $0x1744] ss:$72 sps:$4 sm:$0xff]  }
 0x2d5   :  { %6144 = vmatpush1.bf16.msra.mxu1 %v14261_v30  ;;  %v14332_v30 = vld [vmem:[#allocation5 + $0x54c] ss:$72 sps:$4 sm:$0xff]  }
 0x2d6   :  { %6230 = vmatpush1.bf16.msra.mxu0 %v14264_v31  ;;  %6145 = vmatprep.subr.bf16.mxu1 %v14269_v33  ;;  %v14327_v31 = vld [vmem:[#allocation5 + $0x1740] ss:$72 sps:$4 sm:$0xff]  }
 0x2d7   :  { %6231 = vmatprep.subr.bf16.mxu0 %v14272_v34  ;;  %v14330_v33 = vld [vmem:[#allocation5 + $0x548] ss:$72 sps:$4 sm:$0xff]   ;;  %v14335_v34 = vld [vmem:[#allocation5 + $0x17d4] ss:$72 sps:$4 sm:$0xff]  }
 0x2d9   :  { %6146 = vmatpush1.bf16.msra.mxu1 %v14267_v0  ;;  %v14338_v0 = vld [vmem:[#allocation5 + $0x5dc] ss:$72 sps:$4 sm:$0xff]  }
 0x2da   :  { %6232 = vmatpush1.bf16.msra.mxu0 %v14270_v35  ;;  %6287 = vmatprep.subr.bf16.mxu1 %v14278_v37  ;;  %v14333_v35 = vld [vmem:[#allocation5 + $0x17d0] ss:$72 sps:$4 sm:$0xff]   ;;  %v14341_v37 = vld [vmem:[#allocation5 + $0x1864] ss:$72 sps:$4 sm:$0xff]  }
 0x2db   :  { %6244 = vmatprep.subr.bf16.mxu0 %v14275_v1  ;;  %v14336_v1 = vld [vmem:[#allocation5 + $0x5d8] ss:$72 sps:$4 sm:$0xff]  }
 0x2dc   :  { %6148 = vmatmul.mubr.bf16.vlgmr.msra.gmra.mrb[12].mxu1 %v15404_v23 }
 0x2dd   :  { %6234 = vmatmul.mubr.bf16.vlgmr.msra.gmra.mrb[12].mxu0 %v15396_v15  ;;  %6288 = vmatpush1.bf16.msra.mxu1 %v14276_v38  ;;  %v14339_v38 = vld [vmem:[#allocation5 + $0x1860] ss:$72 sps:$4 sm:$0xff]  }
 0x2de   :  { %6245 = vmatpush1.bf16.msra.mxu0 %v14273_v4  ;;  %6289 = vmatprep.subr.bf16.mxu1 %v14284_v40  ;;  %v14344_v4 = vld [vmem:[#allocation5 + $0x66c] ss:$72 sps:$4 sm:$0xff]  }
 0x2df   :  { %6246 = vmatprep.subr.bf16.mxu0 %v14281_v39  ;;  %6276 = vmatprep.mubr.bf16.mxu0 %v15401_v44  ;;  %v14342_v39 = vld [vmem:[#allocation5 + $0x668] ss:$72 sps:$4 sm:$0xff]   ;;  %v14347_v40 = vld [vmem:[#allocation5 + $0x18f4] ss:$72 sps:$4 sm:$0xff]  }
 0x2e0   :  { %6319 = vmatprep.mubr.bf16.mxu1 %v15388_v50 }
 0x2e1   :  { %6290 = vmatpush1.bf16.msra.mxu1 %v14282_v42  ;;  %v14345_v42 = vld [vmem:[#allocation5 + $0x18f0] ss:$72 sps:$4 sm:$0xff]  }
 0x2e2   :  { %6247 = vmatpush1.bf16.msra.mxu0 %v14279_v41  ;;  %6291 = vmatprep.subr.bf16.mxu1 %v14290_v45  ;;  %v14350_v41 = vld [vmem:[#allocation5 + $0x6fc] ss:$72 sps:$4 sm:$0xff]  }
 0x2e3   :  { %6248 = vmatprep.subr.bf16.mxu0 %v14287_v43  ;;  %v14348_v43 = vld [vmem:[#allocation5 + $0x6f8] ss:$72 sps:$4 sm:$0xff]   ;;  %v14353_v45 = vld [vmem:[#allocation5 + $0x1984] ss:$72 sps:$4 sm:$0xff]  }
 0x2e5   :  { %6292 = vmatpush1.bf16.msra.mxu1 %v14288_v47  ;;  %v14351_v47 = vld [vmem:[#allocation5 + $0x1980] ss:$72 sps:$4 sm:$0xff]  }
 0x2e6   :  { %6249 = vmatpush1.bf16.msra.mxu0 %v14285_v46  ;;  %6293 = vmatprep.subr.bf16.mxu1 %v14296_v49  ;;  %v14356_v46 = vld [vmem:[#allocation5 + $0x78c] ss:$72 sps:$4 sm:$0xff]  }
 0x2e7   :  { %6250 = vmatprep.subr.bf16.mxu0 %v14293_v48  ;;  %v14354_v48 = vld [vmem:[#allocation5 + $0x788] ss:$72 sps:$4 sm:$0xff]   ;;  %v14359_v49 = vld [vmem:[#allocation5 + $0x1a14] ss:$72 sps:$4 sm:$0xff]  }
 0x2e9   :  { %6294 = vmatpush1.bf16.msra.mxu1 %v14294_v52  ;;  %v14357_v52 = vld [vmem:[#allocation5 + $0x1a10] ss:$72 sps:$4 sm:$0xff]  }
 0x2ea   :  { %6251 = vmatpush1.bf16.msra.mxu0 %v14291_v51  ;;  %6295 = vmatprep.subr.bf16.mxu1 %v14302_v54  ;;  %v14362_v51 = vld [vmem:[#allocation5 + $0x81c] ss:$72 sps:$4 sm:$0xff]  }
 0x2eb   :  { %6252 = vmatprep.subr.bf16.mxu0 %v14299_v53  ;;  %v14360_v53 = vld [vmem:[#allocation5 + $0x818] ss:$72 sps:$4 sm:$0xff]   ;;  %v14365_v54 = vld [vmem:[#allocation5 + $0x1aa4] ss:$72 sps:$4 sm:$0xff]  }
 0x2ed   :  { %6296 = vmatpush1.bf16.msra.mxu1 %v14300_v57  ;;  %v14363_v57 = vld [vmem:[#allocation5 + $0x1aa0] ss:$72 sps:$4 sm:$0xff]  }
 0x2ee   :  { %6253 = vmatpush1.bf16.msra.mxu0 %v14297_v56  ;;  %6297 = vmatprep.subr.bf16.mxu1 %v14308_v59  ;;  %v14368_v56 = vld [vmem:[#allocation5 + $0x8ac] ss:$72 sps:$4 sm:$0xff]   ;;  %v14371_v59 = vld [vmem:[#allocation5 + $0x93c] ss:$72 sps:$4 sm:$0xff]  }
 0x2ef   :  { %6254 = vmatprep.subr.bf16.mxu0 %v14305_v58  ;;  %v15480_v11 = vpop.f32.mrb[8].mxu1  ;;  %v14366_v58 = vld [vmem:[#allocation5 + $0x8a8] ss:$72 sps:$4 sm:$0xff]  }
 0x2f0   :  { %v15482_v13 = vpop.f32.mrb[9].mxu1 }
 0x2f1   :  { %v15484_v14 = vpop.f32.mrb[10].mxu1  ;;  %6298 = vmatpush1.bf16.msra.mxu1 %v14306_v5  ;;  %v14369_v5 = vld [vmem:[#allocation5 + $0x938] ss:$72 sps:$4 sm:$0xff]  }
 0x2f2   :  { %6255 = vmatpush1.bf16.msra.mxu0 %v14303_v3  ;;  %v15486_v18 = vpop.f32.mrb[11].mxu1  ;;  %6299 = vmatprep.subr.bf16.mxu1 %v14314_v10  ;;  %v14374_v3 = vld [vmem:[#allocation5 + $0x44] ss:$72 sps:$4 sm:$0xff]  }
 0x2f3   :  { %6256 = vmatprep.subr.bf16.mxu0 %v14311_v8  ;;  %v14372_v8 = vld [vmem:[#allocation5 + $0x40] ss:$72 sps:$4 sm:$0xff]   ;;  %v14377_v10 = vld [vmem:[#allocation5 + $0x9cc] ss:$72 sps:$4 sm:$0xff]  }
 0x2f5   :  { %6300 = vmatpush1.bf16.msra.mxu1 %v14312_v17  ;;  %v14375_v17 = vld [vmem:[#allocation5 + $0x9c8] ss:$72 sps:$4 sm:$0xff]  }
 0x2f6   :  { %6257 = vmatpush1.bf16.msra.mxu0 %v14309_v16  ;;  %6301 = vmatprep.subr.bf16.mxu1 %v14320_v20  ;;  %v14380_v16 = vld [vmem:[#allocation5 + $0xd4] ss:$72 sps:$4 sm:$0xff]  }
 0x2f7   :  { %6258 = vmatprep.subr.bf16.mxu0 %v14317_v19  ;;  %v14378_v19 = vld [vmem:[#allocation5 + $0xd0] ss:$72 sps:$4 sm:$0xff]   ;;  %v14383_v20 = vld [vmem:[#allocation5 + $0xa5c] ss:$72 sps:$4 sm:$0xff]  }
 0x2f9   :  { %6302 = vmatpush1.bf16.msra.mxu1 %v14318_v22  ;;  %v14381_v22 = vld [vmem:[#allocation5 + $0xa58] ss:$72 sps:$4 sm:$0xff]  }
 0x2fa   :  { %6259 = vmatpush1.bf16.msra.mxu0 %v14315_v21  ;;  %6303 = vmatprep.subr.bf16.mxu1 %v14326_v25  ;;  %v14386_v21 = vld [vmem:[#allocation5 + $0x164] ss:$72 sps:$4 sm:$0xff]  }
 0x2fb   :  { %6260 = vmatprep.subr.bf16.mxu0 %v14323_v24  ;;  %v14384_v24 = vld [vmem:[#allocation5 + $0x160] ss:$72 sps:$4 sm:$0xff]   ;;  %v14389_v25 = vld [vmem:[#allocation5 + $0xaec] ss:$72 sps:$4 sm:$0xff]  }
 0x2fd   :  { %6304 = vmatpush1.bf16.msra.mxu1 %v14324_v27  ;;  %v14387_v27 = vld [vmem:[#allocation5 + $0xae8] ss:$72 sps:$4 sm:$0xff]  }
 0x2fe   :  { %6261 = vmatpush1.bf16.msra.mxu0 %v14321_v26  ;;  %6305 = vmatprep.subr.bf16.mxu1 %v14332_v30  ;;  %v14392_v26 = vld [vmem:[#allocation5 + $0x1f4] ss:$72 sps:$4 sm:$0xff]  }
 0x2ff   :  { %6262 = vmatprep.subr.bf16.mxu0 %v14329_v28  ;;  %v14390_v28 = vld [vmem:[#allocation5 + $0x1f0] ss:$72 sps:$4 sm:$0xff]   ;;  %v14395_v30 = vld [vmem:[#allocation5 + $0xb7c] ss:$72 sps:$4 sm:$0xff]  }
 0x301   :  { %6306 = vmatpush1.bf16.msra.mxu1 %v14330_v33  ;;  %v14393_v33 = vld [vmem:[#allocation5 + $0xb78] ss:$72 sps:$4 sm:$0xff]  }
 0x302   :  { %6263 = vmatpush1.bf16.msra.mxu0 %v14327_v31  ;;  %6307 = vmatprep.subr.bf16.mxu1 %v14338_v0  ;;  %v14398_v31 = vld [vmem:[#allocation5 + $0x284] ss:$72 sps:$4 sm:$0xff]   ;;  %v14404_v0 = vld [vmem:[#allocation5 + $0x314] ss:$72 sps:$4 sm:$0xff]  }
 0x303   :  { %6264 = vmatprep.subr.bf16.mxu0 %v14335_v34  ;;  %v14401_v34 = vld [vmem:[#allocation5 + $0xc0c] ss:$72 sps:$4 sm:$0xff]  }
 0x305   :  { %6308 = vmatpush1.bf16.msra.mxu1 %v14336_v1  ;;  %v15495_v1 = vpop.f32.mrb[4].mxu0 }
 0x306   :  { %6265 = vmatpush1.bf16.msra.mxu0 %v14333_v35  ;;  %6309 = vmatprep.subr.bf16.mxu1 %v14344_v4  ;;  %v15493_v35 = vsub.s32 4, %v15430_v60 }
 0x307   :  { %6266 = vmatprep.subr.bf16.mxu0 %v14341_v37  ;;  %v15497_v37 = vld [vmem:[#allocation7] sm:$0xff] }
 0x308   :  { %v15501_v4 = vrot.slane %v15497_v37, %v15493_v35 }
 0x309   :  { %6310 = vmatpush1.bf16.msra.mxu1 %v14342_v39  ;;  %v14402_v39 = vld [vmem:[#allocation5 + $0x310] ss:$72 sps:$4 sm:$0xff]  }
 0x30a   :  { %6267 = vmatpush1.bf16.msra.mxu0 %v14339_v38  ;;  %6311 = vmatprep.subr.bf16.mxu1 %v14350_v41  ;;  %v14399_v38 = vld [vmem:[#allocation5 + $0xc08] ss:$72 sps:$4 sm:$0xff]   ;;  %v14407_v41 = vld [vmem:[#allocation5 + $0xc9c] ss:$72 sps:$4 sm:$0xff]  }
 0x30b   :  { %6268 = vmatprep.subr.bf16.mxu0 %v14347_v40  ;;  %v15503_v40 = vpop.f32.mrb[5].mxu0 }
 0x30d   :  { %6312 = vmatpush1.bf16.msra.mxu1 %v14348_v43  ;;  %v5766_v43 = vpop.f32.mrb[6].mxu0 }
 0x30e   :  { %6269 = vmatpush1.bf16.msra.mxu0 %v14345_v42  ;;  %6313 = vmatprep.subr.bf16.mxu1 %v14356_v46  ;;  %v14410_v42 = vld [vmem:[#allocation5 + $0x3a4] ss:$72 sps:$4 sm:$0xff]   ;;  %v15508_v46 = vpop.f32.mrb[7].mxu0 }
 0x30f   :  { %6270 = vmatprep.subr.bf16.mxu0 %v14353_v45  ;;  %v15506_v45 = vadd.f32 %v5766_v43, %v15501_v4  ;;  %v14459_v43 = vld [vmem:[#allocation5 + $0x11a8] ss:$72 sps:$4 sm:$0xff]  }
 0x311   :  { %6314 = vmatpush1.bf16.msra.mxu1 %v14354_v48  ;;  %v14408_v48 = vld [vmem:[#allocation5 + $0x3a0] ss:$72 sps:$4 sm:$0xff]  }
 0x312   :  { %6271 = vmatpush1.bf16.msra.mxu0 %v14351_v47  ;;  %6315 = vmatprep.subr.bf16.mxu1 %v14362_v51  ;;  %v14405_v47 = vld [vmem:[#allocation5 + $0xc98] ss:$72 sps:$4 sm:$0xff]   ;;  %v14416_v51 = vld [vmem:[#allocation5 + $0x434] ss:$72 sps:$4 sm:$0xff]  }
 0x313   :  { %6272 = vmatprep.subr.bf16.mxu0 %v14359_v49  ;;  %v14413_v49 = vld [vmem:[#allocation5 + $0xd2c] ss:$72 sps:$4 sm:$0xff]  }
 0x315   :  { %6316 = vmatpush1.bf16.msra.mxu1 %v14360_v53  ;;  %v14414_v53 = vld [vmem:[#allocation5 + $0x430] ss:$72 sps:$4 sm:$0xff]  }
 0x316   :  { %6273 = vmatpush1.bf16.msra.mxu0 %v14357_v52  ;;  %6317 = vmatprep.subr.bf16.mxu1 %v14368_v56  ;;  %v14411_v52 = vld [vmem:[#allocation5 + $0xd28] ss:$72 sps:$4 sm:$0xff]   ;;  %v14422_v56 = vld [vmem:[#allocation5 + $0x4c4] ss:$72 sps:$4 sm:$0xff]  }
 0x317   :  { %6274 = vmatprep.subr.bf16.mxu0 %v14365_v54  ;;  %v14419_v54 = vld [vmem:[#allocation5 + $0xdbc] ss:$72 sps:$4 sm:$0xff]  }
 0x319   :  { %6318 = vmatpush1.bf16.msra.mxu1 %v14366_v58  ;;  %v14420_v58 = vld [vmem:[#allocation5 + $0x4c0] ss:$72 sps:$4 sm:$0xff]  }
 0x31a   :  { %6275 = vmatpush1.bf16.msra.mxu0 %v14363_v57  ;;  %6330 = vmatprep.subr.bf16.mxu1 %v14371_v59  ;;  %v14417_v57 = vld [vmem:[#allocation5 + $0xdb8] ss:$72 sps:$4 sm:$0xff]   ;;  %v14425_v59 = vld [vmem:[#allocation5 + $0xe4c] ss:$72 sps:$4 sm:$0xff]  }
 0x31b   :  { %6416 = vmatprep.subr.bf16.mxu0 %v14374_v3  ;;  %v14428_v3 = vld [vmem:[#allocation5 + $0x554] ss:$72 sps:$4 sm:$0xff]  }
 0x31c   :  { %6320 = vmatmul.mubr.bf16.vlgmr.msra.gmra.mrb[16].mxu1 %v15394_v12 }
 0x31d   :  { %6277 = vmatmul.mubr.bf16.vlgmr.msra.gmra.mrb[12].mxu0 %v15404_v23  ;;  %6331 = vmatpush1.bf16.msra.mxu1 %v14369_v5  ;;  %v14423_v5 = vld [vmem:[#allocation5 + $0xe48] ss:$72 sps:$4 sm:$0xff]  }
 0x31e   :  { %6417 = vmatpush1.bf16.msra.mxu0 %v14372_v8  ;;  %6332 = vmatprep.subr.bf16.mxu1 %v14377_v10  ;;  %v14426_v8 = vld [vmem:[#allocation5 + $0x550] ss:$72 sps:$4 sm:$0xff]   ;;  %v14431_v10 = vld [vmem:[#allocation5 + $0xedc] ss:$72 sps:$4 sm:$0xff]  }
 0x31f   :  { %6418 = vmatprep.subr.bf16.mxu0 %v14380_v16  ;;  %6362 = vmatprep.mubr.bf16.mxu1 %v15390_v55  ;;  %v14434_v16 = vld [vmem:[#allocation5 + $0x5e4] ss:$72 sps:$4 sm:$0xff]  }
 0x320   :  { %6448 = vmatprep.mubr.bf16.mxu0 %v15388_v50  ;;  %v14396_v50 = vld [vmem:[#allocation5 + $0x280] ss:$72 sps:$4 sm:$0xff]  }
 0x321   :  { %6333 = vmatpush1.bf16.msra.mxu1 %v14375_v17  ;;  %v14429_v17 = vld [vmem:[#allocation5 + $0xed8] ss:$72 sps:$4 sm:$0xff]  }
 0x322   :  { %6419 = vmatpush1.bf16.msra.mxu0 %v14378_v19  ;;  %6334 = vmatprep.subr.bf16.mxu1 %v14383_v20  ;;  %v14432_v19 = vld [vmem:[#allocation5 + $0x5e0] ss:$72 sps:$4 sm:$0xff]   ;;  %v14437_v20 = vld [vmem:[#allocation5 + $0xf6c] ss:$72 sps:$4 sm:$0xff]  }
 0x323   :  { %6420 = vmatprep.subr.bf16.mxu0 %v14386_v21  ;;  %v14440_v21 = vld [vmem:[#allocation5 + $0x674] ss:$72 sps:$4 sm:$0xff]  }
 0x325   :  { %6335 = vmatpush1.bf16.msra.mxu1 %v14381_v22  ;;  %v14435_v22 = vld [vmem:[#allocation5 + $0xf68] ss:$72 sps:$4 sm:$0xff]  }
 0x326   :  { %6421 = vmatpush1.bf16.msra.mxu0 %v14384_v24  ;;  %6336 = vmatprep.subr.bf16.mxu1 %v14389_v25  ;;  %v14438_v24 = vld [vmem:[#allocation5 + $0x670] ss:$72 sps:$4 sm:$0xff]   ;;  %v14443_v25 = vld [vmem:[#allocation5 + $0xffc] ss:$72 sps:$4 sm:$0xff]  }
 0x327   :  { %6422 = vmatprep.subr.bf16.mxu0 %v14392_v26  ;;  %v14446_v26 = vld [vmem:[#allocation5 + $0x704] ss:$72 sps:$4 sm:$0xff]  }
 0x329   :  { %6337 = vmatpush1.bf16.msra.mxu1 %v14387_v27  ;;  %v14441_v27 = vld [vmem:[#allocation5 + $0xff8] ss:$72 sps:$4 sm:$0xff]  }
 0x32a   :  { %6423 = vmatpush1.bf16.msra.mxu0 %v14390_v28  ;;  %6338 = vmatprep.subr.bf16.mxu1 %v14395_v30  ;;  %v14444_v28 = vld [vmem:[#allocation5 + $0x700] ss:$72 sps:$4 sm:$0xff]   ;;  %v14449_v30 = vld [vmem:[#allocation5 + $0x108c] ss:$72 sps:$4 sm:$0xff]  }
 0x32b   :  { %6424 = vmatprep.subr.bf16.mxu0 %v14398_v31  ;;  %v14452_v31 = vld [vmem:[#allocation5 + $0x794] ss:$72 sps:$4 sm:$0xff]  }
 0x32d   :  { %6339 = vmatpush1.bf16.msra.mxu1 %v14393_v33  ;;  %v14447_v33 = vld [vmem:[#allocation5 + $0x1088] ss:$72 sps:$4 sm:$0xff]  }
 0x32e   :  { %6425 = vmatpush1.bf16.msra.mxu0 %v14396_v50  ;;  %6340 = vmatprep.subr.bf16.mxu1 %v14401_v34  ;;  %v14450_v50 = vld [vmem:[#allocation5 + $0x790] ss:$72 sps:$4 sm:$0xff]   ;;  %v14455_v34 = vld [vmem:[#allocation5 + $0x111c] ss:$72 sps:$4 sm:$0xff]  }
 0x32f   :  { %6426 = vmatprep.subr.bf16.mxu0 %v14404_v0  ;;  %v14458_v0 = vld [vmem:[#allocation5 + $0x824] ss:$72 sps:$4 sm:$0xff]  }
 0x331   :  { %6341 = vmatpush1.bf16.msra.mxu1 %v14399_v38  ;;  %v14453_v38 = vld [vmem:[#allocation5 + $0x1118] ss:$72 sps:$4 sm:$0xff]  }
 0x332   :  { %6427 = vmatpush1.bf16.msra.mxu0 %v14402_v39  ;;  %6342 = vmatprep.subr.bf16.mxu1 %v14407_v41  ;;  %v14456_v39 = vld [vmem:[#allocation5 + $0x820] ss:$72 sps:$4 sm:$0xff]   ;;  %v14461_v41 = vld [vmem:[#allocation5 + $0x11ac] ss:$72 sps:$4 sm:$0xff]  }
 0x333   :  { %6428 = vmatprep.subr.bf16.mxu0 %v14410_v42  ;;  %v14464_v42 = vld [vmem:[#allocation5 + $0x8b4] ss:$72 sps:$4 sm:$0xff]  }
 0x335   :  { %6343 = vmatpush1.bf16.msra.mxu1 %v14405_v47  ;;  %v14462_v47 = vld [vmem:[#allocation5 + $0x8b0] ss:$72 sps:$4 sm:$0xff]  }
 0x336   :  { %6429 = vmatpush1.bf16.msra.mxu0 %v14408_v48  ;;  %6344 = vmatprep.subr.bf16.mxu1 %v14413_v49  ;;  %v14467_v48 = vld [vmem:[#allocation5 + $0x123c] ss:$72 sps:$4 sm:$0xff]  }
 0x337   :  { %6430 = vmatprep.subr.bf16.mxu0 %v14416_v51  ;;  %v14470_v49 = vld [vmem:[#allocation5 + $0x944] ss:$72 sps:$4 sm:$0xff]   ;;  %v14465_v51 = vld [vmem:[#allocation5 + $0x1238] ss:$72 sps:$4 sm:$0xff]  }
 0x339   :  { %6345 = vmatpush1.bf16.msra.mxu1 %v14411_v52  ;;  %v14468_v52 = vld [vmem:[#allocation5 + $0x940] ss:$72 sps:$4 sm:$0xff]  }
 0x33a   :  { %6431 = vmatpush1.bf16.msra.mxu0 %v14414_v53  ;;  %6346 = vmatprep.subr.bf16.mxu1 %v14419_v54  ;;  %v14473_v53 = vld [vmem:[#allocation5 + $0x12cc] ss:$72 sps:$4 sm:$0xff]  }
 0x33b   :  { %6432 = vmatprep.subr.bf16.mxu0 %v14422_v56  ;;  %v14476_v54 = vld [vmem:[#allocation5 + $0x9d4] ss:$72 sps:$4 sm:$0xff]   ;;  %v14471_v56 = vld [vmem:[#allocation5 + $0x12c8] ss:$72 sps:$4 sm:$0xff]  }
 0x33d   :  { %6347 = vmatpush1.bf16.msra.mxu1 %v14417_v57  ;;  %v14474_v57 = vld [vmem:[#allocation5 + $0x9d0] ss:$72 sps:$4 sm:$0xff]  }
 0x33e   :  { %6433 = vmatpush1.bf16.msra.mxu0 %v14420_v58  ;;  %6348 = vmatprep.subr.bf16.mxu1 %v14425_v59  ;;  %v14479_v58 = vld [vmem:[#allocation5 + $0x135c] ss:$72 sps:$4 sm:$0xff]  }
 0x33f   :  { %6434 = vmatprep.subr.bf16.mxu0 %v14428_v3  ;;  %v14482_v59 = vld [vmem:[#allocation5 + $0xa64] ss:$72 sps:$4 sm:$0xff]   ;;  %v14477_v3 = vld [vmem:[#allocation5 + $0x1358] ss:$72 sps:$4 sm:$0xff]  }
 0x341   :  { %6349 = vmatpush1.bf16.msra.mxu1 %v14423_v5  ;;  %v14480_v5 = vld [vmem:[#allocation5 + $0xa60] ss:$72 sps:$4 sm:$0xff]  }
 0x342   :  { %6435 = vmatpush1.bf16.msra.mxu0 %v14426_v8  ;;  %6350 = vmatprep.subr.bf16.mxu1 %v14431_v10  ;;  %v14485_v8 = vld [vmem:[#allocation5 + $0x13ec] ss:$72 sps:$4 sm:$0xff]   ;;  %v14483_v10 = vld [vmem:[#allocation5 + $0x13e8] ss:$72 sps:$4 sm:$0xff]  }
 0x343   :  { %6436 = vmatprep.subr.bf16.mxu0 %v14434_v16  ;;  %v14486_v16 = vld [vmem:[#allocation5 + $0xaf0] ss:$72 sps:$4 sm:$0xff]  }
 0x345   :  { %6351 = vmatpush1.bf16.msra.mxu1 %v14429_v17  ;;  %v14491_v17 = vld [vmem:[#allocation5 + $0x147c] ss:$72 sps:$4 sm:$0xff]  }
 0x346   :  { %6437 = vmatpush1.bf16.msra.mxu0 %v14432_v19  ;;  %6352 = vmatprep.subr.bf16.mxu1 %v14437_v20  ;;  %v14494_v19 = vld [vmem:[#allocation5 + $0xb84] ss:$72 sps:$4 sm:$0xff]   ;;  %v14489_v20 = vld [vmem:[#allocation5 + $0x1478] ss:$72 sps:$4 sm:$0xff]  }
 0x347   :  { %6438 = vmatprep.subr.bf16.mxu0 %v14440_v21  ;;  %v15514_v21 = vpop.f32.mrb[8].mxu0 }
 0x349   :  { %6353 = vmatpush1.bf16.msra.mxu1 %v14435_v22  ;;  %v14497_v22 = vld [vmem:[#allocation5 + $0x150c] ss:$72 sps:$4 sm:$0xff]  }
 0x34a   :  { %6439 = vmatpush1.bf16.msra.mxu0 %v14438_v24  ;;  %6354 = vmatprep.subr.bf16.mxu1 %v14443_v25  ;;  %v14500_v24 = vld [vmem:[#allocation5 + $0xc14] ss:$72 sps:$4 sm:$0xff]   ;;  %v15516_v25 = vpop.f32.mrb[9].mxu0 }
 0x34b   :  { %6440 = vmatprep.subr.bf16.mxu0 %v14446_v26  ;;  %v15518_v26 = vpop.f32.mrb[10].mxu0 }
 0x34d   :  { %6355 = vmatpush1.bf16.msra.mxu1 %v14441_v27  ;;  %v14495_v27 = vld [vmem:[#allocation5 + $0x1508] ss:$72 sps:$4 sm:$0xff]  }
 0x34e   :  { %6441 = vmatpush1.bf16.msra.mxu0 %v14444_v28  ;;  %6356 = vmatprep.subr.bf16.mxu1 %v14449_v30  ;;  %v14498_v28 = vld [vmem:[#allocation5 + $0xc10] ss:$72 sps:$4 sm:$0xff]   ;;  %v14503_v30 = vld [vmem:[#allocation5 + $0x159c] ss:$72 sps:$4 sm:$0xff]  }
 0x34f   :  { %6442 = vmatprep.subr.bf16.mxu0 %v14452_v31  ;;  %v14506_v31 = vld [vmem:[#allocation5 + $0xca4] ss:$72 sps:$4 sm:$0xff]  }
 0x351   :  { %6357 = vmatpush1.bf16.msra.mxu1 %v14447_v33  ;;  %v14501_v33 = vld [vmem:[#allocation5 + $0x1598] ss:$72 sps:$4 sm:$0xff]  }
 0x352   :  { %6443 = vmatpush1.bf16.msra.mxu0 %v14450_v50  ;;  %6358 = vmatprep.subr.bf16.mxu1 %v14455_v34  ;;  %v14504_v50 = vld [vmem:[#allocation5 + $0xca0] ss:$72 sps:$4 sm:$0xff]   ;;  %v14509_v34 = vld [vmem:[#allocation5 + $0x162c] ss:$72 sps:$4 sm:$0xff]  }
 0x353   :  { %6444 = vmatprep.subr.bf16.mxu0 %v14458_v0  ;;  %v14512_v0 = vld [vmem:[#allocation5 + $0xd34] ss:$72 sps:$4 sm:$0xff]  }
 0x355   :  { %6359 = vmatpush1.bf16.msra.mxu1 %v14453_v38  ;;  %v14507_v38 = vld [vmem:[#allocation5 + $0x1628] ss:$72 sps:$4 sm:$0xff]  }
 0x356   :  { %6445 = vmatpush1.bf16.msra.mxu0 %v14456_v39  ;;  %6360 = vmatprep.subr.bf16.mxu1 %v14461_v41  ;;  %v14510_v39 = vld [vmem:[#allocation5 + $0xd30] ss:$72 sps:$4 sm:$0xff]   ;;  %v14515_v41 = vld [vmem:[#allocation5 + $0x16bc] ss:$72 sps:$4 sm:$0xff]  }
 0x357   :  { %6446 = vmatprep.subr.bf16.mxu0 %v14464_v42  ;;  %v14518_v42 = vld [vmem:[#allocation5 + $0xdc4] ss:$72 sps:$4 sm:$0xff]  }
 0x359   :  { %6361 = vmatpush1.bf16.msra.mxu1 %v14459_v43  ;;  %v14513_v43 = vld [vmem:[#allocation5 + $0x16b8] ss:$72 sps:$4 sm:$0xff]  }
 0x35a   :  { %6447 = vmatpush1.bf16.msra.mxu0 %v14462_v47  ;;  %6373 = vmatprep.subr.bf16.mxu1 %v14467_v48  ;;  %v14516_v47 = vld [vmem:[#allocation5 + $0xdc0] ss:$72 sps:$4 sm:$0xff]   ;;  %v14521_v48 = vld [vmem:[#allocation5 + $0x174c] ss:$72 sps:$4 sm:$0xff]  }
 0x35b   :  { %6459 = vmatprep.subr.bf16.mxu0 %v14470_v49  ;;  %v14524_v49 = vld [vmem:[#allocation5 + $0xe54] ss:$72 sps:$4 sm:$0xff]  }
 0x35c   :  { %6363 = vmatmul.mubr.bf16.vlgmr.msra.gmra.mrb[16].mxu1 %v15396_v15 }
 0x35d   :  { %6449 = vmatmul.mubr.bf16.vlgmr.msra.gmra.mrb[16].mxu0 %v15394_v12  ;;  %6374 = vmatpush1.bf16.msra.mxu1 %v14465_v51  ;;  %v14488_v12 = vld [vmem:[#allocation5 + $0xaf4] ss:$72 sps:$4 sm:$0xff]   ;;  %v14519_v51 = vld [vmem:[#allocation5 + $0x1748] ss:$72 sps:$4 sm:$0xff]  }
 0x35e   :  { %6460 = vmatpush1.bf16.msra.mxu0 %v14468_v52  ;;  %6375 = vmatprep.subr.bf16.mxu1 %v14473_v53  ;;  %v14522_v52 = vld [vmem:[#allocation5 + $0xe50] ss:$72 sps:$4 sm:$0xff]   ;;  %v14527_v53 = vld [vmem:[#allocation5 + $0x17dc] ss:$72 sps:$4 sm:$0xff]  }
 0x35f   :  { %6461 = vmatprep.subr.bf16.mxu0 %v14476_v54  ;;  %6405 = vmatprep.mubr.bf16.mxu1 %v15401_v44  ;;  %v14530_v54 = vld [vmem:[#allocation5 + $0xee4] ss:$72 sps:$4 sm:$0xff]  }
 0x360   :  { %6491 = vmatprep.mubr.bf16.mxu0 %v15390_v55  ;;  %v14492_v55 = vld [vmem:[#allocation5 + $0xb80] ss:$72 sps:$4 sm:$0xff]  }
 0x361   :  { %6376 = vmatpush1.bf16.msra.mxu1 %v14471_v56  ;;  %v14525_v56 = vld [vmem:[#allocation5 + $0x17d8] ss:$72 sps:$4 sm:$0xff]  }
 0x362   :  { %6462 = vmatpush1.bf16.msra.mxu0 %v14474_v57  ;;  %6377 = vmatprep.subr.bf16.mxu1 %v14479_v58  ;;  %v14528_v57 = vld [vmem:[#allocation5 + $0xee0] ss:$72 sps:$4 sm:$0xff]   ;;  %v14533_v58 = vld [vmem:[#allocation5 + $0x186c] ss:$72 sps:$4 sm:$0xff]  }
 0x363   :  { %6463 = vmatprep.subr.bf16.mxu0 %v14482_v59  ;;  %v14536_v59 = vld [vmem:[#allocation5 + $0xf74] ss:$72 sps:$4 sm:$0xff]  }
 0x365   :  { %6378 = vmatpush1.bf16.msra.mxu1 %v14477_v3  ;;  %v14531_v3 = vld [vmem:[#allocation5 + $0x1868] ss:$72 sps:$4 sm:$0xff]  }
 0x366   :  { %6464 = vmatpush1.bf16.msra.mxu0 %v14480_v5  ;;  %6379 = vmatprep.subr.bf16.mxu1 %v14485_v8  ;;  %v14534_v5 = vld [vmem:[#allocation5 + $0xf70] ss:$72 sps:$4 sm:$0xff]   ;;  %v14539_v8 = vld [vmem:[#allocation5 + $0x18fc] ss:$72 sps:$4 sm:$0xff]  }
 0x367   :  { %6465 = vmatprep.subr.bf16.mxu0 %v14488_v12  ;;  %v14542_v12 = vld [vmem:[#allocation5 + $0x1004] ss:$72 sps:$4 sm:$0xff]  }
 0x369   :  { %6380 = vmatpush1.bf16.msra.mxu1 %v14483_v10  ;;  %v14537_v10 = vld [vmem:[#allocation5 + $0x18f8] ss:$72 sps:$4 sm:$0xff]  }
 0x36a   :  { %6466 = vmatpush1.bf16.msra.mxu0 %v14486_v16  ;;  %6381 = vmatprep.subr.bf16.mxu1 %v14491_v17  ;;  %v14540_v16 = vld [vmem:[#allocation5 + $0x1000] ss:$72 sps:$4 sm:$0xff]   ;;  %v14545_v17 = vld [vmem:[#allocation5 + $0x198c] ss:$72 sps:$4 sm:$0xff]  }
 0x36b   :  { %6467 = vmatprep.subr.bf16.mxu0 %v14494_v19  ;;  %v14548_v19 = vld [vmem:[#allocation5 + $0x1094] ss:$72 sps:$4 sm:$0xff]  }
 0x36d   :  { %6382 = vmatpush1.bf16.msra.mxu1 %v14489_v20  ;;  %v14543_v20 = vld [vmem:[#allocation5 + $0x1988] ss:$72 sps:$4 sm:$0xff]  }
 0x36e   :  { %6468 = vmatpush1.bf16.msra.mxu0 %v14492_v55  ;;  %6383 = vmatprep.subr.bf16.mxu1 %v14497_v22  ;;  %v14546_v55 = vld [vmem:[#allocation5 + $0x1090] ss:$72 sps:$4 sm:$0xff]   ;;  %v14551_v22 = vld [vmem:[#allocation5 + $0x1a1c] ss:$72 sps:$4 sm:$0xff]  }
 0x36f   :  { %6469 = vmatprep.subr.bf16.mxu0 %v14500_v24  ;;  %v14554_v24 = vld [vmem:[#allocation5 + $0x1124] ss:$72 sps:$4 sm:$0xff]  }
 0x371   :  { %6384 = vmatpush1.bf16.msra.mxu1 %v14495_v27  ;;  %v1000_v27 = vsub.s32 6, %v15430_v60 }
 0x372   :  { %6470 = vmatpush1.bf16.msra.mxu0 %v14498_v28  ;;  %6385 = vmatprep.subr.bf16.mxu1 %v14503_v30  ;;  %v14549_v28 = vld [vmem:[#allocation5 + $0x1a18] ss:$72 sps:$4 sm:$0xff]  }
 0x373   :  { %6471 = vmatprep.subr.bf16.mxu0 %v14506_v31  ;;  %v14552_v30 = vld [vmem:[#allocation5 + $0x1120] ss:$72 sps:$4 sm:$0xff]   ;;  %v14557_v31 = vld [vmem:[#allocation5 + $0x1aac] ss:$72 sps:$4 sm:$0xff]  }
 0x375   :  { %6386 = vmatpush1.bf16.msra.mxu1 %v14501_v33  ;;  %v14560_v33 = vld [vmem:[#allocation5 + $0x11b4] ss:$72 sps:$4 sm:$0xff]  }
 0x376   :  { %6472 = vmatpush1.bf16.msra.mxu0 %v14504_v50  ;;  %6387 = vmatprep.subr.bf16.mxu1 %v14509_v34  ;;  %v1001_v50 = vrot.slane %v15497_v37, %v1000_v27  ;;  %v14555_v34 = vld [vmem:[#allocation5 + $0x1aa8] ss:$72 sps:$4 sm:$0xff]  }
 0x377   :  { %6473 = vmatprep.subr.bf16.mxu0 %v14512_v0  ;;  %v14558_v0 = vld [vmem:[#allocation5 + $0x11b0] ss:$72 sps:$4 sm:$0xff]  }
 0x379   :  { %6388 = vmatpush1.bf16.msra.mxu1 %v14507_v38  ;;  %v14563_v38 = vld [vmem:[#allocation5 + $0x1244] ss:$72 sps:$4 sm:$0xff]  }
 0x37a   :  { %6474 = vmatpush1.bf16.msra.mxu0 %v14510_v39  ;;  %6389 = vmatprep.subr.bf16.mxu1 %v14515_v41  ;;  %v13140_v39 = vadd.f32 %v15480_v11, %v1001_v50  ;;  %v14561_v41 = vld [vmem:[#allocation5 + $0x1240] ss:$72 sps:$4 sm:$0xff]   ;;  %v14569_v11 = vld [vmem:[#allocation5 + $0x1364] ss:$72 sps:$4 sm:$0xff]  }
 0x37b   :  { %6475 = vmatprep.subr.bf16.mxu0 %v14518_v42  ;;  %v14566_v42 = vld [vmem:[#allocation5 + $0x12d4] ss:$72 sps:$4 sm:$0xff]  }
 0x37d   :  { %6390 = vmatpush1.bf16.msra.mxu1 %v14513_v43  ;;  %v15291_v43 = vmov 0.0  }
 0x37e   :  { %6476 = vmatpush1.bf16.msra.mxu0 %v14516_v47  ;;  %6391 = vmatprep.subr.bf16.mxu1 %v14521_v48  ;;  %v15528_v47 = vpack.c.bf16 %v13140_v39, %v13140_v39  ;;  %v14564_v48 = vld [vmem:[#allocation5 + $0x12d0] ss:$72 sps:$4 sm:$0xff]   ;;  %v14597_v39 = vld [vmem:[#allocation5 + $0x1900] ss:$72 sps:$4 sm:$0xff]  }
 0x37f   :  { %6477 = vmatprep.subr.bf16.mxu0 %v14524_v49 }
 0x380   :  { %v6583_v49 = vsel %vm6578_vm1, %v15528_v47, 0 }
 0x381   :  { %6392 = vmatpush1.bf16.msra.mxu1 %v14519_v51  ;;  %v13142_v51 = vadd.f32 %v15484_v14, %v1001_v50  ;;  %v14591_v50 = vld [vmem:[#allocation5 + $0x17e0] ss:$72 sps:$4 sm:$0xff]  }
 0x382   :  { %6478 = vmatpush1.bf16.msra.mxu0 %v14522_v52  ;;  %6393 = vmatprep.subr.bf16.mxu1 %v14527_v53  ;;  %v14572_v52 = vld [vmem:[#allocation5 + $0x13f4] ss:$72 sps:$4 sm:$0xff]  }
 0x383   :  { %6479 = vmatprep.subr.bf16.mxu0 %v14530_v54  ;;  %v15537_v53 = vpack.c.bf16 %v13142_v51, %v13142_v51  ;;  %v14570_v54 = vld [vmem:[#allocation5 + $0x13f0] ss:$72 sps:$4 sm:$0xff]  }
 0x384   :  { %v14606_v51 = vld [vmem:[#allocation5 + $0x1ab0] ss:$72 sps:$4 sm:$0xff]  }
 0x385   :  { %6394 = vmatpush1.bf16.msra.mxu1 %v14525_v56  ;;  %v14575_v56 = vld [vmem:[#allocation5 + $0x1484] ss:$72 sps:$4 sm:$0xff]   ;;  %v6629_v14 = vsel %vm6578_vm1, %v15537_v53, 0 }
 0x386   :  { %6480 = vmatpush1.bf16.msra.mxu0 %v14528_v57  ;;  %6395 = vmatprep.subr.bf16.mxu1 %v14533_v58  ;;  %v14573_v57 = vld [vmem:[#allocation5 + $0x1480] ss:$72 sps:$4 sm:$0xff]   ;;  %v14578_v58 = vld [vmem:[#allocation5 + $0x1514] ss:$72 sps:$4 sm:$0xff]  }
 0x387   :  { %6481 = vmatprep.subr.bf16.mxu0 %v14536_v59  ;;  %v15550_v59 = vld [vmem:[#allocation7 + $0x8] sm:$0xff] }
 0x389   :  { %6396 = vmatpush1.bf16.msra.mxu1 %v14531_v3  ;;  %v15553_v3 = vsub.s32 2, %v15430_v60 }
 0x38a   :  { %6482 = vmatpush1.bf16.msra.mxu0 %v14534_v5  ;;  %6397 = vmatprep.subr.bf16.mxu1 %v14539_v8  ;;  %v14581_v5 = vld [vmem:[#allocation5 + $0x15a4] ss:$72 sps:$4 sm:$0xff]   ;;  %v15557_v8 = vpack.c.bf16 %v15448_v63, %v15448_v63  ;;  %v14582_v63 = vld [vmem:[#allocation5 + $0x1630] ss:$72 sps:$4 sm:$0xff]  }
 0x38b   :  { %6483 = vmatprep.subr.bf16.mxu0 %v14542_v12 }
 0x38d   :  { %6398 = vmatpush1.bf16.msra.mxu1 %v14537_v10  ;;  %v1017_v10 = vrot.slane %v15550_v59, %v15553_v3 }
 0x38e   :  { %6484 = vmatpush1.bf16.msra.mxu0 %v14540_v16  ;;  %6399 = vmatprep.subr.bf16.mxu1 %v14545_v17 }
 0x38f   :  { %6485 = vmatprep.subr.bf16.mxu0 %v14548_v19  ;;  %v14579_v19 = vld [vmem:[#allocation5 + $0x15a0] ss:$72 sps:$4 sm:$0xff]  }
 0x391   :  { %6400 = vmatpush1.bf16.msra.mxu1 %v14543_v20 }
 0x392   :  { %6486 = vmatpush1.bf16.msra.mxu0 %v14546_v55  ;;  %6401 = vmatprep.subr.bf16.mxu1 %v14551_v22  ;;  %v14584_v22 = vld [vmem:[#allocation5 + $0x1634] ss:$72 sps:$4 sm:$0xff]  }
 0x393   :  { %6487 = vmatprep.subr.bf16.mxu0 %v14554_v24  ;;  %v14587_v24 = vld [vmem:[#allocation5 + $0x16c4] ss:$72 sps:$4 sm:$0xff]  }
 0x395   :  { %6402 = vmatpush1.bf16.msra.mxu1 %v14549_v28  ;;  %v14585_v28 = vld [vmem:[#allocation5 + $0x16c0] ss:$72 sps:$4 sm:$0xff]  }
 0x396   :  { %6488 = vmatpush1.bf16.msra.mxu0 %v14552_v30  ;;  %6403 = vmatprep.subr.bf16.mxu1 %v14557_v31  ;;  %v14590_v30 = vld [vmem:[#allocation5 + $0x1754] ss:$72 sps:$4 sm:$0xff]   ;;  %v14588_v31 = vld [vmem:[#allocation5 + $0x1750] ss:$72 sps:$4 sm:$0xff]  }
 0x397   :  { %6489 = vmatprep.subr.bf16.mxu0 %v14560_v33  ;;  %v14593_v33 = vld [vmem:[#allocation5 + $0x17e4] ss:$72 sps:$4 sm:$0xff]  }
 0x399   :  { %6404 = vmatpush1.bf16.msra.mxu1 %v14555_v34  ;;  %v14596_v34 = vld [vmem:[#allocation5 + $0x1874] ss:$72 sps:$4 sm:$0xff]  }
 0x39a   :  { %6490 = vmatpush1.bf16.msra.mxu0 %v14558_v0  ;;  %12836 = vmatprep.subr.bf16.mxu1 %v15291_v43  ;;  %v14594_v0 = vld [vmem:[#allocation5 + $0x1870] ss:$72 sps:$4 sm:$0xff]  }
 0x39b   :  { %6502 = vmatprep.subr.bf16.mxu0 %v14563_v38  ;;  %v14599_v38 = vld [vmem:[#allocation5 + $0x1904] ss:$72 sps:$4 sm:$0xff]  }
 0x39c   :  { %6406 = vmatmul.mubr.bf16.vlgmr.msra.gmra.mrb[16].mxu1 %v15404_v23 }
 0x39d   :  { %6492 = vmatmul.mubr.bf16.vlgmr.msra.gmra.mrb[16].mxu0 %v15396_v15  ;;  %12838 = vmatprep.mubr.msk.bf16.mxu1 %vm15292_vm0, %v15291_v43  ;;  %v14567_v15 = vld [vmem:[#allocation5 + $0x1360] ss:$72 sps:$4 sm:$0xff]  }
 0x39e   :  { %6503 = vmatpush1.bf16.msra.mxu0 %v14561_v41  ;;  %6534 = vmatprep.mubr.bf16.mxu0 %v15401_v44  ;;  %v15541_v44 = vpack.c.bf16 %v15443_v29, %v15443_v29  ;;  %v14576_v29 = vld [vmem:[#allocation5 + $0x1510] ss:$72 sps:$4 sm:$0xff]   ;;  %v14602_v41 = vld [vmem:[#allocation5 + $0x1994] ss:$72 sps:$4 sm:$0xff]  }
 0x39f   :  { %6504 = vmatprep.subr.bf16.mxu0 %v14566_v42  ;;  %v14600_v42 = vld [vmem:[#allocation5 + $0x1990] ss:$72 sps:$4 sm:$0xff]  }
 0x3a2   :  { %6505 = vmatpush1.bf16.msra.mxu0 %v14564_v48  ;;  %12837 = vmatpush3.bf16.xpose.msra.mxu1 %v6583_v49  ;;  %v14605_v48 = vld [vmem:[#allocation5 + $0x1a24] ss:$72 sps:$4 sm:$0xff]   ;;  %v14608_v49 = vld [vmem:[#allocation5 + $0x1ab4] ss:$72 sps:$4 sm:$0xff]  }
 0x3a3   :  { %6506 = vmatprep.subr.bf16.mxu0 %v14569_v11  ;;  %12842 = vmatprep.subr.bf16.mxu1 %v15291_v43  ;;  %v14603_v11 = vld [vmem:[#allocation5 + $0x1a20] ss:$72 sps:$4 sm:$0xff]  }
 0x3a6   :  { %6507 = vmatpush1.bf16.msra.mxu0 %v14567_v15 }
 0x3a7   :  { %6508 = vmatprep.subr.bf16.mxu0 %v14572_v52 }
 0x3a9   :  { %12839 = vmatmul.mubr.msk.bf16.vlgmr.msra.gmra.mrb[20].mxu1 %vm6578_vm1, %v15541_v44 }
 0x3aa   :  { %6509 = vmatpush1.bf16.msra.mxu0 %v14570_v54  ;;  %12843 = vmatpush3.bf16.xpose.msra.mxu1 %v6629_v14 }
 0x3ab   :  { %6510 = vmatprep.subr.bf16.mxu0 %v14575_v56  ;;  %12844 = vmatprep.mubr.msk.bf16.mxu1 %vm15292_vm0, %v15291_v43  ;;  %v13136_v56 = vadd.f32 %v15495_v1, %v15501_v4 }
 0x3ac   :  { %12848 = vmatprep.subr.bf16.mxu1 %v15291_v43 }
 0x3ad   :  { %v15582_v14 = vpack.c.bf16 %v13136_v56, %v13136_v56  ;;  %v970_v56 = vld [vmem:[#allocation7 + $0x10] sm:$0x3] }
 0x3ae   :  { %6511 = vmatpush1.bf16.msra.mxu0 %v14573_v57  ;;  %v15591_v57 = vsub.s32 5, %v15430_v60 }
 0x3af   :  { %6512 = vmatprep.subr.bf16.mxu0 %v14578_v58  ;;  %v6149_v12 = vpop.f32.mrb[12].mxu1  ;;  %v1025_v58 = vrot.slane %v15550_v59, %v15493_v35 }
 0x3b0   :  { %v15561_v16 = vpop.f32.mrb[13].mxu1  ;;  %v13148_v15 = vadd.f32 %v6149_v12, %v1017_v10  ;;  %v15597_v1 = vrot.slane %v15550_v59, %v15591_v57 }
 0x3b1   :  { %v6153_v17 = vpop.f32.mrb[14].mxu1  ;;  %12845 = vmatmul.mubr.msk.bf16.vlgmr.msra.gmra.mrb[24].mxu1 %vm6578_vm1, %v15557_v8 }
 0x3b2   :  { %6513 = vmatpush1.bf16.msra.mxu0 %v14576_v29  ;;  %v15565_v20 = vadd.f32 %v6153_v17, %v1017_v10  ;;  %v15567_v55 = vpop.f32.mrb[15].mxu1  ;;  %12850 = vmatprep.mubr.msk.bf16.mxu1 %vm15292_vm0, %v15291_v43  ;;  %v15573_v52 = vpack.c.bf16 %v13148_v15, %v13148_v15 }
 0x3b3   :  { %6514 = vmatprep.subr.bf16.mxu0 %v14581_v5 }
 0x3b4   :  { %v8357_v54 = vsel %vm6578_vm1, %v15573_v52, 0 }
 0x3b6   :  { %6515 = vmatpush1.bf16.msra.mxu0 %v14579_v19 }
 0x3b7   :  { %6516 = vmatprep.subr.bf16.mxu0 %v14584_v22 }
 0x3ba   :  { %6517 = vmatpush1.bf16.msra.mxu0 %v14582_v63 }
 0x3bb   :  { %6518 = vmatprep.subr.bf16.mxu0 %v14587_v24  ;;  %v1004_v24 = vsub.s32 7, %v15430_v60 }
 0x3be   :  { %6519 = vmatpush1.bf16.msra.mxu0 %v14585_v28 }
 0x3bf   :  { %6520 = vmatprep.subr.bf16.mxu0 %v14590_v30  ;;  %v15617_v30 = vrot.slane %v15550_v59, %v1000_v27 }
 0x3c2   :  { %6521 = vmatpush1.bf16.msra.mxu0 %v14588_v31 }
 0x3c3   :  { %6522 = vmatprep.subr.bf16.mxu0 %v14593_v33  ;;  %v15624_v33 = vrot.slane %v15550_v59, %v1004_v24 }
 0x3c6   :  { %6523 = vmatpush1.bf16.msra.mxu0 %v14591_v50 }
 0x3c7   :  { %6524 = vmatprep.subr.bf16.mxu0 %v14596_v34 }
 0x3ca   :  { %6525 = vmatpush1.bf16.msra.mxu0 %v14594_v0 }
 0x3cb   :  { %6526 = vmatprep.subr.bf16.mxu0 %v14599_v38 }
 0x3ce   :  { %6527 = vmatpush1.bf16.msra.mxu0 %v14597_v39 }
 0x3cf   :  { %6528 = vmatprep.subr.bf16.mxu0 %v14602_v41 }
 0x3d2   :  { %6529 = vmatpush1.bf16.msra.mxu0 %v14600_v42 }
 0x3d3   :  { %6530 = vmatprep.subr.bf16.mxu0 %v14605_v48 }
 0x3d6   :  { %6531 = vmatpush1.bf16.msra.mxu0 %v14603_v11 }
 0x3d7   :  { %6532 = vmatprep.subr.bf16.mxu0 %v14608_v49 }
 0x3da   :  { %6533 = vmatpush1.bf16.msra.mxu0 %v14606_v51 }
 0x3db   :  { %13028 = vmatprep.subr.bf16.mxu0 %v15291_v43 }
 0x3dd   :  { %6535 = vmatmul.mubr.bf16.vlgmr.msra.gmra.mrb[16].mxu0 %v15404_v23  ;;  %v15588_v23 = vpop.f32.mrb[11].mxu0 }
 0x3de   :  { %13030 = vmatprep.mubr.msk.bf16.mxu0 %vm15292_vm0, %v15291_v43 }
 0x3e3   :  { %13029 = vmatpush3.bf16.xpose.msra.mxu0 %v8357_v54 }
 0x3e4   :  { %13040 = vmatprep.subr.bf16.mxu0 %v15291_v43 }
 0x3ea   :  { %13031 = vmatmul.mubr.msk.bf16.vlgmr.msra.gmra.mrb[20].mxu0 %vm6578_vm1, %v15582_v14 }
 0x3eb   :  { %13042 = vmatprep.mubr.msk.bf16.mxu0 %vm15292_vm0, %v15291_v43 }
 0x3f0   :  { %v6278_v29 = vpop.f32.mrb[12].mxu0 }
 0x3f1   :  { %v15599_v4 = vpop.f32.mrb[13].mxu0  ;;  %v13152_v5 = vadd.f32 %v6278_v29, %v1025_v58  ;;  %v1045_v29 = vrot.slane %v970_v56, %v15436_v9 }
 0x3f2   :  { %v6282_v12 = vpop.f32.mrb[14].mxu0 }
 0x3f3   :  { %v15601_v10 = vadd.f32 %v6282_v12, %v1025_v58  ;;  %v6284_v17 = vpop.f32.mrb[15].mxu0  ;;  %v15603_v19 = vpack.c.bf16 %v13152_v5, %v13152_v5  ;;  %v1041_v58 = vrot.slane %v970_v56, %v15433_v6 }
 0x3f4   :  { %v15606_v22 = vadd.f32 %v6284_v17, %v15597_v1 }
 0x3f5   :  { %v6701_v63 = vsel %vm6699_vm2, %v15603_v19, 0 }
 0x3f6   :  { %12849 = vmatpush3.bf16.msra.mxu1 %v6701_v63 }
 0x3f7   :  { %12854 = vmatprep.subr.bf16.mxu1 %v15291_v43 }
 0x46f   :  { %v15612_v28 = vpop.f32.mrb[16].mxu1 }
 0x470   :  { %v15619_v31 = vpop.f32.mrb[17].mxu1 }
 0x471   :  { %v6411_v50 = vpop.f32.mrb[18].mxu1 }
 0x472   :  { %v15627_v34 = vadd.f32 %v6411_v50, %v15617_v30  ;;  %v6413_v0 = vpop.f32.mrb[19].mxu1 }
 0x473   :  { %v15630_v38 = vadd.f32 %v6413_v0, %v15624_v33 }
 0x47c   :  { %v6619_v39 = vpop.f32.mrb[20].mxu1 }
 0x47d   :  { %v12840_v41 = vpop.f32.mrb[21].mxu1  ;;  %v6672_v27 = vsel %vm6671_vm3, %v6619_v39, -inf }
 0x47e   :  { %6673 = vmax.xlane.f32.xlu0 %v6672_v27  ;;  %v6622_v42 = vpop.f32.mrb[22].mxu1 }
 0x47f   :  { %v12841_v48 = vpop.f32.mrb[23].mxu1 }
 0x484   :  { %v6665_v11 = vpop.f32.mrb[24].mxu1 }
 0x485   :  { %v12846_v49 = vpop.f32.mrb[25].mxu1  ;;  %v6675_v51 = vsel %vm6671_vm3, %v6665_v11, -inf }
 0x486   :  { %6676 = vmax.xlane.f32.xlu0 %v6675_v51  ;;  %v6668_v15 = vpop.f32.mrb[26].mxu1 }
 0x487   :  { %v12847_v54 = vpop.f32.mrb[27].mxu1 }
 0x49c   :  { %6791 = vrot.lane.b32.xlu0 %v15528_v47, %s15293_s4 }
 0x4b0   :  { %v6536_v5 = vpop.f32.mrb[16].mxu0 }
 0x4b1   :  { %v13160_v12 = vadd.f32 %v6536_v5, %v1041_v58  ;;  %v6538_v17 = vpop.f32.mrb[17].mxu0 }
 0x4b2   :  { %v15638_v63 = vadd.f32 %v6538_v17, %v1045_v29  ;;  %v6540_v50 = vpop.f32.mrb[18].mxu0 }
 0x4b3   :  { %v15640_v0 = vpack.c.bf16 %v13160_v12, %v13160_v12  ;;  %v15642_v41 = vadd.f32 %v6540_v50, %v1041_v58  ;;  %v6542_v27 = vpop.f32.mrb[19].mxu0 }
 0x4b4   :  { %v15644_v42 = vadd.f32 %v6542_v27, %v1045_v29 }
 0x4b5   :  { %v8473_v47 = vsel %vm6699_vm2, %v15640_v0, 0 }
 0x4b6   :  { %13041 = vmatpush3.bf16.msra.mxu0 %v8473_v47 }
 0x4b7   :  { %13052 = vmatprep.subr.bf16.mxu0 %v15291_v43 }
 0x4bd   :  { %v15649_v48 = vpop.f32.mrb[20].mxu0 }
 0x4be   :  { %v13032_v49 = vpop.f32.mrb[21].mxu0 }
 0x4bf   :  { %v8396_v51 = vpop.f32.mrb[22].mxu0 }
 0x4c0   :  { %v13033_v15 = vpop.f32.mrb[23].mxu0  ;;  %v12709_v51 = vpack.c.bf16 %v15601_v10, %v15601_v10 }
 0x50b   :  { %v6674_v54 = vpop.xlane.xlu0 %6673 }
 0x50c   :  { %v6678_v56 = vsub.f32 %v6619_v39, %v6674_v54 }
 0x50e   :  { %v6680_v5 = vmul.f32 1.442695, %v6678_v56  ;;  %v6747_v56 = vsel %vm6699_vm2, %v12709_v51, 0 }
 0x510   :  { %15041 = vpow2.f32 %v6680_v5 }
 0x513   :  { %v6677_v58 = vpop.xlane.xlu0 %6676 }
 0x514   :  { %v6679_v12 = vsub.f32 %v6665_v11, %v6677_v58 }
 0x516   :  { %v6682_v17 = vmul.f32 1.442695, %v6679_v12 }
 0x518   :  { %15043 = vpow2.f32 %v6682_v17 }
 0x51a   :  { %v15042_v29 = vpop.eup %15041 }
 0x51b   :  { %v6684_v50 = vsel %vm6671_vm3, %v15042_v29, 0.0 }
 0x51c   :  { %6685 = vadd.xlane.f32.xlu1 %v6684_v50 }
 0x522   :  { %v15044_v27 = vpop.eup %15043 }
 0x523   :  { %v6687_v47 = vsel %vm6671_vm3, %v15044_v27, 0.0 }
 0x524   :  { %6688 = vadd.xlane.f32.xlu1 %v6687_v47 }
 0x535   :  { %6789 = vrot.lane.b32.xlu1 %v15541_v44, %s15293_s4 }
 0x539   :  { %6841 = vrot.lane.b32.xlu1 %v15537_v53, %s15293_s4 }
 0x53d   :  { %6839 = vrot.lane.b32.xlu1 %v15557_v8, %s15293_s4  ;;  %v6792_v8 = vpop.permute.xlu0 %6791 }
 0x53e   :  { %v6797_v10 = vsel %vm6578_vm1, %v6792_v8, 0 }
 0x5a9   :  { %v6686_v39 = vpop.xlane.xlu1 %6685 }
 0x5aa   :  { %15045 = vrcp.f32 %v6686_v39 }
 0x5b1   :  { %v6689_v11 = vpop.xlane.xlu1 %6688 }
 0x5b2   :  { %15047 = vrcp.f32 %v6689_v11 }
 0x5b4   :  { %v15046_v49 = vpop.eup %15045 }
 0x5b5   :  { %v6692_v15 = vmul.f32 %v15046_v49, %v15042_v29  ;;  %v6790_v58 = vpop.permute.xlu1 %6789 }
 0x5b7   :  { %v6694_v54 = vpack.c.bf16 %v6692_v15, %v6692_v15 }
 0x5b9   :  { %12851 = vmatmul.mubr.msk.bf16.vlgmr.msra.gmra.mrb[28].mxu1 %vm6671_vm3, %v6694_v54  ;;  %v6842_v12 = vpop.permute.xlu1 %6841 }
 0x5ba   :  { %12855 = vmatpush3.bf16.msra.mxu1 %v6747_v56  ;;  %12856 = vmatprep.mubr.msk.bf16.mxu1 %vm15292_vm0, %v15291_v43  ;;  %v6847_v17 = vsel %vm6578_vm1, %v6842_v12, 0 }
 0x5bb   :  { %12860 = vmatprep.subr.bf16.mxu1 %v15291_v43 }
 0x5bc   :  { %v15048_v53 = vpop.eup %15047 }
 0x5bd   :  { %v6693_v44 = vmul.f32 %v15048_v53, %v15044_v27  ;;  %v6840_v29 = vpop.permute.xlu1 %6839 }
 0x5bf   :  { %v6695_v5 = vpack.c.bf16 %v6693_v44, %v6693_v44 }
 0x5c1   :  { %12857 = vmatmul.mubr.msk.bf16.vlgmr.msra.gmra.mrb[32].mxu1 %vm6671_vm3, %v6695_v5 }
 0x5c2   :  { %12862 = vmatprep.mubr.msk.bf16.mxu1 %vm15292_vm0, %v15291_v43 }
 0x5c3   :  { %12861 = vmatpush3.bf16.xpose.msra.mxu1 %v6797_v10 }
 0x5c4   :  { %12866 = vmatprep.subr.bf16.mxu1 %v15291_v43 }
 0x5ca   :  { %12863 = vmatmul.mubr.msk.bf16.vlgmr.msra.gmra.mrb[36].mxu1 %vm6578_vm1, %v6790_v58 }
 0x5cb   :  { %12867 = vmatpush3.bf16.xpose.msra.mxu1 %v6847_v17  ;;  %12868 = vmatprep.mubr.msk.bf16.mxu1 %vm15292_vm0, %v15291_v43 }
 0x5cc   :  { %12872 = vmatprep.subr.bf16.mxu1 %v15291_v43 }
 0x5d2   :  { %12869 = vmatmul.mubr.msk.bf16.vlgmr.msra.gmra.mrb[40].mxu1 %vm6578_vm1, %v6840_v29 }
 0x5d3   :  { %12874 = vmatprep.mubr.msk.bf16.mxu1 %vm15292_vm0, %v15291_v43 }
 0x68c   :  { %v15679_v50 = vpop.f32.mrb[28].mxu1 }
 0x68d   :  { %v12852_v27 = vpop.f32.mrb[29].mxu1 }
 0x68e   :  { %v6740_v47 = vpop.f32.mrb[30].mxu1 }
 0x68f   :  { %v12853_v39 = vpop.f32.mrb[31].mxu1 }
 0x694   :  { %v15681_v11 = vpop.f32.mrb[32].mxu1 }
 0x695   :  { %v12858_v49 = vpop.f32.mrb[33].mxu1 }
 0x696   :  { %v6786_v15 = vpop.f32.mrb[34].mxu1 }
 0x697   :  { %v12859_v54 = vpop.f32.mrb[35].mxu1 }
 0x69d   :  { %v6833_v56 = vpop.f32.mrb[36].mxu1 }
 0x69e   :  { %v12864_v53 = vpop.f32.mrb[37].mxu1  ;;  %v6889_v44 = vsel %vm6671_vm3, %v6833_v56, -inf }
 0x69f   :  { %6890 = vmax.xlane.f32.xlu0 %v6889_v44  ;;  %v6836_v8 = vpop.f32.mrb[38].mxu1 }
 0x6a0   :  { %v12865_v5 = vpop.f32.mrb[39].mxu1 }
 0x6a5   :  { %v6883_v58 = vpop.f32.mrb[40].mxu1 }
 0x6a6   :  { %v12870_v10 = vpop.f32.mrb[41].mxu1  ;;  %v6892_v12 = vsel %vm6671_vm3, %v6883_v58, -inf }
 0x6a7   :  { %6893 = vmax.xlane.f32.xlu1 %v6892_v12  ;;  %v6886_v17 = vpop.f32.mrb[42].mxu1 }
 0x6a8   :  { %v12871_v29 = vpop.f32.mrb[43].mxu1 }
 0x6a9   :  { %v1005_v29 = vrot.slane %v15497_v37, %v1004_v24 }
 0x6b8   :  { %6961 = vrot.lane.b32.xlu1 %v12709_v51, %s15293_s4 }
 0x72c   :  { %v6891_v27 = vpop.xlane.xlu0 %6890 }
 0x72d   :  { %v6895_v47 = vsub.f32 %v6833_v56, %v6891_v27 }
 0x72f   :  { %v6897_v39 = vmul.f32 1.442695, %v6895_v47 }
 0x731   :  { %15049 = vpow2.f32 %v6897_v39  ;;  %v13141_v39 = vadd.f32 %v15482_v13, %v1005_v29 }
 0x733   :  { %v12712_v37 = vpack.c.bf16 %v13141_v39, %v13141_v39 }
 0x734   :  { %v6894_v49 = vpop.xlane.xlu1 %6893 }
 0x735   :  { %v6896_v15 = vsub.f32 %v6883_v58, %v6894_v49 }
 0x737   :  { %v6899_v54 = vmul.f32 1.442695, %v6896_v15 }
 0x738   :  { %v6962_v27 = vpop.permute.xlu1 %6961 }
 0x739   :  { %15051 = vpow2.f32 %v6899_v54  ;;  %v7028_v54 = vsel %vm6578_vm1, %v12712_v37, 0 }
 0x73b   :  { %v15050_v53 = vpop.eup %15049 }
 0x73c   :  { %v6901_v44 = vsel %vm6671_vm3, %v15050_v53, 0.0 }
 0x73d   :  { %6902 = vadd.xlane.f32.xlu0 %v6901_v44  ;;  %v12710_v44 = vpack.c.bf16 %v15446_v32, %v15446_v32 }
 0x743   :  { %v15052_v8 = vpop.eup %15051 }
 0x744   :  { %v6904_v5 = vsel %vm6671_vm3, %v15052_v8, 0.0 }
 0x745   :  { %6905 = vadd.xlane.f32.xlu0 %v6904_v5  ;;  %v13153_v5 = vadd.f32 %v15599_v4, %v15597_v1 }
 0x75b   :  { %6913 = vrot.lane.b32.xlu0 %v15603_v19, %s15293_s4  ;;  %v6967_v19 = vsel %vm6699_vm2, %v6962_v27, 0 }
 0x7ca   :  { %v6903_v51 = vpop.xlane.xlu0 %6902 }
 0x7cb   :  { %15053 = vrcp.f32 %v6903_v51  ;;  %v12711_v51 = vpack.c.bf16 %v15450_v36, %v15450_v36 }
 0x7d2   :  { %v6906_v56 = vpop.xlane.xlu0 %6905 }
 0x7d3   :  { %15055 = vrcp.f32 %v6906_v56 }
 0x7d5   :  { %v15054_v10 = vpop.eup %15053 }
 0x7d6   :  { %v6909_v12 = vmul.f32 %v15054_v10, %v15050_v53  ;;  %v6914_v58 = vpop.permute.xlu0 %6913  ;;  %v13143_v53 = vadd.f32 %v15486_v18, %v1005_v29  ;;  %v15716_v18 = vpack.c.bf16 %v13153_v5, %v13153_v5 }
 0x7d7   :  { %v6919_v17 = vsel %vm6699_vm2, %v6914_v58, 0 }
 0x7d8   :  { %12873 = vmatpush3.bf16.msra.mxu1 %v6919_v17  ;;  %v6911_v47 = vpack.c.bf16 %v6909_v12, %v6909_v12  ;;  %v12713_v13 = vpack.c.bf16 %v13143_v53, %v13143_v53  ;;  %v7144_v32 = vsel %vm6699_vm2, %v15716_v18, 0 }
 0x7d9   :  { %12878 = vmatprep.subr.bf16.mxu1 %v15291_v43 }
 0x7db   :  { %12875 = vmatmul.mubr.msk.bf16.vlgmr.msra.gmra.mrb[44].mxu1 %vm6671_vm3, %v6911_v47 }
 0x7dc   :  { %12879 = vmatpush3.bf16.msra.mxu1 %v6967_v19  ;;  %12880 = vmatprep.mubr.msk.bf16.mxu1 %vm15292_vm0, %v15291_v43 }
 0x7dd   :  { %v15056_v49 = vpop.eup %15055  ;;  %12884 = vmatprep.subr.bf16.mxu1 %v15291_v43 }
 0x7de   :  { %v6910_v15 = vmul.f32 %v15056_v49, %v15052_v8  ;;  %v7074_v8 = vsel %vm6578_vm1, %v12713_v13, 0 }
 0x7e0   :  { %v6912_v24 = vpack.c.bf16 %v6910_v15, %v6910_v15 }
 0x7e3   :  { %12881 = vmatmul.mubr.msk.bf16.vlgmr.msra.gmra.mrb[48].mxu1 %vm6671_vm3, %v6912_v24 }
 0x7e4   :  { %12886 = vmatprep.mubr.msk.bf16.mxu1 %vm15292_vm0, %v15291_v43 }
 0x7e5   :  { %12885 = vmatpush3.bf16.xpose.msra.mxu1 %v7028_v54 }
 0x7e6   :  { %12890 = vmatprep.subr.bf16.mxu1 %v15291_v43 }
 0x7ec   :  { %12887 = vmatmul.mubr.msk.bf16.vlgmr.msra.gmra.mrb[52].mxu1 %vm6578_vm1, %v12710_v44 }
 0x7ed   :  { %12891 = vmatpush3.bf16.xpose.msra.mxu1 %v7074_v8  ;;  %12892 = vmatprep.mubr.msk.bf16.mxu1 %vm15292_vm0, %v15291_v43 }
 0x7ee   :  { %12896 = vmatprep.subr.bf16.mxu1 %v15291_v43 }
 0x7f4   :  { %12893 = vmatmul.mubr.msk.bf16.vlgmr.msra.gmra.mrb[56].mxu1 %vm6578_vm1, %v12711_v51 }
 0x7f5   :  { %12897 = vmatpush3.bf16.msra.mxu1 %v7144_v32  ;;  %12898 = vmatprep.mubr.msk.bf16.mxu1 %vm15292_vm0, %v15291_v43 }
 0x7f6   :  { %12902 = vmatprep.subr.bf16.mxu1 %v15291_v43 }
 0x8ae   :  { %v15726_v1 = vpop.f32.mrb[44].mxu1 }
 0x8af   :  { %v12876_v4 = vpop.f32.mrb[45].mxu1 }
 0x8b0   :  { %v6958_v56 = vpop.f32.mrb[46].mxu1 }
 0x8b1   :  { %v12877_v10 = vpop.f32.mrb[47].mxu1 }
 0x8b6   :  { %v15728_v12 = vpop.f32.mrb[48].mxu1 }
 0x8b7   :  { %v13288_v36 = vpack.i.bf16 %v15728_v12, %v15726_v1  ;;  %v12882_v58 = vpop.f32.mrb[49].mxu1 }
 0x8b8   :  { %v7006_v17 = vpop.f32.mrb[50].mxu1 }
 0x8b9   :  { %v12883_v29 = vpop.f32.mrb[51].mxu1 }
 0x8bf   :  { %v7064_v27 = vpop.f32.mrb[52].mxu1 }
 0x8c0   :  { %v12888_v47 = vpop.f32.mrb[53].mxu1  ;;  %v7116_v19 = vsel %vm6671_vm3, %v7064_v27, -inf }
 0x8c1   :  { %7117 = vmax.xlane.f32.xlu1 %v7116_v19  ;;  %v7067_v39 = vpop.f32.mrb[54].mxu1 }
 0x8c2   :  { %v12889_v49 = vpop.f32.mrb[55].mxu1 }
 0x8c7   :  { %v7110_v15 = vpop.f32.mrb[56].mxu1 }
 0x8c8   :  { %v12894_v24 = vpop.f32.mrb[57].mxu1  ;;  %v7119_v54 = vsel %vm6671_vm3, %v7110_v15, -inf }
 0x8c9   :  { %7120 = vmax.xlane.f32.xlu0 %v7119_v54  ;;  %v7113_v53 = vpop.f32.mrb[58].mxu1 }
 0x8ca   :  { %v12895_v8 = vpop.f32.mrb[59].mxu1 }
 0x94e   :  { %v7118_v5 = vpop.xlane.xlu1 %7117 }
 0x94f   :  { %v7122_v32 = vsub.f32 %v7064_v27, %v7118_v5 }
 0x951   :  { %v7124_v4 = vmul.f32 1.442695, %v7122_v32 }
 0x953   :  { %15057 = vpow2.f32 %v7124_v4 }
 0x956   :  { %v7121_v56 = vpop.xlane.xlu0 %7120 }
 0x957   :  { %v7123_v10 = vsub.f32 %v7110_v15, %v7121_v56  ;;  %v12715_v15 = vpack.c.bf16 %v15606_v22, %v15606_v22 }
 0x959   :  { %v7126_v58 = vmul.f32 1.442695, %v7123_v10  ;;  %v7190_v53 = vsel %vm6699_vm2, %v12715_v15, 0 }
 0x95b   :  { %15059 = vpow2.f32 %v7126_v58 }
 0x95d   :  { %v15058_v17 = vpop.eup %15057 }
 0x95e   :  { %v7128_v29 = vsel %vm6671_vm3, %v15058_v17, 0.0 }
 0x95f   :  { %7129 = vadd.xlane.f32.xlu0 %v7128_v29 }
 0x965   :  { %v15060_v47 = vpop.eup %15059 }
 0x966   :  { %v7131_v19 = vsel %vm6671_vm3, %v15060_v47, 0.0 }
 0x967   :  { %7132 = vadd.xlane.f32.xlu1 %v7131_v19 }
 0x975   :  { %7234 = vrot.lane.b32.xlu0 %v12712_v37, %s15293_s4 }
 0x978   :  { %7232 = vrot.lane.b32.xlu1 %v12710_v44, %s15293_s4 }
 0x97c   :  { %7284 = vrot.lane.b32.xlu1 %v12713_v13, %s15293_s4 }
 0x980   :  { %7282 = vrot.lane.b32.xlu1 %v12711_v51, %s15293_s4 }
 0x9ec   :  { %v7130_v27 = vpop.xlane.xlu0 %7129 }
 0x9ed   :  { %15061 = vrcp.f32 %v7130_v27 }
 0x9f0   :  { %v7235_v44 = vpop.permute.xlu0 %7234 }
 0x9f1   :  { %v7240_v22 = vsel %vm6578_vm1, %v7235_v44, 0 }
 0x9f4   :  { %v7133_v39 = vpop.xlane.xlu1 %7132 }
 0x9f5   :  { %15063 = vrcp.f32 %v7133_v39 }
 0x9f7   :  { %v15062_v49 = vpop.eup %15061 }
 0x9f8   :  { %v7136_v24 = vmul.f32 %v15062_v49, %v15058_v17  ;;  %v7233_v8 = vpop.permute.xlu1 %7232 }
 0x9fa   :  { %v7138_v54 = vpack.c.bf16 %v7136_v24, %v7136_v24 }
 0x9fc   :  { %12899 = vmatmul.mubr.msk.bf16.vlgmr.msra.gmra.mrb[60].mxu1 %vm6671_vm3, %v7138_v54  ;;  %v7285_v5 = vpop.permute.xlu1 %7284 }
 0x9fd   :  { %12903 = vmatpush3.bf16.msra.mxu1 %v7190_v53  ;;  %12904 = vmatprep.mubr.msk.bf16.mxu1 %vm15292_vm0, %v15291_v43  ;;  %v7290_v32 = vsel %vm6578_vm1, %v7285_v5, 0 }
 0x9fe   :  { %12908 = vmatprep.subr.bf16.mxu1 %v15291_v43 }
 0x9ff   :  { %v15064_v37 = vpop.eup %15063 }
 0xa00   :  { %v7137_v13 = vmul.f32 %v15064_v37, %v15060_v47  ;;  %v7283_v4 = vpop.permute.xlu1 %7282 }
 0xa02   :  { %v7139_v51 = vpack.c.bf16 %v7137_v13, %v7137_v13 }
 0xa04   :  { %12905 = vmatmul.mubr.msk.bf16.vlgmr.msra.gmra.mrb[64].mxu1 %vm6671_vm3, %v7139_v51 }
 0xa05   :  { %12910 = vmatprep.mubr.msk.bf16.mxu1 %vm15292_vm0, %v15291_v43 }
 0xa06   :  { %12909 = vmatpush3.bf16.xpose.msra.mxu1 %v7240_v22 }
 0xa07   :  { %12914 = vmatprep.subr.bf16.mxu1 %v15291_v43 }
 0xa0d   :  { %12911 = vmatmul.mubr.msk.bf16.vlgmr.msra.gmra.mrb[68].mxu1 %vm6578_vm1, %v7233_v8 }
 0xa0e   :  { %12915 = vmatpush3.bf16.xpose.msra.mxu1 %v7290_v32  ;;  %12916 = vmatprep.mubr.msk.bf16.mxu1 %vm15292_vm0, %v15291_v43 }
 0xa0f   :  { %12920 = vmatprep.subr.bf16.mxu1 %v15291_v43 }
 0xa15   :  { %12917 = vmatmul.mubr.msk.bf16.vlgmr.msra.gmra.mrb[72].mxu1 %vm6578_vm1, %v7283_v4 }
 0xa16   :  { %12922 = vmatprep.mubr.msk.bf16.mxu1 %vm15292_vm0, %v15291_v43 }
 0xacf   :  { %v15760_v56 = vpop.f32.mrb[60].mxu1 }
 0xad0   :  { %v12900_v10 = vpop.f32.mrb[61].mxu1 }
 0xad1   :  { %v7183_v58 = vpop.f32.mrb[62].mxu1 }
 0xad2   :  { %v12901_v17 = vpop.f32.mrb[63].mxu1 }
 0xad7   :  { %v15762_v29 = vpop.f32.mrb[64].mxu1 }
 0xad8   :  { %v12906_v47 = vpop.f32.mrb[65].mxu1 }
 0xad9   :  { %v7229_v19 = vpop.f32.mrb[66].mxu1 }
 0xada   :  { %v12907_v27 = vpop.f32.mrb[67].mxu1 }
 0xae0   :  { %v7276_v39 = vpop.f32.mrb[68].mxu1 }
 0xae1   :  { %v12912_v49 = vpop.f32.mrb[69].mxu1  ;;  %v7332_v24 = vsel %vm6671_vm3, %v7276_v39, -inf }
 0xae2   :  { %7333 = vmax.xlane.f32.xlu0 %v7332_v24  ;;  %v7279_v54 = vpop.f32.mrb[70].mxu1 }
 0xae3   :  { %v12913_v53 = vpop.f32.mrb[71].mxu1 }
 0xae8   :  { %v7326_v37 = vpop.f32.mrb[72].mxu1 }
 0xae9   :  { %v12918_v13 = vpop.f32.mrb[73].mxu1  ;;  %v7335_v44 = vsel %vm6671_vm3, %v7326_v37, -inf }
 0xaea   :  { %7336 = vmax.xlane.f32.xlu1 %v7335_v44  ;;  %v7329_v51 = vpop.f32.mrb[74].mxu1 }
 0xaeb   :  { %v12919_v8 = vpop.f32.mrb[75].mxu1 }
 0xafb   :  { %7404 = vrot.lane.b32.xlu1 %v12715_v15, %s15293_s4 }
 0xb6f   :  { %v7334_v22 = vpop.xlane.xlu0 %7333 }
 0xb70   :  { %v7338_v5 = vsub.f32 %v7276_v39, %v7334_v22 }
 0xb72   :  { %v7340_v32 = vmul.f32 1.442695, %v7338_v5 }
 0xb74   :  { %15065 = vpow2.f32 %v7340_v32  ;;  %v15781_v32 = vld [vmem:[#allocation7] sm:$0xff] }
 0xb77   :  { %v7337_v4 = vpop.xlane.xlu1 %7336 }
 0xb78   :  { %v7339_v10 = vsub.f32 %v7326_v37, %v7337_v4  ;;  %v1009_v37 = vrot.slane %v15550_v59, %v15433_v6  ;;  %v985_v4 = vrot.slane %v15781_v32, %v15553_v3 }
 0xb7a   :  { %v7342_v58 = vmul.f32 1.442695, %v7339_v10 }
 0xb7b   :  { %v7405_v13 = vpop.permute.xlu1 %7404 }
 0xb7c   :  { %15067 = vpow2.f32 %v7342_v58  ;;  %v7410_v51 = vsel %vm6699_vm2, %v7405_v13, 0  ;;  %v13132_v58 = vadd.f32 %v15460_v61, %v985_v4 }
 0xb7e   :  { %v15066_v17 = vpop.eup %15065 }
 0xb7f   :  { %v7344_v47 = vsel %vm6671_vm3, %v15066_v17, 0.0 }
 0xb80   :  { %7345 = vadd.xlane.f32.xlu0 %v7344_v47  ;;  %v12716_v47 = vpack.c.bf16 %v13132_v58, %v13132_v58 }
 0xb86   :  { %v15068_v19 = vpop.eup %15067 }
 0xb87   :  { %v7347_v27 = vsel %vm6671_vm3, %v15068_v19, 0.0 }
 0xb88   :  { %7348 = vadd.xlane.f32.xlu0 %v7347_v27  ;;  %v13156_v27 = vadd.f32 %v15612_v28, %v15617_v30 }
 0xb8a   :  { %v15800_v61 = vpack.c.bf16 %v13156_v27, %v13156_v27 }
 0xb9e   :  { %7356 = vrot.lane.b32.xlu0 %v15716_v18, %s15293_s4  ;;  %v13144_v18 = vadd.f32 %v15514_v21, %v1009_v37  ;;  %v13146_v21 = vadd.f32 %v15518_v26, %v1009_v37  ;;  %v13134_v26 = vadd.f32 %v15464_v2, %v985_v4 }
 0xba0   :  { %v12718_v59 = vpack.c.bf16 %v13144_v18, %v13144_v18 }
 0xba2   :  { %v7471_v10 = vsel %vm6578_vm1, %v12718_v59, 0 }
 0xc0d   :  { %v7346_v15 = vpop.xlane.xlu0 %7345 }
 0xc0e   :  { %15069 = vrcp.f32 %v7346_v15  ;;  %v12717_v15 = vpack.c.bf16 %v13134_v26, %v13134_v26 }
 0xc15   :  { %v7349_v39 = vpop.xlane.xlu0 %7348 }
 0xc16   :  { %15071 = vrcp.f32 %v7349_v39  ;;  %v7587_v39 = vsel %vm6699_vm2, %v15800_v61, 0 }
 0xc18   :  { %v15070_v49 = vpop.eup %15069 }
 0xc19   :  { %v7352_v24 = vmul.f32 %v15070_v49, %v15066_v17  ;;  %v7357_v54 = vpop.permute.xlu0 %7356  ;;  %v12719_v17 = vpack.c.bf16 %v13146_v21, %v13146_v21 }
 0xc1a   :  { %v7362_v53 = vsel %vm6699_vm2, %v7357_v54, 0 }
 0xc1b   :  { %12921 = vmatpush3.bf16.msra.mxu1 %v7362_v53  ;;  %v7354_v44 = vpack.c.bf16 %v7352_v24, %v7352_v24 }
 0xc1c   :  { %12926 = vmatprep.subr.bf16.mxu1 %v15291_v43 }
 0xc1e   :  { %12923 = vmatmul.mubr.msk.bf16.vlgmr.msra.gmra.mrb[76].mxu1 %vm6671_vm3, %v7354_v44 }
 0xc1f   :  { %12927 = vmatpush3.bf16.msra.mxu1 %v7410_v51  ;;  %12928 = vmatprep.mubr.msk.bf16.mxu1 %vm15292_vm0, %v15291_v43 }
 0xc20   :  { %v15072_v8 = vpop.eup %15071  ;;  %12932 = vmatprep.subr.bf16.mxu1 %v15291_v43 }
 0xc21   :  { %v7353_v22 = vmul.f32 %v15072_v8, %v15068_v19  ;;  %v7517_v19 = vsel %vm6578_vm1, %v12719_v17, 0 }
 0xc23   :  { %v7355_v5 = vpack.c.bf16 %v7353_v22, %v7353_v22 }
 0xc26   :  { %12929 = vmatmul.mubr.msk.bf16.vlgmr.msra.gmra.mrb[80].mxu1 %vm6671_vm3, %v7355_v5 }
 0xc27   :  { %12934 = vmatprep.mubr.msk.bf16.mxu1 %vm15292_vm0, %v15291_v43 }
 0xc28   :  { %12933 = vmatpush3.bf16.xpose.msra.mxu1 %v7471_v10 }
 0xc29   :  { %12938 = vmatprep.subr.bf16.mxu1 %v15291_v43 }
 0xc2f   :  { %12935 = vmatmul.mubr.msk.bf16.vlgmr.msra.gmra.mrb[84].mxu1 %vm6578_vm1, %v12716_v47 }
 0xc30   :  { %12939 = vmatpush3.bf16.xpose.msra.mxu1 %v7517_v19  ;;  %12940 = vmatprep.mubr.msk.bf16.mxu1 %vm15292_vm0, %v15291_v43 }
 0xc31   :  { %12944 = vmatprep.subr.bf16.mxu1 %v15291_v43 }
 0xc37   :  { %12941 = vmatmul.mubr.msk.bf16.vlgmr.msra.gmra.mrb[88].mxu1 %vm6578_vm1, %v12717_v15 }
 0xc38   :  { %12945 = vmatpush3.bf16.msra.mxu1 %v7587_v39  ;;  %12946 = vmatprep.mubr.msk.bf16.mxu1 %vm15292_vm0, %v15291_v43 }
 0xc39   :  { %12950 = vmatprep.subr.bf16.mxu1 %v15291_v43 }
 0xcf1   :  { %v15808_v28 = vpop.f32.mrb[76].mxu1 }
 0xcf2   :  { %v12924_v30 = vpop.f32.mrb[77].mxu1 }
 0xcf3   :  { %v7401_v2 = vpop.f32.mrb[78].mxu1 }
 0xcf4   :  { %v12925_v49 = vpop.f32.mrb[79].mxu1 }
 0xcf9   :  { %v15810_v24 = vpop.f32.mrb[80].mxu1 }
 0xcfa   :  { %v13283_v54 = vpack.i.bf16 %v15810_v24, %v15808_v28  ;;  %v12930_v53 = vpop.f32.mrb[81].mxu1 }
 0xcfb   :  { %v7449_v37 = vpop.f32.mrb[82].mxu1 }
 0xcfc   :  { %v12931_v13 = vpop.f32.mrb[83].mxu1 }
 0xd02   :  { %v7507_v44 = vpop.f32.mrb[84].mxu1 }
 0xd03   :  { %v12936_v51 = vpop.f32.mrb[85].mxu1  ;;  %v7559_v18 = vsel %vm6671_vm3, %v7507_v44, -inf }
 0xd04   :  { %7560 = vmax.xlane.f32.xlu1 %v7559_v18  ;;  %v7510_v8 = vpop.f32.mrb[86].mxu1 }
 0xd05   :  { %v12937_v22 = vpop.f32.mrb[87].mxu1  ;;  %v12721_v8 = vpack.c.bf16 %v15627_v34, %v15627_v34 }
 0xd0a   :  { %v7553_v5 = vpop.f32.mrb[88].mxu1 }
 0xd0b   :  { %v12942_v4 = vpop.f32.mrb[89].mxu1  ;;  %v7562_v10 = vsel %vm6671_vm3, %v7553_v5, -inf }
 0xd0c   :  { %7563 = vmax.xlane.f32.xlu0 %v7562_v10  ;;  %v7556_v21 = vpop.f32.mrb[90].mxu1  ;;  %v7633_v4 = vsel %vm6699_vm2, %v12721_v8, 0 }
 0xd0d   :  { %v12943_v58 = vpop.f32.mrb[91].mxu1 }
 0xd91   :  { %v7561_v19 = vpop.xlane.xlu1 %7560 }
 0xd92   :  { %v7565_v27 = vsub.f32 %v7507_v44, %v7561_v19 }
 0xd94   :  { %v7567_v26 = vmul.f32 1.442695, %v7565_v27 }
 0xd96   :  { %15073 = vpow2.f32 %v7567_v26 }
 0xd99   :  { %v7564_v39 = vpop.xlane.xlu0 %7563 }
 0xd9a   :  { %v7566_v30 = vsub.f32 %v7553_v5, %v7564_v39 }
 0xd9c   :  { %v7569_v2 = vmul.f32 1.442695, %v7566_v30 }
 0xd9e   :  { %15075 = vpow2.f32 %v7569_v2 }
 0xda0   :  { %v15074_v49 = vpop.eup %15073 }
 0xda1   :  { %v7571_v53 = vsel %vm6671_vm3, %v15074_v49, 0.0 }
 0xda2   :  { %7572 = vadd.xlane.f32.xlu0 %v7571_v53 }
 0xda8   :  { %v15076_v37 = vpop.eup %15075 }
 0xda9   :  { %v7574_v13 = vsel %vm6671_vm3, %v15076_v37, 0.0 }
 0xdaa   :  { %7575 = vadd.xlane.f32.xlu1 %v7574_v13 }
 0xdb8   :  { %7677 = vrot.lane.b32.xlu0 %v12718_v59, %s15293_s4 }
 0xdbb   :  { %7675 = vrot.lane.b32.xlu1 %v12716_v47, %s15293_s4 }
 0xdbf   :  { %7727 = vrot.lane.b32.xlu1 %v12719_v17, %s15293_s4 }
 0xdc3   :  { %7725 = vrot.lane.b32.xlu1 %v12717_v15, %s15293_s4 }
 0xe2f   :  { %v7573_v44 = vpop.xlane.xlu0 %7572 }
 0xe30   :  { %15077 = vrcp.f32 %v7573_v44 }
 0xe33   :  { %v7678_v47 = vpop.permute.xlu0 %7677 }
 0xe34   :  { %v7683_v34 = vsel %vm6578_vm1, %v7678_v47, 0 }
 0xe37   :  { %v7576_v51 = vpop.xlane.xlu1 %7575 }
 0xe38   :  { %15079 = vrcp.f32 %v7576_v51 }
 0xe3a   :  { %v15078_v18 = vpop.eup %15077 }
 0xe3b   :  { %v7579_v22 = vmul.f32 %v15078_v18, %v15074_v49  ;;  %v7676_v10 = vpop.permute.xlu1 %7675 }
 0xe3d   :  { %v7581_v5 = vpack.c.bf16 %v7579_v22, %v7579_v22 }
 0xe3f   :  { %12947 = vmatmul.mubr.msk.bf16.vlgmr.msra.gmra.mrb[92].mxu1 %vm6671_vm3, %v7581_v5  ;;  %v7728_v21 = vpop.permute.xlu1 %7727 }
 0xe40   :  { %12951 = vmatpush3.bf16.msra.mxu1 %v7633_v4  ;;  %12952 = vmatprep.mubr.msk.bf16.mxu1 %vm15292_vm0, %v15291_v43  ;;  %v7733_v58 = vsel %vm6578_vm1, %v7728_v21, 0 }
 0xe41   :  { %12956 = vmatprep.subr.bf16.mxu1 %v15291_v43 }
 0xe42   :  { %v15080_v59 = vpop.eup %15079 }
 0xe43   :  { %v7580_v17 = vmul.f32 %v15080_v59, %v15076_v37  ;;  %v7726_v19 = vpop.permute.xlu1 %7725 }
 0xe45   :  { %v7582_v15 = vpack.c.bf16 %v7580_v17, %v7580_v17 }
 0xe47   :  { %12953 = vmatmul.mubr.msk.bf16.vlgmr.msra.gmra.mrb[96].mxu1 %vm6671_vm3, %v7582_v15 }
 0xe48   :  { %12958 = vmatprep.mubr.msk.bf16.mxu1 %vm15292_vm0, %v15291_v43 }
 0xe49   :  { %12957 = vmatpush3.bf16.xpose.msra.mxu1 %v7683_v34 }
 0xe4a   :  { %12962 = vmatprep.subr.bf16.mxu1 %v15291_v43 }
 0xe50   :  { %12959 = vmatmul.mubr.msk.bf16.vlgmr.msra.gmra.mrb[100].mxu1 %vm6578_vm1, %v7676_v10 }
 0xe51   :  { %12963 = vmatpush3.bf16.xpose.msra.mxu1 %v7733_v58  ;;  %12964 = vmatprep.mubr.msk.bf16.mxu1 %vm15292_vm0, %v15291_v43 }
 0xe52   :  { %12968 = vmatprep.subr.bf16.mxu1 %v15291_v43 }
 0xe58   :  { %12965 = vmatmul.mubr.msk.bf16.vlgmr.msra.gmra.mrb[104].mxu1 %vm6578_vm1, %v7726_v19 }
 0xe59   :  { %12970 = vmatprep.mubr.msk.bf16.mxu1 %vm15292_vm0, %v15291_v43 }
 0xf12   :  { %v15842_v27 = vpop.f32.mrb[92].mxu1 }
 0xf13   :  { %v12948_v26 = vpop.f32.mrb[93].mxu1 }
 0xf14   :  { %v7626_v39 = vpop.f32.mrb[94].mxu1 }
 0xf15   :  { %v12949_v30 = vpop.f32.mrb[95].mxu1 }
 0xf1a   :  { %v15844_v2 = vpop.f32.mrb[96].mxu1 }
 0xf1b   :  { %v12954_v49 = vpop.f32.mrb[97].mxu1 }
 0xf1c   :  { %v7672_v53 = vpop.f32.mrb[98].mxu1 }
 0xf1d   :  { %v12955_v37 = vpop.f32.mrb[99].mxu1 }
 0xf23   :  { %v7719_v13 = vpop.f32.mrb[100].mxu1 }
 0xf24   :  { %v12960_v44 = vpop.f32.mrb[101].mxu1  ;;  %v7775_v51 = vsel %vm6671_vm3, %v7719_v13, -inf }
 0xf25   :  { %7776 = vmax.xlane.f32.xlu0 %v7775_v51  ;;  %v7722_v18 = vpop.f32.mrb[102].mxu1 }
 0xf26   :  { %v12961_v22 = vpop.f32.mrb[103].mxu1  ;;  %v15854_v18 = vld [vmem:[#allocation7 + $0x8] sm:$0xff] }
 0xf27   :  { %v1013_v22 = vrot.slane %v15854_v18, %v15436_v9 }
 0xf2b   :  { %v7769_v5 = vpop.f32.mrb[104].mxu1 }
 0xf2c   :  { %v12966_v4 = vpop.f32.mrb[105].mxu1  ;;  %v7778_v59 = vsel %vm6671_vm3, %v7769_v5, -inf }
 0xf2d   :  { %7779 = vmax.xlane.f32.xlu1 %v7778_v59  ;;  %v7772_v17 = vpop.f32.mrb[106].mxu1  ;;  %v13145_v59 = vadd.f32 %v15516_v25, %v1013_v22 }
 0xf2e   :  { %v12967_v47 = vpop.f32.mrb[107].mxu1 }
 0xf2f   :  { %v15866_v47 = vsub.s32 3, %v15430_v60 }
 0xf3e   :  { %7847 = vrot.lane.b32.xlu1 %v12721_v8, %s15293_s4 }
 0xfb2   :  { %v7777_v15 = vpop.xlane.xlu0 %7776 }
 0xfb3   :  { %v7781_v10 = vsub.f32 %v7719_v13, %v7777_v15 }
 0xfb5   :  { %v7783_v34 = vmul.f32 1.442695, %v7781_v10  ;;  %v12724_v10 = vpack.c.bf16 %v13145_v59, %v13145_v59 }
 0xfb7   :  { %15081 = vpow2.f32 %v7783_v34  ;;  %v7914_v25 = vsel %vm6578_vm1, %v12724_v10, 0 }
 0xfba   :  { %v7780_v21 = vpop.xlane.xlu1 %7779 }
 0xfbb   :  { %v7782_v58 = vsub.f32 %v7769_v5, %v7780_v21  ;;  %v989_v21 = vrot.slane %v15781_v32, %v15866_v47 }
 0xfbd   :  { %v7785_v19 = vmul.f32 1.442695, %v7782_v58  ;;  %v13147_v58 = vadd.f32 %v15588_v23, %v1013_v22  ;;  %v13135_v23 = vadd.f32 %v15466_v7, %v989_v21 }
 0xfbe   :  { %v7848_v5 = vpop.permute.xlu1 %7847 }
 0xfbf   :  { %15083 = vpow2.f32 %v7785_v19  ;;  %v13133_v19 = vadd.f32 %v15462_v62, %v989_v21  ;;  %v12725_v60 = vpack.c.bf16 %v13147_v58, %v13147_v58 }
 0xfc1   :  { %v15082_v26 = vpop.eup %15081 }
 0xfc2   :  { %v7787_v39 = vsel %vm6671_vm3, %v15082_v26, 0.0 }
 0xfc3   :  { %7788 = vadd.xlane.f32.xlu0 %v7787_v39  ;;  %v7960_v39 = vsel %vm6578_vm1, %v12725_v60, 0 }
 0xfc9   :  { %v15084_v30 = vpop.eup %15083 }
 0xfca   :  { %v7790_v49 = vsel %vm6671_vm3, %v15084_v30, 0.0 }
 0xfcb   :  { %7791 = vadd.xlane.f32.xlu0 %v7790_v49  ;;  %v12723_v49 = vpack.c.bf16 %v13135_v23, %v13135_v23 }
 0xfe1   :  { %7799 = vrot.lane.b32.xlu0 %v15800_v61, %s15293_s4  ;;  %v7853_v61 = vsel %vm6699_vm2, %v7848_v5, 0 }
0x1050   :  { %v7789_v8 = vpop.xlane.xlu0 %7788 }
0x1051   :  { %15085 = vrcp.f32 %v7789_v8 }
0x1058   :  { %v7792_v53 = vpop.xlane.xlu0 %7791 }
0x1059   :  { %15087 = vrcp.f32 %v7792_v53 }
0x105b   :  { %v15086_v37 = vpop.eup %15085 }
0x105c   :  { %v7795_v13 = vmul.f32 %v15086_v37, %v15082_v26  ;;  %v7800_v44 = vpop.permute.xlu0 %7799  ;;  %v12722_v26 = vpack.c.bf16 %v13133_v19, %v13133_v19 }
0x105d   :  { %v7805_v51 = vsel %vm6699_vm2, %v7800_v44, 0 }
0x105e   :  { %12969 = vmatpush3.bf16.msra.mxu1 %v7805_v51  ;;  %v7797_v4 = vpack.c.bf16 %v7795_v13, %v7795_v13 }
0x105f   :  { %12974 = vmatprep.subr.bf16.mxu1 %v15291_v43 }
0x1061   :  { %12971 = vmatmul.mubr.msk.bf16.vlgmr.msra.gmra.mrb[108].mxu1 %vm6671_vm3, %v7797_v4 }
0x1062   :  { %12975 = vmatpush3.bf16.msra.mxu1 %v7853_v61  ;;  %12976 = vmatprep.mubr.msk.bf16.mxu1 %vm15292_vm0, %v15291_v43 }
0x1063   :  { %v15088_v17 = vpop.eup %15087  ;;  %12980 = vmatprep.subr.bf16.mxu1 %v15291_v43 }
0x1064   :  { %v7796_v15 = vmul.f32 %v15088_v17, %v15084_v30  ;;  %v13157_v30 = vadd.f32 %v15619_v31, %v15624_v33 }
0x1066   :  { %v7798_v34 = vpack.c.bf16 %v7796_v15, %v7796_v15  ;;  %v15885_v62 = vpack.c.bf16 %v13157_v30, %v13157_v30 }
0x1068   :  { %v8030_v8 = vsel %vm6699_vm2, %v15885_v62, 0 }
0x1069   :  { %12977 = vmatmul.mubr.msk.bf16.vlgmr.msra.gmra.mrb[112].mxu1 %vm6671_vm3, %v7798_v34 }
0x106a   :  { %12982 = vmatprep.mubr.msk.bf16.mxu1 %vm15292_vm0, %v15291_v43 }
0x106b   :  { %12981 = vmatpush3.bf16.xpose.msra.mxu1 %v7914_v25 }
0x106c   :  { %12986 = vmatprep.subr.bf16.mxu1 %v15291_v43 }
0x1072   :  { %12983 = vmatmul.mubr.msk.bf16.vlgmr.msra.gmra.mrb[116].mxu1 %vm6578_vm1, %v12722_v26 }
0x1073   :  { %12987 = vmatpush3.bf16.xpose.msra.mxu1 %v7960_v39  ;;  %12988 = vmatprep.mubr.msk.bf16.mxu1 %vm15292_vm0, %v15291_v43 }
0x1074   :  { %12992 = vmatprep.subr.bf16.mxu1 %v15291_v43 }
0x107a   :  { %12989 = vmatmul.mubr.msk.bf16.vlgmr.msra.gmra.mrb[120].mxu1 %vm6578_vm1, %v12723_v49 }
0x107b   :  { %12993 = vmatpush3.bf16.msra.mxu1 %v8030_v8  ;;  %12994 = vmatprep.mubr.msk.bf16.mxu1 %vm15292_vm0, %v15291_v43 }
0x107c   :  { %12998 = vmatprep.subr.bf16.mxu1 %v15291_v43 }
0x1134   :  { %v15893_v31 = vpop.f32.mrb[108].mxu1 }
0x1135   :  { %v12972_v33 = vpop.f32.mrb[109].mxu1 }
0x1136   :  { %v7844_v7 = vpop.f32.mrb[110].mxu1 }
0x1137   :  { %v12973_v53 = vpop.f32.mrb[111].mxu1 }
0x113c   :  { %v15895_v37 = vpop.f32.mrb[112].mxu1 }
0x113d   :  { %v13298_v13 = vpack.i.bf16 %v15895_v37, %v15893_v31  ;;  %v12978_v44 = vpop.f32.mrb[113].mxu1 }
0x113e   :  { %v7892_v51 = vpop.f32.mrb[114].mxu1 }
0x113f   :  { %v12979_v22 = vpop.f32.mrb[115].mxu1 }
0x1145   :  { %v7950_v5 = vpop.f32.mrb[116].mxu1 }
0x1146   :  { %v12984_v4 = vpop.f32.mrb[117].mxu1  ;;  %v8002_v61 = vsel %vm6671_vm3, %v7950_v5, -inf }
0x1147   :  { %8003 = vmax.xlane.f32.xlu1 %v8002_v61  ;;  %v7953_v59 = vpop.f32.mrb[118].mxu1  ;;  %v12727_v61 = vpack.c.bf16 %v15630_v38, %v15630_v38 }
0x1148   :  { %v12985_v17 = vpop.f32.mrb[119].mxu1 }
0x114d   :  { %v7996_v15 = vpop.f32.mrb[120].mxu1 }
0x114e   :  { %v12990_v34 = vpop.f32.mrb[121].mxu1  ;;  %v8005_v21 = vsel %vm6671_vm3, %v7996_v15, -inf }
0x114f   :  { %8006 = vmax.xlane.f32.xlu0 %v8005_v21  ;;  %v7999_v25 = vpop.f32.mrb[122].mxu1 }
0x1150   :  { %v12991_v58 = vpop.f32.mrb[123].mxu1 }
0x11d4   :  { %v8004_v19 = vpop.xlane.xlu1 %8003 }
0x11d5   :  { %v8008_v39 = vsub.f32 %v7950_v5, %v8004_v19 }
0x11d7   :  { %v8010_v30 = vmul.f32 1.442695, %v8008_v39 }
0x11d9   :  { %15089 = vpow2.f32 %v8010_v30 }
0x11dc   :  { %v8007_v23 = vpop.xlane.xlu0 %8006 }
0x11dd   :  { %v8009_v8 = vsub.f32 %v7996_v15, %v8007_v23  ;;  %v8076_v15 = vsel %vm6699_vm2, %v12727_v61, 0 }
0x11df   :  { %v8012_v33 = vmul.f32 1.442695, %v8009_v8 }
0x11e1   :  { %15091 = vpow2.f32 %v8012_v33 }
0x11e3   :  { %v15090_v7 = vpop.eup %15089 }
0x11e4   :  { %v8014_v53 = vsel %vm6671_vm3, %v15090_v7, 0.0 }
0x11e5   :  { %8015 = vadd.xlane.f32.xlu0 %v8014_v53 }
0x11eb   :  { %v15092_v44 = vpop.eup %15091 }
0x11ec   :  { %v8017_v51 = vsel %vm6671_vm3, %v15092_v44, 0.0 }
0x11ed   :  { %8018 = vadd.xlane.f32.xlu1 %v8017_v51 }
0x11fb   :  { %8120 = vrot.lane.b32.xlu0 %v12724_v10, %s15293_s4 }
0x11fe   :  { %8118 = vrot.lane.b32.xlu1 %v12722_v26, %s15293_s4 }
0x1202   :  { %8170 = vrot.lane.b32.xlu1 %v12725_v60, %s15293_s4 }
0x1206   :  { %8168 = vrot.lane.b32.xlu1 %v12723_v49, %s15293_s4 }
0x1272   :  { %v8016_v22 = vpop.xlane.xlu0 %8015 }
0x1273   :  { %15093 = vrcp.f32 %v8016_v22 }
0x1276   :  { %v8121_v26 = vpop.permute.xlu0 %8120 }
0x1277   :  { %v8126_v38 = vsel %vm6578_vm1, %v8121_v26, 0  ;;  %v8445_v26 = vsel %vm6671_vm3, %v15649_v48, -inf }
0x127a   :  { %v8019_v5 = vpop.xlane.xlu1 %8018 }
0x127b   :  { %15095 = vrcp.f32 %v8019_v5 }
0x127d   :  { %v15094_v4 = vpop.eup %15093 }
0x127e   :  { %v8022_v59 = vmul.f32 %v15094_v4, %v15090_v7  ;;  %v8119_v34 = vpop.permute.xlu1 %8118 }
0x1280   :  { %v8024_v17 = vpack.c.bf16 %v8022_v59, %v8022_v59 }
0x1282   :  { %12995 = vmatmul.mubr.msk.bf16.vlgmr.msra.gmra.mrb[124].mxu1 %vm6671_vm3, %v8024_v17  ;;  %v8171_v21 = vpop.permute.xlu1 %8170 }
0x1283   :  { %12999 = vmatpush3.bf16.msra.mxu1 %v8076_v15  ;;  %13000 = vmatprep.mubr.msk.bf16.mxu1 %vm15292_vm0, %v15291_v43  ;;  %v8176_v25 = vsel %vm6578_vm1, %v8171_v21, 0 }
0x1284   :  { %13004 = vmatprep.subr.bf16.mxu1 %v15291_v43 }
0x1285   :  { %v15096_v10 = vpop.eup %15095 }
0x1286   :  { %v8023_v60 = vmul.f32 %v15096_v10, %v15092_v44  ;;  %v8169_v58 = vpop.permute.xlu1 %8168 }
0x1288   :  { %v8025_v49 = vpack.c.bf16 %v8023_v60, %v8023_v60 }
0x128a   :  { %13001 = vmatmul.mubr.msk.bf16.vlgmr.msra.gmra.mrb[128].mxu1 %vm6671_vm3, %v8025_v49  ;;  %v12731_v49 = vpack.c.bf16 %v15565_v20, %v15565_v20 }
0x128b   :  { %13006 = vmatprep.mubr.msk.bf16.mxu1 %vm15292_vm0, %v15291_v43 }
0x128c   :  { %13005 = vmatpush3.bf16.xpose.msra.mxu1 %v8126_v38 }
0x128d   :  { %13010 = vmatprep.subr.bf16.mxu1 %v15291_v43 }
0x1293   :  { %13007 = vmatmul.mubr.msk.bf16.vlgmr.msra.gmra.mrb[132].mxu1 %vm6578_vm1, %v8119_v34 }
0x1294   :  { %13011 = vmatpush3.bf16.xpose.msra.mxu1 %v8176_v25  ;;  %13012 = vmatprep.mubr.msk.bf16.mxu1 %vm15292_vm0, %v15291_v43 }
0x1295   :  { %13016 = vmatprep.subr.bf16.mxu1 %v15291_v43 }
0x129b   :  { %13013 = vmatmul.mubr.msk.bf16.vlgmr.msra.gmra.mrb[136].mxu1 %vm6578_vm1, %v8169_v58 }
0x129c   :  { %13018 = vmatprep.mubr.msk.bf16.mxu1 %vm15292_vm0, %v15291_v43 }
0x1355   :  { %v15927_v19 = vpop.f32.mrb[124].mxu1 }
0x1356   :  { %v12996_v39 = vpop.f32.mrb[125].mxu1 }
0x1357   :  { %v8069_v30 = vpop.f32.mrb[126].mxu1 }
0x1358   :  { %v12997_v23 = vpop.f32.mrb[127].mxu1 }
0x135d   :  { %v15929_v8 = vpop.f32.mrb[128].mxu1 }
0x135e   :  { %v13002_v33 = vpop.f32.mrb[129].mxu1 }
0x135f   :  { %v8115_v7 = vpop.f32.mrb[130].mxu1 }
0x1360   :  { %v13003_v53 = vpop.f32.mrb[131].mxu1 }
0x1366   :  { %v8162_v44 = vpop.f32.mrb[132].mxu1 }
0x1367   :  { %v13008_v51 = vpop.f32.mrb[133].mxu1  ;;  %v8218_v22 = vsel %vm6671_vm3, %v8162_v44, -inf }
0x1368   :  { %8219 = vmax.xlane.f32.xlu0 %v8218_v22  ;;  %v8165_v5 = vpop.f32.mrb[134].mxu1 }
0x1369   :  { %v13009_v4 = vpop.f32.mrb[135].mxu1 }
0x136e   :  { %v8212_v59 = vpop.f32.mrb[136].mxu1 }
0x136f   :  { %v13014_v17 = vpop.f32.mrb[137].mxu1  ;;  %v8221_v15 = vsel %vm6671_vm3, %v8212_v59, -inf }
0x1370   :  { %8222 = vmax.xlane.f32.xlu1 %v8221_v15  ;;  %v8215_v10 = vpop.f32.mrb[138].mxu1 }
0x1371   :  { %v13015_v60 = vpop.f32.mrb[139].mxu1  ;;  %v8403_v10 = vsel %vm6578_vm1, %v12731_v49, 0 }
0x1372   :  { %v15956_v60 = vpack.c.bf16 %v15642_v41, %v15642_v41 }
0x1381   :  { %8290 = vrot.lane.b32.xlu1 %v12727_v61, %s15293_s4 }
0x13a5   :  { %8446 = vmax.xlane.f32.xlu1 %v8445_v26  ;;  %v12729_v26 = vpack.c.bf16 %v15506_v45, %v15506_v45 }
0x13b6   :  { %8613 = vrot.lane.b32.xlu1 %v12731_v49, %s15293_s4 }
0x13f5   :  { %v8220_v34 = vpop.xlane.xlu0 %8219 }
0x13f6   :  { %v8224_v38 = vsub.f32 %v8162_v44, %v8220_v34  ;;  %v8519_v34 = vsel %vm6699_vm2, %v15956_v60, 0 }
0x13f8   :  { %v8226_v21 = vmul.f32 1.442695, %v8224_v38 }
0x13fa   :  { %15097 = vpow2.f32 %v8226_v21 }
0x13fd   :  { %v8223_v25 = vpop.xlane.xlu1 %8222 }
0x13fe   :  { %v8225_v58 = vsub.f32 %v8212_v59, %v8223_v25 }
0x1400   :  { %v8228_v39 = vmul.f32 1.442695, %v8225_v58 }
0x1401   :  { %v8291_v5 = vpop.permute.xlu1 %8290 }
0x1402   :  { %15099 = vpow2.f32 %v8228_v39  ;;  %v8296_v59 = vsel %vm6699_vm2, %v8291_v5, 0 }
0x1404   :  { %v15098_v30 = vpop.eup %15097 }
0x1405   :  { %v8230_v61 = vsel %vm6671_vm3, %v15098_v30, 0.0 }
0x1406   :  { %8231 = vadd.xlane.f32.xlu0 %v8230_v61 }
0x140c   :  { %v15100_v23 = vpop.eup %15099 }
0x140d   :  { %v8233_v33 = vsel %vm6671_vm3, %v15100_v23, 0.0 }
0x140e   :  { %8234 = vadd.xlane.f32.xlu0 %v8233_v33 }
0x1424   :  { %8242 = vrot.lane.b32.xlu0 %v15885_v62, %s15293_s4 }
0x1432   :  { %v8447_v49 = vpop.xlane.xlu1 %8446 }
0x1433   :  { %v8451_v41 = vsub.f32 %v15649_v48, %v8447_v49 }
0x1435   :  { %v8453_v45 = vmul.f32 1.442695, %v8451_v41 }
0x1493   :  { %v8232_v20 = vpop.xlane.xlu0 %8231 }
0x1494   :  { %15101 = vrcp.f32 %v8232_v20 }
0x149b   :  { %v8235_v7 = vpop.xlane.xlu0 %8234 }
0x149c   :  { %15103 = vrcp.f32 %v8235_v7 }
0x149d   :  { %15105 = vpow2.f32 %v8453_v45 }
0x149e   :  { %v15102_v53 = vpop.eup %15101 }
0x149f   :  { %v8238_v44 = vmul.f32 %v15102_v53, %v15098_v30  ;;  %v8243_v51 = vpop.permute.xlu0 %8242 }
0x14a0   :  { %v8248_v22 = vsel %vm6699_vm2, %v8243_v51, 0 }
0x14a1   :  { %13017 = vmatpush3.bf16.msra.mxu1 %v8248_v22  ;;  %v8240_v4 = vpack.c.bf16 %v8238_v44, %v8238_v44 }
0x14a2   :  { %13022 = vmatprep.subr.bf16.mxu1 %v15291_v43 }
0x14a4   :  { %13019 = vmatmul.mubr.msk.bf16.vlgmr.msra.gmra.mrb[140].mxu1 %vm6671_vm3, %v8240_v4 }
0x14a5   :  { %13023 = vmatpush3.bf16.msra.mxu1 %v8296_v59  ;;  %13024 = vmatprep.mubr.msk.bf16.mxu1 %vm15292_vm0, %v15291_v43 }
0x14a6   :  { %v15104_v62 = vpop.eup %15103  ;;  %13034 = vmatprep.subr.bf16.mxu1 %v15291_v43 }
0x14a7   :  { %v8239_v17 = vmul.f32 %v15104_v62, %v15100_v23  ;;  %v15106_v44 = vpop.eup %15105 }
0x14a8   :  { %v8457_v22 = vsel %vm6671_vm3, %v15106_v44, 0.0 }
0x14a9   :  { %v8241_v15 = vpack.c.bf16 %v8239_v17, %v8239_v17 }
0x14ac   :  { %13025 = vmatmul.mubr.msk.bf16.vlgmr.msra.gmra.mrb[144].mxu1 %vm6671_vm3, %v8241_v15 }
0x14ad   :  { %13036 = vmatprep.mubr.msk.bf16.mxu1 %vm15292_vm0, %v15291_v43 }
0x14ae   :  { %13035 = vmatpush3.bf16.xpose.msra.mxu1 %v8403_v10 }
0x14af   :  { %13046 = vmatprep.subr.bf16.mxu1 %v15291_v43 }
0x14b5   :  { %13037 = vmatmul.mubr.msk.bf16.vlgmr.msra.gmra.mrb[148].mxu1 %vm6578_vm1, %v12729_v26 }
0x14b6   :  { %13047 = vmatpush3.bf16.msra.mxu1 %v8519_v34  ;;  %13048 = vmatprep.mubr.msk.bf16.mxu1 %vm15292_vm0, %v15291_v43 }
0x14b7   :  { %13058 = vmatprep.subr.bf16.mxu1 %v15291_v43 }
0x1577   :  { %v15967_v38 = vpop.f32.mrb[140].mxu1 }
0x1578   :  { %v13020_v21 = vpop.f32.mrb[141].mxu1 }
0x1579   :  { %v8287_v25 = vpop.f32.mrb[142].mxu1 }
0x157a   :  { %v13021_v58 = vpop.f32.mrb[143].mxu1 }
0x157f   :  { %v15970_v39 = vpop.f32.mrb[144].mxu1 }
0x1580   :  { %v13293_v30 = vpack.i.bf16 %v15970_v39, %v15967_v38  ;;  %v13026_v61 = vpop.f32.mrb[145].mxu1  ;;  %v14614_v39 = vld [vmem:[#allocation8 + $0x34] ss:$24 sps:$4 sm:$0xff]  }
0x1581   :  { %v8335_v23 = vpop.f32.mrb[146].mxu1 }
0x1582   :  { %v13027_v33 = vpop.f32.mrb[147].mxu1 }
0x1588   :  { %v8439_v20 = vpop.f32.mrb[148].mxu1 }
0x1589   :  { %v13038_v7 = vpop.f32.mrb[149].mxu1  ;;  %v8448_v53 = vsel %vm6671_vm3, %v8439_v20, -inf }
0x158a   :  { %8449 = vmax.xlane.f32.xlu0 %v8448_v53  ;;  %v8442_v48 = vpop.f32.mrb[150].mxu1 }
0x158b   :  { %v13039_v51 = vpop.f32.mrb[151].mxu1 }
0x158e   :  { %8458 = vadd.xlane.f32.xlu0 %v8457_v22 }
0x15a4   :  { %8563 = vrot.lane.b32.xlu0 %v15573_v52, %s15293_s4  ;;  %v8614_v52 = vpop.permute.xlu1 %8613 }
0x15a5   :  { %v8619_v33 = vsel %vm6578_vm1, %v8614_v52, 0 }
0x1617   :  { %v8450_v5 = vpop.xlane.xlu0 %8449 }
0x1618   :  { %v8452_v4 = vsub.f32 %v8439_v20, %v8450_v5 }
0x161a   :  { %v8455_v59 = vmul.f32 1.442695, %v8452_v4 }
0x161b   :  { %v8459_v62 = vpop.xlane.xlu0 %8458 }
0x161c   :  { %15107 = vpow2.f32 %v8455_v59 }
0x161d   :  { %15109 = vrcp.f32 %v8459_v62 }
0x161f   :  { %v8564_v49 = vpop.permute.xlu0 %8563 }
0x1620   :  { %v8569_v21 = vsel %vm6578_vm1, %v8564_v49, 0 }
0x1626   :  { %v15108_v17 = vpop.eup %15107 }
0x1627   :  { %v15110_v15 = vpop.eup %15109  ;;  %v8460_v10 = vsel %vm6671_vm3, %v15108_v17, 0.0 }
0x1628   :  { %v8465_v34 = vmul.f32 %v15110_v15, %v15106_v44  ;;  %8461 = vadd.xlane.f32.xlu1 %v8460_v10 }
0x162a   :  { %v8467_v41 = vpack.c.bf16 %v8465_v34, %v8465_v34 }
0x162c   :  { %13043 = vmatmul.mubr.msk.bf16.vlgmr.msra.gmra.mrb[24].mxu0 %vm6671_vm3, %v8467_v41 }
0x162d   :  { %13053 = vmatpush3.bf16.xpose.msra.mxu0 %v8569_v21  ;;  %13054 = vmatprep.mubr.msk.bf16.mxu0 %vm15292_vm0, %v15291_v43 }
0x162e   :  { %13064 = vmatprep.subr.bf16.mxu0 %v15291_v43 }
0x1639   :  { %8561 = vrot.lane.b32.xlu1 %v15582_v14, %s15293_s4 }
0x163d   :  { %8611 = vrot.lane.b32.xlu1 %v12729_v26, %s15293_s4 }
0x16b5   :  { %v8462_v25 = vpop.xlane.xlu1 %8461 }
0x16b6   :  { %15111 = vrcp.f32 %v8462_v25 }
0x16b9   :  { %v8562_v58 = vpop.permute.xlu1 %8561 }
0x16ba   :  { %13055 = vmatmul.mubr.msk.bf16.vlgmr.msra.gmra.mrb[28].mxu0 %vm6578_vm1, %v8562_v58 }
0x16bb   :  { %13066 = vmatprep.mubr.msk.bf16.mxu0 %vm15292_vm0, %v15291_v43 }
0x16bd   :  { %v8612_v14 = vpop.permute.xlu1 %8611 }
0x16c0   :  { %v15112_v45 = vpop.eup %15111 }
0x16c1   :  { %v8466_v61 = vmul.f32 %v15112_v45, %v15108_v17 }
0x16c3   :  { %v8468_v23 = vpack.c.bf16 %v8466_v61, %v8466_v61 }
0x16c5   :  { %13049 = vmatmul.mubr.msk.bf16.vlgmr.msra.gmra.mrb[152].mxu1 %vm6671_vm3, %v8468_v23 }
0x16c6   :  { %13059 = vmatpush3.bf16.xpose.msra.mxu1 %v8619_v33  ;;  %13060 = vmatprep.mubr.msk.bf16.mxu1 %vm15292_vm0, %v15291_v43 }
0x16c7   :  { %13070 = vmatprep.subr.bf16.mxu1 %v15291_v43 }
0x16cd   :  { %13061 = vmatmul.mubr.msk.bf16.vlgmr.msra.gmra.mrb[156].mxu1 %vm6578_vm1, %v8612_v14 }
0x16ce   :  { %13072 = vmatprep.mubr.msk.bf16.mxu1 %vm15292_vm0, %v15291_v43 }
0x16ff   :  { %v15998_v26 = vpop.f32.mrb[24].mxu0 }
0x1700   :  { %v13044_v20 = vpop.f32.mrb[25].mxu0 }
0x1701   :  { %v8512_v7 = vpop.f32.mrb[26].mxu0 }
0x1702   :  { %v13045_v53 = vpop.f32.mrb[27].mxu0 }
0x178d   :  { %v8605_v44 = vpop.f32.mrb[28].mxu0 }
0x178e   :  { %v13056_v48 = vpop.f32.mrb[29].mxu0  ;;  %v8661_v51 = vsel %vm6671_vm3, %v8605_v44, -inf }
0x178f   :  { %8662 = vmax.xlane.f32.xlu0 %v8661_v51  ;;  %v8608_v22 = vpop.f32.mrb[30].mxu0  ;;  %v1021_v51 = vrot.slane %v15854_v18, %v15866_v47 }
0x1790   :  { %v13057_v5 = vpop.f32.mrb[31].mxu0 }
0x1798   :  { %v16001_v4 = vpop.f32.mrb[152].mxu1 }
0x1799   :  { %v13050_v59 = vpop.f32.mrb[153].mxu1 }
0x179a   :  { %v8558_v62 = vpop.f32.mrb[154].mxu1 }
0x179b   :  { %v13051_v17 = vpop.f32.mrb[155].mxu1  ;;  %v13149_v62 = vadd.f32 %v15561_v16, %v1021_v51 }
0x17a0   :  { %v8655_v15 = vpop.f32.mrb[156].mxu1 }
0x17a1   :  { %v13062_v10 = vpop.f32.mrb[157].mxu1  ;;  %v8664_v34 = vsel %vm6671_vm3, %v8655_v15, -inf }
0x17a2   :  { %8665 = vmax.xlane.f32.xlu1 %v8664_v34  ;;  %v8658_v49 = vpop.f32.mrb[158].mxu1  ;;  %v997_v10 = vrot.slane %v15781_v32, %v15591_v57 }
0x17a3   :  { %v13063_v41 = vpop.f32.mrb[159].mxu1 }
0x17a4   :  { %v13139_v32 = vadd.f32 %v15508_v46, %v997_v10 }
0x17b3   :  { %8733 = vrot.lane.b32.xlu1 %v15956_v60, %s15293_s4 }
0x181c   :  { %v8663_v21 = vpop.xlane.xlu0 %8662 }
0x181d   :  { %v8667_v52 = vsub.f32 %v8605_v44, %v8663_v21 }
0x181f   :  { %v8669_v25 = vmul.f32 1.442695, %v8667_v52  ;;  %v16036_v52 = vpack.c.bf16 %v15638_v63, %v15638_v63 }
0x1821   :  { %15113 = vpow2.f32 %v8669_v25 }
0x182b   :  { %v15114_v58 = vpop.eup %15113 }
0x182c   :  { %v8673_v45 = vsel %vm6671_vm3, %v15114_v58, 0.0 }
0x182d   :  { %8674 = vadd.xlane.f32.xlu0 %v8673_v45  ;;  %v8916_v45 = vsel %vm6699_vm2, %v16036_v52, 0 }
0x182f   :  { %v8666_v61 = vpop.xlane.xlu1 %8665 }
0x1830   :  { %v8668_v23 = vsub.f32 %v8655_v15, %v8666_v61  ;;  %v16019_v15 = vpack.c.bf16 %v13149_v62, %v13149_v62 }
0x1832   :  { %v8671_v33 = vmul.f32 1.442695, %v8668_v23  ;;  %v8800_v16 = vsel %vm6578_vm1, %v16019_v15, 0 }
0x1833   :  { %v8734_v14 = vpop.permute.xlu1 %8733 }
0x1834   :  { %15115 = vpow2.f32 %v8671_v33  ;;  %v8739_v20 = vsel %vm6699_vm2, %v8734_v14, 0 }
0x1835   :  { %13071 = vmatpush3.bf16.msra.mxu1 %v8739_v20 }
0x1836   :  { %13082 = vmatprep.subr.bf16.mxu1 %v15291_v43 }
0x183e   :  { %v15116_v7 = vpop.eup %15115 }
0x183f   :  { %v8676_v60 = vsel %vm6671_vm3, %v15116_v7, 0.0 }
0x1840   :  { %8677 = vadd.xlane.f32.xlu0 %v8676_v60 }
0x1856   :  { %8685 = vrot.lane.b32.xlu0 %v15640_v0, %s15293_s4  ;;  %v13151_v0 = vadd.f32 %v15567_v55, %v1021_v51  ;;  %v13137_v55 = vadd.f32 %v15503_v40, %v997_v10  ;;  %v16041_v40 = vpack.c.bf16 %v15644_v42, %v15644_v42 }
0x1858   :  { %v12737_v34 = vpack.c.bf16 %v13151_v0, %v13151_v0  ;;  %v12734_v25 = vpack.c.bf16 %v13137_v55, %v13137_v55  ;;  %v8962_v46 = vsel %vm6699_vm2, %v16041_v40, 0 }
0x185a   :  { %v8846_v21 = vsel %vm6578_vm1, %v12737_v34, 0 }
0x18ba   :  { %v8675_v53 = vpop.xlane.xlu0 %8674 }
0x18bb   :  { %15117 = vrcp.f32 %v8675_v53 }
0x18c5   :  { %v15118_v44 = vpop.eup %15117 }
0x18c6   :  { %v8681_v22 = vmul.f32 %v15118_v44, %v15114_v58  ;;  %v12735_v58 = vpack.c.bf16 %v13139_v32, %v13139_v32 }
0x18c8   :  { %v8683_v17 = vpack.c.bf16 %v8681_v22, %v8681_v22 }
0x18cd   :  { %v8678_v48 = vpop.xlane.xlu0 %8677 }
0x18ce   :  { %15119 = vrcp.f32 %v8678_v48 }
0x18d1   :  { %v8686_v5 = vpop.permute.xlu0 %8685 }
0x18d2   :  { %v8691_v59 = vsel %vm6699_vm2, %v8686_v5, 0 }
0x18d3   :  { %13065 = vmatpush3.bf16.msra.mxu0 %v8691_v59 }
0x18d4   :  { %13076 = vmatprep.subr.bf16.mxu0 %v15291_v43 }
0x18d6   :  { %13067 = vmatmul.mubr.msk.bf16.vlgmr.msra.gmra.mrb[32].mxu0 %vm6671_vm3, %v8683_v17 }
0x18d7   :  { %13078 = vmatprep.mubr.msk.bf16.mxu0 %vm15292_vm0, %v15291_v43 }
0x18d8   :  { %v15120_v18 = vpop.eup %15119 }
0x18d9   :  { %v8682_v49 = vmul.f32 %v15120_v18, %v15116_v7 }
0x18db   :  { %v8684_v41 = vpack.c.bf16 %v8682_v49, %v8682_v49 }
0x18dc   :  { %13077 = vmatpush3.bf16.xpose.msra.mxu0 %v8800_v16 }
0x18dd   :  { %13073 = vmatmul.mubr.msk.bf16.vlgmr.msra.gmra.mrb[160].mxu1 %vm6671_vm3, %v8684_v41  ;;  %13088 = vmatprep.subr.bf16.mxu0 %v15291_v43 }
0x18de   :  { %13083 = vmatpush3.bf16.xpose.msra.mxu1 %v8846_v21  ;;  %13084 = vmatprep.mubr.msk.bf16.mxu1 %vm15292_vm0, %v15291_v43 }
0x18df   :  { %13094 = vmatprep.subr.bf16.mxu1 %v15291_v43 }
0x18e3   :  { %13079 = vmatmul.mubr.msk.bf16.vlgmr.msra.gmra.mrb[36].mxu0 %vm6578_vm1, %v12734_v25 }
0x18e4   :  { %13089 = vmatpush3.bf16.msra.mxu0 %v8916_v45  ;;  %13090 = vmatprep.mubr.msk.bf16.mxu0 %vm15292_vm0, %v15291_v43 }
0x18e5   :  { %13085 = vmatmul.mubr.msk.bf16.vlgmr.msra.gmra.mrb[164].mxu1 %vm6578_vm1, %v12735_v58  ;;  %13100 = vmatprep.subr.bf16.mxu0 %v15291_v43 }
0x18e6   :  { %13095 = vmatpush3.bf16.msra.mxu1 %v8962_v46  ;;  %13096 = vmatprep.mubr.msk.bf16.mxu1 %vm15292_vm0, %v15291_v43 }
0x18e7   :  { %13106 = vmatprep.subr.bf16.mxu1 %v15291_v43 }
0x19a9   :  { %v16055_v63 = vpop.f32.mrb[32].mxu0 }
0x19aa   :  { %v13068_v42 = vpop.f32.mrb[33].mxu0 }
0x19ab   :  { %v8730_v61 = vpop.f32.mrb[34].mxu0 }
0x19ac   :  { %v13069_v23 = vpop.f32.mrb[35].mxu0 }
0x19b0   :  { %v16057_v33 = vpop.f32.mrb[160].mxu1 }
0x19b1   :  { %v13308_v14 = vpack.i.bf16 %v16057_v33, %v16055_v63  ;;  %v13074_v20 = vpop.f32.mrb[161].mxu1 }
0x19b2   :  { %v8778_v7 = vpop.f32.mrb[162].mxu1 }
0x19b3   :  { %v13075_v60 = vpop.f32.mrb[163].mxu1 }
0x19b6   :  { %v8836_v53 = vpop.f32.mrb[36].mxu0 }
0x19b7   :  { %v13080_v44 = vpop.f32.mrb[37].mxu0  ;;  %v8888_v48 = vsel %vm6671_vm3, %v8836_v53, -inf }
0x19b8   :  { %8889 = vmax.xlane.f32.xlu1 %v8888_v48  ;;  %v8839_v51 = vpop.f32.mrb[38].mxu0  ;;  %v8882_v22 = vpop.f32.mrb[164].mxu1 }
0x19b9   :  { %v13081_v5 = vpop.f32.mrb[39].mxu0  ;;  %v13086_v59 = vpop.f32.mrb[165].mxu1  ;;  %v8891_v62 = vsel %vm6671_vm3, %v8882_v22, -inf }
0x19ba   :  { %8892 = vmax.xlane.f32.xlu0 %v8891_v62  ;;  %v8885_v17 = vpop.f32.mrb[166].mxu1 }
0x19bb   :  { %v13087_v0 = vpop.f32.mrb[167].mxu1 }
0x19c9   :  { %9056 = vrot.lane.b32.xlu1 %v12737_v34, %s15293_s4 }
0x1a45   :  { %v8890_v18 = vpop.xlane.xlu1 %8889 }
0x1a46   :  { %v8894_v10 = vsub.f32 %v8836_v53, %v8890_v18 }
0x1a47   :  { %v8893_v49 = vpop.xlane.xlu0 %8892 }
0x1a48   :  { %v8896_v16 = vmul.f32 1.442695, %v8894_v10  ;;  %v8895_v41 = vsub.f32 %v8882_v22, %v8893_v49 }
0x1a49   :  { %v9057_v34 = vpop.permute.xlu1 %9056 }
0x1a4a   :  { %15121 = vpow2.f32 %v8896_v16  ;;  %v8898_v55 = vmul.f32 1.442695, %v8895_v41 }
0x1a4c   :  { %15123 = vpow2.f32 %v8898_v55 }
0x1a54   :  { %v15122_v21 = vpop.eup %15121 }
0x1a55   :  { %v8900_v32 = vsel %vm6671_vm3, %v15122_v21, 0.0 }
0x1a56   :  { %v15124_v45 = vpop.eup %15123  ;;  %8901 = vadd.xlane.f32.xlu0 %v8900_v32 }
0x1a57   :  { %v8903_v46 = vsel %vm6671_vm3, %v15124_v45, 0.0 }
0x1a58   :  { %8904 = vadd.xlane.f32.xlu1 %v8903_v46 }
0x1a69   :  { %9004 = vrot.lane.b32.xlu1 %v12734_v25, %s15293_s4 }
0x1a6c   :  { %9006 = vrot.lane.b32.xlu0 %v16019_v15, %s15293_s4  ;;  %v9062_v15 = vsel %vm6578_vm1, %v9057_v34, 0 }
0x1a6d   :  { %9054 = vrot.lane.b32.xlu1 %v12735_v58, %s15293_s4 }
0x1ae3   :  { %v8902_v42 = vpop.xlane.xlu0 %8901 }
0x1ae4   :  { %15125 = vrcp.f32 %v8902_v42 }
0x1ae5   :  { %v8905_v61 = vpop.xlane.xlu1 %8904 }
0x1ae6   :  { %15127 = vrcp.f32 %v8905_v61 }
0x1ae7   :  { %v9007_v60 = vpop.permute.xlu0 %9006 }
0x1ae8   :  { %v9012_v48 = vsel %vm6578_vm1, %v9007_v60, 0 }
0x1ae9   :  { %v9005_v58 = vpop.permute.xlu1 %9004 }
0x1aed   :  { %v9055_v51 = vpop.permute.xlu1 %9054 }
0x1aee   :  { %v15126_v23 = vpop.eup %15125 }
0x1aef   :  { %v8908_v20 = vmul.f32 %v15126_v23, %v15122_v21 }
0x1af0   :  { %v15128_v7 = vpop.eup %15127 }
0x1af1   :  { %v8909_v53 = vmul.f32 %v15128_v7, %v15124_v45  ;;  %v8910_v44 = vpack.c.bf16 %v8908_v20, %v8908_v20 }
0x1af3   :  { %13091 = vmatmul.mubr.msk.bf16.vlgmr.msra.gmra.mrb[40].mxu0 %vm6671_vm3, %v8910_v44  ;;  %v8911_v25 = vpack.c.bf16 %v8909_v53, %v8909_v53 }
0x1af4   :  { %13101 = vmatpush3.bf16.xpose.msra.mxu0 %v9012_v48  ;;  %13102 = vmatprep.mubr.msk.bf16.mxu0 %vm15292_vm0, %v15291_v43 }
0x1af5   :  { %13097 = vmatmul.mubr.msk.bf16.vlgmr.msra.gmra.mrb[168].mxu1 %vm6671_vm3, %v8911_v25  ;;  %13112 = vmatprep.subr.bf16.mxu0 %v15291_v43 }
0x1af6   :  { %13107 = vmatpush3.bf16.xpose.msra.mxu1 %v9062_v15  ;;  %13108 = vmatprep.mubr.msk.bf16.mxu1 %vm15292_vm0, %v15291_v43 }
0x1af7   :  { %13118 = vmatprep.subr.bf16.mxu1 %v15291_v43 }
0x1afb   :  { %13103 = vmatmul.mubr.msk.bf16.vlgmr.msra.gmra.mrb[44].mxu0 %vm6578_vm1, %v9005_v58 }
0x1afc   :  { %13114 = vmatprep.mubr.msk.bf16.mxu0 %vm15292_vm0, %v15291_v43 }
0x1afd   :  { %13109 = vmatmul.mubr.msk.bf16.vlgmr.msra.gmra.mrb[172].mxu1 %vm6578_vm1, %v9055_v51 }
0x1afe   :  { %13120 = vmatprep.mubr.msk.bf16.mxu1 %vm15292_vm0, %v15291_v43 }
0x1bc6   :  { %v16086_v22 = vpop.f32.mrb[40].mxu0 }
0x1bc7   :  { %v13092_v5 = vpop.f32.mrb[41].mxu0 }
0x1bc8   :  { %v8955_v59 = vpop.f32.mrb[42].mxu0  ;;  %v16088_v62 = vpop.f32.mrb[168].mxu1 }
0x1bc9   :  { %v13093_v17 = vpop.f32.mrb[43].mxu0  ;;  %v13098_v0 = vpop.f32.mrb[169].mxu1 }
0x1bca   :  { %v9001_v18 = vpop.f32.mrb[170].mxu1 }
0x1bcb   :  { %v13099_v10 = vpop.f32.mrb[171].mxu1 }
0x1bce   :  { %v9048_v49 = vpop.f32.mrb[44].mxu0 }
0x1bcf   :  { %v13104_v16 = vpop.f32.mrb[45].mxu0  ;;  %v9104_v41 = vsel %vm6671_vm3, %v9048_v49, -inf }
0x1bd0   :  { %9105 = vmax.xlane.f32.xlu0 %v9104_v41  ;;  %v9051_v55 = vpop.f32.mrb[46].mxu0  ;;  %v9098_v21 = vpop.f32.mrb[172].mxu1 }
0x1bd1   :  { %v13105_v32 = vpop.f32.mrb[47].mxu0  ;;  %v13110_v45 = vpop.f32.mrb[173].mxu1  ;;  %v9107_v43 = vsel %vm6671_vm3, %v9098_v21, -inf }
0x1bd2   :  { %9108 = vmax.xlane.f32.xlu1 %v9107_v43  ;;  %v9101_v46 = vpop.f32.mrb[174].mxu1  ;;  %v14609_v45 = vld [vmem:[#allocation8] ss:$24 sps:$4 sm:$0xff]  }
0x1bd3   :  { %v13111_v34 = vpop.f32.mrb[175].mxu1 }
0x1be3   :  { %9176 = vrot.lane.b32.xlu1 %v16041_v40, %s15293_s4 }
0x1be7   :  { %13284 = vrot.lane.b32.xlu1 %v13283_v54, %s15293_s4 }
0x1beb   :  { %13289 = vrot.lane.b32.xlu1 %v13288_v36, %s15293_s4 }
0x1bef   :  { %13299 = vrot.lane.b32.xlu1 %v13298_v13, %s15293_s4 }
0x1bf3   :  { %13309 = vrot.lane.b32.xlu1 %v13308_v14, %s15293_s4 }
0x1c5d   :  { %v9106_v40 = vpop.xlane.xlu0 %9105 }
0x1c5e   :  { %v9110_v42 = vsub.f32 %v9048_v49, %v9106_v40 }
0x1c5f   :  { %v9109_v61 = vpop.xlane.xlu1 %9108 }
0x1c60   :  { %v9112_v28 = vmul.f32 1.442695, %v9110_v42  ;;  %v9111_v24 = vsub.f32 %v9098_v21, %v9109_v61  ;;  %v14612_v42 = vld [vmem:[#allocation8 + $0x30] ss:$24 sps:$4 sm:$0xff]  }
0x1c61   :  { %v14615_v61 = vld [vmem:[#allocation8 + $0x8] ss:$24 sps:$4 sm:$0xff]  }
0x1c62   :  { %15129 = vpow2.f32 %v9112_v28  ;;  %v9114_v54 = vmul.f32 1.442695, %v9111_v24  ;;  %v14620_v24 = vld [vmem:[#allocation8 + $0x64] ss:$24 sps:$4 sm:$0xff]  }
0x1c63   :  { %v9177_v23 = vpop.permute.xlu1 %9176 }
0x1c64   :  { %15131 = vpow2.f32 %v9114_v54  ;;  %v9182_v1 = vsel %vm6699_vm2, %v9177_v23, 0  ;;  %v14623_v54 = vld [vmem:[#allocation8 + $0x3c] ss:$24 sps:$4 sm:$0xff]  }
0x1c65   :  { %13119 = vmatpush3.bf16.msra.mxu1 %v9182_v1  ;;  %v14626_v23 = vld [vmem:[#allocation8 + $0x94] ss:$24 sps:$4 sm:$0xff]  }
0x1c66   :  { %v14629_v1 = vld [vmem:[#allocation8 + $0x6c] ss:$24 sps:$4 sm:$0xff]  }
0x1c67   :  { %v13285_v12 = vpop.permute.xlu1 %13284 }
0x1c68   :  { %v13287_v36 = vunpack.i.h.bf16 %v13285_v12  ;;  %v13286_v31 = vunpack.i.l.bf16 %v13285_v12  ;;  %v14624_v12 = vld [vmem:[#allocation8 + $0x90] ss:$24 sps:$4 sm:$0xff]  }
0x1c6a   :  { %v9274_v37 = vsel %vm6578_vm1, %v15760_v56, %v13286_v31  ;;  %v9275_v13 = vsel %vm6578_vm1, %v15762_v29, %v13287_v36  ;;  %v14627_v36 = vld [vmem:[#allocation8 + $0x68] ss:$24 sps:$4 sm:$0xff]   ;;  %v14632_v31 = vld [vmem:[#allocation8 + $0xc4] ss:$24 sps:$4 sm:$0xff]  }
0x1c6b   :  { %v13290_v63 = vpop.permute.xlu1 %13289  ;;  %v16115_v33 = vpack.c.bf16 %v9275_v13, %v9274_v37  ;;  %v14635_v37 = vld [vmem:[#allocation8 + $0x9c] ss:$24 sps:$4 sm:$0xff]   ;;  %v14630_v13 = vld [vmem:[#allocation8 + $0xc0] ss:$24 sps:$4 sm:$0xff]  }
0x1c6c   :  { %v15130_v14 = vpop.eup %15129  ;;  %v13292_v20 = vunpack.i.h.bf16 %v13290_v63  ;;  %v13291_v7 = vunpack.i.l.bf16 %v13290_v63  ;;  %v14633_v63 = vld [vmem:[#allocation8 + $0x98] ss:$24 sps:$4 sm:$0xff]  }
0x1c6d   :  { %v9116_v60 = vsel %vm6671_vm3, %v15130_v14, 0.0 }
0x1c6e   :  { %v15132_v53 = vpop.eup %15131  ;;  %v9273_v44 = vsel %vm6578_vm1, %v15681_v11, %v13292_v20  ;;  %v9272_v48 = vsel %vm6578_vm1, %v15679_v50, %v13291_v7  ;;  %9117 = vadd.xlane.f32.xlu0 %v9116_v60  ;;  %v14641_v20 = vld [vmem:[#allocation8 + $0xcc] ss:$24 sps:$4 sm:$0xff]   ;;  %v14636_v7 = vld [vmem:[#allocation8 + $0xf0] ss:$24 sps:$4 sm:$0xff]  }
0x1c6f   :  { %v16122_v56 = vpack.c.bf16 %v9273_v44, %v9272_v48  ;;  %v13300_v25 = vpop.permute.xlu1 %13299  ;;  %v9119_v58 = vsel %vm6671_vm3, %v15132_v53, 0.0  ;;  %v14639_v60 = vld [vmem:[#allocation8 + $0xc8] ss:$24 sps:$4 sm:$0xff]   ;;  %v14647_v44 = vld [vmem:[#allocation8 + $0xfc] ss:$24 sps:$4 sm:$0xff]  }
0x1c70   :  { %v13302_v29 = vunpack.i.h.bf16 %v13300_v25  ;;  %v13301_v15 = vunpack.i.l.bf16 %v13300_v25  ;;  %v14642_v48 = vld [vmem:[#allocation8 + $0x120] ss:$24 sps:$4 sm:$0xff]  }
0x1c71   :  { %v14645_v25 = vld [vmem:[#allocation8 + $0xf8] ss:$24 sps:$4 sm:$0xff]  }
0x1c72   :  { %v9277_v51 = vsel %vm6578_vm1, %v15844_v2, %v13302_v29  ;;  %v9276_v5 = vsel %vm6578_vm1, %v15842_v27, %v13301_v15  ;;  %9120 = vadd.xlane.f32.xlu0 %v9119_v58  ;;  %v14617_v27 = vld [vmem:[#allocation8 + $0xc] ss:$24 sps:$4 sm:$0xff]   ;;  %v14648_v58 = vld [vmem:[#allocation8 + $0x150] ss:$24 sps:$4 sm:$0xff]  }
0x1c73   :  { %v16129_v59 = vpack.c.bf16 %v9277_v51, %v9276_v5  ;;  %v13310_v11 = vpop.permute.xlu1 %13309  ;;  %11179 = vmatprep.subr.bf16.mxu1 %v14617_v27  ;;  %v14650_v29 = vld [vmem:[#allocation8 + $0x154] ss:$24 sps:$4 sm:$0xff]   ;;  %v14651_v51 = vld [vmem:[#allocation8 + $0x128] ss:$24 sps:$4 sm:$0xff]   ;;  %v14656_v5 = vld [vmem:[#allocation8 + $0x184] ss:$24 sps:$4 sm:$0xff]  }
0x1c74   :  { %v13312_v17 = vunpack.i.h.bf16 %v13310_v11  ;;  %v13311_v50 = vunpack.i.l.bf16 %v13310_v11  ;;  %v14653_v15 = vld [vmem:[#allocation8 + $0x12c] ss:$24 sps:$4 sm:$0xff]   ;;  %v14659_v11 = vld [vmem:[#allocation8 + $0x15c] ss:$24 sps:$4 sm:$0xff]   ;;  %v14660_v27 = vld [vmem:[#allocation8 + $0x1b0] ss:$24 sps:$4 sm:$0xff]  }
0x1c76   :  { %v9281_v0 = vsel %vm6578_vm1, %v16001_v4, %v13312_v17  ;;  %v9280_v18 = vsel %vm6578_vm1, %v15998_v26, %v13311_v50  ;;  %v14611_v4 = vld [vmem:[#allocation8 + $0x4] ss:$24 sps:$4 sm:$0xff]   ;;  %v14654_v17 = vld [vmem:[#allocation8 + $0x180] ss:$24 sps:$4 sm:$0xff]  }
0x1c77   :  { %v16135_v10 = vpack.c.bf16 %v9281_v0, %v9280_v18  ;;  %v14657_v50 = vld [vmem:[#allocation8 + $0x158] ss:$24 sps:$4 sm:$0xff]   ;;  %v14662_v0 = vld [vmem:[#allocation8 + $0x1b4] ss:$24 sps:$4 sm:$0xff]  }
0x1c78   :  { %v14665_v18 = vld [vmem:[#allocation8 + $0x18c] ss:$24 sps:$4 sm:$0xff]  }
0x1c88   :  { %9128 = vrot.lane.b32.xlu0 %v16036_v52, %s15293_s4 }
0x1c8c   :  { %13294 = vrot.lane.b32.xlu0 %v13293_v30, %s15293_s4 }
0x1cfb   :  { %v9118_v2 = vpop.xlane.xlu0 %9117 }
0x1cfc   :  { %15133 = vrcp.f32 %v9118_v2  ;;  %v14663_v2 = vld [vmem:[#allocation8 + $0x188] ss:$24 sps:$4 sm:$0xff]  }
0x1cff   :  { %v9121_v49 = vpop.xlane.xlu0 %9120 }
0x1d00   :  { %15135 = vrcp.f32 %v9121_v49  ;;  %v14668_v49 = vld [vmem:[#allocation8 + $0x1e4] ss:$24 sps:$4 sm:$0xff]  }
0x1d03   :  { %v9129_v16 = vpop.permute.xlu0 %9128 }
0x1d04   :  { %v9134_v26 = vsel %vm6699_vm2, %v9129_v16, 0  ;;  %v14666_v16 = vld [vmem:[#allocation8 + $0x1e0] ss:$24 sps:$4 sm:$0xff]  }
0x1d05   :  { %13113 = vmatpush3.bf16.msra.mxu0 %v9134_v26  ;;  %v14669_v26 = vld [vmem:[#allocation8 + $0x1b8] ss:$24 sps:$4 sm:$0xff]  }
0x1d06   :  { %v15134_v41 = vpop.eup %15133  ;;  %11050 = vmatprep.subr.bf16.mxu0 %v14611_v4  ;;  %v14671_v4 = vld [vmem:[#allocation8 + $0x1bc] ss:$24 sps:$4 sm:$0xff]  }
0x1d07   :  { %v9124_v55 = vmul.f32 %v15134_v41, %v15130_v14  ;;  %v13295_v52 = vpop.permute.xlu0 %13294  ;;  %v14638_v14 = vld [vmem:[#allocation8 + $0xf4] ss:$24 sps:$4 sm:$0xff]  }
0x1d08   :  { %v13297_v21 = vunpack.i.h.bf16 %v13295_v52  ;;  %v13296_v32 = vunpack.i.l.bf16 %v13295_v52  ;;  %v14674_v41 = vld [vmem:[#allocation8 + $0x214] ss:$24 sps:$4 sm:$0xff]   ;;  %v14672_v52 = vld [vmem:[#allocation8 + $0x210] ss:$24 sps:$4 sm:$0xff]  }
0x1d09   :  { %v9126_v38 = vpack.c.bf16 %v9124_v55, %v9124_v55  ;;  %v14677_v55 = vld [vmem:[#allocation8 + $0x1ec] ss:$24 sps:$4 sm:$0xff]  }
0x1d0a   :  { %v15136_v30 = vpop.eup %15135  ;;  %v9278_v43 = vsel %vm6578_vm1, %v15927_v19, %v13296_v32  ;;  %v9279_v46 = vsel %vm6578_vm1, %v15929_v8, %v13297_v21  ;;  %v14618_v19 = vld [vmem:[#allocation8 + $0x60] ss:$24 sps:$4 sm:$0xff]   ;;  %v14680_v32 = vld [vmem:[#allocation8 + $0x244] ss:$24 sps:$4 sm:$0xff]  }
0x1d0b   :  { %v9125_v34 = vmul.f32 %v15136_v30, %v15132_v53  ;;  %13115 = vmatmul.mubr.msk.bf16.vlgmr.msra.gmra.mrb[48].mxu0 %vm6671_vm3, %v9126_v38  ;;  %v16149_v40 = vpack.c.bf16 %v9279_v46, %v9278_v43  ;;  %v14621_v8 = vld [vmem:[#allocation8 + $0x38] ss:$24 sps:$4 sm:$0xff]   ;;  %v14644_v53 = vld [vmem:[#allocation8 + $0x124] ss:$24 sps:$4 sm:$0xff]   ;;  %v14675_v21 = vld [vmem:[#allocation8 + $0x1e8] ss:$24 sps:$4 sm:$0xff]  }
0x1d0c   :  { %11051 = vmatpush1.bf16.msra.mxu0 %v14609_v45  ;;  %11082 = vmatprep.mubr.bf16.mxu0 %v16115_v33  ;;  %v14683_v45 = vld [vmem:[#allocation8 + $0x21c] ss:$24 sps:$4 sm:$0xff]   ;;  %v14678_v38 = vld [vmem:[#allocation8 + $0x240] ss:$24 sps:$4 sm:$0xff]   ;;  %v14689_v43 = vld [vmem:[#allocation8 + $0x24c] ss:$24 sps:$4 sm:$0xff]  }
0x1d0d   :  { %11052 = vmatprep.subr.bf16.mxu0 %v14614_v39  ;;  %v9127_v28 = vpack.c.bf16 %v9125_v34, %v9125_v34  ;;  %v14681_v39 = vld [vmem:[#allocation8 + $0x218] ss:$24 sps:$4 sm:$0xff]   ;;  %v14686_v30 = vld [vmem:[#allocation8 + $0x274] ss:$24 sps:$4 sm:$0xff]   ;;  %v14687_v34 = vld [vmem:[#allocation8 + $0x248] ss:$24 sps:$4 sm:$0xff]  }
0x1d0e   :  { %v14684_v46 = vld [vmem:[#allocation8 + $0x270] ss:$24 sps:$4 sm:$0xff]  }
0x1d0f   :  { %13121 = vmatmul.mubr.msk.bf16.vlgmr.msra.gmra.mrb[176].mxu1 %vm6671_vm3, %v9127_v28  ;;  %v14690_v28 = vld [vmem:[#allocation8 + $0x2a0] ss:$24 sps:$4 sm:$0xff]  }
0x1d10   :  { %11053 = vmatpush1.bf16.msra.mxu0 %v14612_v42  ;;  %11180 = vmatpush1.bf16.msra.mxu1 %v14615_v61  ;;  %v14692_v42 = vld [vmem:[#allocation8 + $0x2a4] ss:$24 sps:$4 sm:$0xff]  }
0x1d11   :  { %11211 = vmatprep.mubr.bf16.mxu1 %v16115_v33  ;;  %11054 = vmatprep.subr.bf16.mxu0 %v14620_v24  ;;  %v14695_v61 = vld [vmem:[#allocation8 + $0x27c] ss:$24 sps:$4 sm:$0xff]   ;;  %v14693_v24 = vld [vmem:[#allocation8 + $0x278] ss:$24 sps:$4 sm:$0xff]  }
0x1d12   :  { %11181 = vmatprep.subr.bf16.mxu1 %v14623_v54  ;;  %v14698_v54 = vld [vmem:[#allocation8 + $0x2d4] ss:$24 sps:$4 sm:$0xff]  }
0x1d14   :  { %11055 = vmatpush1.bf16.msra.mxu0 %v14618_v19  ;;  %11182 = vmatpush1.bf16.msra.mxu1 %v14621_v8  ;;  %v14701_v19 = vld [vmem:[#allocation8 + $0x2ac] ss:$24 sps:$4 sm:$0xff]   ;;  %v14696_v8 = vld [vmem:[#allocation8 + $0x2d0] ss:$24 sps:$4 sm:$0xff]  }
0x1d15   :  { %11056 = vmatprep.subr.bf16.mxu0 %v14626_v23  ;;  %11183 = vmatprep.subr.bf16.mxu1 %v14629_v1  ;;  %v14699_v23 = vld [vmem:[#allocation8 + $0x2a8] ss:$24 sps:$4 sm:$0xff]   ;;  %v14704_v1 = vld [vmem:[#allocation8 + $0x304] ss:$24 sps:$4 sm:$0xff]  }
0x1d18   :  { %11057 = vmatpush1.bf16.msra.mxu0 %v14624_v12  ;;  %11184 = vmatpush1.bf16.msra.mxu1 %v14627_v36  ;;  %v14707_v12 = vld [vmem:[#allocation8 + $0x2dc] ss:$24 sps:$4 sm:$0xff]   ;;  %v14702_v36 = vld [vmem:[#allocation8 + $0x300] ss:$24 sps:$4 sm:$0xff]  }
0x1d19   :  { %11058 = vmatprep.subr.bf16.mxu0 %v14632_v31  ;;  %11185 = vmatprep.subr.bf16.mxu1 %v14635_v37  ;;  %v14705_v31 = vld [vmem:[#allocation8 + $0x2d8] ss:$24 sps:$4 sm:$0xff]   ;;  %v14710_v37 = vld [vmem:[#allocation8 + $0x334] ss:$24 sps:$4 sm:$0xff]  }
0x1d1c   :  { %11059 = vmatpush1.bf16.msra.mxu0 %v14630_v13  ;;  %11186 = vmatpush1.bf16.msra.mxu1 %v14633_v63  ;;  %v14713_v13 = vld [vmem:[#allocation8 + $0x30c] ss:$24 sps:$4 sm:$0xff]   ;;  %v14708_v63 = vld [vmem:[#allocation8 + $0x330] ss:$24 sps:$4 sm:$0xff]  }
0x1d1d   :  { %11060 = vmatprep.subr.bf16.mxu0 %v14638_v14  ;;  %11187 = vmatprep.subr.bf16.mxu1 %v14641_v20  ;;  %v14711_v14 = vld [vmem:[#allocation8 + $0x308] ss:$24 sps:$4 sm:$0xff]   ;;  %v14716_v20 = vld [vmem:[#allocation8 + $0x364] ss:$24 sps:$4 sm:$0xff]  }
0x1d20   :  { %11061 = vmatpush1.bf16.msra.mxu0 %v14636_v7  ;;  %11188 = vmatpush1.bf16.msra.mxu1 %v14639_v60  ;;  %v14719_v7 = vld [vmem:[#allocation8 + $0x33c] ss:$24 sps:$4 sm:$0xff]   ;;  %v14714_v60 = vld [vmem:[#allocation8 + $0x360] ss:$24 sps:$4 sm:$0xff]  }
0x1d21   :  { %11062 = vmatprep.subr.bf16.mxu0 %v14644_v53  ;;  %11189 = vmatprep.subr.bf16.mxu1 %v14647_v44  ;;  %v14717_v53 = vld [vmem:[#allocation8 + $0x338] ss:$24 sps:$4 sm:$0xff]   ;;  %v14722_v44 = vld [vmem:[#allocation8 + $0x394] ss:$24 sps:$4 sm:$0xff]  }
0x1d24   :  { %11063 = vmatpush1.bf16.msra.mxu0 %v14642_v48  ;;  %11190 = vmatpush1.bf16.msra.mxu1 %v14645_v25  ;;  %v14725_v48 = vld [vmem:[#allocation8 + $0x36c] ss:$24 sps:$4 sm:$0xff]   ;;  %v14720_v25 = vld [vmem:[#allocation8 + $0x390] ss:$24 sps:$4 sm:$0xff]  }
0x1d25   :  { %11064 = vmatprep.subr.bf16.mxu0 %v14650_v29  ;;  %11191 = vmatprep.subr.bf16.mxu1 %v14653_v15  ;;  %v14723_v29 = vld [vmem:[#allocation8 + $0x368] ss:$24 sps:$4 sm:$0xff]   ;;  %v14728_v15 = vld [vmem:[#allocation8 + $0x3c4] ss:$24 sps:$4 sm:$0xff]  }
0x1d28   :  { %11065 = vmatpush1.bf16.msra.mxu0 %v14648_v58  ;;  %11192 = vmatpush1.bf16.msra.mxu1 %v14651_v51  ;;  %v14731_v58 = vld [vmem:[#allocation8 + $0x39c] ss:$24 sps:$4 sm:$0xff]   ;;  %v14726_v51 = vld [vmem:[#allocation8 + $0x3c0] ss:$24 sps:$4 sm:$0xff]  }
0x1d29   :  { %11066 = vmatprep.subr.bf16.mxu0 %v14656_v5  ;;  %11193 = vmatprep.subr.bf16.mxu1 %v14659_v11  ;;  %v14729_v5 = vld [vmem:[#allocation8 + $0x398] ss:$24 sps:$4 sm:$0xff]   ;;  %v14734_v11 = vld [vmem:[#allocation8 + $0x3f4] ss:$24 sps:$4 sm:$0xff]  }
0x1d2c   :  { %11067 = vmatpush1.bf16.msra.mxu0 %v14654_v17  ;;  %11194 = vmatpush1.bf16.msra.mxu1 %v14657_v50  ;;  %v14737_v17 = vld [vmem:[#allocation8 + $0x3cc] ss:$24 sps:$4 sm:$0xff]   ;;  %v14732_v50 = vld [vmem:[#allocation8 + $0x3f0] ss:$24 sps:$4 sm:$0xff]  }
0x1d2d   :  { %11068 = vmatprep.subr.bf16.mxu0 %v14662_v0  ;;  %11195 = vmatprep.subr.bf16.mxu1 %v14665_v18  ;;  %v14735_v0 = vld [vmem:[#allocation8 + $0x3c8] ss:$24 sps:$4 sm:$0xff]   ;;  %v14740_v18 = vld [vmem:[#allocation8 + $0x424] ss:$24 sps:$4 sm:$0xff]  }
0x1d30   :  { %11069 = vmatpush1.bf16.msra.mxu0 %v14660_v27  ;;  %11196 = vmatpush1.bf16.msra.mxu1 %v14663_v2  ;;  %v14743_v27 = vld [vmem:[#allocation8 + $0x3fc] ss:$24 sps:$4 sm:$0xff]   ;;  %v14738_v2 = vld [vmem:[#allocation8 + $0x420] ss:$24 sps:$4 sm:$0xff]  }
0x1d31   :  { %11070 = vmatprep.subr.bf16.mxu0 %v14668_v49  ;;  %11197 = vmatprep.subr.bf16.mxu1 %v14671_v4  ;;  %v14741_v49 = vld [vmem:[#allocation8 + $0x3f8] ss:$24 sps:$4 sm:$0xff]   ;;  %v14746_v4 = vld [vmem:[#allocation8 + $0x454] ss:$24 sps:$4 sm:$0xff]  }
0x1d34   :  { %11071 = vmatpush1.bf16.msra.mxu0 %v14666_v16  ;;  %11198 = vmatpush1.bf16.msra.mxu1 %v14669_v26  ;;  %v14749_v16 = vld [vmem:[#allocation8 + $0x42c] ss:$24 sps:$4 sm:$0xff]   ;;  %v14744_v26 = vld [vmem:[#allocation8 + $0x450] ss:$24 sps:$4 sm:$0xff]  }
0x1d35   :  { %11072 = vmatprep.subr.bf16.mxu0 %v14674_v41  ;;  %11199 = vmatprep.subr.bf16.mxu1 %v14677_v55  ;;  %v14747_v41 = vld [vmem:[#allocation8 + $0x428] ss:$24 sps:$4 sm:$0xff]   ;;  %v14752_v55 = vld [vmem:[#allocation8 + $0x484] ss:$24 sps:$4 sm:$0xff]  }
0x1d38   :  { %11073 = vmatpush1.bf16.msra.mxu0 %v14672_v52  ;;  %11200 = vmatpush1.bf16.msra.mxu1 %v14675_v21  ;;  %v14755_v52 = vld [vmem:[#allocation8 + $0x45c] ss:$24 sps:$4 sm:$0xff]   ;;  %v14750_v21 = vld [vmem:[#allocation8 + $0x480] ss:$24 sps:$4 sm:$0xff]  }
0x1d39   :  { %11074 = vmatprep.subr.bf16.mxu0 %v14680_v32  ;;  %11201 = vmatprep.subr.bf16.mxu1 %v14683_v45  ;;  %v14753_v32 = vld [vmem:[#allocation8 + $0x458] ss:$24 sps:$4 sm:$0xff]   ;;  %v14758_v45 = vld [vmem:[#allocation8 + $0x4b4] ss:$24 sps:$4 sm:$0xff]  }
0x1d3c   :  { %11075 = vmatpush1.bf16.msra.mxu0 %v14678_v38  ;;  %11202 = vmatpush1.bf16.msra.mxu1 %v14681_v39  ;;  %v14761_v38 = vld [vmem:[#allocation8 + $0x48c] ss:$24 sps:$4 sm:$0xff]   ;;  %v14756_v39 = vld [vmem:[#allocation8 + $0x4b0] ss:$24 sps:$4 sm:$0xff]  }
0x1d3d   :  { %11076 = vmatprep.subr.bf16.mxu0 %v14686_v30  ;;  %11203 = vmatprep.subr.bf16.mxu1 %v14689_v43  ;;  %v14759_v30 = vld [vmem:[#allocation8 + $0x488] ss:$24 sps:$4 sm:$0xff]   ;;  %v14764_v43 = vld [vmem:[#allocation8 + $0x4e4] ss:$24 sps:$4 sm:$0xff]  }
0x1d40   :  { %11077 = vmatpush1.bf16.msra.mxu0 %v14684_v46  ;;  %11204 = vmatpush1.bf16.msra.mxu1 %v14687_v34  ;;  %v14767_v46 = vld [vmem:[#allocation8 + $0x4bc] ss:$24 sps:$4 sm:$0xff]   ;;  %v14762_v34 = vld [vmem:[#allocation8 + $0x4e0] ss:$24 sps:$4 sm:$0xff]  }
0x1d41   :  { %11078 = vmatprep.subr.bf16.mxu0 %v14692_v42  ;;  %11205 = vmatprep.subr.bf16.mxu1 %v14695_v61  ;;  %v14765_v42 = vld [vmem:[#allocation8 + $0x4b8] ss:$24 sps:$4 sm:$0xff]   ;;  %v14770_v61 = vld [vmem:[#allocation8 + $0x514] ss:$24 sps:$4 sm:$0xff]  }
0x1d44   :  { %11079 = vmatpush1.bf16.msra.mxu0 %v14690_v28  ;;  %11206 = vmatpush1.bf16.msra.mxu1 %v14693_v24  ;;  %v14773_v28 = vld [vmem:[#allocation8 + $0x4ec] ss:$24 sps:$4 sm:$0xff]   ;;  %v14768_v24 = vld [vmem:[#allocation8 + $0x510] ss:$24 sps:$4 sm:$0xff]  }
0x1d45   :  { %11080 = vmatprep.subr.bf16.mxu0 %v14698_v54  ;;  %11207 = vmatprep.subr.bf16.mxu1 %v14701_v19  ;;  %v14771_v54 = vld [vmem:[#allocation8 + $0x4e8] ss:$24 sps:$4 sm:$0xff]   ;;  %v14776_v19 = vld [vmem:[#allocation8 + $0x544] ss:$24 sps:$4 sm:$0xff]  }
0x1d48   :  { %11081 = vmatpush1.bf16.msra.mxu0 %v14696_v8  ;;  %11208 = vmatpush1.bf16.msra.mxu1 %v14699_v23  ;;  %v14779_v8 = vld [vmem:[#allocation8 + $0x51c] ss:$24 sps:$4 sm:$0xff]   ;;  %v14774_v23 = vld [vmem:[#allocation8 + $0x540] ss:$24 sps:$4 sm:$0xff]  }
0x1d49   :  { %11093 = vmatprep.subr.bf16.mxu0 %v14704_v1  ;;  %11209 = vmatprep.subr.bf16.mxu1 %v14707_v12  ;;  %v14777_v1 = vld [vmem:[#allocation8 + $0x518] ss:$24 sps:$4 sm:$0xff]   ;;  %v14782_v12 = vld [vmem:[#allocation8 + $0x574] ss:$24 sps:$4 sm:$0xff]  }
0x1d4b   :  { %11083 = vmatmul.mubr.bf16.vlgmr.msra.gmra.mrb[52].mxu0 %v16122_v56 }
0x1d4c   :  { %11094 = vmatpush1.bf16.msra.mxu0 %v14702_v36  ;;  %11125 = vmatprep.mubr.bf16.mxu0 %v16149_v40  ;;  %v14785_v36 = vld [vmem:[#allocation8 + $0x54c] ss:$24 sps:$4 sm:$0xff]  }
0x1d4d   :  { %11210 = vmatpush1.bf16.msra.mxu1 %v14705_v31  ;;  %11095 = vmatprep.subr.bf16.mxu0 %v14710_v37  ;;  %v14780_v31 = vld [vmem:[#allocation8 + $0x570] ss:$24 sps:$4 sm:$0xff]  }
0x1d4e   :  { %11222 = vmatprep.subr.bf16.mxu1 %v14713_v13  ;;  %v14783_v37 = vld [vmem:[#allocation8 + $0x548] ss:$24 sps:$4 sm:$0xff]   ;;  %v14788_v13 = vld [vmem:[#allocation8 + $0x5a4] ss:$24 sps:$4 sm:$0xff]  }
0x1d50   :  { %11212 = vmatmul.mubr.bf16.vlgmr.msra.gmra.mrb[180].mxu1 %v16122_v56  ;;  %11096 = vmatpush1.bf16.msra.mxu0 %v14708_v63  ;;  %v14791_v63 = vld [vmem:[#allocation8 + $0x57c] ss:$24 sps:$4 sm:$0xff]  }
0x1d51   :  { %11223 = vmatpush1.bf16.msra.mxu1 %v14711_v14  ;;  %11254 = vmatprep.mubr.bf16.mxu1 %v16149_v40  ;;  %v14786_v14 = vld [vmem:[#allocation8 + $0x5a0] ss:$24 sps:$4 sm:$0xff]  }
0x1d52   :  { %11097 = vmatprep.subr.bf16.mxu0 %v14716_v20  ;;  %11224 = vmatprep.subr.bf16.mxu1 %v14719_v7  ;;  %v14789_v20 = vld [vmem:[#allocation8 + $0x578] ss:$24 sps:$4 sm:$0xff]   ;;  %v14794_v7 = vld [vmem:[#allocation8 + $0x5d4] ss:$24 sps:$4 sm:$0xff]  }
0x1d54   :  { %11098 = vmatpush1.bf16.msra.mxu0 %v14714_v60  ;;  %v14797_v60 = vld [vmem:[#allocation8 + $0x5ac] ss:$24 sps:$4 sm:$0xff]  }
0x1d55   :  { %11225 = vmatpush1.bf16.msra.mxu1 %v14717_v53  ;;  %11099 = vmatprep.subr.bf16.mxu0 %v14722_v44  ;;  %v14792_v53 = vld [vmem:[#allocation8 + $0x5d0] ss:$24 sps:$4 sm:$0xff]  }
0x1d56   :  { %11226 = vmatprep.subr.bf16.mxu1 %v14725_v48  ;;  %v14795_v44 = vld [vmem:[#allocation8 + $0x5a8] ss:$24 sps:$4 sm:$0xff]   ;;  %v14803_v48 = vld [vmem:[#allocation8 + $0x604] ss:$24 sps:$4 sm:$0xff]  }
0x1d58   :  { %11100 = vmatpush1.bf16.msra.mxu0 %v14720_v25  ;;  %v14800_v25 = vld [vmem:[#allocation8 + $0x5dc] ss:$24 sps:$4 sm:$0xff]  }
0x1d59   :  { %11227 = vmatpush1.bf16.msra.mxu1 %v14723_v29  ;;  %11101 = vmatprep.subr.bf16.mxu0 %v14728_v15  ;;  %v14801_v29 = vld [vmem:[#allocation8 + $0x600] ss:$24 sps:$4 sm:$0xff]  }
0x1d5a   :  { %11228 = vmatprep.subr.bf16.mxu1 %v14731_v58  ;;  %v14798_v15 = vld [vmem:[#allocation8 + $0x5d8] ss:$24 sps:$4 sm:$0xff]   ;;  %v14809_v58 = vld [vmem:[#allocation8 + $0x634] ss:$24 sps:$4 sm:$0xff]  }
0x1d5c   :  { %11102 = vmatpush1.bf16.msra.mxu0 %v14726_v51  ;;  %v14806_v51 = vld [vmem:[#allocation8 + $0x60c] ss:$24 sps:$4 sm:$0xff]  }
0x1d5d   :  { %11229 = vmatpush1.bf16.msra.mxu1 %v14729_v5  ;;  %11103 = vmatprep.subr.bf16.mxu0 %v14734_v11  ;;  %v14807_v5 = vld [vmem:[#allocation8 + $0x630] ss:$24 sps:$4 sm:$0xff]  }
0x1d5e   :  { %11230 = vmatprep.subr.bf16.mxu1 %v14737_v17  ;;  %v14804_v11 = vld [vmem:[#allocation8 + $0x608] ss:$24 sps:$4 sm:$0xff]   ;;  %v14815_v17 = vld [vmem:[#allocation8 + $0x664] ss:$24 sps:$4 sm:$0xff]  }
0x1d60   :  { %11104 = vmatpush1.bf16.msra.mxu0 %v14732_v50  ;;  %v14812_v50 = vld [vmem:[#allocation8 + $0x63c] ss:$24 sps:$4 sm:$0xff]  }
0x1d61   :  { %11231 = vmatpush1.bf16.msra.mxu1 %v14735_v0  ;;  %11105 = vmatprep.subr.bf16.mxu0 %v14740_v18  ;;  %v14813_v0 = vld [vmem:[#allocation8 + $0x660] ss:$24 sps:$4 sm:$0xff]  }
0x1d62   :  { %11232 = vmatprep.subr.bf16.mxu1 %v14743_v27  ;;  %v14810_v18 = vld [vmem:[#allocation8 + $0x638] ss:$24 sps:$4 sm:$0xff]   ;;  %v14821_v27 = vld [vmem:[#allocation8 + $0x694] ss:$24 sps:$4 sm:$0xff]  }
0x1d64   :  { %11106 = vmatpush1.bf16.msra.mxu0 %v14738_v2  ;;  %v14818_v2 = vld [vmem:[#allocation8 + $0x66c] ss:$24 sps:$4 sm:$0xff]  }
0x1d65   :  { %11233 = vmatpush1.bf16.msra.mxu1 %v14741_v49  ;;  %11107 = vmatprep.subr.bf16.mxu0 %v14746_v4  ;;  %v14819_v49 = vld [vmem:[#allocation8 + $0x690] ss:$24 sps:$4 sm:$0xff]  }
0x1d66   :  { %11234 = vmatprep.subr.bf16.mxu1 %v14749_v16  ;;  %v14816_v4 = vld [vmem:[#allocation8 + $0x668] ss:$24 sps:$4 sm:$0xff]   ;;  %v14827_v16 = vld [vmem:[#allocation8 + $0x6c4] ss:$24 sps:$4 sm:$0xff]  }
0x1d68   :  { %11108 = vmatpush1.bf16.msra.mxu0 %v14744_v26  ;;  %v14824_v26 = vld [vmem:[#allocation8 + $0x69c] ss:$24 sps:$4 sm:$0xff]  }
0x1d69   :  { %11235 = vmatpush1.bf16.msra.mxu1 %v14747_v41  ;;  %11109 = vmatprep.subr.bf16.mxu0 %v14752_v55  ;;  %v14825_v41 = vld [vmem:[#allocation8 + $0x6c0] ss:$24 sps:$4 sm:$0xff]  }
0x1d6a   :  { %11236 = vmatprep.subr.bf16.mxu1 %v14755_v52  ;;  %v14822_v55 = vld [vmem:[#allocation8 + $0x698] ss:$24 sps:$4 sm:$0xff]   ;;  %v14833_v52 = vld [vmem:[#allocation8 + $0x6f4] ss:$24 sps:$4 sm:$0xff]  }
0x1d6c   :  { %11110 = vmatpush1.bf16.msra.mxu0 %v14750_v21  ;;  %v14830_v21 = vld [vmem:[#allocation8 + $0x6cc] ss:$24 sps:$4 sm:$0xff]  }
0x1d6d   :  { %11237 = vmatpush1.bf16.msra.mxu1 %v14753_v32  ;;  %11111 = vmatprep.subr.bf16.mxu0 %v14758_v45  ;;  %v14831_v32 = vld [vmem:[#allocation8 + $0x6f0] ss:$24 sps:$4 sm:$0xff]  }
0x1d6e   :  { %11238 = vmatprep.subr.bf16.mxu1 %v14761_v38  ;;  %v14828_v45 = vld [vmem:[#allocation8 + $0x6c8] ss:$24 sps:$4 sm:$0xff]   ;;  %v14839_v38 = vld [vmem:[#allocation8 + $0x724] ss:$24 sps:$4 sm:$0xff]  }
0x1d70   :  { %11112 = vmatpush1.bf16.msra.mxu0 %v14756_v39  ;;  %v14836_v39 = vld [vmem:[#allocation8 + $0x6fc] ss:$24 sps:$4 sm:$0xff]  }
0x1d71   :  { %11239 = vmatpush1.bf16.msra.mxu1 %v14759_v30  ;;  %11113 = vmatprep.subr.bf16.mxu0 %v14764_v43  ;;  %v14837_v30 = vld [vmem:[#allocation8 + $0x720] ss:$24 sps:$4 sm:$0xff]  }
0x1d72   :  { %11240 = vmatprep.subr.bf16.mxu1 %v14767_v46  ;;  %v14834_v43 = vld [vmem:[#allocation8 + $0x6f8] ss:$24 sps:$4 sm:$0xff]   ;;  %v14845_v46 = vld [vmem:[#allocation8 + $0x754] ss:$24 sps:$4 sm:$0xff]  }
0x1d74   :  { %11114 = vmatpush1.bf16.msra.mxu0 %v14762_v34  ;;  %v14842_v34 = vld [vmem:[#allocation8 + $0x72c] ss:$24 sps:$4 sm:$0xff]  }
0x1d75   :  { %11241 = vmatpush1.bf16.msra.mxu1 %v14765_v42  ;;  %11115 = vmatprep.subr.bf16.mxu0 %v14770_v61  ;;  %v14843_v42 = vld [vmem:[#allocation8 + $0x750] ss:$24 sps:$4 sm:$0xff]  }
0x1d76   :  { %11242 = vmatprep.subr.bf16.mxu1 %v14773_v28  ;;  %v14840_v61 = vld [vmem:[#allocation8 + $0x728] ss:$24 sps:$4 sm:$0xff]   ;;  %v14851_v28 = vld [vmem:[#allocation8 + $0x784] ss:$24 sps:$4 sm:$0xff]  }
0x1d78   :  { %11116 = vmatpush1.bf16.msra.mxu0 %v14768_v24  ;;  %v14848_v24 = vld [vmem:[#allocation8 + $0x75c] ss:$24 sps:$4 sm:$0xff]  }
0x1d79   :  { %11243 = vmatpush1.bf16.msra.mxu1 %v14771_v54  ;;  %11117 = vmatprep.subr.bf16.mxu0 %v14776_v19  ;;  %v14849_v54 = vld [vmem:[#allocation8 + $0x780] ss:$24 sps:$4 sm:$0xff]  }
0x1d7a   :  { %11244 = vmatprep.subr.bf16.mxu1 %v14779_v8  ;;  %v14846_v19 = vld [vmem:[#allocation8 + $0x758] ss:$24 sps:$4 sm:$0xff]   ;;  %v14857_v8 = vld [vmem:[#allocation8 + $0x7b4] ss:$24 sps:$4 sm:$0xff]  }
0x1d7c   :  { %11118 = vmatpush1.bf16.msra.mxu0 %v14774_v23  ;;  %v14854_v23 = vld [vmem:[#allocation8 + $0x78c] ss:$24 sps:$4 sm:$0xff]  }
0x1d7d   :  { %11245 = vmatpush1.bf16.msra.mxu1 %v14777_v1  ;;  %11119 = vmatprep.subr.bf16.mxu0 %v14782_v12  ;;  %v14855_v1 = vld [vmem:[#allocation8 + $0x7b0] ss:$24 sps:$4 sm:$0xff]  }
0x1d7e   :  { %11246 = vmatprep.subr.bf16.mxu1 %v14785_v36  ;;  %v14852_v12 = vld [vmem:[#allocation8 + $0x788] ss:$24 sps:$4 sm:$0xff]   ;;  %v14863_v36 = vld [vmem:[#allocation8 + $0x7e4] ss:$24 sps:$4 sm:$0xff]  }
0x1d80   :  { %11120 = vmatpush1.bf16.msra.mxu0 %v14780_v31  ;;  %v14860_v31 = vld [vmem:[#allocation8 + $0x7bc] ss:$24 sps:$4 sm:$0xff]  }
0x1d81   :  { %11247 = vmatpush1.bf16.msra.mxu1 %v14783_v37  ;;  %11121 = vmatprep.subr.bf16.mxu0 %v14788_v13  ;;  %v14861_v37 = vld [vmem:[#allocation8 + $0x7e0] ss:$24 sps:$4 sm:$0xff]  }
0x1d82   :  { %11248 = vmatprep.subr.bf16.mxu1 %v14791_v63  ;;  %v14858_v13 = vld [vmem:[#allocation8 + $0x7b8] ss:$24 sps:$4 sm:$0xff]   ;;  %v14869_v63 = vld [vmem:[#allocation8 + $0x814] ss:$24 sps:$4 sm:$0xff]  }
0x1d84   :  { %11122 = vmatpush1.bf16.msra.mxu0 %v14786_v14  ;;  %v14866_v14 = vld [vmem:[#allocation8 + $0x7ec] ss:$24 sps:$4 sm:$0xff]  }
0x1d85   :  { %11249 = vmatpush1.bf16.msra.mxu1 %v14789_v20  ;;  %11123 = vmatprep.subr.bf16.mxu0 %v14794_v7  ;;  %v14867_v20 = vld [vmem:[#allocation8 + $0x810] ss:$24 sps:$4 sm:$0xff]  }
0x1d86   :  { %11250 = vmatprep.subr.bf16.mxu1 %v14797_v60  ;;  %v14864_v7 = vld [vmem:[#allocation8 + $0x7e8] ss:$24 sps:$4 sm:$0xff]   ;;  %v14875_v60 = vld [vmem:[#allocation8 + $0x844] ss:$24 sps:$4 sm:$0xff]  }
0x1d88   :  { %11124 = vmatpush1.bf16.msra.mxu0 %v14792_v53  ;;  %v14872_v53 = vld [vmem:[#allocation8 + $0x81c] ss:$24 sps:$4 sm:$0xff]  }
0x1d89   :  { %11251 = vmatpush1.bf16.msra.mxu1 %v14795_v44  ;;  %11136 = vmatprep.subr.bf16.mxu0 %v14803_v48  ;;  %v14873_v44 = vld [vmem:[#allocation8 + $0x840] ss:$24 sps:$4 sm:$0xff]  }
0x1d8a   :  { %11252 = vmatprep.subr.bf16.mxu1 %v14800_v25  ;;  %v14870_v48 = vld [vmem:[#allocation8 + $0x818] ss:$24 sps:$4 sm:$0xff]   ;;  %v14881_v25 = vld [vmem:[#allocation8 + $0x874] ss:$24 sps:$4 sm:$0xff]  }
0x1d8b   :  { %11126 = vmatmul.mubr.bf16.vlgmr.msra.gmra.mrb[52].mxu0 %v16129_v59 }
0x1d8c   :  { %11137 = vmatpush1.bf16.msra.mxu0 %v14801_v29  ;;  %v14878_v29 = vld [vmem:[#allocation8 + $0x84c] ss:$24 sps:$4 sm:$0xff]  }
0x1d8d   :  { %11253 = vmatpush1.bf16.msra.mxu1 %v14798_v15  ;;  %11138 = vmatprep.subr.bf16.mxu0 %v14809_v58  ;;  %v14879_v15 = vld [vmem:[#allocation8 + $0x870] ss:$24 sps:$4 sm:$0xff]  }
0x1d8e   :  { %11265 = vmatprep.subr.bf16.mxu1 %v14806_v51  ;;  %v14876_v58 = vld [vmem:[#allocation8 + $0x848] ss:$24 sps:$4 sm:$0xff]   ;;  %v14887_v51 = vld [vmem:[#allocation8 + $0x8a4] ss:$24 sps:$4 sm:$0xff]  }
0x1d90   :  { %11255 = vmatmul.mubr.bf16.vlgmr.msra.gmra.mrb[180].mxu1 %v16129_v59  ;;  %11139 = vmatpush1.bf16.msra.mxu0 %v14807_v5  ;;  %v14884_v5 = vld [vmem:[#allocation8 + $0x87c] ss:$24 sps:$4 sm:$0xff]  }
0x1d91   :  { %11266 = vmatpush1.bf16.msra.mxu1 %v14804_v11  ;;  %11140 = vmatprep.subr.bf16.mxu0 %v14815_v17  ;;  %v14885_v11 = vld [vmem:[#allocation8 + $0x8a0] ss:$24 sps:$4 sm:$0xff]  }
0x1d92   :  { %11267 = vmatprep.subr.bf16.mxu1 %v14812_v50  ;;  %v14882_v17 = vld [vmem:[#allocation8 + $0x878] ss:$24 sps:$4 sm:$0xff]   ;;  %v14890_v50 = vld [vmem:[#allocation8 + $0x8ac] ss:$24 sps:$4 sm:$0xff]  }
0x1d94   :  { %11141 = vmatpush1.bf16.msra.mxu0 %v14813_v0  ;;  %v14888_v0 = vld [vmem:[#allocation8 + $0x8a8] ss:$24 sps:$4 sm:$0xff]  }
0x1d95   :  { %11268 = vmatpush1.bf16.msra.mxu1 %v14810_v18  ;;  %11142 = vmatprep.subr.bf16.mxu0 %v14821_v27  ;;  %v14891_v18 = vld [vmem:[#allocation8 + $0x8d0] ss:$24 sps:$4 sm:$0xff]   ;;  %v14893_v27 = vld [vmem:[#allocation8 + $0x8d4] ss:$24 sps:$4 sm:$0xff]  }
0x1d96   :  { %11269 = vmatprep.subr.bf16.mxu1 %v14818_v2  ;;  %v14894_v2 = vld [vmem:[#allocation8 + $0x8d8] ss:$24 sps:$4 sm:$0xff]  }
0x1d98   :  { %11143 = vmatpush1.bf16.msra.mxu0 %v14819_v49  ;;  %v14896_v49 = vld [vmem:[#allocation8 + $0x8dc] ss:$24 sps:$4 sm:$0xff]  }
0x1d99   :  { %11270 = vmatpush1.bf16.msra.mxu1 %v14816_v4  ;;  %11144 = vmatprep.subr.bf16.mxu0 %v14827_v16  ;;  %v14899_v4 = vld [vmem:[#allocation8 + $0x14] ss:$24 sps:$4 sm:$0xff]  }
0x1d9a   :  { %11271 = vmatprep.subr.bf16.mxu1 %v14824_v26 }
0x1d9c   :  { %11145 = vmatpush1.bf16.msra.mxu0 %v14825_v41 }
0x1d9d   :  { %11272 = vmatpush1.bf16.msra.mxu1 %v14822_v55  ;;  %11146 = vmatprep.subr.bf16.mxu0 %v14833_v52 }
0x1d9e   :  { %11273 = vmatprep.subr.bf16.mxu1 %v14830_v21 }
0x1da0   :  { %11147 = vmatpush1.bf16.msra.mxu0 %v14831_v32 }
0x1da1   :  { %11274 = vmatpush1.bf16.msra.mxu1 %v14828_v45  ;;  %11148 = vmatprep.subr.bf16.mxu0 %v14839_v38 }
0x1da2   :  { %11275 = vmatprep.subr.bf16.mxu1 %v14836_v39 }
0x1da4   :  { %11149 = vmatpush1.bf16.msra.mxu0 %v14837_v30 }
0x1da5   :  { %11276 = vmatpush1.bf16.msra.mxu1 %v14834_v43  ;;  %11150 = vmatprep.subr.bf16.mxu0 %v14845_v46 }
0x1da6   :  { %11277 = vmatprep.subr.bf16.mxu1 %v14842_v34 }
0x1da8   :  { %11151 = vmatpush1.bf16.msra.mxu0 %v14843_v42 }
0x1da9   :  { %11278 = vmatpush1.bf16.msra.mxu1 %v14840_v61  ;;  %11152 = vmatprep.subr.bf16.mxu0 %v14851_v28  ;;  %v14897_v61 = vld [vmem:[#allocation8 + $0x10] ss:$24 sps:$4 sm:$0xff]   ;;  %v14902_v28 = vld [vmem:[#allocation8 + $0x44] ss:$24 sps:$4 sm:$0xff]  }
0x1daa   :  { %11279 = vmatprep.subr.bf16.mxu1 %v14848_v24  ;;  %v14900_v24 = vld [vmem:[#allocation8 + $0x40] ss:$24 sps:$4 sm:$0xff]  }
0x1dac   :  { %11153 = vmatpush1.bf16.msra.mxu0 %v14849_v54  ;;  %v14908_v54 = vld [vmem:[#allocation8 + $0xa4] ss:$24 sps:$4 sm:$0xff]  }
0x1dad   :  { %11280 = vmatpush1.bf16.msra.mxu1 %v14846_v19  ;;  %11154 = vmatprep.subr.bf16.mxu0 %v14857_v8  ;;  %v14906_v19 = vld [vmem:[#allocation8 + $0xa0] ss:$24 sps:$4 sm:$0xff]   ;;  %v14911_v8 = vld [vmem:[#allocation8 + $0xd4] ss:$24 sps:$4 sm:$0xff]  }
0x1dae   :  { %11281 = vmatprep.subr.bf16.mxu1 %v14854_v23  ;;  %v14909_v23 = vld [vmem:[#allocation8 + $0xd0] ss:$24 sps:$4 sm:$0xff]  }
0x1db0   :  { %11155 = vmatpush1.bf16.msra.mxu0 %v14855_v1  ;;  %v14914_v1 = vld [vmem:[#allocation8 + $0x104] ss:$24 sps:$4 sm:$0xff]  }
0x1db1   :  { %11282 = vmatpush1.bf16.msra.mxu1 %v14852_v12  ;;  %11156 = vmatprep.subr.bf16.mxu0 %v14863_v36  ;;  %v14912_v12 = vld [vmem:[#allocation8 + $0x100] ss:$24 sps:$4 sm:$0xff]   ;;  %v14917_v36 = vld [vmem:[#allocation8 + $0x134] ss:$24 sps:$4 sm:$0xff]  }
0x1db2   :  { %11283 = vmatprep.subr.bf16.mxu1 %v14860_v31  ;;  %v14920_v31 = vld [vmem:[#allocation8 + $0x164] ss:$24 sps:$4 sm:$0xff]  }
0x1db4   :  { %11157 = vmatpush1.bf16.msra.mxu0 %v14861_v37  ;;  %v14918_v37 = vld [vmem:[#allocation8 + $0x160] ss:$24 sps:$4 sm:$0xff]  }
0x1db5   :  { %11284 = vmatpush1.bf16.msra.mxu1 %v14858_v13  ;;  %11158 = vmatprep.subr.bf16.mxu0 %v14869_v63  ;;  %v14923_v13 = vld [vmem:[#allocation8 + $0x194] ss:$24 sps:$4 sm:$0xff]   ;;  %v14921_v63 = vld [vmem:[#allocation8 + $0x190] ss:$24 sps:$4 sm:$0xff]  }
0x1db6   :  { %11285 = vmatprep.subr.bf16.mxu1 %v14866_v14  ;;  %v14926_v14 = vld [vmem:[#allocation8 + $0x1c4] ss:$24 sps:$4 sm:$0xff]  }
0x1db8   :  { %11159 = vmatpush1.bf16.msra.mxu0 %v14867_v20  ;;  %v14924_v20 = vld [vmem:[#allocation8 + $0x1c0] ss:$24 sps:$4 sm:$0xff]  }
0x1db9   :  { %11286 = vmatpush1.bf16.msra.mxu1 %v14864_v7  ;;  %11160 = vmatprep.subr.bf16.mxu0 %v14875_v60  ;;  %v14929_v7 = vld [vmem:[#allocation8 + $0x1f4] ss:$24 sps:$4 sm:$0xff]   ;;  %v14927_v60 = vld [vmem:[#allocation8 + $0x1f0] ss:$24 sps:$4 sm:$0xff]  }
0x1dba   :  { %11287 = vmatprep.subr.bf16.mxu1 %v14872_v53  ;;  %v14932_v53 = vld [vmem:[#allocation8 + $0x224] ss:$24 sps:$4 sm:$0xff]  }
0x1dbc   :  { %11161 = vmatpush1.bf16.msra.mxu0 %v14873_v44  ;;  %v14930_v44 = vld [vmem:[#allocation8 + $0x220] ss:$24 sps:$4 sm:$0xff]  }
0x1dbd   :  { %11288 = vmatpush1.bf16.msra.mxu1 %v14870_v48  ;;  %11162 = vmatprep.subr.bf16.mxu0 %v14881_v25  ;;  %v14935_v48 = vld [vmem:[#allocation8 + $0x254] ss:$24 sps:$4 sm:$0xff]   ;;  %v14933_v25 = vld [vmem:[#allocation8 + $0x250] ss:$24 sps:$4 sm:$0xff]  }
0x1dbe   :  { %11289 = vmatprep.subr.bf16.mxu1 %v14878_v29  ;;  %v14938_v29 = vld [vmem:[#allocation8 + $0x284] ss:$24 sps:$4 sm:$0xff]  }
0x1dc0   :  { %11163 = vmatpush1.bf16.msra.mxu0 %v14879_v15  ;;  %v14936_v15 = vld [vmem:[#allocation8 + $0x280] ss:$24 sps:$4 sm:$0xff]  }
0x1dc1   :  { %11290 = vmatpush1.bf16.msra.mxu1 %v14876_v58  ;;  %11164 = vmatprep.subr.bf16.mxu0 %v14887_v51  ;;  %v14941_v58 = vld [vmem:[#allocation8 + $0x2b4] ss:$24 sps:$4 sm:$0xff]   ;;  %v14939_v51 = vld [vmem:[#allocation8 + $0x2b0] ss:$24 sps:$4 sm:$0xff]  }
0x1dc2   :  { %11291 = vmatprep.subr.bf16.mxu1 %v14884_v5  ;;  %v14944_v5 = vld [vmem:[#allocation8 + $0x2e4] ss:$24 sps:$4 sm:$0xff]  }
0x1dc4   :  { %11165 = vmatpush1.bf16.msra.mxu0 %v14885_v11  ;;  %v14942_v11 = vld [vmem:[#allocation8 + $0x2e0] ss:$24 sps:$4 sm:$0xff]  }
0x1dc5   :  { %11292 = vmatpush1.bf16.msra.mxu1 %v14882_v17  ;;  %11166 = vmatprep.subr.bf16.mxu0 %v14893_v27  ;;  %v14947_v17 = vld [vmem:[#allocation8 + $0x314] ss:$24 sps:$4 sm:$0xff]  }
0x1dc6   :  { %11293 = vmatprep.subr.bf16.mxu1 %v14890_v50  ;;  %v14945_v50 = vld [vmem:[#allocation8 + $0x310] ss:$24 sps:$4 sm:$0xff]   ;;  %v14953_v27 = vld [vmem:[#allocation8 + $0x374] ss:$24 sps:$4 sm:$0xff]  }
0x1dc8   :  { %11167 = vmatpush1.bf16.msra.mxu0 %v14891_v18  ;;  %v14948_v18 = vld [vmem:[#allocation8 + $0x340] ss:$24 sps:$4 sm:$0xff]  }
0x1dc9   :  { %11294 = vmatpush1.bf16.msra.mxu1 %v14888_v0  ;;  %11308 = vmatprep.subr.bf16.mxu0 %v14899_v4  ;;  %v14950_v0 = vld [vmem:[#allocation8 + $0x344] ss:$24 sps:$4 sm:$0xff]   ;;  %v14954_v4 = vld [vmem:[#allocation8 + $0x3a0] ss:$24 sps:$4 sm:$0xff]  }
0x1dca   :  { %11295 = vmatprep.subr.bf16.mxu1 %v14896_v49  ;;  %v14956_v49 = vld [vmem:[#allocation8 + $0x3a4] ss:$24 sps:$4 sm:$0xff]  }
0x1dcd   :  { %11296 = vmatpush1.bf16.msra.mxu1 %v14894_v2  ;;  %v14951_v2 = vld [vmem:[#allocation8 + $0x370] ss:$24 sps:$4 sm:$0xff]  }
0x1dde   :  { %v9170_v16 = vpop.f32.mrb[48].mxu0 }
0x1ddf   :  { %v13116_v26 = vpop.f32.mrb[49].mxu0 }
0x1de0   :  { %v9173_v41 = vpop.f32.mrb[50].mxu0  ;;  %v14957_v26 = vld [vmem:[#allocation8 + $0x3d0] ss:$24 sps:$4 sm:$0xff]  }
0x1de1   :  { %v13117_v55 = vpop.f32.mrb[51].mxu0  ;;  %v14962_v41 = vld [vmem:[#allocation8 + $0x404] ss:$24 sps:$4 sm:$0xff]  }
0x1de2   :  { %v9218_v52 = vpop.f32.mrb[176].mxu1  ;;  %v14965_v55 = vld [vmem:[#allocation8 + $0x434] ss:$24 sps:$4 sm:$0xff]  }
0x1de3   :  { %v13303_v21 = vpack.i.bf16 %v9218_v52, %v9170_v16  ;;  %v13122_v32 = vpop.f32.mrb[177].mxu1  ;;  %v14959_v16 = vld [vmem:[#allocation8 + $0x3d4] ss:$24 sps:$4 sm:$0xff]   ;;  %v14968_v52 = vld [vmem:[#allocation8 + $0x464] ss:$24 sps:$4 sm:$0xff]  }
0x1de4   :  { %v9221_v45 = vpop.f32.mrb[178].mxu1  ;;  %v14971_v32 = vld [vmem:[#allocation8 + $0x494] ss:$24 sps:$4 sm:$0xff]  }
0x1de5   :  { %13304 = vrot.lane.b32.xlu0 %v13303_v21, %s15293_s4  ;;  %v13123_v38 = vpop.f32.mrb[179].mxu1  ;;  %v14966_v21 = vld [vmem:[#allocation8 + $0x460] ss:$24 sps:$4 sm:$0xff]   ;;  %v14969_v45 = vld [vmem:[#allocation8 + $0x490] ss:$24 sps:$4 sm:$0xff]  }
0x1de6   :  { %v14974_v38 = vld [vmem:[#allocation8 + $0x4c4] ss:$24 sps:$4 sm:$0xff]  }
0x1e57   :  { %v13305_v39 = vpop.permute.xlu0 %13304 }
0x1e58   :  { %v13307_v30 = vunpack.i.h.bf16 %v13305_v39  ;;  %v13306_v43 = vunpack.i.l.bf16 %v13305_v39  ;;  %v14972_v39 = vld [vmem:[#allocation8 + $0x4c0] ss:$24 sps:$4 sm:$0xff]  }
0x1e5a   :  { %v9282_v46 = vsel %vm6578_vm1, %v16086_v22, %v13306_v43  ;;  %v9283_v34 = vsel %vm6578_vm1, %v16088_v62, %v13307_v30  ;;  %v14905_v22 = vld [vmem:[#allocation8 + $0x74] ss:$24 sps:$4 sm:$0xff]   ;;  %v14903_v62 = vld [vmem:[#allocation8 + $0x70] ss:$24 sps:$4 sm:$0xff]  }
0x1e5b   :  { %v16165_v42 = vpack.c.bf16 %v9283_v34, %v9282_v46  ;;  %v14977_v30 = vld [vmem:[#allocation8 + $0x4f4] ss:$24 sps:$4 sm:$0xff]   ;;  %v14975_v43 = vld [vmem:[#allocation8 + $0x4f0] ss:$24 sps:$4 sm:$0xff]   ;;  %v14980_v46 = vld [vmem:[#allocation8 + $0x524] ss:$24 sps:$4 sm:$0xff]  }
0x1e5c   :  { %v14978_v34 = vld [vmem:[#allocation8 + $0x520] ss:$24 sps:$4 sm:$0xff]  }
0x1e5d   :  { %11168 = vmatprep.mubr.bf16.mxu0 %v16165_v42  ;;  %11297 = vmatprep.mubr.bf16.mxu1 %v16165_v42 }
0x1e5e   :  { %11169 = vmatmul.mubr.bf16.vlgmr.msra.gmra.mrb[52].mxu0 %v16135_v10  ;;  %11298 = vmatmul.mubr.bf16.vlgmr.msra.gmra.mrb[180].mxu1 %v16135_v10 }
0x1e5f   :  { %11309 = vmatpush1.bf16.msra.mxu0 %v14897_v61  ;;  %11340 = vmatprep.mubr.bf16.mxu0 %v16115_v33  ;;  %v14915_v33 = vld [vmem:[#allocation8 + $0x130] ss:$24 sps:$4 sm:$0xff]   ;;  %v14983_v61 = vld [vmem:[#allocation8 + $0x554] ss:$24 sps:$4 sm:$0xff]  }
0x1e60   :  { %11310 = vmatprep.subr.bf16.mxu0 %v14902_v28  ;;  %v14981_v28 = vld [vmem:[#allocation8 + $0x550] ss:$24 sps:$4 sm:$0xff]  }
0x1e63   :  { %11311 = vmatpush1.bf16.msra.mxu0 %v14900_v24  ;;  %v14986_v24 = vld [vmem:[#allocation8 + $0x584] ss:$24 sps:$4 sm:$0xff]  }
0x1e64   :  { %11312 = vmatprep.subr.bf16.mxu0 %v14905_v22  ;;  %v14984_v22 = vld [vmem:[#allocation8 + $0x580] ss:$24 sps:$4 sm:$0xff]  }
0x1e67   :  { %11313 = vmatpush1.bf16.msra.mxu0 %v14903_v62  ;;  %v14989_v62 = vld [vmem:[#allocation8 + $0x5b4] ss:$24 sps:$4 sm:$0xff]  }
0x1e68   :  { %11314 = vmatprep.subr.bf16.mxu0 %v14908_v54  ;;  %v14987_v54 = vld [vmem:[#allocation8 + $0x5b0] ss:$24 sps:$4 sm:$0xff]  }
0x1e6b   :  { %11315 = vmatpush1.bf16.msra.mxu0 %v14906_v19  ;;  %v14992_v19 = vld [vmem:[#allocation8 + $0x5e4] ss:$24 sps:$4 sm:$0xff]  }
0x1e6c   :  { %11316 = vmatprep.subr.bf16.mxu0 %v14911_v8  ;;  %v14990_v8 = vld [vmem:[#allocation8 + $0x5e0] ss:$24 sps:$4 sm:$0xff]  }
0x1e6f   :  { %11317 = vmatpush1.bf16.msra.mxu0 %v14909_v23  ;;  %v14995_v23 = vld [vmem:[#allocation8 + $0x614] ss:$24 sps:$4 sm:$0xff]  }
0x1e70   :  { %11318 = vmatprep.subr.bf16.mxu0 %v14914_v1  ;;  %v14993_v1 = vld [vmem:[#allocation8 + $0x610] ss:$24 sps:$4 sm:$0xff]  }
0x1e73   :  { %11319 = vmatpush1.bf16.msra.mxu0 %v14912_v12  ;;  %v14998_v12 = vld [vmem:[#allocation8 + $0x644] ss:$24 sps:$4 sm:$0xff]  }
0x1e74   :  { %11320 = vmatprep.subr.bf16.mxu0 %v14917_v36  ;;  %v14996_v36 = vld [vmem:[#allocation8 + $0x640] ss:$24 sps:$4 sm:$0xff]  }
0x1e77   :  { %11321 = vmatpush1.bf16.msra.mxu0 %v14915_v33  ;;  %v15001_v33 = vld [vmem:[#allocation8 + $0x674] ss:$24 sps:$4 sm:$0xff]  }
0x1e78   :  { %11322 = vmatprep.subr.bf16.mxu0 %v14920_v31  ;;  %v14999_v31 = vld [vmem:[#allocation8 + $0x670] ss:$24 sps:$4 sm:$0xff]  }
0x1e7b   :  { %11323 = vmatpush1.bf16.msra.mxu0 %v14918_v37  ;;  %v15004_v37 = vld [vmem:[#allocation8 + $0x6a4] ss:$24 sps:$4 sm:$0xff]  }
0x1e7c   :  { %11324 = vmatprep.subr.bf16.mxu0 %v14923_v13  ;;  %v15002_v13 = vld [vmem:[#allocation8 + $0x6a0] ss:$24 sps:$4 sm:$0xff]  }
0x1e7f   :  { %11325 = vmatpush1.bf16.msra.mxu0 %v14921_v63  ;;  %v15007_v63 = vld [vmem:[#allocation8 + $0x6d4] ss:$24 sps:$4 sm:$0xff]  }
0x1e80   :  { %11326 = vmatprep.subr.bf16.mxu0 %v14926_v14  ;;  %v15005_v14 = vld [vmem:[#allocation8 + $0x6d0] ss:$24 sps:$4 sm:$0xff]  }
0x1e83   :  { %11327 = vmatpush1.bf16.msra.mxu0 %v14924_v20  ;;  %v15010_v20 = vld [vmem:[#allocation8 + $0x704] ss:$24 sps:$4 sm:$0xff]  }
0x1e84   :  { %11328 = vmatprep.subr.bf16.mxu0 %v14929_v7  ;;  %v15013_v7 = vld [vmem:[#allocation8 + $0x734] ss:$24 sps:$4 sm:$0xff]  }
0x1e87   :  { %11329 = vmatpush1.bf16.msra.mxu0 %v14927_v60  ;;  %v15016_v60 = vld [vmem:[#allocation8 + $0x764] ss:$24 sps:$4 sm:$0xff]  }
0x1e88   :  { %11330 = vmatprep.subr.bf16.mxu0 %v14932_v53  ;;  %v15014_v53 = vld [vmem:[#allocation8 + $0x760] ss:$24 sps:$4 sm:$0xff]  }
0x1e8b   :  { %11331 = vmatpush1.bf16.msra.mxu0 %v14930_v44  ;;  %v15019_v44 = vld [vmem:[#allocation8 + $0x794] ss:$24 sps:$4 sm:$0xff]  }
0x1e8c   :  { %11332 = vmatprep.subr.bf16.mxu0 %v14935_v48  ;;  %v15017_v48 = vld [vmem:[#allocation8 + $0x790] ss:$24 sps:$4 sm:$0xff]  }
0x1e8f   :  { %11333 = vmatpush1.bf16.msra.mxu0 %v14933_v25  ;;  %v15022_v25 = vld [vmem:[#allocation8 + $0x7c4] ss:$24 sps:$4 sm:$0xff]  }
0x1e90   :  { %11334 = vmatprep.subr.bf16.mxu0 %v14938_v29  ;;  %v15020_v29 = vld [vmem:[#allocation8 + $0x7c0] ss:$24 sps:$4 sm:$0xff]  }
0x1e93   :  { %11335 = vmatpush1.bf16.msra.mxu0 %v14936_v15  ;;  %v15025_v15 = vld [vmem:[#allocation8 + $0x7f4] ss:$24 sps:$4 sm:$0xff]  }
0x1e94   :  { %11336 = vmatprep.subr.bf16.mxu0 %v14941_v58  ;;  %v15023_v58 = vld [vmem:[#allocation8 + $0x7f0] ss:$24 sps:$4 sm:$0xff]  }
0x1e97   :  { %11337 = vmatpush1.bf16.msra.mxu0 %v14939_v51  ;;  %v15028_v51 = vld [vmem:[#allocation8 + $0x824] ss:$24 sps:$4 sm:$0xff]  }
0x1e98   :  { %11338 = vmatprep.subr.bf16.mxu0 %v14944_v5  ;;  %v15026_v5 = vld [vmem:[#allocation8 + $0x820] ss:$24 sps:$4 sm:$0xff]  }
0x1e9b   :  { %11339 = vmatpush1.bf16.msra.mxu0 %v14942_v11  ;;  %v15031_v11 = vld [vmem:[#allocation8 + $0x854] ss:$24 sps:$4 sm:$0xff]  }
0x1e9c   :  { %11351 = vmatprep.subr.bf16.mxu0 %v14947_v17  ;;  %v15029_v17 = vld [vmem:[#allocation8 + $0x850] ss:$24 sps:$4 sm:$0xff]  }
0x1e9e   :  { %11341 = vmatmul.mubr.bf16.vlgmr.msra.gmra.mrb[56].mxu0 %v16122_v56  ;;  %v14960_v56 = vld [vmem:[#allocation8 + $0x400] ss:$24 sps:$4 sm:$0xff]  }
0x1e9f   :  { %11352 = vmatpush1.bf16.msra.mxu0 %v14945_v50  ;;  %11383 = vmatprep.mubr.bf16.mxu0 %v16149_v40  ;;  %v14963_v40 = vld [vmem:[#allocation8 + $0x430] ss:$24 sps:$4 sm:$0xff]   ;;  %v15034_v50 = vld [vmem:[#allocation8 + $0x884] ss:$24 sps:$4 sm:$0xff]  }
0x1ea0   :  { %11353 = vmatprep.subr.bf16.mxu0 %v14950_v0  ;;  %v15032_v0 = vld [vmem:[#allocation8 + $0x880] ss:$24 sps:$4 sm:$0xff]  }
0x1ea3   :  { %11354 = vmatpush1.bf16.msra.mxu0 %v14948_v18  ;;  %v15037_v18 = vld [vmem:[#allocation8 + $0x8b4] ss:$24 sps:$4 sm:$0xff]  }
0x1ea4   :  { %11355 = vmatprep.subr.bf16.mxu0 %v14953_v27  ;;  %v15035_v27 = vld [vmem:[#allocation8 + $0x8b0] ss:$24 sps:$4 sm:$0xff]  }
0x1ea7   :  { %11356 = vmatpush1.bf16.msra.mxu0 %v14951_v2  ;;  %v15040_v2 = vld [vmem:[#allocation8 + $0x8e4] ss:$24 sps:$4 sm:$0xff]  }
0x1ea8   :  { %11357 = vmatprep.subr.bf16.mxu0 %v14956_v49  ;;  %v15038_v49 = vld [vmem:[#allocation8 + $0x8e0] ss:$24 sps:$4 sm:$0xff]  }
0x1eab   :  { %11358 = vmatpush1.bf16.msra.mxu0 %v14954_v4  ;;  %v9578_v4 = vld [vmem:[#allocation10] sm:$0x3f] }
0x1eac   :  { %11359 = vmatprep.subr.bf16.mxu0 %v14959_v16  ;;  %v9583_v16 = vrot.slane %v9578_v4, %v15433_v6 }
0x1eaf   :  { %11360 = vmatpush1.bf16.msra.mxu0 %v14957_v26  ;;  %v9591_v26 = vrot.slane %v9578_v4, %v15553_v3 }
0x1eb0   :  { %11361 = vmatprep.subr.bf16.mxu0 %v14962_v41  ;;  %v9587_v41 = vrot.slane %v9578_v4, %v15436_v9 }
0x1eb3   :  { %11362 = vmatpush1.bf16.msra.mxu0 %v14960_v56  ;;  %v9595_v56 = vrot.slane %v9578_v4, %v15866_v47 }
0x1eb4   :  { %11363 = vmatprep.subr.bf16.mxu0 %v14965_v55 }
0x1eb7   :  { %11364 = vmatpush1.bf16.msra.mxu0 %v14963_v40 }
0x1eb8   :  { %11365 = vmatprep.subr.bf16.mxu0 %v14968_v52 }
0x1ebb   :  { %11366 = vmatpush1.bf16.msra.mxu0 %v14966_v21 }
0x1ebc   :  { %11367 = vmatprep.subr.bf16.mxu0 %v14971_v32 }
0x1ebf   :  { %11368 = vmatpush1.bf16.msra.mxu0 %v14969_v45 }
0x1ec0   :  { %11369 = vmatprep.subr.bf16.mxu0 %v14974_v38 }
0x1ec3   :  { %11370 = vmatpush1.bf16.msra.mxu0 %v14972_v39 }
0x1ec4   :  { %11371 = vmatprep.subr.bf16.mxu0 %v14977_v30 }
0x1ec7   :  { %11372 = vmatpush1.bf16.msra.mxu0 %v14975_v43 }
0x1ec8   :  { %11373 = vmatprep.subr.bf16.mxu0 %v14980_v46 }
0x1ecb   :  { %11374 = vmatpush1.bf16.msra.mxu0 %v14978_v34  ;;  %v9599_v34 = vrot.slane %v9578_v4, %v15493_v35 }
0x1ecc   :  { %11375 = vmatprep.subr.bf16.mxu0 %v14983_v61  ;;  %v9603_v61 = vrot.slane %v9578_v4, %v15591_v57 }
0x1ecf   :  { %11376 = vmatpush1.bf16.msra.mxu0 %v14981_v28 }
0x1ed0   :  { %11377 = vmatprep.subr.bf16.mxu0 %v14986_v24 }
0x1ed3   :  { %11378 = vmatpush1.bf16.msra.mxu0 %v14984_v22 }
0x1ed4   :  { %11379 = vmatprep.subr.bf16.mxu0 %v14989_v62 }
0x1ed7   :  { %11380 = vmatpush1.bf16.msra.mxu0 %v14987_v54 }
0x1ed8   :  { %11381 = vmatprep.subr.bf16.mxu0 %v14992_v19 }
0x1edb   :  { %11382 = vmatpush1.bf16.msra.mxu0 %v14990_v8 }
0x1edc   :  { %11394 = vmatprep.subr.bf16.mxu0 %v14995_v23 }
0x1ede   :  { %11384 = vmatmul.mubr.bf16.vlgmr.msra.gmra.mrb[56].mxu0 %v16129_v59  ;;  %v15008_v59 = vld [vmem:[#allocation8 + $0x700] ss:$24 sps:$4 sm:$0xff]  }
0x1edf   :  { %11395 = vmatpush1.bf16.msra.mxu0 %v14993_v1  ;;  %11426 = vmatprep.mubr.bf16.mxu0 %v16165_v42  ;;  %v15011_v42 = vld [vmem:[#allocation8 + $0x730] ss:$24 sps:$4 sm:$0xff]  }
0x1ee0   :  { %11396 = vmatprep.subr.bf16.mxu0 %v14998_v12 }
0x1ee3   :  { %11397 = vmatpush1.bf16.msra.mxu0 %v14996_v36 }
0x1ee4   :  { %11398 = vmatprep.subr.bf16.mxu0 %v15001_v33 }
0x1ee7   :  { %11399 = vmatpush1.bf16.msra.mxu0 %v14999_v31 }
0x1ee8   :  { %11400 = vmatprep.subr.bf16.mxu0 %v15004_v37 }
0x1eeb   :  { %11401 = vmatpush1.bf16.msra.mxu0 %v15002_v13 }
0x1eec   :  { %11402 = vmatprep.subr.bf16.mxu0 %v15007_v63 }
0x1eef   :  { %11403 = vmatpush1.bf16.msra.mxu0 %v15005_v14 }
0x1ef0   :  { %11404 = vmatprep.subr.bf16.mxu0 %v15010_v20 }
0x1ef3   :  { %11405 = vmatpush1.bf16.msra.mxu0 %v15008_v59 }
0x1ef4   :  { %11406 = vmatprep.subr.bf16.mxu0 %v15013_v7 }
0x1ef7   :  { %11407 = vmatpush1.bf16.msra.mxu0 %v15011_v42 }
0x1ef8   :  { %11408 = vmatprep.subr.bf16.mxu0 %v15016_v60 }
0x1efb   :  { %11409 = vmatpush1.bf16.msra.mxu0 %v15014_v53 }
0x1efc   :  { %11410 = vmatprep.subr.bf16.mxu0 %v15019_v44 }
0x1eff   :  { %11411 = vmatpush1.bf16.msra.mxu0 %v15017_v48 }
0x1f00   :  { %11412 = vmatprep.subr.bf16.mxu0 %v15022_v25 }
0x1f03   :  { %11413 = vmatpush1.bf16.msra.mxu0 %v15020_v29 }
0x1f04   :  { %11414 = vmatprep.subr.bf16.mxu0 %v15025_v15 }
0x1f07   :  { %11415 = vmatpush1.bf16.msra.mxu0 %v15023_v58 }
0x1f08   :  { %11416 = vmatprep.subr.bf16.mxu0 %v15028_v51 }
0x1f0b   :  { %11417 = vmatpush1.bf16.msra.mxu0 %v15026_v5 }
0x1f0c   :  { %11418 = vmatprep.subr.bf16.mxu0 %v15031_v11 }
0x1f0f   :  { %11419 = vmatpush1.bf16.msra.mxu0 %v15029_v17 }
0x1f10   :  { %11420 = vmatprep.subr.bf16.mxu0 %v15034_v50 }
0x1f13   :  { %11421 = vmatpush1.bf16.msra.mxu0 %v15032_v0 }
0x1f14   :  { %11422 = vmatprep.subr.bf16.mxu0 %v15037_v18 }
0x1f17   :  { %11423 = vmatpush1.bf16.msra.mxu0 %v15035_v27 }
0x1f18   :  { %11424 = vmatprep.subr.bf16.mxu0 %v15040_v2 }
0x1f1b   :  { %11425 = vmatpush1.bf16.msra.mxu0 %v15038_v49 }
0x1f1e   :  { %11427 = vmatmul.mubr.bf16.vlgmr.msra.gmra.mrb[56].mxu0 %v16135_v10 }
0x1f31   :  { %v11170_v55 = vpop.f32.mrb[52].mxu0  ;;  %v11299_v40 = vpop.f32.mrb[180].mxu1 }
0x1f32   :  { %v13164_v52 = vadd.f32 %v11170_v55, %v9583_v16  ;;  %v13168_v21 = vadd.f32 %v11299_v40, %v9591_v26  ;;  %v11172_v32 = vpop.f32.mrb[53].mxu0  ;;  %v11301_v45 = vpop.f32.mrb[181].mxu1 }
0x1f33   :  { %v13165_v38 = vadd.f32 %v11172_v32, %v9587_v41  ;;  %v13169_v39 = vadd.f32 %v11301_v45, %v9595_v56  ;;  %v11174_v30 = vpop.f32.mrb[54].mxu0  ;;  %v11303_v43 = vpop.f32.mrb[182].mxu1 }
0x1f34   :  { %11437 = vst [vmem:[#allocation11] sm:$0xff] %v13164_v52  ;;  %11439 = vst [vmem:[#allocation11 + $0x10] sm:$0xff] %v13168_v21  ;;  %v13166_v10 = vadd.f32 %v11174_v30, %v9583_v16  ;;  %v13170_v6 = vadd.f32 %v11303_v43, %v9591_v26  ;;  %v11176_v46 = vpop.f32.mrb[55].mxu0  ;;  %v11305_v3 = vpop.f32.mrb[183].mxu1 }
0x1f35   :  { %11438 = vst [vmem:[#allocation11 + $0x8] sm:$0xff] %v13165_v38  ;;  %11440 = vst [vmem:[#allocation11 + $0x18] sm:$0xff] %v13169_v39  ;;  %v13167_v9 = vadd.f32 %v11176_v46, %v9587_v41  ;;  %v13171_v47 = vadd.f32 %v11305_v3, %v9595_v56 }
0x1f36   :  { %11443 = vst [vmem:[#allocation11 + $0x30] sm:$0xff] %v13166_v10  ;;  %11445 = vst [vmem:[#allocation11 + $0x40] sm:$0xff] %v13170_v6 }
0x1f37   :  { %11444 = vst [vmem:[#allocation11 + $0x38] sm:$0xff] %v13167_v9  ;;  %11446 = vst [vmem:[#allocation11 + $0x48] sm:$0xff] %v13171_v47 }
0x1ff1   :  { %v11428_v28 = vpop.f32.mrb[56].mxu0 }
0x1ff2   :  { %v13172_v24 = vadd.f32 %v11428_v28, %v9599_v34  ;;  %v11430_v22 = vpop.f32.mrb[57].mxu0 }
0x1ff3   :  { %v13173_v62 = vadd.f32 %v11430_v22, %v9603_v61  ;;  %v11432_v54 = vpop.f32.mrb[58].mxu0 }
0x1ff4   :  { %11441 = vst [vmem:[#allocation11 + $0x20] sm:$0xff] %v13172_v24  ;;  %v13174_v19 = vadd.f32 %v11432_v54, %v9599_v34  ;;  %v11434_v8 = vpop.f32.mrb[59].mxu0 }
0x1ff5   :  { %11442 = vst [vmem:[#allocation11 + $0x28] sm:$0xff] %v13173_v62  ;;  %v13175_v23 = vadd.f32 %v11434_v8, %v9603_v61 }
0x1ff6   :  { %11447 = vst [vmem:[#allocation11 + $0x50] sm:$0xff] %v13174_v19 }
0x1ff7   :  { %11448 = vst [vmem:[#allocation11 + $0x58] sm:$0xff] %v13175_v23 }
0x1ff8   :  { %15261 = shalt.err (!%p15258_p2)
}
0x1ff9   :  { %s15262_s10 = scalar_lea.hbm %s16203_s5, 1536 }
0x1ffa   :  { %p15263_p3 = scmp.ne.s32.totalorder %s16203_s5, %s15262_s10  ;;  %p15266_p4 = scmp.lt.u32.totalorder %s15262_s10, %s16203_s5 }
0x1ffc   :  { %p15268_p5 = pnand %p15266_p4, %p15263_p3 }
0x1ffe   :  { %15271 = shalt.err (!%p15268_p5)
}
0x1fff   :  { %11460 = dma.vmem_to_hbm [thread:$0]  %s11455_s6, 1536, %s16203_s5, [#allocation4], %s15287_s3, %s15287_s3, %s15288_s30  }
0x2000   :  { %15278 = dma.done.wait [#allocation4], 1536  }
0x2001   :  { %15279 = vsyncadd [#allocation4], 4294965760 }
0x2002   :  { %11464 = vsyncpa [#allocation3], 1 }
0x2003   :  { %11465 = vsyncpa [#allocation6], 1 }
0x2004   :  { %11466 = vsyncpa [#allocation9], 1 }
0x2005   :  { %11467 = vsyncpa [#allocation4], 1 }

</bundles_post_ra>
